<compile_context>
chip_gen: v7x
topology: tpu7x:2x2x1
jax: 0.10.0
libtpu: 0.0.40
codegen_flags: <defaults>
</compile_context>

<pallas_src>
import math
from functools import partial

import jax
import jax.numpy as jnp
from jax.experimental import pallas as pl
from jax.experimental.pallas import tpu as pltpu

EPS = 1e-5


# ----------------------------- in-kernel helpers -----------------------------

def _affine(y, s_ref, b_ref, relu):
    y = y * s_ref[...] + b_ref[...]
    return jnp.maximum(y, 0.0) if relu else y


def _cbr1x1(x2d, w_ref, s_ref, b_ref, relu=True):
    y = jnp.dot(x2d, w_ref[...], preferred_element_type=jnp.float32)
    return _affine(y, s_ref, b_ref, relu)


def _staged_taps(pad_ref, x2d, pad, K, dilation=1):
    """Zero-pad x2d along L inside a VMEM scratch ref and return the K conv taps
    (each (L, C)); only static, stride-1 ref slices are used."""
    L, C = x2d.shape
    Lp = L + 2 * pad
    pad_ref[0:Lp, 0:C] = jnp.zeros((Lp, C), jnp.float32)
    pad_ref[pad:pad + L, 0:C] = x2d
    return [pad_ref[k * dilation:k * dilation + L, 0:C] for k in range(K)]


def _dwconv(pad_ref, x2d, w_ref, s_ref, b_ref, K, pad, dilation=1):
    taps = _staged_taps(pad_ref, x2d, pad, K, dilation)
    acc = taps[0] * w_ref[0]
    for k in range(1, K):
        acc = acc + taps[k] * w_ref[k]
    return _affine(acc, s_ref, b_ref, True)


def _kconv(taps, w_ref, s_ref, b_ref, relu=True):
    acc = jnp.dot(taps[0], w_ref[0], preferred_element_type=jnp.float32)
    for k in range(1, len(taps)):
        acc = acc + jnp.dot(taps[k], w_ref[k], preferred_element_type=jnp.float32)
    return _affine(acc, s_ref, b_ref, relu)


# --------------------------------- kernels ------------------------------------

def stem_kernel(xe_ref, xo_ref, w_ref, s_ref, b_ref, o_ref, pad_ref):
    # xe/xo: (1, Lp, 7) even/odd phase im2col of the raw signal.
    xe = xe_ref[0]
    xo = xo_ref[0]
    ye = _cbr1x1(xe, w_ref, s_ref, b_ref)          # conv outputs at even positions
    yo = _cbr1x1(xo, w_ref, s_ref, b_ref)          # conv outputs at odd positions
    # maxpool k3 s2 p1: out[t] = max(y[2t-1], y[2t], y[2t+1]).  y >= 0 (post ReLU),
    # so padding with 0 instead of -inf is exactly equivalent.
    yo_prev = _staged_taps(pad_ref, yo, pad=1, K=1)[0]     # [0, yo[:-1]]
    o_ref[...] = jnp.maximum(jnp.maximum(yo_prev, ye), yo)[None]


def block_kernel(*refs, has_down):
    (x_ref, p1_w, p1_s, p1_b, dw5_w, dw5_s, dw5_b, dw7_w, dw7_s, dw7_b,
     c2_w, c2_s, c2_b, lka_s, lka_b, pr2_w, pr2_s, pr2_b,
     se_w1, se_b1, se_w2, se_b2) = refs[:22]
    if has_down:
        dn_w, dn_s, dn_b = refs[22:25]
        o_ref, pad_ref = refs[25], refs[26]
    else:
        o_ref, pad_ref = refs[22], refs[23]

    x = x_ref[0]                                            # (L, Cin)

    # identity path (downsample is a 1x1 conv + BN; stride already applied outside)
    if has_down:
        idn = _cbr1x1(x, dn_w, dn_s, dn_b, relu=False)
    else:
        idn = x

    # LKABlock
    h1 = _cbr1x1(x, p1_w, p1_s, p1_b)                       # proj_1 (CBR 1x1)
    h2 = _dwconv(pad_ref, h1, dw5_w, dw5_s, dw5_b, K=5, pad=2)
    h3 = _dwconv(pad_ref, h2, dw7_w, dw7_s, dw7_b, K=7, pad=9, dilation=3)
    h4 = _cbr1x1(h3, c2_w, c2_s, c2_b)                      # LKA conv2 (CBR 1x1)
    h5 = _affine(h4 * h1, lka_s, lka_b, relu=True)          # LKA: relu(bn(attn*id))
    res = _cbr1x1(h5, pr2_w, pr2_s, pr2_b, relu=False)      # proj_2 (+bias folded, BN)

    # squeeze-excite + residual add + relu
    sq = jnp.mean(res, axis=0, keepdims=True)               # (1, Cout)
    e = jnp.maximum(
        jnp.dot(sq, se_w1[...], preferred_element_type=jnp.float32) + se_b1[...], 0.0)
    z = jnp.dot(e, se_w2[...], preferred_element_type=jnp.float32) + se_b2[...]
    gate = 1.0 / (1.0 + jnp.exp(-z))                        # sigmoid
    o_ref[...] = jnp.maximum(res * gate + idn, 0.0)[None]


def fpn_kernel(c2_ref, c3_ref, c4_ref, c5_ref,
               top_w, lat1_w, lat2_w, lat3_w, a1_ref, a2_ref, a3_ref,
               sh_w, sh_s, sh_b, o_ref, pad_ref):
    f32 = jnp.float32
    p5 = jnp.dot(c5_ref[0], top_w[...], preferred_element_type=f32)
    p4 = (jnp.dot(a1_ref[...], p5, preferred_element_type=f32)
          + jnp.dot(c4_ref[0], lat1_w[...], preferred_element_type=f32))
    p3 = (jnp.dot(a2_ref[...], p4, preferred_element_type=f32)
          + jnp.dot(c3_ref[0], lat2_w[...], preferred_element_type=f32))
    p2 = (jnp.dot(a3_ref[...], p3, preferred_element_type=f32)
          + jnp.dot(c2_ref[0], lat3_w[...], preferred_element_type=f32))
    taps = _staged_taps(pad_ref, p2, pad=1, K=3)            # share: CBR k3 s1 p1
    o_ref[...] = _kconv(taps, sh_w, sh_s, sh_b)[None]


def head_kernel(se_ref, so_ref, wa_ref, sa_ref, ba_ref, wb_ref, sb_ref, bb_ref,
                wm_ref, bm_ref, o_ref, pad_ref):
    # Both head branches at once (weights pre-concatenated / block-diagonal).
    s_e = se_ref[0]                                         # share[0::2]  (Lh, W)
    s_o = so_ref[0]                                         # share[1::2]
    s_prev = _staged_taps(pad_ref, s_o, pad=1, K=1)[0]      # share[2t-1] (zero pad)
    # CBR k3 s2 p1: taps are share[2t-1], share[2t], share[2t+1]
    h1 = _kconv([s_prev, s_e, s_o], wa_ref, sa_ref, ba_ref)           # (Lh, 4W)
    taps = _staged_taps(pad_ref, h1, pad=1, K=3)                      # CBR k3 s1 p1
    h2 = _kconv(taps, wb_ref, sb_ref, bb_ref)                         # (Lh, 4W)
    m = jnp.mean(h2, axis=0, keepdims=True)                           # avg-pool (1,4W)
    out = jnp.dot(m, wm_ref[...], preferred_element_type=jnp.float32) + bm_ref[...]
    o_ref[...] = out[None]                                            # (1, 1, 2)


# ------------------------------ pallas_call glue ------------------------------

def _pcall(kernel, out_shape, acts, params, scratch_shapes=()):
    B = out_shape[0]

    def act_spec(a):
        nd = a.ndim
        return pl.BlockSpec((1,) + tuple(a.shape[1:]),
                            lambda b, _n=nd: (b,) + (0,) * (_n - 1))

    def par_spec(a):
        nd = a.ndim
        return pl.BlockSpec(tuple(a.shape), lambda b, _n=nd: (0,) * _n)

    out_nd = len(out_shape)
    return pl.pallas_call(
        kernel,
        grid=(B,),
        in_specs=[act_spec(a) for a in acts] + [par_spec(w) for w in params],
        out_specs=pl.BlockSpec((1,) + tuple(out_shape[1:]),
                               lambda b, _n=out_nd: (b,) + (0,) * (_n - 1)),
        out_shape=jax.ShapeDtypeStruct(tuple(out_shape), jnp.float32),
        scratch_shapes=list(scratch_shapes),
        compiler_params=pltpu.CompilerParams(dimension_semantics=("parallel",)),
    )(*acts, *params)


# ------------------------------- parameters -----------------------------------

class PInit:
    def __init__(self, key):
        self._key = key

    def next(self, shape, scale=0.1):
        self._key, sub = jax.random.split(self._key)
        return scale * jax.random.normal(sub, shape, jnp.float32)


def make_bn(c):
    # eval-mode BN with default stats (gamma=1, beta=0, mean=0, var=1)
    return {"scale": jnp.full((1, c), 1.0 / math.sqrt(1.0 + EPS), jnp.float32),
            "bias": jnp.zeros((1, c), jnp.float32)}


def make_block(pi, cin, cout, stride, ratio):
    p = {"stride": stride,
         "p1_w": pi.next((cin, cout)), "p1_bn": make_bn(cout),
         "dw5_w": pi.next((5, cout)), "dw5_bn": make_bn(cout),
         "dw7_w": pi.next((7, cout)), "dw7_bn": make_bn(cout),
         "c2_w": pi.next((cout, cout)), "c2_bn": make_bn(cout),
         "lka_bn": make_bn(cout),
         "pr2_w": pi.next((cout, cout)), "pr2_cb": pi.next((cout,)),
         "pr2_bn": make_bn(cout),
         "se_w1": pi.next((cout, cout // ratio)), "se_b1": pi.next((1, cout // ratio)),
         "se_w2": pi.next((cout // ratio, cout)), "se_b2": pi.next((1, cout)),
         "down": None}
    if stride != 1 or cin != cout:
        p["down"] = {"w": pi.next((cin, cout)), "bn": make_bn(cout)}
    return p


def interp_matrix(lin, lout):
    # F.interpolate(mode='linear', align_corners=True) as a static (lout, lin) matrix.
    t = jnp.arange(lout)
    src = t.astype(jnp.float32) * (lin - 1) / max(lout - 1, 1)
    i0 = jnp.clip(jnp.floor(src).astype(jnp.int32), 0, lin - 1)
    i1 = jnp.clip(i0 + 1, 0, lin - 1)
    w = src - i0.astype(jnp.float32)
    A = jnp.zeros((lout, lin), jnp.float32)
    A = A.at[t, i0].add(1.0 - w)
    A = A.at[t, i1].add(w)
    return A


def make_bpnet(pi, width, layer_dims, ratio, L_in):
    p = {"width": width,
         "stem": {"w": pi.next((7, width)), "bn": make_bn(width)}}
    layers = []
    in_ch = width
    for mult, nblocks, first_stride in zip((1, 2, 4, 8), layer_dims, (1, 2, 2, 2)):
        out_ch = width * mult
        blocks = []
        for s in [first_stride] + [1] * (nblocks - 1):
            blocks.append(make_block(pi, in_ch, out_ch, s, ratio))
            in_ch = out_ch
        layers.append(blocks)
    p["layers"] = layers

    l2 = L_in // 4                         # length of c2
    lens = [l2, l2 // 2, l2 // 4, l2 // 8]  # c2, c3, c4, c5
    p["fpn"] = {"top": pi.next((width * 8, width)),
                "lat1": pi.next((width * 4, width)),
                "lat2": pi.next((width * 2, width)),
                "lat3": pi.next((width, width)),
                "a1": interp_matrix(lens[3], lens[2]),
                "a2": interp_matrix(lens[2], lens[1]),
                "a3": interp_matrix(lens[1], lens[0]),
                "sh_w": pi.next((3, width, width)),
                "sh_bn": make_bn(width)}

    # Head: two identical branches (cbr_1/mlp_1 and cbr_2/mlp_2) fused into one set
    # of concatenated / block-diagonal weights so a single kernel evaluates both.
    w2 = width * 2
    w1a, w2a = pi.next((3, width, w2)), pi.next((3, width, w2))
    w1b, w2b = pi.next((3, w2, w2)), pi.next((3, w2, w2))
    bn1a, bn2a = make_bn(w2), make_bn(w2)
    bn1b, bn2b = make_bn(w2), make_bn(w2)
    m1w, m2w = pi.next((w2, 1)), pi.next((w2, 1))
    m1b, m2b = pi.next((1, 1)), pi.next((1, 1))
    z = jnp.zeros((3, w2, w2), jnp.float32)
    wb = jnp.concatenate([jnp.concatenate([w1b, z], axis=2),
                          jnp.concatenate([z, w2b], axis=2)], axis=1)   # (3,4W,4W)
    zm = jnp.zeros((w2, 1), jnp.float32)
    wm = jnp.concatenate([jnp.concatenate([m1w, zm], axis=1),
                          jnp.concatenate([zm, m2w], axis=1)], axis=0)  # (4W, 2)
    p["head"] = {"wa": jnp.concatenate([w1a, w2a], axis=2),             # (3, W, 4W)
                 "sa": jnp.concatenate([bn1a["scale"], bn2a["scale"]], axis=1),
                 "ba": jnp.concatenate([bn1a["bias"], bn2a["bias"]], axis=1),
                 "wb": wb,
                 "sb": jnp.concatenate([bn1b["scale"], bn2b["scale"]], axis=1),
                 "bb": jnp.concatenate([bn1b["bias"], bn2b["bias"]], axis=1),
                 "wm": wm,
                 "bm": jnp.concatenate([m1b, m2b], axis=1)}             # (1, 2)
    return p


# -------------------------------- forward -------------------------------------

def apply_block(p, x):
    if p["stride"] != 1:
        # stride belongs to the 1x1 proj_1 / downsample convs only -> equivalent to
        # subsampling their shared input once (cheap XLA slice), stride-1 in-kernel.
        x = x[:, ::p["stride"], :]
    B, L, _ = x.shape
    cout = p["p1_w"].shape[1]
    has_down = p["down"] is not None
    pr2_scale = p["pr2_bn"]["scale"]
    pr2_bias = p["pr2_bn"]["bias"] + p["pr2_cb"][None, :] * pr2_scale
    params = [p["p1_w"], p["p1_bn"]["scale"], p["p1_bn"]["bias"],
              p["dw5_w"], p["dw5_bn"]["scale"], p["dw5_bn"]["bias"],
              p["dw7_w"], p["dw7_bn"]["scale"], p["dw7_bn"]["bias"],
              p["c2_w"], p["c2_bn"]["scale"], p["c2_bn"]["bias"],
              p["lka_bn"]["scale"], p["lka_bn"]["bias"],
              p["pr2_w"], pr2_scale, pr2_bias,
              p["se_w1"], p["se_b1"], p["se_w2"], p["se_b2"]]
    if has_down:
        params += [p["down"]["w"], p["down"]["bn"]["scale"], p["down"]["bn"]["bias"]]
    return _pcall(partial(block_kernel, has_down=has_down),
                  (B, L, cout), [x], params,
                  scratch_shapes=[pltpu.VMEM((L + 18, cout), jnp.float32)])


def bpnet_forward(params, ppg_x):
    B, _, L = ppg_x.shape
    W = params["width"]
    Lc = (L + 6 - 7) // 2 + 1            # length after stem conv (k7 s2 p3)
    Lp = (Lc + 2 - 3) // 2 + 1           # length after maxpool (k3 s2 p1)
    assert Lc == 2 * Lp, "stem phase split assumes an even conv length"

    # ---- stem: tiny XLA im2col (Cin=1) split into even/odd output phases ----
    x = ppg_x[:, 0, :]
    xpad = jnp.pad(x, ((0, 0), (3, 3)))
    idx = 4 * jnp.arange(Lp)[:, None] + jnp.arange(7)[None, :]
    xt_e = xpad[:, idx]                  # (B, Lp, 7): windows of even conv outputs
    xt_o = xpad[:, idx + 2]              # (B, Lp, 7): windows of odd conv outputs
    st = params["stem"]
    c1 = _pcall(stem_kernel, (B, Lp, W), [xt_e, xt_o],
                [st["w"], st["bn"]["scale"], st["bn"]["bias"]],
                scratch_shapes=[pltpu.VMEM((Lp + 2, W), jnp.float32)])

    # ---- SE-ResNet body (one fused kernel per BasicBlock) ----
    feats, out = [], c1
    for blocks in params["layers"]:
        for bp in blocks:
            out = apply_block(bp, out)
        feats.append(out)
    c2, c3, c4, c5 = feats

    # ---- FPN + share (fused) ----
    fp = params["fpn"]
    Ls = c2.shape[1]
    share = _pcall(fpn_kernel, (B, Ls, W), [c2, c3, c4, c5],
                   [fp["top"], fp["lat1"], fp["lat2"], fp["lat3"],
                    fp["a1"], fp["a2"], fp["a3"],
                    fp["sh_w"], fp["sh_bn"]["scale"], fp["sh_bn"]["bias"]],
                   scratch_shapes=[pltpu.VMEM((Ls + 2, W), jnp.float32)])

    # ---- both heads (fused); stride-2 first conv via phase split of `share` ----
    hd = params["head"]
    s_e = share[:, 0::2, :]
    s_o = share[:, 1::2, :]
    heads = _pcall(head_kernel, (B, 1, 2), [s_e, s_o],
                   [hd["wa"], hd["sa"], hd["ba"], hd["wb"], hd["sb"], hd["bb"],
                    hd["wm"], hd["bm"]],
                   scratch_shapes=[pltpu.VMEM((Ls // 2 + 2, 4 * W), jnp.float32)])
    return heads[:, 0, 0:1], heads[:, 0, 1:2]


# ---------------------------------- main ---------------------------------------

if __name__ == "__main__":
    B, L = 2, 256
    model_width, layer_dims, ratio = 16, (1, 1, 1, 1), 4

    key = jax.random.PRNGKey(0)
    kp, kx = jax.random.split(key)
    params = make_bpnet(PInit(kp), model_width, layer_dims, ratio, L)

    ppg_x = jax.random.normal(kx, (B, 1, L), jnp.float32)   # PyTorch NCL input

    fwd = jax.jit(lambda t: bpnet_forward(params, t))
    out1, out2 = fwd(ppg_x)
    jax.block_until_ready((out1, out2))

    assert out1.shape == (B, 1) and out2.shape == (B, 1)
    assert bool(jnp.all(jnp.isfinite(out1))) and bool(jnp.all(jnp.isfinite(out2)))
    print("KERNEL_OK")
</pallas_src>

<mosaic_0001>
module attributes {stable_mosaic.version = 11 : i64} {
  func.func @stem_kernel(%arg0: i32, %arg1: memref<1x64x7xf32, #tpu.memory_space<vmem>>, %arg2: memref<1x64x7xf32, #tpu.memory_space<vmem>>, %arg3: memref<7x16xf32, #tpu.memory_space<vmem>>, %arg4: memref<1x16xf32, #tpu.memory_space<vmem>>, %arg5: memref<1x16xf32, #tpu.memory_space<vmem>>, %arg6: memref<1x64x16xf32, #tpu.memory_space<vmem>>, %arg7: memref<66x16xf32, #tpu.memory_space<vmem>>) attributes {dimension_semantics = [#tpu.dimension_semantics<parallel>], iteration_bounds = array<i64: 2>, scalar_prefetch = 0 : i64, scratch_operands = 1 : i64, tpu.core_type = #tpu.core_type<tc>, window_params = [{transform_indices = @transform_0, window_bounds = array<i64: 1, 64, 7>}, {transform_indices = @transform_1, window_bounds = array<i64: 1, 64, 7>}, {pipeline_mode = #tpu.pipeline_mode<synchronous>, transform_indices = @transform_2, window_bounds = array<i64: 7, 16>}, {pipeline_mode = #tpu.pipeline_mode<synchronous>, transform_indices = @transform_3, window_bounds = array<i64: 1, 16>}, {pipeline_mode = #tpu.pipeline_mode<synchronous>, transform_indices = @transform_4, window_bounds = array<i64: 1, 16>}, {transform_indices = @transform_5, window_bounds = array<i64: 1, 64, 16>}]} {
    %c0 = arith.constant 0 : index
    %c0_0 = arith.constant 0 : index
    %c0_1 = arith.constant 0 : index
    %0 = vector.load %arg1[%c0, %c0_0, %c0_1] : memref<1x64x7xf32, #tpu.memory_space<vmem>>, vector<1x64x7xf32>
    %1 = vector.shape_cast %0 : vector<1x64x7xf32> to vector<64x7xf32>
    %c0_2 = arith.constant 0 : index
    %c0_3 = arith.constant 0 : index
    %c0_4 = arith.constant 0 : index
    %2 = vector.load %arg2[%c0_2, %c0_3, %c0_4] : memref<1x64x7xf32, #tpu.memory_space<vmem>>, vector<1x64x7xf32>
    %3 = vector.shape_cast %2 : vector<1x64x7xf32> to vector<64x7xf32>
    %c0_5 = arith.constant 0 : index
    %c0_6 = arith.constant 0 : index
    %4 = vector.load %arg3[%c0_5, %c0_6] : memref<7x16xf32, #tpu.memory_space<vmem>>, vector<7x16xf32>
    %cst = arith.constant dense<0.000000e+00> : vector<64x16xf32>
    %5 = tpu.matmul %1, %4, %cst {dimension_numbers = #tpu.dot_dimension_numbers<[1], [0], [0], [1], [0, 0, 1, 1], [], []>} : vector<64x7xf32>, vector<7x16xf32>, vector<64x16xf32> -> vector<64x16xf32>
    %c0_7 = arith.constant 0 : index
    %c0_8 = arith.constant 0 : index
    %6 = vector.load %arg4[%c0_7, %c0_8] : memref<1x16xf32, #tpu.memory_space<vmem>>, vector<1x16xf32>
    %7 = vector.broadcast %6 : vector<1x16xf32> to vector<64x16xf32>
    %8 = arith.mulf %5, %7 : vector<64x16xf32>
    %c0_9 = arith.constant 0 : index
    %c0_10 = arith.constant 0 : index
    %9 = vector.load %arg5[%c0_9, %c0_10] : memref<1x16xf32, #tpu.memory_space<vmem>>, vector<1x16xf32>
    %10 = vector.broadcast %9 : vector<1x16xf32> to vector<64x16xf32>
    %11 = arith.addf %8, %10 : vector<64x16xf32>
    %cst_11 = arith.constant 0.000000e+00 : f32
    %12 = vector.broadcast %cst_11 : f32 to vector<64x16xf32>
    %13 = arith.maximumf %11, %12 : vector<64x16xf32>
    %c0_12 = arith.constant 0 : index
    %c0_13 = arith.constant 0 : index
    %14 = vector.load %arg3[%c0_12, %c0_13] : memref<7x16xf32, #tpu.memory_space<vmem>>, vector<7x16xf32>
    %cst_14 = arith.constant dense<0.000000e+00> : vector<64x16xf32>
    %15 = tpu.matmul %3, %14, %cst_14 {dimension_numbers = #tpu.dot_dimension_numbers<[1], [0], [0], [1], [0, 0, 1, 1], [], []>} : vector<64x7xf32>, vector<7x16xf32>, vector<64x16xf32> -> vector<64x16xf32>
    %c0_15 = arith.constant 0 : index
    %c0_16 = arith.constant 0 : index
    %16 = vector.load %arg4[%c0_15, %c0_16] : memref<1x16xf32, #tpu.memory_space<vmem>>, vector<1x16xf32>
    %17 = vector.broadcast %16 : vector<1x16xf32> to vector<64x16xf32>
    %18 = arith.mulf %15, %17 : vector<64x16xf32>
    %c0_17 = arith.constant 0 : index
    %c0_18 = arith.constant 0 : index
    %19 = vector.load %arg5[%c0_17, %c0_18] : memref<1x16xf32, #tpu.memory_space<vmem>>, vector<1x16xf32>
    %20 = vector.broadcast %19 : vector<1x16xf32> to vector<64x16xf32>
    %21 = arith.addf %18, %20 : vector<64x16xf32>
    %cst_19 = arith.constant 0.000000e+00 : f32
    %22 = vector.broadcast %cst_19 : f32 to vector<64x16xf32>
    %23 = arith.maximumf %21, %22 : vector<64x16xf32>
    %cst_20 = arith.constant 0.000000e+00 : f32
    %24 = vector.broadcast %cst_20 : f32 to vector<66x16xf32>
    %c0_21 = arith.constant 0 : index
    %c0_22 = arith.constant 0 : index
    %25 = vector.load %arg7[%c0_21, %c0_22] : memref<66x16xf32, #tpu.memory_space<vmem>>, vector<66x16xf32>
    tpu.vector_store %arg7[%c0_21, %c0_22], %24 {strides = array<i32>} : memref<66x16xf32, #tpu.memory_space<vmem>>, vector<66x16xf32>,
    %c1 = arith.constant 1 : index
    %c0_23 = arith.constant 0 : index
    %26 = vector.load %arg7[%c1, %c0_23] : memref<66x16xf32, #tpu.memory_space<vmem>>, vector<64x16xf32>
    tpu.vector_store %arg7[%c1, %c0_23], %23 {strides = array<i32>} : memref<66x16xf32, #tpu.memory_space<vmem>>, vector<64x16xf32>,
    %c0_24 = arith.constant 0 : index
    %c0_25 = arith.constant 0 : index
    %27 = vector.load %arg7[%c0_24, %c0_25] : memref<66x16xf32, #tpu.memory_space<vmem>>, vector<64x16xf32>
    %28 = arith.maximumf %27, %13 : vector<64x16xf32>
    %29 = arith.maximumf %28, %23 : vector<64x16xf32>
    %30 = vector.shape_cast %29 : vector<64x16xf32> to vector<1x64x16xf32>
    %c0_26 = arith.constant 0 : index
    %c0_27 = arith.constant 0 : index
    %c0_28 = arith.constant 0 : index
    %31 = vector.load %arg6[%c0_26, %c0_27, %c0_28] : memref<1x64x16xf32, #tpu.memory_space<vmem>>, vector<1x64x16xf32>
    tpu.vector_store %arg6[%c0_26, %c0_27, %c0_28], %30 {strides = array<i32>} : memref<1x64x16xf32, #tpu.memory_space<vmem>>, vector<1x64x16xf32>,
    return
  }
  func.func @transform_0(%arg0: i32) -> (i32, i32, i32) {
    %c0_i32 = arith.constant 0 : i32
    %c0_i32_0 = arith.constant 0 : i32
    %c0_i32_1 = arith.constant 0 : i32
    return %arg0, %c0_i32, %c0_i32_0 : i32, i32, i32
  }
  func.func @transform_1(%arg0: i32) -> (i32, i32, i32) {
    %c0_i32 = arith.constant 0 : i32
    %c0_i32_0 = arith.constant 0 : i32
    %c0_i32_1 = arith.constant 0 : i32
    return %arg0, %c0_i32, %c0_i32_0 : i32, i32, i32
  }
  func.func @transform_2(%arg0: i32) -> (i32, i32) {
    %c0_i32 = arith.constant 0 : i32
    %c0_i32_0 = arith.constant 0 : i32
    %c0_i32_1 = arith.constant 0 : i32
    return %c0_i32, %c0_i32_0 : i32, i32
  }
  func.func @transform_3(%arg0: i32) -> (i32, i32) {
    %c0_i32 = arith.constant 0 : i32
    %c0_i32_0 = arith.constant 0 : i32
    %c0_i32_1 = arith.constant 0 : i32
    return %c0_i32, %c0_i32_0 : i32, i32
  }
  func.func @transform_4(%arg0: i32) -> (i32, i32) {
    %c0_i32 = arith.constant 0 : i32
    %c0_i32_0 = arith.constant 0 : i32
    %c0_i32_1 = arith.constant 0 : i32
    return %c0_i32, %c0_i32_0 : i32, i32
  }
  func.func @transform_5(%arg0: i32) -> (i32, i32, i32) {
    %c0_i32 = arith.constant 0 : i32
    %c0_i32_0 = arith.constant 0 : i32
    %c0_i32_1 = arith.constant 0 : i32
    return %arg0, %c0_i32, %c0_i32_0 : i32, i32, i32
  }
}

module attributes {stable_mosaic.version = 11 : i64} {
  func.func @block_kernel(%arg0: i32, %arg1: memref<1x64x16xf32, #tpu.memory_space<vmem>>, %arg2: memref<16x16xf32, #tpu.memory_space<vmem>>, %arg3: memref<1x16xf32, #tpu.memory_space<vmem>>, %arg4: memref<1x16xf32, #tpu.memory_space<vmem>>, %arg5: memref<5x16xf32, #tpu.memory_space<vmem>>, %arg6: memref<1x16xf32, #tpu.memory_space<vmem>>, %arg7: memref<1x16xf32, #tpu.memory_space<vmem>>, %arg8: memref<7x16xf32, #tpu.memory_space<vmem>>, %arg9: memref<1x16xf32, #tpu.memory_space<vmem>>, %arg10: memref<1x16xf32, #tpu.memory_space<vmem>>, %arg11: memref<16x16xf32, #tpu.memory_space<vmem>>, %arg12: memref<1x16xf32, #tpu.memory_space<vmem>>, %arg13: memref<1x16xf32, #tpu.memory_space<vmem>>, %arg14: memref<1x16xf32, #tpu.memory_space<vmem>>, %arg15: memref<1x16xf32, #tpu.memory_space<vmem>>, %arg16: memref<16x16xf32, #tpu.memory_space<vmem>>, %arg17: memref<1x16xf32, #tpu.memory_space<vmem>>, %arg18: memref<1x16xf32, #tpu.memory_space<vmem>>, %arg19: memref<16x4xf32, #tpu.memory_space<vmem>>, %arg20: memref<1x4xf32, #tpu.memory_space<vmem>>, %arg21: memref<4x16xf32, #tpu.memory_space<vmem>>, %arg22: memref<1x16xf32, #tpu.memory_space<vmem>>, %arg23: memref<1x64x16xf32, #tpu.memory_space<vmem>>, %arg24: memref<82x16xf32, #tpu.memory_space<vmem>>) attributes {dimension_semantics = [#tpu.dimension_semantics<parallel>], iteration_bounds = array<i64: 2>, scalar_prefetch = 0 : i64, scratch_operands = 1 : i64, tpu.core_type = #tpu.core_type<tc>, window_params = [{transform_indices = @transform_0, window_bounds = array<i64: 1, 64, 16>}, {pipeline_mode = #tpu.pipeline_mode<synchronous>, transform_indices = @transform_1, window_bounds = array<i64: 16, 16>}, {pipeline_mode = #tpu.pipeline_mode<synchronous>, transform_indices = @transform_2, window_bounds = array<i64: 1, 16>}, {pipeline_mode = #tpu.pipeline_mode<synchronous>, transform_indices = @transform_3, window_bounds = array<i64: 1, 16>}, {pipeline_mode = #tpu.pipeline_mode<synchronous>, transform_indices = @transform_4, window_bounds = array<i64: 5, 16>}, {pipeline_mode = #tpu.pipeline_mode<synchronous>, transform_indices = @transform_5, window_bounds = array<i64: 1, 16>}, {pipeline_mode = #tpu.pipeline_mode<synchronous>, transform_indices = @transform_6, window_bounds = array<i64: 1, 16>}, {pipeline_mode = #tpu.pipeline_mode<synchronous>, transform_indices = @transform_7, window_bounds = array<i64: 7, 16>}, {pipeline_mode = #tpu.pipeline_mode<synchronous>, transform_indices = @transform_8, window_bounds = array<i64: 1, 16>}, {pipeline_mode = #tpu.pipeline_mode<synchronous>, transform_indices = @transform_9, window_bounds = array<i64: 1, 16>}, {pipeline_mode = #tpu.pipeline_mode<synchronous>, transform_indices = @transform_10, window_bounds = array<i64: 16, 16>}, {pipeline_mode = #tpu.pipeline_mode<synchronous>, transform_indices = @transform_11, window_bounds = array<i64: 1, 16>}, {pipeline_mode = #tpu.pipeline_mode<synchronous>, transform_indices = @transform_12, window_bounds = array<i64: 1, 16>}, {pipeline_mode = #tpu.pipeline_mode<synchronous>, transform_indices = @transform_13, window_bounds = array<i64: 1, 16>}, {pipeline_mode = #tpu.pipeline_mode<synchronous>, transform_indices = @transform_14, window_bounds = array<i64: 1, 16>}, {pipeline_mode = #tpu.pipeline_mode<synchronous>, transform_indices = @transform_15, window_bounds = array<i64: 16, 16>}, {pipeline_mode = #tpu.pipeline_mode<synchronous>, transform_indices = @transform_16, window_bounds = array<i64: 1, 16>}, {pipeline_mode = #tpu.pipeline_mode<synchronous>, transform_indices = @transform_17, window_bounds = array<i64: 1, 16>}, {pipeline_mode = #tpu.pipeline_mode<synchronous>, transform_indices = @transform_18, window_bounds = array<i64: 16, 4>}, {pipeline_mode = #tpu.pipeline_mode<synchronous>, transform_indices = @transform_19, window_bounds = array<i64: 1, 4>}, {pipeline_mode = #tpu.pipeline_mode<synchronous>, transform_indices = @transform_20, window_bounds = array<i64: 4, 16>}, {pipeline_mode = #tpu.pipeline_mode<synchronous>, transform_indices = @transform_21, window_bounds = array<i64: 1, 16>}, {transform_indices = @transform_22, window_bounds = array<i64: 1, 64, 16>}]} {
    %c0 = arith.constant 0 : index
    %c0_0 = arith.constant 0 : index
    %c0_1 = arith.constant 0 : index
    %0 = vector.load %arg1[%c0, %c0_0, %c0_1] : memref<1x64x16xf32, #tpu.memory_space<vmem>>, vector<1x64x16xf32>
    %1 = vector.shape_cast %0 : vector<1x64x16xf32> to vector<64x16xf32>
    %c0_2 = arith.constant 0 : index
    %c0_3 = arith.constant 0 : index
    %2 = vector.load %arg2[%c0_2, %c0_3] : memref<16x16xf32, #tpu.memory_space<vmem>>, vector<16x16xf32>
    %cst = arith.constant dense<0.000000e+00> : vector<64x16xf32>
    %3 = tpu.matmul %1, %2, %cst {dimension_numbers = #tpu.dot_dimension_numbers<[1], [0], [0], [1], [0, 0, 1, 1], [], []>} : vector<64x16xf32>, vector<16x16xf32>, vector<64x16xf32> -> vector<64x16xf32>
    %c0_4 = arith.constant 0 : index
    %c0_5 = arith.constant 0 : index
    %4 = vector.load %arg3[%c0_4, %c0_5] : memref<1x16xf32, #tpu.memory_space<vmem>>, vector<1x16xf32>
    %5 = vector.broadcast %4 : vector<1x16xf32> to vector<64x16xf32>
    %6 = arith.mulf %3, %5 : vector<64x16xf32>
    %c0_6 = arith.constant 0 : index
    %c0_7 = arith.constant 0 : index
    %7 = vector.load %arg4[%c0_6, %c0_7] : memref<1x16xf32, #tpu.memory_space<vmem>>, vector<1x16xf32>
    %8 = vector.broadcast %7 : vector<1x16xf32> to vector<64x16xf32>
    %9 = arith.addf %6, %8 : vector<64x16xf32>
    %cst_8 = arith.constant 0.000000e+00 : f32
    %10 = vector.broadcast %cst_8 : f32 to vector<64x16xf32>
    %11 = arith.maximumf %9, %10 : vector<64x16xf32>
    %cst_9 = arith.constant 0.000000e+00 : f32
    %12 = vector.broadcast %cst_9 : f32 to vector<68x16xf32>
    %c0_10 = arith.constant 0 : index
    %c0_11 = arith.constant 0 : index
    %13 = vector.load %arg24[%c0_10, %c0_11] : memref<82x16xf32, #tpu.memory_space<vmem>>, vector<68x16xf32>
    tpu.vector_store %arg24[%c0_10, %c0_11], %12 {strides = array<i32>} : memref<82x16xf32, #tpu.memory_space<vmem>>, vector<68x16xf32>,
    %c2 = arith.constant 2 : index
    %c0_12 = arith.constant 0 : index
    %14 = vector.load %arg24[%c2, %c0_12] : memref<82x16xf32, #tpu.memory_space<vmem>>, vector<64x16xf32>
    tpu.vector_store %arg24[%c2, %c0_12], %11 {strides = array<i32>} : memref<82x16xf32, #tpu.memory_space<vmem>>, vector<64x16xf32>,
    %c0_13 = arith.constant 0 : index
    %c0_14 = arith.constant 0 : index
    %15 = vector.load %arg24[%c0_13, %c0_14] : memref<82x16xf32, #tpu.memory_space<vmem>>, vector<64x16xf32>
    %c1 = arith.constant 1 : index
    %c0_15 = arith.constant 0 : index
    %16 = vector.load %arg24[%c1, %c0_15] : memref<82x16xf32, #tpu.memory_space<vmem>>, vector<64x16xf32>
    %c2_16 = arith.constant 2 : index
    %c0_17 = arith.constant 0 : index
    %17 = vector.load %arg24[%c2_16, %c0_17] : memref<82x16xf32, #tpu.memory_space<vmem>>, vector<64x16xf32>
    %c3 = arith.constant 3 : index
    %c0_18 = arith.constant 0 : index
    %18 = vector.load %arg24[%c3, %c0_18] : memref<82x16xf32, #tpu.memory_space<vmem>>, vector<64x16xf32>
    %c4 = arith.constant 4 : index
    %c0_19 = arith.constant 0 : index
    %19 = vector.load %arg24[%c4, %c0_19] : memref<82x16xf32, #tpu.memory_space<vmem>>, vector<64x16xf32>
    %c0_20 = arith.constant 0 : index
    %c0_21 = arith.constant 0 : index
    %20 = vector.load %arg5[%c0_20, %c0_21] : memref<5x16xf32, #tpu.memory_space<vmem>>, vector<1x16xf32>
    %21 = vector.shape_cast %20 : vector<1x16xf32> to vector<16xf32>
    %22 = vector.shape_cast %21 : vector<16xf32> to vector<1x16xf32>
    %23 = vector.broadcast %22 : vector<1x16xf32> to vector<64x16xf32>
    %24 = arith.mulf %15, %23 : vector<64x16xf32>
    %c1_22 = arith.constant 1 : index
    %c0_23 = arith.constant 0 : index
    %25 = vector.load %arg5[%c1_22, %c0_23] : memref<5x16xf32, #tpu.memory_space<vmem>>, vector<1x16xf32>
    %26 = vector.shape_cast %25 : vector<1x16xf32> to vector<16xf32>
    %27 = vector.shape_cast %26 : vector<16xf32> to vector<1x16xf32>
    %28 = vector.broadcast %27 : vector<1x16xf32> to vector<64x16xf32>
    %29 = arith.mulf %16, %28 : vector<64x16xf32>
    %30 = arith.addf %24, %29 : vector<64x16xf32>
    %c2_24 = arith.constant 2 : index
    %c0_25 = arith.constant 0 : index
    %31 = vector.load %arg5[%c2_24, %c0_25] : memref<5x16xf32, #tpu.memory_space<vmem>>, vector<1x16xf32>
    %32 = vector.shape_cast %31 : vector<1x16xf32> to vector<16xf32>
    %33 = vector.shape_cast %32 : vector<16xf32> to vector<1x16xf32>
    %34 = vector.broadcast %33 : vector<1x16xf32> to vector<64x16xf32>
    %35 = arith.mulf %17, %34 : vector<64x16xf32>
    %36 = arith.addf %30, %35 : vector<64x16xf32>
    %c3_26 = arith.constant 3 : index
    %c0_27 = arith.constant 0 : index
    %37 = vector.load %arg5[%c3_26, %c0_27] : memref<5x16xf32, #tpu.memory_space<vmem>>, vector<1x16xf32>
    %38 = vector.shape_cast %37 : vector<1x16xf32> to vector<16xf32>
    %39 = vector.shape_cast %38 : vector<16xf32> to vector<1x16xf32>
    %40 = vector.broadcast %39 : vector<1x16xf32> to vector<64x16xf32>
    %41 = arith.mulf %18, %40 : vector<64x16xf32>
    %42 = arith.addf %36, %41 : vector<64x16xf32>
    %c4_28 = arith.constant 4 : index
    %c0_29 = arith.constant 0 : index
    %43 = vector.load %arg5[%c4_28, %c0_29] : memref<5x16xf32, #tpu.memory_space<vmem>>, vector<1x16xf32>
    %44 = vector.shape_cast %43 : vector<1x16xf32> to vector<16xf32>
    %45 = vector.shape_cast %44 : vector<16xf32> to vector<1x16xf32>
    %46 = vector.broadcast %45 : vector<1x16xf32> to vector<64x16xf32>
    %47 = arith.mulf %19, %46 : vector<64x16xf32>
    %48 = arith.addf %42, %47 : vector<64x16xf32>
    %c0_30 = arith.constant 0 : index
    %c0_31 = arith.constant 0 : index
    %49 = vector.load %arg6[%c0_30, %c0_31] : memref<1x16xf32, #tpu.memory_space<vmem>>, vector<1x16xf32>
    %50 = vector.broadcast %49 : vector<1x16xf32> to vector<64x16xf32>
    %51 = arith.mulf %48, %50 : vector<64x16xf32>
    %c0_32 = arith.constant 0 : index
    %c0_33 = arith.constant 0 : index
    %52 = vector.load %arg7[%c0_32, %c0_33] : memref<1x16xf32, #tpu.memory_space<vmem>>, vector<1x16xf32>
    %53 = vector.broadcast %52 : vector<1x16xf32> to vector<64x16xf32>
    %54 = arith.addf %51, %53 : vector<64x16xf32>
    %cst_34 = arith.constant 0.000000e+00 : f32
    %55 = vector.broadcast %cst_34 : f32 to vector<64x16xf32>
    %56 = arith.maximumf %54, %55 : vector<64x16xf32>
    %cst_35 = arith.constant 0.000000e+00 : f32
    %57 = vector.broadcast %cst_35 : f32 to vector<82x16xf32>
    %c0_36 = arith.constant 0 : index
    %c0_37 = arith.constant 0 : index
    %58 = vector.load %arg24[%c0_36, %c0_37] : memref<82x16xf32, #tpu.memory_space<vmem>>, vector<82x16xf32>
    tpu.vector_store %arg24[%c0_36, %c0_37], %57 {strides = array<i32>} : memref<82x16xf32, #tpu.memory_space<vmem>>, vector<82x16xf32>,
    %c9 = arith.constant 9 : index
    %c0_38 = arith.constant 0 : index
    %59 = vector.load %arg24[%c9, %c0_38] : memref<82x16xf32, #tpu.memory_space<vmem>>, vector<64x16xf32>
    tpu.vector_store %arg24[%c9, %c0_38], %56 {strides = array<i32>} : memref<82x16xf32, #tpu.memory_space<vmem>>, vector<64x16xf32>,
    %c0_39 = arith.constant 0 : index
    %c0_40 = arith.constant 0 : index
    %60 = vector.load %arg24[%c0_39, %c0_40] : memref<82x16xf32, #tpu.memory_space<vmem>>, vector<64x16xf32>
    %c3_41 = arith.constant 3 : index
    %c0_42 = arith.constant 0 : index
    %61 = vector.load %arg24[%c3_41, %c0_42] : memref<82x16xf32, #tpu.memory_space<vmem>>, vector<64x16xf32>
    %c6 = arith.constant 6 : index
    %c0_43 = arith.constant 0 : index
    %62 = vector.load %arg24[%c6, %c0_43] : memref<82x16xf32, #tpu.memory_space<vmem>>, vector<64x16xf32>
    %c9_44 = arith.constant 9 : index
    %c0_45 = arith.constant 0 : index
    %63 = vector.load %arg24[%c9_44, %c0_45] : memref<82x16xf32, #tpu.memory_space<vmem>>, vector<64x16xf32>
    %c12 = arith.constant 12 : index
    %c0_46 = arith.constant 0 : index
    %64 = vector.load %arg24[%c12, %c0_46] : memref<82x16xf32, #tpu.memory_space<vmem>>, vector<64x16xf32>
    %c15 = arith.constant 15 : index
    %c0_47 = arith.constant 0 : index
    %65 = vector.load %arg24[%c15, %c0_47] : memref<82x16xf32, #tpu.memory_space<vmem>>, vector<64x16xf32>
    %c18 = arith.constant 18 : index
    %c0_48 = arith.constant 0 : index
    %66 = vector.load %arg24[%c18, %c0_48] : memref<82x16xf32, #tpu.memory_space<vmem>>, vector<64x16xf32>
    %c0_49 = arith.constant 0 : index
    %c0_50 = arith.constant 0 : index
    %67 = vector.load %arg8[%c0_49, %c0_50] : memref<7x16xf32, #tpu.memory_space<vmem>>, vector<1x16xf32>
    %68 = vector.shape_cast %67 : vector<1x16xf32> to vector<16xf32>
    %69 = vector.shape_cast %68 : vector<16xf32> to vector<1x16xf32>
    %70 = vector.broadcast %69 : vector<1x16xf32> to vector<64x16xf32>
    %71 = arith.mulf %60, %70 : vector<64x16xf32>
    %c1_51 = arith.constant 1 : index
    %c0_52 = arith.constant 0 : index
    %72 = vector.load %arg8[%c1_51, %c0_52] : memref<7x16xf32, #tpu.memory_space<vmem>>, vector<1x16xf32>
    %73 = vector.shape_cast %72 : vector<1x16xf32> to vector<16xf32>
    %74 = vector.shape_cast %73 : vector<16xf32> to vector<1x16xf32>
    %75 = vector.broadcast %74 : vector<1x16xf32> to vector<64x16xf32>
    %76 = arith.mulf %61, %75 : vector<64x16xf32>
    %77 = arith.addf %71, %76 : vector<64x16xf32>
    %c2_53 = arith.constant 2 : index
    %c0_54 = arith.constant 0 : index
    %78 = vector.load %arg8[%c2_53, %c0_54] : memref<7x16xf32, #tpu.memory_space<vmem>>, vector<1x16xf32>
    %79 = vector.shape_cast %78 : vector<1x16xf32> to vector<16xf32>
    %80 = vector.shape_cast %79 : vector<16xf32> to vector<1x16xf32>
    %81 = vector.broadcast %80 : vector<1x16xf32> to vector<64x16xf32>
    %82 = arith.mulf %62, %81 : vector<64x16xf32>
    %83 = arith.addf %77, %82 : vector<64x16xf32>
    %c3_55 = arith.constant 3 : index
    %c0_56 = arith.constant 0 : index
    %84 = vector.load %arg8[%c3_55, %c0_56] : memref<7x16xf32, #tpu.memory_space<vmem>>, vector<1x16xf32>
    %85 = vector.shape_cast %84 : vector<1x16xf32> to vector<16xf32>
    %86 = vector.shape_cast %85 : vector<16xf32> to vector<1x16xf32>
    %87 = vector.broadcast %86 : vector<1x16xf32> to vector<64x16xf32>
    %88 = arith.mulf %63, %87 : vector<64x16xf32>
    %89 = arith.addf %83, %88 : vector<64x16xf32>
    %c4_57 = arith.constant 4 : index
    %c0_58 = arith.constant 0 : index
    %90 = vector.load %arg8[%c4_57, %c0_58] : memref<7x16xf32, #tpu.memory_space<vmem>>, vector<1x16xf32>
    %91 = vector.shape_cast %90 : vector<1x16xf32> to vector<16xf32>
    %92 = vector.shape_cast %91 : vector<16xf32> to vector<1x16xf32>
    %93 = vector.broadcast %92 : vector<1x16xf32> to vector<64x16xf32>
    %94 = arith.mulf %64, %93 : vector<64x16xf32>
    %95 = arith.addf %89, %94 : vector<64x16xf32>
    %c5 = arith.constant 5 : index
    %c0_59 = arith.constant 0 : index
    %96 = vector.load %arg8[%c5, %c0_59] : memref<7x16xf32, #tpu.memory_space<vmem>>, vector<1x16xf32>
    %97 = vector.shape_cast %96 : vector<1x16xf32> to vector<16xf32>
    %98 = vector.shape_cast %97 : vector<16xf32> to vector<1x16xf32>
    %99 = vector.broadcast %98 : vector<1x16xf32> to vector<64x16xf32>
    %100 = arith.mulf %65, %99 : vector<64x16xf32>
    %101 = arith.addf %95, %100 : vector<64x16xf32>
    %c6_60 = arith.constant 6 : index
    %c0_61 = arith.constant 0 : index
    %102 = vector.load %arg8[%c6_60, %c0_61] : memref<7x16xf32, #tpu.memory_space<vmem>>, vector<1x16xf32>
    %103 = vector.shape_cast %102 : vector<1x16xf32> to vector<16xf32>
    %104 = vector.shape_cast %103 : vector<16xf32> to vector<1x16xf32>
    %105 = vector.broadcast %104 : vector<1x16xf32> to vector<64x16xf32>
    %106 = arith.mulf %66, %105 : vector<64x16xf32>
    %107 = arith.addf %101, %106 : vector<64x16xf32>
    %c0_62 = arith.constant 0 : index
    %c0_63 = arith.constant 0 : index
    %108 = vector.load %arg9[%c0_62, %c0_63] : memref<1x16xf32, #tpu.memory_space<vmem>>, vector<1x16xf32>
    %109 = vector.broadcast %108 : vector<1x16xf32> to vector<64x16xf32>
    %110 = arith.mulf %107, %109 : vector<64x16xf32>
    %c0_64 = arith.constant 0 : index
    %c0_65 = arith.constant 0 : index
    %111 = vector.load %arg10[%c0_64, %c0_65] : memref<1x16xf32, #tpu.memory_space<vmem>>, vector<1x16xf32>
    %112 = vector.broadcast %111 : vector<1x16xf32> to vector<64x16xf32>
    %113 = arith.addf %110, %112 : vector<64x16xf32>
    %cst_66 = arith.constant 0.000000e+00 : f32
    %114 = vector.broadcast %cst_66 : f32 to vector<64x16xf32>
    %115 = arith.maximumf %113, %114 : vector<64x16xf32>
    %c0_67 = arith.constant 0 : index
    %c0_68 = arith.constant 0 : index
    %116 = vector.load %arg11[%c0_67, %c0_68] : memref<16x16xf32, #tpu.memory_space<vmem>>, vector<16x16xf32>
    %cst_69 = arith.constant dense<0.000000e+00> : vector<64x16xf32>
    %117 = tpu.matmul %115, %116, %cst_69 {dimension_numbers = #tpu.dot_dimension_numbers<[1], [0], [0], [1], [0, 0, 1, 1], [], []>} : vector<64x16xf32>, vector<16x16xf32>, vector<64x16xf32> -> vector<64x16xf32>
    %c0_70 = arith.constant 0 : index
    %c0_71 = arith.constant 0 : index
    %118 = vector.load %arg12[%c0_70, %c0_71] : memref<1x16xf32, #tpu.memory_space<vmem>>, vector<1x16xf32>
    %119 = vector.broadcast %118 : vector<1x16xf32> to vector<64x16xf32>
    %120 = arith.mulf %117, %119 : vector<64x16xf32>
    %c0_72 = arith.constant 0 : index
    %c0_73 = arith.constant 0 : index
    %121 = vector.load %arg13[%c0_72, %c0_73] : memref<1x16xf32, #tpu.memory_space<vmem>>, vector<1x16xf32>
    %122 = vector.broadcast %121 : vector<1x16xf32> to vector<64x16xf32>
    %123 = arith.addf %120, %122 : vector<64x16xf32>
    %cst_74 = arith.constant 0.000000e+00 : f32
    %124 = vector.broadcast %cst_74 : f32 to vector<64x16xf32>
    %125 = arith.maximumf %123, %124 : vector<64x16xf32>
    %126 = arith.mulf %125, %11 : vector<64x16xf32>
    %c0_75 = arith.constant 0 : index
    %c0_76 = arith.constant 0 : index
    %127 = vector.load %arg14[%c0_75, %c0_76] : memref<1x16xf32, #tpu.memory_space<vmem>>, vector<1x16xf32>
    %128 = vector.broadcast %127 : vector<1x16xf32> to vector<64x16xf32>
    %129 = arith.mulf %126, %128 : vector<64x16xf32>
    %c0_77 = arith.constant 0 : index
    %c0_78 = arith.constant 0 : index
    %130 = vector.load %arg15[%c0_77, %c0_78] : memref<1x16xf32, #tpu.memory_space<vmem>>, vector<1x16xf32>
    %131 = vector.broadcast %130 : vector<1x16xf32> to vector<64x16xf32>
    %132 = arith.addf %129, %131 : vector<64x16xf32>
    %cst_79 = arith.constant 0.000000e+00 : f32
    %133 = vector.broadcast %cst_79 : f32 to vector<64x16xf32>
    %134 = arith.maximumf %132, %133 : vector<64x16xf32>
    %c0_80 = arith.constant 0 : index
    %c0_81 = arith.constant 0 : index
    %135 = vector.load %arg16[%c0_80, %c0_81] : memref<16x16xf32, #tpu.memory_space<vmem>>, vector<16x16xf32>
    %cst_82 = arith.constant dense<0.000000e+00> : vector<64x16xf32>
    %136 = tpu.matmul %134, %135, %cst_82 {dimension_numbers = #tpu.dot_dimension_numbers<[1], [0], [0], [1], [0, 0, 1, 1], [], []>} : vector<64x16xf32>, vector<16x16xf32>, vector<64x16xf32> -> vector<64x16xf32>
    %c0_83 = arith.constant 0 : index
    %c0_84 = arith.constant 0 : index
    %137 = vector.load %arg17[%c0_83, %c0_84] : memref<1x16xf32, #tpu.memory_space<vmem>>, vector<1x16xf32>
    %138 = vector.broadcast %137 : vector<1x16xf32> to vector<64x16xf32>
    %139 = arith.mulf %136, %138 : vector<64x16xf32>
    %c0_85 = arith.constant 0 : index
    %c0_86 = arith.constant 0 : index
    %140 = vector.load %arg18[%c0_85, %c0_86] : memref<1x16xf32, #tpu.memory_space<vmem>>, vector<1x16xf32>
    %141 = vector.broadcast %140 : vector<1x16xf32> to vector<64x16xf32>
    %142 = arith.addf %139, %141 : vector<64x16xf32>
    %cst_87 = arith.constant dense<0.000000e+00> : vector<16xf32>
    %143 = vector.multi_reduction <add>, %142, %cst_87 [0] : vector<64x16xf32> to vector<16xf32>
    %144 = vector.shape_cast %143 : vector<16xf32> to vector<1x16xf32>
    %cst_88 = arith.constant 6.400000e+01 : f32
    %145 = vector.broadcast %cst_88 : f32 to vector<1x16xf32>
    %146 = arith.divf %144, %145 : vector<1x16xf32>
    %c0_89 = arith.constant 0 : index
    %c0_90 = arith.constant 0 : index
    %147 = vector.load %arg19[%c0_89, %c0_90] : memref<16x4xf32, #tpu.memory_space<vmem>>, vector<16x4xf32>
    %cst_91 = arith.constant dense<0.000000e+00> : vector<1x4xf32>
    %148 = tpu.matmul %146, %147, %cst_91 {dimension_numbers = #tpu.dot_dimension_numbers<[1], [0], [0], [1], [0, 0, 1, 1], [], []>} : vector<1x16xf32>, vector<16x4xf32>, vector<1x4xf32> -> vector<1x4xf32>
    %c0_92 = arith.constant 0 : index
    %c0_93 = arith.constant 0 : index
    %149 = vector.load %arg20[%c0_92, %c0_93] : memref<1x4xf32, #tpu.memory_space<vmem>>, vector<1x4xf32>
    %150 = arith.addf %148, %149 : vector<1x4xf32>
    %cst_94 = arith.constant 0.000000e+00 : f32
    %151 = vector.broadcast %cst_94 : f32 to vector<1x4xf32>
    %152 = arith.maximumf %150, %151 : vector<1x4xf32>
    %c0_95 = arith.constant 0 : index
    %c0_96 = arith.constant 0 : index
    %153 = vector.load %arg21[%c0_95, %c0_96] : memref<4x16xf32, #tpu.memory_space<vmem>>, vector<4x16xf32>
    %cst_97 = arith.constant dense<0.000000e+00> : vector<1x16xf32>
    %154 = tpu.matmul %152, %153, %cst_97 {dimension_numbers = #tpu.dot_dimension_numbers<[1], [0], [0], [1], [0, 0, 1, 1], [], []>} : vector<1x4xf32>, vector<4x16xf32>, vector<1x16xf32> -> vector<1x16xf32>
    %c0_98 = arith.constant 0 : index
    %c0_99 = arith.constant 0 : index
    %155 = vector.load %arg22[%c0_98, %c0_99] : memref<1x16xf32, #tpu.memory_space<vmem>>, vector<1x16xf32>
    %156 = arith.addf %154, %155 : vector<1x16xf32>
    %cst_100 = arith.constant 0.000000e+00 : f32
    %157 = vector.broadcast %cst_100 : f32 to vector<1x16xf32>
    %158 = arith.subf %157, %156 : vector<1x16xf32>
    %159 = math.exp %158 : vector<1x16xf32>
    %cst_101 = arith.constant 1.000000e+00 : f32
    %160 = vector.broadcast %cst_101 : f32 to vector<1x16xf32>
    %161 = arith.addf %160, %159 : vector<1x16xf32>
    %cst_102 = arith.constant 1.000000e+00 : f32
    %162 = vector.broadcast %cst_102 : f32 to vector<1x16xf32>
    %163 = arith.divf %162, %161 : vector<1x16xf32>
    %164 = vector.broadcast %163 : vector<1x16xf32> to vector<64x16xf32>
    %165 = arith.mulf %142, %164 : vector<64x16xf32>
    %166 = arith.addf %165, %1 : vector<64x16xf32>
    %cst_103 = arith.constant 0.000000e+00 : f32
    %167 = vector.broadcast %cst_103 : f32 to vector<64x16xf32>
    %168 = arith.maximumf %166, %167 : vector<64x16xf32>
    %169 = vector.shape_cast %168 : vector<64x16xf32> to vector<1x64x16xf32>
    %c0_104 = arith.constant 0 : index
    %c0_105 = arith.constant 0 : index
    %c0_106 = arith.constant 0 : index
    %170 = vector.load %arg23[%c0_104, %c0_105, %c0_106] : memref<1x64x16xf32, #tpu.memory_space<vmem>>, vector<1x64x16xf32>
    tpu.vector_store %arg23[%c0_104, %c0_105, %c0_106], %169 {strides = array<i32>} : memref<1x64x16xf32, #tpu.memory_space<vmem>>, vector<1x64x16xf32>,
    return
  }
  func.func @transform_0(%arg0: i32) -> (i32, i32, i32) {
    %c0_i32 = arith.constant 0 : i32
    %c0_i32_0 = arith.constant 0 : i32
    %c0_i32_1 = arith.constant 0 : i32
    return %arg0, %c0_i32, %c0_i32_0 : i32, i32, i32
  }
  func.func @transform_1(%arg0: i32) -> (i32, i32) {
    %c0_i32 = arith.constant 0 : i32
    %c0_i32_0 = arith.constant 0 : i32
    %c0_i32_1 = arith.constant 0 : i32
    return %c0_i32, %c0_i32_0 : i32, i32
  }
  func.func @transform_2(%arg0: i32) -> (i32, i32) {
    %c0_i32 = arith.constant 0 : i32
    %c0_i32_0 = arith.constant 0 : i32
    %c0_i32_1 = arith.constant 0 : i32
    return %c0_i32, %c0_i32_0 : i32, i32
  }
  func.func @transform_3(%arg0: i32) -> (i32, i32) {
    %c0_i32 = arith.constant 0 : i32
    %c0_i32_0 = arith.constant 0 : i32
    %c0_i32_1 = arith.constant 0 : i32
    return %c0_i32, %c0_i32_0 : i32, i32
  }
  func.func @transform_4(%arg0: i32) -> (i32, i32) {
    %c0_i32 = arith.constant 0 : i32
    %c0_i32_0 = arith.constant 0 : i32
    %c0_i32_1 = arith.constant 0 : i32
    return %c0_i32, %c0_i32_0 : i32, i32
  }
  func.func @transform_5(%arg0: i32) -> (i32, i32) {
    %c0_i32 = arith.constant 0 : i32
    %c0_i32_0 = arith.constant 0 : i32
    %c0_i32_1 = arith.constant 0 : i32
    return %c0_i32, %c0_i32_0 : i32, i32
  }
  func.func @transform_6(%arg0: i32) -> (i32, i32) {
    %c0_i32 = arith.constant 0 : i32
    %c0_i32_0 = arith.constant 0 : i32
    %c0_i32_1 = arith.constant 0 : i32
    return %c0_i32, %c0_i32_0 : i32, i32
  }
  func.func @transform_7(%arg0: i32) -> (i32, i32) {
    %c0_i32 = arith.constant 0 : i32
    %c0_i32_0 = arith.constant 0 : i32
    %c0_i32_1 = arith.constant 0 : i32
    return %c0_i32, %c0_i32_0 : i32, i32
  }
  func.func @transform_8(%arg0: i32) -> (i32, i32) {
    %c0_i32 = arith.constant 0 : i32
    %c0_i32_0 = arith.constant 0 : i32
    %c0_i32_1 = arith.constant 0 : i32
    return %c0_i32, %c0_i32_0 : i32, i32
  }
  func.func @transform_9(%arg0: i32) -> (i32, i32) {
    %c0_i32 = arith.constant 0 : i32
    %c0_i32_0 = arith.constant 0 : i32
    %c0_i32_1 = arith.constant 0 : i32
    return %c0_i32, %c0_i32_0 : i32, i32
  }
  func.func @transform_10(%arg0: i32) -> (i32, i32) {
    %c0_i32 = arith.constant 0 : i32
    %c0_i32_0 = arith.constant 0 : i32
    %c0_i32_1 = arith.constant 0 : i32
    return %c0_i32, %c0_i32_0 : i32, i32
  }
  func.func @transform_11(%arg0: i32) -> (i32, i32) {
    %c0_i32 = arith.constant 0 : i32
    %c0_i32_0 = arith.constant 0 : i32
    %c0_i32_1 = arith.constant 0 : i32
    return %c0_i32, %c0_i32_0 : i32, i32
  }
  func.func @transform_12(%arg0: i32) -> (i32, i32) {
    %c0_i32 = arith.constant 0 : i32
    %c0_i32_0 = arith.constant 0 : i32
    %c0_i32_1 = arith.constant 0 : i32
    return %c0_i32, %c0_i32_0 : i32, i32
  }
  func.func @transform_13(%arg0: i32) -> (i32, i32) {
    %c0_i32 = arith.constant 0 : i32
    %c0_i32_0 = arith.constant 0 : i32
    %c0_i32_1 = arith.constant 0 : i32
    return %c0_i32, %c0_i32_0 : i32, i32
  }
  func.func @transform_14(%arg0: i32) -> (i32, i32) {
    %c0_i32 = arith.constant 0 : i32
    %c0_i32_0 = arith.constant 0 : i32
    %c0_i32_1 = arith.constant 0 : i32
    return %c0_i32, %c0_i32_0 : i32, i32
  }
  func.func @transform_15(%arg0: i32) -> (i32, i32) {
    %c0_i32 = arith.constant 0 : i32
    %c0_i32_0 = arith.constant 0 : i32
    %c0_i32_1 = arith.constant 0 : i32
    return %c0_i32, %c0_i32_0 : i32, i32
  }
  func.func @transform_16(%arg0: i32) -> (i32, i32) {
    %c0_i32 = arith.constant 0 : i32
    %c0_i32_0 = arith.constant 0 : i32
    %c0_i32_1 = arith.constant 0 : i32
    return %c0_i32, %c0_i32_0 : i32, i32
  }
  func.func @transform_17(%arg0: i32) -> (i32, i32) {
    %c0_i32 = arith.constant 0 : i32
    %c0_i32_0 = arith.constant 0 : i32
    %c0_i32_1 = arith.constant 0 : i32
    return %c0_i32, %c0_i32_0 : i32, i32
  }
  func.func @transform_18(%arg0: i32) -> (i32, i32) {
    %c0_i32 = arith.constant 0 : i32
    %c0_i32_0 = arith.constant 0 : i32
    %c0_i32_1 = arith.constant 0 : i32
    return %c0_i32, %c0_i32_0 : i32, i32
  }
  func.func @transform_19(%arg0: i32) -> (i32, i32) {
    %c0_i32 = arith.constant 0 : i32
    %c0_i32_0 = arith.constant 0 : i32
    %c0_i32_1 = arith.constant 0 : i32
    return %c0_i32, %c0_i32_0 : i32, i32
  }
  func.func @transform_20(%arg0: i32) -> (i32, i32) {
    %c0_i32 = arith.constant 0 : i32
    %c0_i32_0 = arith.constant 0 : i32
    %c0_i32_1 = arith.constant 0 : i32
    return %c0_i32, %c0_i32_0 : i32, i32
  }
  func.func @transform_21(%arg0: i32) -> (i32, i32) {
    %c0_i32 = arith.constant 0 : i32
    %c0_i32_0 = arith.constant 0 : i32
    %c0_i32_1 = arith.constant 0 : i32
    return %c0_i32, %c0_i32_0 : i32, i32
  }
  func.func @transform_22(%arg0: i32) -> (i32, i32, i32) {
    %c0_i32 = arith.constant 0 : i32
    %c0_i32_0 = arith.constant 0 : i32
    %c0_i32_1 = arith.constant 0 : i32
    return %arg0, %c0_i32, %c0_i32_0 : i32, i32, i32
  }
}

module attributes {stable_mosaic.version = 11 : i64} {
  func.func @block_kernel(%arg0: i32, %arg1: memref<1x32x16xf32, #tpu.memory_space<vmem>>, %arg2: memref<16x32xf32, #tpu.memory_space<vmem>>, %arg3: memref<1x32xf32, #tpu.memory_space<vmem>>, %arg4: memref<1x32xf32, #tpu.memory_space<vmem>>, %arg5: memref<5x32xf32, #tpu.memory_space<vmem>>, %arg6: memref<1x32xf32, #tpu.memory_space<vmem>>, %arg7: memref<1x32xf32, #tpu.memory_space<vmem>>, %arg8: memref<7x32xf32, #tpu.memory_space<vmem>>, %arg9: memref<1x32xf32, #tpu.memory_space<vmem>>, %arg10: memref<1x32xf32, #tpu.memory_space<vmem>>, %arg11: memref<32x32xf32, #tpu.memory_space<vmem>>, %arg12: memref<1x32xf32, #tpu.memory_space<vmem>>, %arg13: memref<1x32xf32, #tpu.memory_space<vmem>>, %arg14: memref<1x32xf32, #tpu.memory_space<vmem>>, %arg15: memref<1x32xf32, #tpu.memory_space<vmem>>, %arg16: memref<32x32xf32, #tpu.memory_space<vmem>>, %arg17: memref<1x32xf32, #tpu.memory_space<vmem>>, %arg18: memref<1x32xf32, #tpu.memory_space<vmem>>, %arg19: memref<32x8xf32, #tpu.memory_space<vmem>>, %arg20: memref<1x8xf32, #tpu.memory_space<vmem>>, %arg21: memref<8x32xf32, #tpu.memory_space<vmem>>, %arg22: memref<1x32xf32, #tpu.memory_space<vmem>>, %arg23: memref<16x32xf32, #tpu.memory_space<vmem>>, %arg24: memref<1x32xf32, #tpu.memory_space<vmem>>, %arg25: memref<1x32xf32, #tpu.memory_space<vmem>>, %arg26: memref<1x32x32xf32, #tpu.memory_space<vmem>>, %arg27: memref<50x32xf32, #tpu.memory_space<vmem>>) attributes {dimension_semantics = [#tpu.dimension_semantics<parallel>], iteration_bounds = array<i64: 2>, scalar_prefetch = 0 : i64, scratch_operands = 1 : i64, tpu.core_type = #tpu.core_type<tc>, window_params = [{transform_indices = @transform_0, window_bounds = array<i64: 1, 32, 16>}, {pipeline_mode = #tpu.pipeline_mode<synchronous>, transform_indices = @transform_1, window_bounds = array<i64: 16, 32>}, {pipeline_mode = #tpu.pipeline_mode<synchronous>, transform_indices = @transform_2, window_bounds = array<i64: 1, 32>}, {pipeline_mode = #tpu.pipeline_mode<synchronous>, transform_indices = @transform_3, window_bounds = array<i64: 1, 32>}, {pipeline_mode = #tpu.pipeline_mode<synchronous>, transform_indices = @transform_4, window_bounds = array<i64: 5, 32>}, {pipeline_mode = #tpu.pipeline_mode<synchronous>, transform_indices = @transform_5, window_bounds = array<i64: 1, 32>}, {pipeline_mode = #tpu.pipeline_mode<synchronous>, transform_indices = @transform_6, window_bounds = array<i64: 1, 32>}, {pipeline_mode = #tpu.pipeline_mode<synchronous>, transform_indices = @transform_7, window_bounds = array<i64: 7, 32>}, {pipeline_mode = #tpu.pipeline_mode<synchronous>, transform_indices = @transform_8, window_bounds = array<i64: 1, 32>}, {pipeline_mode = #tpu.pipeline_mode<synchronous>, transform_indices = @transform_9, window_bounds = array<i64: 1, 32>}, {pipeline_mode = #tpu.pipeline_mode<synchronous>, transform_indices = @transform_10, window_bounds = array<i64: 32, 32>}, {pipeline_mode = #tpu.pipeline_mode<synchronous>, transform_indices = @transform_11, window_bounds = array<i64: 1, 32>}, {pipeline_mode = #tpu.pipeline_mode<synchronous>, transform_indices = @transform_12, window_bounds = array<i64: 1, 32>}, {pipeline_mode = #tpu.pipeline_mode<synchronous>, transform_indices = @transform_13, window_bounds = array<i64: 1, 32>}, {pipeline_mode = #tpu.pipeline_mode<synchronous>, transform_indices = @transform_14, window_bounds = array<i64: 1, 32>}, {pipeline_mode = #tpu.pipeline_mode<synchronous>, transform_indices = @transform_15, window_bounds = array<i64: 32, 32>}, {pipeline_mode = #tpu.pipeline_mode<synchronous>, transform_indices = @transform_16, window_bounds = array<i64: 1, 32>}, {pipeline_mode = #tpu.pipeline_mode<synchronous>, transform_indices = @transform_17, window_bounds = array<i64: 1, 32>}, {pipeline_mode = #tpu.pipeline_mode<synchronous>, transform_indices = @transform_18, window_bounds = array<i64: 32, 8>}, {pipeline_mode = #tpu.pipeline_mode<synchronous>, transform_indices = @transform_19, window_bounds = array<i64: 1, 8>}, {pipeline_mode = #tpu.pipeline_mode<synchronous>, transform_indices = @transform_20, window_bounds = array<i64: 8, 32>}, {pipeline_mode = #tpu.pipeline_mode<synchronous>, transform_indices = @transform_21, window_bounds = array<i64: 1, 32>}, {pipeline_mode = #tpu.pipeline_mode<synchronous>, transform_indices = @transform_22, window_bounds = array<i64: 16, 32>}, {pipeline_mode = #tpu.pipeline_mode<synchronous>, transform_indices = @transform_23, window_bounds = array<i64: 1, 32>}, {pipeline_mode = #tpu.pipeline_mode<synchronous>, transform_indices = @transform_24, window_bounds = array<i64: 1, 32>}, {transform_indices = @transform_25, window_bounds = array<i64: 1, 32, 32>}]} {
    %c0 = arith.constant 0 : index
    %c0_0 = arith.constant 0 : index
    %c0_1 = arith.constant 0 : index
    %0 = vector.load %arg1[%c0, %c0_0, %c0_1] : memref<1x32x16xf32, #tpu.memory_space<vmem>>, vector<1x32x16xf32>
    %1 = vector.shape_cast %0 : vector<1x32x16xf32> to vector<32x16xf32>
    %c0_2 = arith.constant 0 : index
    %c0_3 = arith.constant 0 : index
    %2 = vector.load %arg23[%c0_2, %c0_3] : memref<16x32xf32, #tpu.memory_space<vmem>>, vector<16x32xf32>
    %cst = arith.constant dense<0.000000e+00> : vector<32x32xf32>
    %3 = tpu.matmul %1, %2, %cst {dimension_numbers = #tpu.dot_dimension_numbers<[1], [0], [0], [1], [0, 0, 1, 1], [], []>} : vector<32x16xf32>, vector<16x32xf32>, vector<32x32xf32> -> vector<32x32xf32>
    %c0_4 = arith.constant 0 : index
    %c0_5 = arith.constant 0 : index
    %4 = vector.load %arg24[%c0_4, %c0_5] : memref<1x32xf32, #tpu.memory_space<vmem>>, vector<1x32xf32>
    %5 = vector.broadcast %4 : vector<1x32xf32> to vector<32x32xf32>
    %6 = arith.mulf %3, %5 : vector<32x32xf32>
    %c0_6 = arith.constant 0 : index
    %c0_7 = arith.constant 0 : index
    %7 = vector.load %arg25[%c0_6, %c0_7] : memref<1x32xf32, #tpu.memory_space<vmem>>, vector<1x32xf32>
    %8 = vector.broadcast %7 : vector<1x32xf32> to vector<32x32xf32>
    %9 = arith.addf %6, %8 : vector<32x32xf32>
    %c0_8 = arith.constant 0 : index
    %c0_9 = arith.constant 0 : index
    %10 = vector.load %arg2[%c0_8, %c0_9] : memref<16x32xf32, #tpu.memory_space<vmem>>, vector<16x32xf32>
    %cst_10 = arith.constant dense<0.000000e+00> : vector<32x32xf32>
    %11 = tpu.matmul %1, %10, %cst_10 {dimension_numbers = #tpu.dot_dimension_numbers<[1], [0], [0], [1], [0, 0, 1, 1], [], []>} : vector<32x16xf32>, vector<16x32xf32>, vector<32x32xf32> -> vector<32x32xf32>
    %c0_11 = arith.constant 0 : index
    %c0_12 = arith.constant 0 : index
    %12 = vector.load %arg3[%c0_11, %c0_12] : memref<1x32xf32, #tpu.memory_space<vmem>>, vector<1x32xf32>
    %13 = vector.broadcast %12 : vector<1x32xf32> to vector<32x32xf32>
    %14 = arith.mulf %11, %13 : vector<32x32xf32>
    %c0_13 = arith.constant 0 : index
    %c0_14 = arith.constant 0 : index
    %15 = vector.load %arg4[%c0_13, %c0_14] : memref<1x32xf32, #tpu.memory_space<vmem>>, vector<1x32xf32>
    %16 = vector.broadcast %15 : vector<1x32xf32> to vector<32x32xf32>
    %17 = arith.addf %14, %16 : vector<32x32xf32>
    %cst_15 = arith.constant 0.000000e+00 : f32
    %18 = vector.broadcast %cst_15 : f32 to vector<32x32xf32>
    %19 = arith.maximumf %17, %18 : vector<32x32xf32>
    %cst_16 = arith.constant 0.000000e+00 : f32
    %20 = vector.broadcast %cst_16 : f32 to vector<36x32xf32>
    %c0_17 = arith.constant 0 : index
    %c0_18 = arith.constant 0 : index
    %21 = vector.load %arg27[%c0_17, %c0_18] : memref<50x32xf32, #tpu.memory_space<vmem>>, vector<36x32xf32>
    tpu.vector_store %arg27[%c0_17, %c0_18], %20 {strides = array<i32>} : memref<50x32xf32, #tpu.memory_space<vmem>>, vector<36x32xf32>,
    %c2 = arith.constant 2 : index
    %c0_19 = arith.constant 0 : index
    %22 = vector.load %arg27[%c2, %c0_19] : memref<50x32xf32, #tpu.memory_space<vmem>>, vector<32x32xf32>
    tpu.vector_store %arg27[%c2, %c0_19], %19 {strides = array<i32>} : memref<50x32xf32, #tpu.memory_space<vmem>>, vector<32x32xf32>,
    %c0_20 = arith.constant 0 : index
    %c0_21 = arith.constant 0 : index
    %23 = vector.load %arg27[%c0_20, %c0_21] : memref<50x32xf32, #tpu.memory_space<vmem>>, vector<32x32xf32>
    %c1 = arith.constant 1 : index
    %c0_22 = arith.constant 0 : index
    %24 = vector.load %arg27[%c1, %c0_22] : memref<50x32xf32, #tpu.memory_space<vmem>>, vector<32x32xf32>
    %c2_23 = arith.constant 2 : index
    %c0_24 = arith.constant 0 : index
    %25 = vector.load %arg27[%c2_23, %c0_24] : memref<50x32xf32, #tpu.memory_space<vmem>>, vector<32x32xf32>
    %c3 = arith.constant 3 : index
    %c0_25 = arith.constant 0 : index
    %26 = vector.load %arg27[%c3, %c0_25] : memref<50x32xf32, #tpu.memory_space<vmem>>, vector<32x32xf32>
    %c4 = arith.constant 4 : index
    %c0_26 = arith.constant 0 : index
    %27 = vector.load %arg27[%c4, %c0_26] : memref<50x32xf32, #tpu.memory_space<vmem>>, vector<32x32xf32>
    %c0_27 = arith.constant 0 : index
    %c0_28 = arith.constant 0 : index
    %28 = vector.load %arg5[%c0_27, %c0_28] : memref<5x32xf32, #tpu.memory_space<vmem>>, vector<1x32xf32>
    %29 = vector.shape_cast %28 : vector<1x32xf32> to vector<32xf32>
    %30 = vector.shape_cast %29 : vector<32xf32> to vector<1x32xf32>
    %31 = vector.broadcast %30 : vector<1x32xf32> to vector<32x32xf32>
    %32 = arith.mulf %23, %31 : vector<32x32xf32>
    %c1_29 = arith.constant 1 : index
    %c0_30 = arith.constant 0 : index
    %33 = vector.load %arg5[%c1_29, %c0_30] : memref<5x32xf32, #tpu.memory_space<vmem>>, vector<1x32xf32>
    %34 = vector.shape_cast %33 : vector<1x32xf32> to vector<32xf32>
    %35 = vector.shape_cast %34 : vector<32xf32> to vector<1x32xf32>
    %36 = vector.broadcast %35 : vector<1x32xf32> to vector<32x32xf32>
    %37 = arith.mulf %24, %36 : vector<32x32xf32>
    %38 = arith.addf %32, %37 : vector<32x32xf32>
    %c2_31 = arith.constant 2 : index
    %c0_32 = arith.constant 0 : index
    %39 = vector.load %arg5[%c2_31, %c0_32] : memref<5x32xf32, #tpu.memory_space<vmem>>, vector<1x32xf32>
    %40 = vector.shape_cast %39 : vector<1x32xf32> to vector<32xf32>
    %41 = vector.shape_cast %40 : vector<32xf32> to vector<1x32xf32>
    %42 = vector.broadcast %41 : vector<1x32xf32> to vector<32x32xf32>
    %43 = arith.mulf %25, %42 : vector<32x32xf32>
    %44 = arith.addf %38, %43 : vector<32x32xf32>
    %c3_33 = arith.constant 3 : index
    %c0_34 = arith.constant 0 : index
    %45 = vector.load %arg5[%c3_33, %c0_34] : memref<5x32xf32, #tpu.memory_space<vmem>>, vector<1x32xf32>
    %46 = vector.shape_cast %45 : vector<1x32xf32> to vector<32xf32>
    %47 = vector.shape_cast %46 : vector<32xf32> to vector<1x32xf32>
    %48 = vector.broadcast %47 : vector<1x32xf32> to vector<32x32xf32>
    %49 = arith.mulf %26, %48 : vector<32x32xf32>
    %50 = arith.addf %44, %49 : vector<32x32xf32>
    %c4_35 = arith.constant 4 : index
    %c0_36 = arith.constant 0 : index
    %51 = vector.load %arg5[%c4_35, %c0_36] : memref<5x32xf32, #tpu.memory_space<vmem>>, vector<1x32xf32>
    %52 = vector.shape_cast %51 : vector<1x32xf32> to vector<32xf32>
    %53 = vector.shape_cast %52 : vector<32xf32> to vector<1x32xf32>
    %54 = vector.broadcast %53 : vector<1x32xf32> to vector<32x32xf32>
    %55 = arith.mulf %27, %54 : vector<32x32xf32>
    %56 = arith.addf %50, %55 : vector<32x32xf32>
    %c0_37 = arith.constant 0 : index
    %c0_38 = arith.constant 0 : index
    %57 = vector.load %arg6[%c0_37, %c0_38] : memref<1x32xf32, #tpu.memory_space<vmem>>, vector<1x32xf32>
    %58 = vector.broadcast %57 : vector<1x32xf32> to vector<32x32xf32>
    %59 = arith.mulf %56, %58 : vector<32x32xf32>
    %c0_39 = arith.constant 0 : index
    %c0_40 = arith.constant 0 : index
    %60 = vector.load %arg7[%c0_39, %c0_40] : memref<1x32xf32, #tpu.memory_space<vmem>>, vector<1x32xf32>
    %61 = vector.broadcast %60 : vector<1x32xf32> to vector<32x32xf32>
    %62 = arith.addf %59, %61 : vector<32x32xf32>
    %cst_41 = arith.constant 0.000000e+00 : f32
    %63 = vector.broadcast %cst_41 : f32 to vector<32x32xf32>
    %64 = arith.maximumf %62, %63 : vector<32x32xf32>
    %cst_42 = arith.constant 0.000000e+00 : f32
    %65 = vector.broadcast %cst_42 : f32 to vector<50x32xf32>
    %c0_43 = arith.constant 0 : index
    %c0_44 = arith.constant 0 : index
    %66 = vector.load %arg27[%c0_43, %c0_44] : memref<50x32xf32, #tpu.memory_space<vmem>>, vector<50x32xf32>
    tpu.vector_store %arg27[%c0_43, %c0_44], %65 {strides = array<i32>} : memref<50x32xf32, #tpu.memory_space<vmem>>, vector<50x32xf32>,
    %c9 = arith.constant 9 : index
    %c0_45 = arith.constant 0 : index
    %67 = vector.load %arg27[%c9, %c0_45] : memref<50x32xf32, #tpu.memory_space<vmem>>, vector<32x32xf32>
    tpu.vector_store %arg27[%c9, %c0_45], %64 {strides = array<i32>} : memref<50x32xf32, #tpu.memory_space<vmem>>, vector<32x32xf32>,
    %c0_46 = arith.constant 0 : index
    %c0_47 = arith.constant 0 : index
    %68 = vector.load %arg27[%c0_46, %c0_47] : memref<50x32xf32, #tpu.memory_space<vmem>>, vector<32x32xf32>
    %c3_48 = arith.constant 3 : index
    %c0_49 = arith.constant 0 : index
    %69 = vector.load %arg27[%c3_48, %c0_49] : memref<50x32xf32, #tpu.memory_space<vmem>>, vector<32x32xf32>
    %c6 = arith.constant 6 : index
    %c0_50 = arith.constant 0 : index
    %70 = vector.load %arg27[%c6, %c0_50] : memref<50x32xf32, #tpu.memory_space<vmem>>, vector<32x32xf32>
    %c9_51 = arith.constant 9 : index
    %c0_52 = arith.constant 0 : index
    %71 = vector.load %arg27[%c9_51, %c0_52] : memref<50x32xf32, #tpu.memory_space<vmem>>, vector<32x32xf32>
    %c12 = arith.constant 12 : index
    %c0_53 = arith.constant 0 : index
    %72 = vector.load %arg27[%c12, %c0_53] : memref<50x32xf32, #tpu.memory_space<vmem>>, vector<32x32xf32>
    %c15 = arith.constant 15 : index
    %c0_54 = arith.constant 0 : index
    %73 = vector.load %arg27[%c15, %c0_54] : memref<50x32xf32, #tpu.memory_space<vmem>>, vector<32x32xf32>
    %c18 = arith.constant 18 : index
    %c0_55 = arith.constant 0 : index
    %74 = vector.load %arg27[%c18, %c0_55] : memref<50x32xf32, #tpu.memory_space<vmem>>, vector<32x32xf32>
    %c0_56 = arith.constant 0 : index
    %c0_57 = arith.constant 0 : index
    %75 = vector.load %arg8[%c0_56, %c0_57] : memref<7x32xf32, #tpu.memory_space<vmem>>, vector<1x32xf32>
    %76 = vector.shape_cast %75 : vector<1x32xf32> to vector<32xf32>
    %77 = vector.shape_cast %76 : vector<32xf32> to vector<1x32xf32>
    %78 = vector.broadcast %77 : vector<1x32xf32> to vector<32x32xf32>
    %79 = arith.mulf %68, %78 : vector<32x32xf32>
    %c1_58 = arith.constant 1 : index
    %c0_59 = arith.constant 0 : index
    %80 = vector.load %arg8[%c1_58, %c0_59] : memref<7x32xf32, #tpu.memory_space<vmem>>, vector<1x32xf32>
    %81 = vector.shape_cast %80 : vector<1x32xf32> to vector<32xf32>
    %82 = vector.shape_cast %81 : vector<32xf32> to vector<1x32xf32>
    %83 = vector.broadcast %82 : vector<1x32xf32> to vector<32x32xf32>
    %84 = arith.mulf %69, %83 : vector<32x32xf32>
    %85 = arith.addf %79, %84 : vector<32x32xf32>
    %c2_60 = arith.constant 2 : index
    %c0_61 = arith.constant 0 : index
    %86 = vector.load %arg8[%c2_60, %c0_61] : memref<7x32xf32, #tpu.memory_space<vmem>>, vector<1x32xf32>
    %87 = vector.shape_cast %86 : vector<1x32xf32> to vector<32xf32>
    %88 = vector.shape_cast %87 : vector<32xf32> to vector<1x32xf32>
    %89 = vector.broadcast %88 : vector<1x32xf32> to vector<32x32xf32>
    %90 = arith.mulf %70, %89 : vector<32x32xf32>
    %91 = arith.addf %85, %90 : vector<32x32xf32>
    %c3_62 = arith.constant 3 : index
    %c0_63 = arith.constant 0 : index
    %92 = vector.load %arg8[%c3_62, %c0_63] : memref<7x32xf32, #tpu.memory_space<vmem>>, vector<1x32xf32>
    %93 = vector.shape_cast %92 : vector<1x32xf32> to vector<32xf32>
    %94 = vector.shape_cast %93 : vector<32xf32> to vector<1x32xf32>
    %95 = vector.broadcast %94 : vector<1x32xf32> to vector<32x32xf32>
    %96 = arith.mulf %71, %95 : vector<32x32xf32>
    %97 = arith.addf %91, %96 : vector<32x32xf32>
    %c4_64 = arith.constant 4 : index
    %c0_65 = arith.constant 0 : index
    %98 = vector.load %arg8[%c4_64, %c0_65] : memref<7x32xf32, #tpu.memory_space<vmem>>, vector<1x32xf32>
    %99 = vector.shape_cast %98 : vector<1x32xf32> to vector<32xf32>
    %100 = vector.shape_cast %99 : vector<32xf32> to vector<1x32xf32>
    %101 = vector.broadcast %100 : vector<1x32xf32> to vector<32x32xf32>
    %102 = arith.mulf %72, %101 : vector<32x32xf32>
    %103 = arith.addf %97, %102 : vector<32x32xf32>
    %c5 = arith.constant 5 : index
    %c0_66 = arith.constant 0 : index
    %104 = vector.load %arg8[%c5, %c0_66] : memref<7x32xf32, #tpu.memory_space<vmem>>, vector<1x32xf32>
    %105 = vector.shape_cast %104 : vector<1x32xf32> to vector<32xf32>
    %106 = vector.shape_cast %105 : vector<32xf32> to vector<1x32xf32>
    %107 = vector.broadcast %106 : vector<1x32xf32> to vector<32x32xf32>
    %108 = arith.mulf %73, %107 : vector<32x32xf32>
    %109 = arith.addf %103, %108 : vector<32x32xf32>
    %c6_67 = arith.constant 6 : index
    %c0_68 = arith.constant 0 : index
    %110 = vector.load %arg8[%c6_67, %c0_68] : memref<7x32xf32, #tpu.memory_space<vmem>>, vector<1x32xf32>
    %111 = vector.shape_cast %110 : vector<1x32xf32> to vector<32xf32>
    %112 = vector.shape_cast %111 : vector<32xf32> to vector<1x32xf32>
    %113 = vector.broadcast %112 : vector<1x32xf32> to vector<32x32xf32>
    %114 = arith.mulf %74, %113 : vector<32x32xf32>
    %115 = arith.addf %109, %114 : vector<32x32xf32>
    %c0_69 = arith.constant 0 : index
    %c0_70 = arith.constant 0 : index
    %116 = vector.load %arg9[%c0_69, %c0_70] : memref<1x32xf32, #tpu.memory_space<vmem>>, vector<1x32xf32>
    %117 = vector.broadcast %116 : vector<1x32xf32> to vector<32x32xf32>
    %118 = arith.mulf %115, %117 : vector<32x32xf32>
    %c0_71 = arith.constant 0 : index
    %c0_72 = arith.constant 0 : index
    %119 = vector.load %arg10[%c0_71, %c0_72] : memref<1x32xf32, #tpu.memory_space<vmem>>, vector<1x32xf32>
    %120 = vector.broadcast %119 : vector<1x32xf32> to vector<32x32xf32>
    %121 = arith.addf %118, %120 : vector<32x32xf32>
    %cst_73 = arith.constant 0.000000e+00 : f32
    %122 = vector.broadcast %cst_73 : f32 to vector<32x32xf32>
    %123 = arith.maximumf %121, %122 : vector<32x32xf32>
    %c0_74 = arith.constant 0 : index
    %c0_75 = arith.constant 0 : index
    %124 = vector.load %arg11[%c0_74, %c0_75] : memref<32x32xf32, #tpu.memory_space<vmem>>, vector<32x32xf32>
    %cst_76 = arith.constant dense<0.000000e+00> : vector<32x32xf32>
    %125 = tpu.matmul %123, %124, %cst_76 {dimension_numbers = #tpu.dot_dimension_numbers<[1], [0], [0], [1], [0, 0, 1, 1], [], []>} : vector<32x32xf32>, vector<32x32xf32>, vector<32x32xf32> -> vector<32x32xf32>
    %c0_77 = arith.constant 0 : index
    %c0_78 = arith.constant 0 : index
    %126 = vector.load %arg12[%c0_77, %c0_78] : memref<1x32xf32, #tpu.memory_space<vmem>>, vector<1x32xf32>
    %127 = vector.broadcast %126 : vector<1x32xf32> to vector<32x32xf32>
    %128 = arith.mulf %125, %127 : vector<32x32xf32>
    %c0_79 = arith.constant 0 : index
    %c0_80 = arith.constant 0 : index
    %129 = vector.load %arg13[%c0_79, %c0_80] : memref<1x32xf32, #tpu.memory_space<vmem>>, vector<1x32xf32>
    %130 = vector.broadcast %129 : vector<1x32xf32> to vector<32x32xf32>
    %131 = arith.addf %128, %130 : vector<32x32xf32>
    %cst_81 = arith.constant 0.000000e+00 : f32
    %132 = vector.broadcast %cst_81 : f32 to vector<32x32xf32>
    %133 = arith.maximumf %131, %132 : vector<32x32xf32>
    %134 = arith.mulf %133, %19 : vector<32x32xf32>
    %c0_82 = arith.constant 0 : index
    %c0_83 = arith.constant 0 : index
    %135 = vector.load %arg14[%c0_82, %c0_83] : memref<1x32xf32, #tpu.memory_space<vmem>>, vector<1x32xf32>
    %136 = vector.broadcast %135 : vector<1x32xf32> to vector<32x32xf32>
    %137 = arith.mulf %134, %136 : vector<32x32xf32>
    %c0_84 = arith.constant 0 : index
    %c0_85 = arith.constant 0 : index
    %138 = vector.load %arg15[%c0_84, %c0_85] : memref<1x32xf32, #tpu.memory_space<vmem>>, vector<1x32xf32>
    %139 = vector.broadcast %138 : vector<1x32xf32> to vector<32x32xf32>
    %140 = arith.addf %137, %139 : vector<32x32xf32>
    %cst_86 = arith.constant 0.000000e+00 : f32
    %141 = vector.broadcast %cst_86 : f32 to vector<32x32xf32>
    %142 = arith.maximumf %140, %141 : vector<32x32xf32>
    %c0_87 = arith.constant 0 : index
    %c0_88 = arith.constant 0 : index
    %143 = vector.load %arg16[%c0_87, %c0_88] : memref<32x32xf32, #tpu.memory_space<vmem>>, vector<32x32xf32>
    %cst_89 = arith.constant dense<0.000000e+00> : vector<32x32xf32>
    %144 = tpu.matmul %142, %143, %cst_89 {dimension_numbers = #tpu.dot_dimension_numbers<[1], [0], [0], [1], [0, 0, 1, 1], [], []>} : vector<32x32xf32>, vector<32x32xf32>, vector<32x32xf32> -> vector<32x32xf32>
    %c0_90 = arith.constant 0 : index
    %c0_91 = arith.constant 0 : index
    %145 = vector.load %arg17[%c0_90, %c0_91] : memref<1x32xf32, #tpu.memory_space<vmem>>, vector<1x32xf32>
    %146 = vector.broadcast %145 : vector<1x32xf32> to vector<32x32xf32>
    %147 = arith.mulf %144, %146 : vector<32x32xf32>
    %c0_92 = arith.constant 0 : index
    %c0_93 = arith.constant 0 : index
    %148 = vector.load %arg18[%c0_92, %c0_93] : memref<1x32xf32, #tpu.memory_space<vmem>>, vector<1x32xf32>
    %149 = vector.broadcast %148 : vector<1x32xf32> to vector<32x32xf32>
    %150 = arith.addf %147, %149 : vector<32x32xf32>
    %cst_94 = arith.constant dense<0.000000e+00> : vector<32xf32>
    %151 = vector.multi_reduction <add>, %150, %cst_94 [0] : vector<32x32xf32> to vector<32xf32>
    %152 = vector.shape_cast %151 : vector<32xf32> to vector<1x32xf32>
    %cst_95 = arith.constant 3.200000e+01 : f32
    %153 = vector.broadcast %cst_95 : f32 to vector<1x32xf32>
    %154 = arith.divf %152, %153 : vector<1x32xf32>
    %c0_96 = arith.constant 0 : index
    %c0_97 = arith.constant 0 : index
    %155 = vector.load %arg19[%c0_96, %c0_97] : memref<32x8xf32, #tpu.memory_space<vmem>>, vector<32x8xf32>
    %cst_98 = arith.constant dense<0.000000e+00> : vector<1x8xf32>
    %156 = tpu.matmul %154, %155, %cst_98 {dimension_numbers = #tpu.dot_dimension_numbers<[1], [0], [0], [1], [0, 0, 1, 1], [], []>} : vector<1x32xf32>, vector<32x8xf32>, vector<1x8xf32> -> vector<1x8xf32>
    %c0_99 = arith.constant 0 : index
    %c0_100 = arith.constant 0 : index
    %157 = vector.load %arg20[%c0_99, %c0_100] : memref<1x8xf32, #tpu.memory_space<vmem>>, vector<1x8xf32>
    %158 = arith.addf %156, %157 : vector<1x8xf32>
    %cst_101 = arith.constant 0.000000e+00 : f32
    %159 = vector.broadcast %cst_101 : f32 to vector<1x8xf32>
    %160 = arith.maximumf %158, %159 : vector<1x8xf32>
    %c0_102 = arith.constant 0 : index
    %c0_103 = arith.constant 0 : index
    %161 = vector.load %arg21[%c0_102, %c0_103] : memref<8x32xf32, #tpu.memory_space<vmem>>, vector<8x32xf32>
    %cst_104 = arith.constant dense<0.000000e+00> : vector<1x32xf32>
    %162 = tpu.matmul %160, %161, %cst_104 {dimension_numbers = #tpu.dot_dimension_numbers<[1], [0], [0], [1], [0, 0, 1, 1], [], []>} : vector<1x8xf32>, vector<8x32xf32>, vector<1x32xf32> -> vector<1x32xf32>
    %c0_105 = arith.constant 0 : index
    %c0_106 = arith.constant 0 : index
    %163 = vector.load %arg22[%c0_105, %c0_106] : memref<1x32xf32, #tpu.memory_space<vmem>>, vector<1x32xf32>
    %164 = arith.addf %162, %163 : vector<1x32xf32>
    %cst_107 = arith.constant 0.000000e+00 : f32
    %165 = vector.broadcast %cst_107 : f32 to vector<1x32xf32>
    %166 = arith.subf %165, %164 : vector<1x32xf32>
    %167 = math.exp %166 : vector<1x32xf32>
    %cst_108 = arith.constant 1.000000e+00 : f32
    %168 = vector.broadcast %cst_108 : f32 to vector<1x32xf32>
    %169 = arith.addf %168, %167 : vector<1x32xf32>
    %cst_109 = arith.constant 1.000000e+00 : f32
    %170 = vector.broadcast %cst_109 : f32 to vector<1x32xf32>
    %171 = arith.divf %170, %169 : vector<1x32xf32>
    %172 = vector.broadcast %171 : vector<1x32xf32> to vector<32x32xf32>
    %173 = arith.mulf %150, %172 : vector<32x32xf32>
    %174 = arith.addf %173, %9 : vector<32x32xf32>
    %cst_110 = arith.constant 0.000000e+00 : f32
    %175 = vector.broadcast %cst_110 : f32 to vector<32x32xf32>
    %176 = arith.maximumf %174, %175 : vector<32x32xf32>
    %177 = vector.shape_cast %176 : vector<32x32xf32> to vector<1x32x32xf32>
    %c0_111 = arith.constant 0 : index
    %c0_112 = arith.constant 0 : index
    %c0_113 = arith.constant 0 : index
    %178 = vector.load %arg26[%c0_111, %c0_112, %c0_113] : memref<1x32x32xf32, #tpu.memory_space<vmem>>, vector<1x32x32xf32>
    tpu.vector_store %arg26[%c0_111, %c0_112, %c0_113], %177 {strides = array<i32>} : memref<1x32x32xf32, #tpu.memory_space<vmem>>, vector<1x32x32xf32>,
    return
  }
  func.func @transform_0(%arg0: i32) -> (i32, i32, i32) {
    %c0_i32 = arith.constant 0 : i32
    %c0_i32_0 = arith.constant 0 : i32
    %c0_i32_1 = arith.constant 0 : i32
    return %arg0, %c0_i32, %c0_i32_0 : i32, i32, i32
  }
  func.func @transform_1(%arg0: i32) -> (i32, i32) {
    %c0_i32 = arith.constant 0 : i32
    %c0_i32_0 = arith.constant 0 : i32
    %c0_i32_1 = arith.constant 0 : i32
    return %c0_i32, %c0_i32_0 : i32, i32
  }
  func.func @transform_2(%arg0: i32) -> (i32, i32) {
    %c0_i32 = arith.constant 0 : i32
    %c0_i32_0 = arith.constant 0 : i32
    %c0_i32_1 = arith.constant 0 : i32
    return %c0_i32, %c0_i32_0 : i32, i32
  }
  func.func @transform_3(%arg0: i32) -> (i32, i32) {
    %c0_i32 = arith.constant 0 : i32
    %c0_i32_0 = arith.constant 0 : i32
    %c0_i32_1 = arith.constant 0 : i32
    return %c0_i32, %c0_i32_0 : i32, i32
  }
  func.func @transform_4(%arg0: i32) -> (i32, i32) {
    %c0_i32 = arith.constant 0 : i32
    %c0_i32_0 = arith.constant 0 : i32
    %c0_i32_1 = arith.constant 0 : i32
    return %c0_i32, %c0_i32_0 : i32, i32
  }
  func.func @transform_5(%arg0: i32) -> (i32, i32) {
    %c0_i32 = arith.constant 0 : i32
    %c0_i32_0 = arith.constant 0 : i32
    %c0_i32_1 = arith.constant 0 : i32
    return %c0_i32, %c0_i32_0 : i32, i32
  }
  func.func @transform_6(%arg0: i32) -> (i32, i32) {
    %c0_i32 = arith.constant 0 : i32
    %c0_i32_0 = arith.constant 0 : i32
    %c0_i32_1 = arith.constant 0 : i32
    return %c0_i32, %c0_i32_0 : i32, i32
  }
  func.func @transform_7(%arg0: i32) -> (i32, i32) {
    %c0_i32 = arith.constant 0 : i32
    %c0_i32_0 = arith.constant 0 : i32
    %c0_i32_1 = arith.constant 0 : i32
    return %c0_i32, %c0_i32_0 : i32, i32
  }
  func.func @transform_8(%arg0: i32) -> (i32, i32) {
    %c0_i32 = arith.constant 0 : i32
    %c0_i32_0 = arith.constant 0 : i32
    %c0_i32_1 = arith.constant 0 : i32
    return %c0_i32, %c0_i32_0 : i32, i32
  }
  func.func @transform_9(%arg0: i32) -> (i32, i32) {
    %c0_i32 = arith.constant 0 : i32
    %c0_i32_0 = arith.constant 0 : i32
    %c0_i32_1 = arith.constant 0 : i32
    return %c0_i32, %c0_i32_0 : i32, i32
  }
  func.func @transform_10(%arg0: i32) -> (i32, i32) {
    %c0_i32 = arith.constant 0 : i32
    %c0_i32_0 = arith.constant 0 : i32
    %c0_i32_1 = arith.constant 0 : i32
    return %c0_i32, %c0_i32_0 : i32, i32
  }
  func.func @transform_11(%arg0: i32) -> (i32, i32) {
    %c0_i32 = arith.constant 0 : i32
    %c0_i32_0 = arith.constant 0 : i32
    %c0_i32_1 = arith.constant 0 : i32
    return %c0_i32, %c0_i32_0 : i32, i32
  }
  func.func @transform_12(%arg0: i32) -> (i32, i32) {
    %c0_i32 = arith.constant 0 : i32
    %c0_i32_0 = arith.constant 0 : i32
    %c0_i32_1 = arith.constant 0 : i32
    return %c0_i32, %c0_i32_0 : i32, i32
  }
  func.func @transform_13(%arg0: i32) -> (i32, i32) {
    %c0_i32 = arith.constant 0 : i32
    %c0_i32_0 = arith.constant 0 : i32
    %c0_i32_1 = arith.constant 0 : i32
    return %c0_i32, %c0_i32_0 : i32, i32
  }
  func.func @transform_14(%arg0: i32) -> (i32, i32) {
    %c0_i32 = arith.constant 0 : i32
    %c0_i32_0 = arith.constant 0 : i32
    %c0_i32_1 = arith.constant 0 : i32
    return %c0_i32, %c0_i32_0 : i32, i32
  }
  func.func @transform_15(%arg0: i32) -> (i32, i32) {
    %c0_i32 = arith.constant 0 : i32
    %c0_i32_0 = arith.constant 0 : i32
    %c0_i32_1 = arith.constant 0 : i32
    return %c0_i32, %c0_i32_0 : i32, i32
  }
  func.func @transform_16(%arg0: i32) -> (i32, i32) {
    %c0_i32 = arith.constant 0 : i32
    %c0_i32_0 = arith.constant 0 : i32
    %c0_i32_1 = arith.constant 0 : i32
    return %c0_i32, %c0_i32_0 : i32, i32
  }
  func.func @transform_17(%arg0: i32) -> (i32, i32) {
    %c0_i32 = arith.constant 0 : i32
    %c0_i32_0 = arith.constant 0 : i32
    %c0_i32_1 = arith.constant 0 : i32
    return %c0_i32, %c0_i32_0 : i32, i32
  }
  func.func @transform_18(%arg0: i32) -> (i32, i32) {
    %c0_i32 = arith.constant 0 : i32
    %c0_i32_0 = arith.constant 0 : i32
    %c0_i32_1 = arith.constant 0 : i32
    return %c0_i32, %c0_i32_0 : i32, i32
  }
  func.func @transform_19(%arg0: i32) -> (i32, i32) {
    %c0_i32 = arith.constant 0 : i32
    %c0_i32_0 = arith.constant 0 : i32
    %c0_i32_1 = arith.constant 0 : i32
    return %c0_i32, %c0_i32_0 : i32, i32
  }
  func.func @transform_20(%arg0: i32) -> (i32, i32) {
    %c0_i32 = arith.constant 0 : i32
    %c0_i32_0 = arith.constant 0 : i32
    %c0_i32_1 = arith.constant 0 : i32
    return %c0_i32, %c0_i32_0 : i32, i32
  }
  func.func @transform_21(%arg0: i32) -> (i32, i32) {
    %c0_i32 = arith.constant 0 : i32
    %c0_i32_0 = arith.constant 0 : i32
    %c0_i32_1 = arith.constant 0 : i32
    return %c0_i32, %c0_i32_0 : i32, i32
  }
  func.func @transform_22(%arg0: i32) -> (i32, i32) {
    %c0_i32 = arith.constant 0 : i32
    %c0_i32_0 = arith.constant 0 : i32
    %c0_i32_1 = arith.constant 0 : i32
    return %c0_i32, %c0_i32_0 : i32, i32
  }
  func.func @transform_23(%arg0: i32) -> (i32, i32) {
    %c0_i32 = arith.constant 0 : i32
    %c0_i32_0 = arith.constant 0 : i32
    %c0_i32_1 = arith.constant 0 : i32
    return %c0_i32, %c0_i32_0 : i32, i32
  }
  func.func @transform_24(%arg0: i32) -> (i32, i32) {
    %c0_i32 = arith.constant 0 : i32
    %c0_i32_0 = arith.constant 0 : i32
    %c0_i32_1 = arith.constant 0 : i32
    return %c0_i32, %c0_i32_0 : i32, i32
  }
  func.func @transform_25(%arg0: i32) -> (i32, i32, i32) {
    %c0_i32 = arith.constant 0 : i32
    %c0_i32_0 = arith.constant 0 : i32
    %c0_i32_1 = arith.constant 0 : i32
    return %arg0, %c0_i32, %c0_i32_0 : i32, i32, i32
  }
}

module attributes {stable_mosaic.version = 11 : i64} {
  func.func @block_kernel(%arg0: i32, %arg1: memref<1x16x32xf32, #tpu.memory_space<vmem>>, %arg2: memref<32x64xf32, #tpu.memory_space<vmem>>, %arg3: memref<1x64xf32, #tpu.memory_space<vmem>>, %arg4: memref<1x64xf32, #tpu.memory_space<vmem>>, %arg5: memref<5x64xf32, #tpu.memory_space<vmem>>, %arg6: memref<1x64xf32, #tpu.memory_space<vmem>>, %arg7: memref<1x64xf32, #tpu.memory_space<vmem>>, %arg8: memref<7x64xf32, #tpu.memory_space<vmem>>, %arg9: memref<1x64xf32, #tpu.memory_space<vmem>>, %arg10: memref<1x64xf32, #tpu.memory_space<vmem>>, %arg11: memref<64x64xf32, #tpu.memory_space<vmem>>, %arg12: memref<1x64xf32, #tpu.memory_space<vmem>>, %arg13: memref<1x64xf32, #tpu.memory_space<vmem>>, %arg14: memref<1x64xf32, #tpu.memory_space<vmem>>, %arg15: memref<1x64xf32, #tpu.memory_space<vmem>>, %arg16: memref<64x64xf32, #tpu.memory_space<vmem>>, %arg17: memref<1x64xf32, #tpu.memory_space<vmem>>, %arg18: memref<1x64xf32, #tpu.memory_space<vmem>>, %arg19: memref<64x16xf32, #tpu.memory_space<vmem>>, %arg20: memref<1x16xf32, #tpu.memory_space<vmem>>, %arg21: memref<16x64xf32, #tpu.memory_space<vmem>>, %arg22: memref<1x64xf32, #tpu.memory_space<vmem>>, %arg23: memref<32x64xf32, #tpu.memory_space<vmem>>, %arg24: memref<1x64xf32, #tpu.memory_space<vmem>>, %arg25: memref<1x64xf32, #tpu.memory_space<vmem>>, %arg26: memref<1x16x64xf32, #tpu.memory_space<vmem>>, %arg27: memref<34x64xf32, #tpu.memory_space<vmem>>) attributes {dimension_semantics = [#tpu.dimension_semantics<parallel>], iteration_bounds = array<i64: 2>, scalar_prefetch = 0 : i64, scratch_operands = 1 : i64, tpu.core_type = #tpu.core_type<tc>, window_params = [{transform_indices = @transform_0, window_bounds = array<i64: 1, 16, 32>}, {pipeline_mode = #tpu.pipeline_mode<synchronous>, transform_indices = @transform_1, window_bounds = array<i64: 32, 64>}, {pipeline_mode = #tpu.pipeline_mode<synchronous>, transform_indices = @transform_2, window_bounds = array<i64: 1, 64>}, {pipeline_mode = #tpu.pipeline_mode<synchronous>, transform_indices = @transform_3, window_bounds = array<i64: 1, 64>}, {pipeline_mode = #tpu.pipeline_mode<synchronous>, transform_indices = @transform_4, window_bounds = array<i64: 5, 64>}, {pipeline_mode = #tpu.pipeline_mode<synchronous>, transform_indices = @transform_5, window_bounds = array<i64: 1, 64>}, {pipeline_mode = #tpu.pipeline_mode<synchronous>, transform_indices = @transform_6, window_bounds = array<i64: 1, 64>}, {pipeline_mode = #tpu.pipeline_mode<synchronous>, transform_indices = @transform_7, window_bounds = array<i64: 7, 64>}, {pipeline_mode = #tpu.pipeline_mode<synchronous>, transform_indices = @transform_8, window_bounds = array<i64: 1, 64>}, {pipeline_mode = #tpu.pipeline_mode<synchronous>, transform_indices = @transform_9, window_bounds = array<i64: 1, 64>}, {pipeline_mode = #tpu.pipeline_mode<synchronous>, transform_indices = @transform_10, window_bounds = array<i64: 64, 64>}, {pipeline_mode = #tpu.pipeline_mode<synchronous>, transform_indices = @transform_11, window_bounds = array<i64: 1, 64>}, {pipeline_mode = #tpu.pipeline_mode<synchronous>, transform_indices = @transform_12, window_bounds = array<i64: 1, 64>}, {pipeline_mode = #tpu.pipeline_mode<synchronous>, transform_indices = @transform_13, window_bounds = array<i64: 1, 64>}, {pipeline_mode = #tpu.pipeline_mode<synchronous>, transform_indices = @transform_14, window_bounds = array<i64: 1, 64>}, {pipeline_mode = #tpu.pipeline_mode<synchronous>, transform_indices = @transform_15, window_bounds = array<i64: 64, 64>}, {pipeline_mode = #tpu.pipeline_mode<synchronous>, transform_indices = @transform_16, window_bounds = array<i64: 1, 64>}, {pipeline_mode = #tpu.pipeline_mode<synchronous>, transform_indices = @transform_17, window_bounds = array<i64: 1, 64>}, {pipeline_mode = #tpu.pipeline_mode<synchronous>, transform_indices = @transform_18, window_bounds = array<i64: 64, 16>}, {pipeline_mode = #tpu.pipeline_mode<synchronous>, transform_indices = @transform_19, window_bounds = array<i64: 1, 16>}, {pipeline_mode = #tpu.pipeline_mode<synchronous>, transform_indices = @transform_20, window_bounds = array<i64: 16, 64>}, {pipeline_mode = #tpu.pipeline_mode<synchronous>, transform_indices = @transform_21, window_bounds = array<i64: 1, 64>}, {pipeline_mode = #tpu.pipeline_mode<synchronous>, transform_indices = @transform_22, window_bounds = array<i64: 32, 64>}, {pipeline_mode = #tpu.pipeline_mode<synchronous>, transform_indices = @transform_23, window_bounds = array<i64: 1, 64>}, {pipeline_mode = #tpu.pipeline_mode<synchronous>, transform_indices = @transform_24, window_bounds = array<i64: 1, 64>}, {transform_indices = @transform_25, window_bounds = array<i64: 1, 16, 64>}]} {
    %c0 = arith.constant 0 : index
    %c0_0 = arith.constant 0 : index
    %c0_1 = arith.constant 0 : index
    %0 = vector.load %arg1[%c0, %c0_0, %c0_1] : memref<1x16x32xf32, #tpu.memory_space<vmem>>, vector<1x16x32xf32>
    %1 = vector.shape_cast %0 : vector<1x16x32xf32> to vector<16x32xf32>
    %c0_2 = arith.constant 0 : index
    %c0_3 = arith.constant 0 : index
    %2 = vector.load %arg23[%c0_2, %c0_3] : memref<32x64xf32, #tpu.memory_space<vmem>>, vector<32x64xf32>
    %cst = arith.constant dense<0.000000e+00> : vector<16x64xf32>
    %3 = tpu.matmul %1, %2, %cst {dimension_numbers = #tpu.dot_dimension_numbers<[1], [0], [0], [1], [0, 0, 1, 1], [], []>} : vector<16x32xf32>, vector<32x64xf32>, vector<16x64xf32> -> vector<16x64xf32>
    %c0_4 = arith.constant 0 : index
    %c0_5 = arith.constant 0 : index
    %4 = vector.load %arg24[%c0_4, %c0_5] : memref<1x64xf32, #tpu.memory_space<vmem>>, vector<1x64xf32>
    %5 = vector.broadcast %4 : vector<1x64xf32> to vector<16x64xf32>
    %6 = arith.mulf %3, %5 : vector<16x64xf32>
    %c0_6 = arith.constant 0 : index
    %c0_7 = arith.constant 0 : index
    %7 = vector.load %arg25[%c0_6, %c0_7] : memref<1x64xf32, #tpu.memory_space<vmem>>, vector<1x64xf32>
    %8 = vector.broadcast %7 : vector<1x64xf32> to vector<16x64xf32>
    %9 = arith.addf %6, %8 : vector<16x64xf32>
    %c0_8 = arith.constant 0 : index
    %c0_9 = arith.constant 0 : index
    %10 = vector.load %arg2[%c0_8, %c0_9] : memref<32x64xf32, #tpu.memory_space<vmem>>, vector<32x64xf32>
    %cst_10 = arith.constant dense<0.000000e+00> : vector<16x64xf32>
    %11 = tpu.matmul %1, %10, %cst_10 {dimension_numbers = #tpu.dot_dimension_numbers<[1], [0], [0], [1], [0, 0, 1, 1], [], []>} : vector<16x32xf32>, vector<32x64xf32>, vector<16x64xf32> -> vector<16x64xf32>
    %c0_11 = arith.constant 0 : index
    %c0_12 = arith.constant 0 : index
    %12 = vector.load %arg3[%c0_11, %c0_12] : memref<1x64xf32, #tpu.memory_space<vmem>>, vector<1x64xf32>
    %13 = vector.broadcast %12 : vector<1x64xf32> to vector<16x64xf32>
    %14 = arith.mulf %11, %13 : vector<16x64xf32>
    %c0_13 = arith.constant 0 : index
    %c0_14 = arith.constant 0 : index
    %15 = vector.load %arg4[%c0_13, %c0_14] : memref<1x64xf32, #tpu.memory_space<vmem>>, vector<1x64xf32>
    %16 = vector.broadcast %15 : vector<1x64xf32> to vector<16x64xf32>
    %17 = arith.addf %14, %16 : vector<16x64xf32>
    %cst_15 = arith.constant 0.000000e+00 : f32
    %18 = vector.broadcast %cst_15 : f32 to vector<16x64xf32>
    %19 = arith.maximumf %17, %18 : vector<16x64xf32>
    %cst_16 = arith.constant 0.000000e+00 : f32
    %20 = vector.broadcast %cst_16 : f32 to vector<20x64xf32>
    %c0_17 = arith.constant 0 : index
    %c0_18 = arith.constant 0 : index
    %21 = vector.load %arg27[%c0_17, %c0_18] : memref<34x64xf32, #tpu.memory_space<vmem>>, vector<20x64xf32>
    tpu.vector_store %arg27[%c0_17, %c0_18], %20 {strides = array<i32>} : memref<34x64xf32, #tpu.memory_space<vmem>>, vector<20x64xf32>,
    %c2 = arith.constant 2 : index
    %c0_19 = arith.constant 0 : index
    %22 = vector.load %arg27[%c2, %c0_19] : memref<34x64xf32, #tpu.memory_space<vmem>>, vector<16x64xf32>
    tpu.vector_store %arg27[%c2, %c0_19], %19 {strides = array<i32>} : memref<34x64xf32, #tpu.memory_space<vmem>>, vector<16x64xf32>,
    %c0_20 = arith.constant 0 : index
    %c0_21 = arith.constant 0 : index
    %23 = vector.load %arg27[%c0_20, %c0_21] : memref<34x64xf32, #tpu.memory_space<vmem>>, vector<16x64xf32>
    %c1 = arith.constant 1 : index
    %c0_22 = arith.constant 0 : index
    %24 = vector.load %arg27[%c1, %c0_22] : memref<34x64xf32, #tpu.memory_space<vmem>>, vector<16x64xf32>
    %c2_23 = arith.constant 2 : index
    %c0_24 = arith.constant 0 : index
    %25 = vector.load %arg27[%c2_23, %c0_24] : memref<34x64xf32, #tpu.memory_space<vmem>>, vector<16x64xf32>
    %c3 = arith.constant 3 : index
    %c0_25 = arith.constant 0 : index
    %26 = vector.load %arg27[%c3, %c0_25] : memref<34x64xf32, #tpu.memory_space<vmem>>, vector<16x64xf32>
    %c4 = arith.constant 4 : index
    %c0_26 = arith.constant 0 : index
    %27 = vector.load %arg27[%c4, %c0_26] : memref<34x64xf32, #tpu.memory_space<vmem>>, vector<16x64xf32>
    %c0_27 = arith.constant 0 : index
    %c0_28 = arith.constant 0 : index
    %28 = vector.load %arg5[%c0_27, %c0_28] : memref<5x64xf32, #tpu.memory_space<vmem>>, vector<1x64xf32>
    %29 = vector.shape_cast %28 : vector<1x64xf32> to vector<64xf32>
    %30 = vector.shape_cast %29 : vector<64xf32> to vector<1x64xf32>
    %31 = vector.broadcast %30 : vector<1x64xf32> to vector<16x64xf32>
    %32 = arith.mulf %23, %31 : vector<16x64xf32>
    %c1_29 = arith.constant 1 : index
    %c0_30 = arith.constant 0 : index
    %33 = vector.load %arg5[%c1_29, %c0_30] : memref<5x64xf32, #tpu.memory_space<vmem>>, vector<1x64xf32>
    %34 = vector.shape_cast %33 : vector<1x64xf32> to vector<64xf32>
    %35 = vector.shape_cast %34 : vector<64xf32> to vector<1x64xf32>
    %36 = vector.broadcast %35 : vector<1x64xf32> to vector<16x64xf32>
    %37 = arith.mulf %24, %36 : vector<16x64xf32>
    %38 = arith.addf %32, %37 : vector<16x64xf32>
    %c2_31 = arith.constant 2 : index
    %c0_32 = arith.constant 0 : index
    %39 = vector.load %arg5[%c2_31, %c0_32] : memref<5x64xf32, #tpu.memory_space<vmem>>, vector<1x64xf32>
    %40 = vector.shape_cast %39 : vector<1x64xf32> to vector<64xf32>
    %41 = vector.shape_cast %40 : vector<64xf32> to vector<1x64xf32>
    %42 = vector.broadcast %41 : vector<1x64xf32> to vector<16x64xf32>
    %43 = arith.mulf %25, %42 : vector<16x64xf32>
    %44 = arith.addf %38, %43 : vector<16x64xf32>
    %c3_33 = arith.constant 3 : index
    %c0_34 = arith.constant 0 : index
    %45 = vector.load %arg5[%c3_33, %c0_34] : memref<5x64xf32, #tpu.memory_space<vmem>>, vector<1x64xf32>
    %46 = vector.shape_cast %45 : vector<1x64xf32> to vector<64xf32>
    %47 = vector.shape_cast %46 : vector<64xf32> to vector<1x64xf32>
    %48 = vector.broadcast %47 : vector<1x64xf32> to vector<16x64xf32>
    %49 = arith.mulf %26, %48 : vector<16x64xf32>
    %50 = arith.addf %44, %49 : vector<16x64xf32>
    %c4_35 = arith.constant 4 : index
    %c0_36 = arith.constant 0 : index
    %51 = vector.load %arg5[%c4_35, %c0_36] : memref<5x64xf32, #tpu.memory_space<vmem>>, vector<1x64xf32>
    %52 = vector.shape_cast %51 : vector<1x64xf32> to vector<64xf32>
    %53 = vector.shape_cast %52 : vector<64xf32> to vector<1x64xf32>
    %54 = vector.broadcast %53 : vector<1x64xf32> to vector<16x64xf32>
    %55 = arith.mulf %27, %54 : vector<16x64xf32>
    %56 = arith.addf %50, %55 : vector<16x64xf32>
    %c0_37 = arith.constant 0 : index
    %c0_38 = arith.constant 0 : index
    %57 = vector.load %arg6[%c0_37, %c0_38] : memref<1x64xf32, #tpu.memory_space<vmem>>, vector<1x64xf32>
    %58 = vector.broadcast %57 : vector<1x64xf32> to vector<16x64xf32>
    %59 = arith.mulf %56, %58 : vector<16x64xf32>
    %c0_39 = arith.constant 0 : index
    %c0_40 = arith.constant 0 : index
    %60 = vector.load %arg7[%c0_39, %c0_40] : memref<1x64xf32, #tpu.memory_space<vmem>>, vector<1x64xf32>
    %61 = vector.broadcast %60 : vector<1x64xf32> to vector<16x64xf32>
    %62 = arith.addf %59, %61 : vector<16x64xf32>
    %cst_41 = arith.constant 0.000000e+00 : f32
    %63 = vector.broadcast %cst_41 : f32 to vector<16x64xf32>
    %64 = arith.maximumf %62, %63 : vector<16x64xf32>
    %cst_42 = arith.constant 0.000000e+00 : f32
    %65 = vector.broadcast %cst_42 : f32 to vector<34x64xf32>
    %c0_43 = arith.constant 0 : index
    %c0_44 = arith.constant 0 : index
    %66 = vector.load %arg27[%c0_43, %c0_44] : memref<34x64xf32, #tpu.memory_space<vmem>>, vector<34x64xf32>
    tpu.vector_store %arg27[%c0_43, %c0_44], %65 {strides = array<i32>} : memref<34x64xf32, #tpu.memory_space<vmem>>, vector<34x64xf32>,
    %c9 = arith.constant 9 : index
    %c0_45 = arith.constant 0 : index
    %67 = vector.load %arg27[%c9, %c0_45] : memref<34x64xf32, #tpu.memory_space<vmem>>, vector<16x64xf32>
    tpu.vector_store %arg27[%c9, %c0_45], %64 {strides = array<i32>} : memref<34x64xf32, #tpu.memory_space<vmem>>, vector<16x64xf32>,
    %c0_46 = arith.constant 0 : index
    %c0_47 = arith.constant 0 : index
    %68 = vector.load %arg27[%c0_46, %c0_47] : memref<34x64xf32, #tpu.memory_space<vmem>>, vector<16x64xf32>
    %c3_48 = arith.constant 3 : index
    %c0_49 = arith.constant 0 : index
    %69 = vector.load %arg27[%c3_48, %c0_49] : memref<34x64xf32, #tpu.memory_space<vmem>>, vector<16x64xf32>
    %c6 = arith.constant 6 : index
    %c0_50 = arith.constant 0 : index
    %70 = vector.load %arg27[%c6, %c0_50] : memref<34x64xf32, #tpu.memory_space<vmem>>, vector<16x64xf32>
    %c9_51 = arith.constant 9 : index
    %c0_52 = arith.constant 0 : index
    %71 = vector.load %arg27[%c9_51, %c0_52] : memref<34x64xf32, #tpu.memory_space<vmem>>, vector<16x64xf32>
    %c12 = arith.constant 12 : index
    %c0_53 = arith.constant 0 : index
    %72 = vector.load %arg27[%c12, %c0_53] : memref<34x64xf32, #tpu.memory_space<vmem>>, vector<16x64xf32>
    %c15 = arith.constant 15 : index
    %c0_54 = arith.constant 0 : index
    %73 = vector.load %arg27[%c15, %c0_54] : memref<34x64xf32, #tpu.memory_space<vmem>>, vector<16x64xf32>
    %c18 = arith.constant 18 : index
    %c0_55 = arith.constant 0 : index
    %74 = vector.load %arg27[%c18, %c0_55] : memref<34x64xf32, #tpu.memory_space<vmem>>, vector<16x64xf32>
    %c0_56 = arith.constant 0 : index
    %c0_57 = arith.constant 0 : index
    %75 = vector.load %arg8[%c0_56, %c0_57] : memref<7x64xf32, #tpu.memory_space<vmem>>, vector<1x64xf32>
    %76 = vector.shape_cast %75 : vector<1x64xf32> to vector<64xf32>
    %77 = vector.shape_cast %76 : vector<64xf32> to vector<1x64xf32>
    %78 = vector.broadcast %77 : vector<1x64xf32> to vector<16x64xf32>
    %79 = arith.mulf %68, %78 : vector<16x64xf32>
    %c1_58 = arith.constant 1 : index
    %c0_59 = arith.constant 0 : index
    %80 = vector.load %arg8[%c1_58, %c0_59] : memref<7x64xf32, #tpu.memory_space<vmem>>, vector<1x64xf32>
    %81 = vector.shape_cast %80 : vector<1x64xf32> to vector<64xf32>
    %82 = vector.shape_cast %81 : vector<64xf32> to vector<1x64xf32>
    %83 = vector.broadcast %82 : vector<1x64xf32> to vector<16x64xf32>
    %84 = arith.mulf %69, %83 : vector<16x64xf32>
    %85 = arith.addf %79, %84 : vector<16x64xf32>
    %c2_60 = arith.constant 2 : index
    %c0_61 = arith.constant 0 : index
    %86 = vector.load %arg8[%c2_60, %c0_61] : memref<7x64xf32, #tpu.memory_space<vmem>>, vector<1x64xf32>
    %87 = vector.shape_cast %86 : vector<1x64xf32> to vector<64xf32>
    %88 = vector.shape_cast %87 : vector<64xf32> to vector<1x64xf32>
    %89 = vector.broadcast %88 : vector<1x64xf32> to vector<16x64xf32>
    %90 = arith.mulf %70, %89 : vector<16x64xf32>
    %91 = arith.addf %85, %90 : vector<16x64xf32>
    %c3_62 = arith.constant 3 : index
    %c0_63 = arith.constant 0 : index
    %92 = vector.load %arg8[%c3_62, %c0_63] : memref<7x64xf32, #tpu.memory_space<vmem>>, vector<1x64xf32>
    %93 = vector.shape_cast %92 : vector<1x64xf32> to vector<64xf32>
    %94 = vector.shape_cast %93 : vector<64xf32> to vector<1x64xf32>
    %95 = vector.broadcast %94 : vector<1x64xf32> to vector<16x64xf32>
    %96 = arith.mulf %71, %95 : vector<16x64xf32>
    %97 = arith.addf %91, %96 : vector<16x64xf32>
    %c4_64 = arith.constant 4 : index
    %c0_65 = arith.constant 0 : index
    %98 = vector.load %arg8[%c4_64, %c0_65] : memref<7x64xf32, #tpu.memory_space<vmem>>, vector<1x64xf32>
    %99 = vector.shape_cast %98 : vector<1x64xf32> to vector<64xf32>
    %100 = vector.shape_cast %99 : vector<64xf32> to vector<1x64xf32>
    %101 = vector.broadcast %100 : vector<1x64xf32> to vector<16x64xf32>
    %102 = arith.mulf %72, %101 : vector<16x64xf32>
    %103 = arith.addf %97, %102 : vector<16x64xf32>
    %c5 = arith.constant 5 : index
    %c0_66 = arith.constant 0 : index
    %104 = vector.load %arg8[%c5, %c0_66] : memref<7x64xf32, #tpu.memory_space<vmem>>, vector<1x64xf32>
    %105 = vector.shape_cast %104 : vector<1x64xf32> to vector<64xf32>
    %106 = vector.shape_cast %105 : vector<64xf32> to vector<1x64xf32>
    %107 = vector.broadcast %106 : vector<1x64xf32> to vector<16x64xf32>
    %108 = arith.mulf %73, %107 : vector<16x64xf32>
    %109 = arith.addf %103, %108 : vector<16x64xf32>
    %c6_67 = arith.constant 6 : index
    %c0_68 = arith.constant 0 : index
    %110 = vector.load %arg8[%c6_67, %c0_68] : memref<7x64xf32, #tpu.memory_space<vmem>>, vector<1x64xf32>
    %111 = vector.shape_cast %110 : vector<1x64xf32> to vector<64xf32>
    %112 = vector.shape_cast %111 : vector<64xf32> to vector<1x64xf32>
    %113 = vector.broadcast %112 : vector<1x64xf32> to vector<16x64xf32>
    %114 = arith.mulf %74, %113 : vector<16x64xf32>
    %115 = arith.addf %109, %114 : vector<16x64xf32>
    %c0_69 = arith.constant 0 : index
    %c0_70 = arith.constant 0 : index
    %116 = vector.load %arg9[%c0_69, %c0_70] : memref<1x64xf32, #tpu.memory_space<vmem>>, vector<1x64xf32>
    %117 = vector.broadcast %116 : vector<1x64xf32> to vector<16x64xf32>
    %118 = arith.mulf %115, %117 : vector<16x64xf32>
    %c0_71 = arith.constant 0 : index
    %c0_72 = arith.constant 0 : index
    %119 = vector.load %arg10[%c0_71, %c0_72] : memref<1x64xf32, #tpu.memory_space<vmem>>, vector<1x64xf32>
    %120 = vector.broadcast %119 : vector<1x64xf32> to vector<16x64xf32>
    %121 = arith.addf %118, %120 : vector<16x64xf32>
    %cst_73 = arith.constant 0.000000e+00 : f32
    %122 = vector.broadcast %cst_73 : f32 to vector<16x64xf32>
    %123 = arith.maximumf %121, %122 : vector<16x64xf32>
    %c0_74 = arith.constant 0 : index
    %c0_75 = arith.constant 0 : index
    %124 = vector.load %arg11[%c0_74, %c0_75] : memref<64x64xf32, #tpu.memory_space<vmem>>, vector<64x64xf32>
    %cst_76 = arith.constant dense<0.000000e+00> : vector<16x64xf32>
    %125 = tpu.matmul %123, %124, %cst_76 {dimension_numbers = #tpu.dot_dimension_numbers<[1], [0], [0], [1], [0, 0, 1, 1], [], []>} : vector<16x64xf32>, vector<64x64xf32>, vector<16x64xf32> -> vector<16x64xf32>
    %c0_77 = arith.constant 0 : index
    %c0_78 = arith.constant 0 : index
    %126 = vector.load %arg12[%c0_77, %c0_78] : memref<1x64xf32, #tpu.memory_space<vmem>>, vector<1x64xf32>
    %127 = vector.broadcast %126 : vector<1x64xf32> to vector<16x64xf32>
    %128 = arith.mulf %125, %127 : vector<16x64xf32>
    %c0_79 = arith.constant 0 : index
    %c0_80 = arith.constant 0 : index
    %129 = vector.load %arg13[%c0_79, %c0_80] : memref<1x64xf32, #tpu.memory_space<vmem>>, vector<1x64xf32>
    %130 = vector.broadcast %129 : vector<1x64xf32> to vector<16x64xf32>
    %131 = arith.addf %128, %130 : vector<16x64xf32>
    %cst_81 = arith.constant 0.000000e+00 : f32
    %132 = vector.broadcast %cst_81 : f32 to vector<16x64xf32>
    %133 = arith.maximumf %131, %132 : vector<16x64xf32>
    %134 = arith.mulf %133, %19 : vector<16x64xf32>
    %c0_82 = arith.constant 0 : index
    %c0_83 = arith.constant 0 : index
    %135 = vector.load %arg14[%c0_82, %c0_83] : memref<1x64xf32, #tpu.memory_space<vmem>>, vector<1x64xf32>
    %136 = vector.broadcast %135 : vector<1x64xf32> to vector<16x64xf32>
    %137 = arith.mulf %134, %136 : vector<16x64xf32>
    %c0_84 = arith.constant 0 : index
    %c0_85 = arith.constant 0 : index
    %138 = vector.load %arg15[%c0_84, %c0_85] : memref<1x64xf32, #tpu.memory_space<vmem>>, vector<1x64xf32>
    %139 = vector.broadcast %138 : vector<1x64xf32> to vector<16x64xf32>
    %140 = arith.addf %137, %139 : vector<16x64xf32>
    %cst_86 = arith.constant 0.000000e+00 : f32
    %141 = vector.broadcast %cst_86 : f32 to vector<16x64xf32>
    %142 = arith.maximumf %140, %141 : vector<16x64xf32>
    %c0_87 = arith.constant 0 : index
    %c0_88 = arith.constant 0 : index
    %143 = vector.load %arg16[%c0_87, %c0_88] : memref<64x64xf32, #tpu.memory_space<vmem>>, vector<64x64xf32>
    %cst_89 = arith.constant dense<0.000000e+00> : vector<16x64xf32>
    %144 = tpu.matmul %142, %143, %cst_89 {dimension_numbers = #tpu.dot_dimension_numbers<[1], [0], [0], [1], [0, 0, 1, 1], [], []>} : vector<16x64xf32>, vector<64x64xf32>, vector<16x64xf32> -> vector<16x64xf32>
    %c0_90 = arith.constant 0 : index
    %c0_91 = arith.constant 0 : index
    %145 = vector.load %arg17[%c0_90, %c0_91] : memref<1x64xf32, #tpu.memory_space<vmem>>, vector<1x64xf32>
    %146 = vector.broadcast %145 : vector<1x64xf32> to vector<16x64xf32>
    %147 = arith.mulf %144, %146 : vector<16x64xf32>
    %c0_92 = arith.constant 0 : index
    %c0_93 = arith.constant 0 : index
    %148 = vector.load %arg18[%c0_92, %c0_93] : memref<1x64xf32, #tpu.memory_space<vmem>>, vector<1x64xf32>
    %149 = vector.broadcast %148 : vector<1x64xf32> to vector<16x64xf32>
    %150 = arith.addf %147, %149 : vector<16x64xf32>
    %cst_94 = arith.constant dense<0.000000e+00> : vector<64xf32>
    %151 = vector.multi_reduction <add>, %150, %cst_94 [0] : vector<16x64xf32> to vector<64xf32>
    %152 = vector.shape_cast %151 : vector<64xf32> to vector<1x64xf32>
    %cst_95 = arith.constant 1.600000e+01 : f32
    %153 = vector.broadcast %cst_95 : f32 to vector<1x64xf32>
    %154 = arith.divf %152, %153 : vector<1x64xf32>
    %c0_96 = arith.constant 0 : index
    %c0_97 = arith.constant 0 : index
    %155 = vector.load %arg19[%c0_96, %c0_97] : memref<64x16xf32, #tpu.memory_space<vmem>>, vector<64x16xf32>
    %cst_98 = arith.constant dense<0.000000e+00> : vector<1x16xf32>
    %156 = tpu.matmul %154, %155, %cst_98 {dimension_numbers = #tpu.dot_dimension_numbers<[1], [0], [0], [1], [0, 0, 1, 1], [], []>} : vector<1x64xf32>, vector<64x16xf32>, vector<1x16xf32> -> vector<1x16xf32>
    %c0_99 = arith.constant 0 : index
    %c0_100 = arith.constant 0 : index
    %157 = vector.load %arg20[%c0_99, %c0_100] : memref<1x16xf32, #tpu.memory_space<vmem>>, vector<1x16xf32>
    %158 = arith.addf %156, %157 : vector<1x16xf32>
    %cst_101 = arith.constant 0.000000e+00 : f32
    %159 = vector.broadcast %cst_101 : f32 to vector<1x16xf32>
    %160 = arith.maximumf %158, %159 : vector<1x16xf32>
    %c0_102 = arith.constant 0 : index
    %c0_103 = arith.constant 0 : index
    %161 = vector.load %arg21[%c0_102, %c0_103] : memref<16x64xf32, #tpu.memory_space<vmem>>, vector<16x64xf32>
    %cst_104 = arith.constant dense<0.000000e+00> : vector<1x64xf32>
    %162 = tpu.matmul %160, %161, %cst_104 {dimension_numbers = #tpu.dot_dimension_numbers<[1], [0], [0], [1], [0, 0, 1, 1], [], []>} : vector<1x16xf32>, vector<16x64xf32>, vector<1x64xf32> -> vector<1x64xf32>
    %c0_105 = arith.constant 0 : index
    %c0_106 = arith.constant 0 : index
    %163 = vector.load %arg22[%c0_105, %c0_106] : memref<1x64xf32, #tpu.memory_space<vmem>>, vector<1x64xf32>
    %164 = arith.addf %162, %163 : vector<1x64xf32>
    %cst_107 = arith.constant 0.000000e+00 : f32
    %165 = vector.broadcast %cst_107 : f32 to vector<1x64xf32>
    %166 = arith.subf %165, %164 : vector<1x64xf32>
    %167 = math.exp %166 : vector<1x64xf32>
    %cst_108 = arith.constant 1.000000e+00 : f32
    %168 = vector.broadcast %cst_108 : f32 to vector<1x64xf32>
    %169 = arith.addf %168, %167 : vector<1x64xf32>
    %cst_109 = arith.constant 1.000000e+00 : f32
    %170 = vector.broadcast %cst_109 : f32 to vector<1x64xf32>
    %171 = arith.divf %170, %169 : vector<1x64xf32>
    %172 = vector.broadcast %171 : vector<1x64xf32> to vector<16x64xf32>
    %173 = arith.mulf %150, %172 : vector<16x64xf32>
    %174 = arith.addf %173, %9 : vector<16x64xf32>
    %cst_110 = arith.constant 0.000000e+00 : f32
    %175 = vector.broadcast %cst_110 : f32 to vector<16x64xf32>
    %176 = arith.maximumf %174, %175 : vector<16x64xf32>
    %177 = vector.shape_cast %176 : vector<16x64xf32> to vector<1x16x64xf32>
    %c0_111 = arith.constant 0 : index
    %c0_112 = arith.constant 0 : index
    %c0_113 = arith.constant 0 : index
    %178 = vector.load %arg26[%c0_111, %c0_112, %c0_113] : memref<1x16x64xf32, #tpu.memory_space<vmem>>, vector<1x16x64xf32>
    tpu.vector_store %arg26[%c0_111, %c0_112, %c0_113], %177 {strides = array<i32>} : memref<1x16x64xf32, #tpu.memory_space<vmem>>, vector<1x16x64xf32>,
    return
  }
  func.func @transform_0(%arg0: i32) -> (i32, i32, i32) {
    %c0_i32 = arith.constant 0 : i32
    %c0_i32_0 = arith.constant 0 : i32
    %c0_i32_1 = arith.constant 0 : i32
    return %arg0, %c0_i32, %c0_i32_0 : i32, i32, i32
  }
  func.func @transform_1(%arg0: i32) -> (i32, i32) {
    %c0_i32 = arith.constant 0 : i32
    %c0_i32_0 = arith.constant 0 : i32
    %c0_i32_1 = arith.constant 0 : i32
    return %c0_i32, %c0_i32_0 : i32, i32
  }
  func.func @transform_2(%arg0: i32) -> (i32, i32) {
    %c0_i32 = arith.constant 0 : i32
    %c0_i32_0 = arith.constant 0 : i32
    %c0_i32_1 = arith.constant 0 : i32
    return %c0_i32, %c0_i32_0 : i32, i32
  }
  func.func @transform_3(%arg0: i32) -> (i32, i32) {
    %c0_i32 = arith.constant 0 : i32
    %c0_i32_0 = arith.constant 0 : i32
    %c0_i32_1 = arith.constant 0 : i32
    return %c0_i32, %c0_i32_0 : i32, i32
  }
  func.func @transform_4(%arg0: i32) -> (i32, i32) {
    %c0_i32 = arith.constant 0 : i32
    %c0_i32_0 = arith.constant 0 : i32
    %c0_i32_1 = arith.constant 0 : i32
    return %c0_i32, %c0_i32_0 : i32, i32
  }
  func.func @transform_5(%arg0: i32) -> (i32, i32) {
    %c0_i32 = arith.constant 0 : i32
    %c0_i32_0 = arith.constant 0 : i32
    %c0_i32_1 = arith.constant 0 : i32
    return %c0_i32, %c0_i32_0 : i32, i32
  }
  func.func @transform_6(%arg0: i32) -> (i32, i32) {
    %c0_i32 = arith.constant 0 : i32
    %c0_i32_0 = arith.constant 0 : i32
    %c0_i32_1 = arith.constant 0 : i32
    return %c0_i32, %c0_i32_0 : i32, i32
  }
  func.func @transform_7(%arg0: i32) -> (i32, i32) {
    %c0_i32 = arith.constant 0 : i32
    %c0_i32_0 = arith.constant 0 : i32
    %c0_i32_1 = arith.constant 0 : i32
    return %c0_i32, %c0_i32_0 : i32, i32
  }
  func.func @transform_8(%arg0: i32) -> (i32, i32) {
    %c0_i32 = arith.constant 0 : i32
    %c0_i32_0 = arith.constant 0 : i32
    %c0_i32_1 = arith.constant 0 : i32
    return %c0_i32, %c0_i32_0 : i32, i32
  }
  func.func @transform_9(%arg0: i32) -> (i32, i32) {
    %c0_i32 = arith.constant 0 : i32
    %c0_i32_0 = arith.constant 0 : i32
    %c0_i32_1 = arith.constant 0 : i32
    return %c0_i32, %c0_i32_0 : i32, i32
  }
  func.func @transform_10(%arg0: i32) -> (i32, i32) {
    %c0_i32 = arith.constant 0 : i32
    %c0_i32_0 = arith.constant 0 : i32
    %c0_i32_1 = arith.constant 0 : i32
    return %c0_i32, %c0_i32_0 : i32, i32
  }
  func.func @transform_11(%arg0: i32) -> (i32, i32) {
    %c0_i32 = arith.constant 0 : i32
    %c0_i32_0 = arith.constant 0 : i32
    %c0_i32_1 = arith.constant 0 : i32
    return %c0_i32, %c0_i32_0 : i32, i32
  }
  func.func @transform_12(%arg0: i32) -> (i32, i32) {
    %c0_i32 = arith.constant 0 : i32
    %c0_i32_0 = arith.constant 0 : i32
    %c0_i32_1 = arith.constant 0 : i32
    return %c0_i32, %c0_i32_0 : i32, i32
  }
  func.func @transform_13(%arg0: i32) -> (i32, i32) {
    %c0_i32 = arith.constant 0 : i32
    %c0_i32_0 = arith.constant 0 : i32
    %c0_i32_1 = arith.constant 0 : i32
    return %c0_i32, %c0_i32_0 : i32, i32
  }
  func.func @transform_14(%arg0: i32) -> (i32, i32) {
    %c0_i32 = arith.constant 0 : i32
    %c0_i32_0 = arith.constant 0 : i32
    %c0_i32_1 = arith.constant 0 : i32
    return %c0_i32, %c0_i32_0 : i32, i32
  }
  func.func @transform_15(%arg0: i32) -> (i32, i32) {
    %c0_i32 = arith.constant 0 : i32
    %c0_i32_0 = arith.constant 0 : i32
    %c0_i32_1 = arith.constant 0 : i32
    return %c0_i32, %c0_i32_0 : i32, i32
  }
  func.func @transform_16(%arg0: i32) -> (i32, i32) {
    %c0_i32 = arith.constant 0 : i32
    %c0_i32_0 = arith.constant 0 : i32
    %c0_i32_1 = arith.constant 0 : i32
    return %c0_i32, %c0_i32_0 : i32, i32
  }
  func.func @transform_17(%arg0: i32) -> (i32, i32) {
    %c0_i32 = arith.constant 0 : i32
    %c0_i32_0 = arith.constant 0 : i32
    %c0_i32_1 = arith.constant 0 : i32
    return %c0_i32, %c0_i32_0 : i32, i32
  }
  func.func @transform_18(%arg0: i32) -> (i32, i32) {
    %c0_i32 = arith.constant 0 : i32
    %c0_i32_0 = arith.constant 0 : i32
    %c0_i32_1 = arith.constant 0 : i32
    return %c0_i32, %c0_i32_0 : i32, i32
  }
  func.func @transform_19(%arg0: i32) -> (i32, i32) {
    %c0_i32 = arith.constant 0 : i32
    %c0_i32_0 = arith.constant 0 : i32
    %c0_i32_1 = arith.constant 0 : i32
    return %c0_i32, %c0_i32_0 : i32, i32
  }
  func.func @transform_20(%arg0: i32) -> (i32, i32) {
    %c0_i32 = arith.constant 0 : i32
    %c0_i32_0 = arith.constant 0 : i32
    %c0_i32_1 = arith.constant 0 : i32
    return %c0_i32, %c0_i32_0 : i32, i32
  }
  func.func @transform_21(%arg0: i32) -> (i32, i32) {
    %c0_i32 = arith.constant 0 : i32
    %c0_i32_0 = arith.constant 0 : i32
    %c0_i32_1 = arith.constant 0 : i32
    return %c0_i32, %c0_i32_0 : i32, i32
  }
  func.func @transform_22(%arg0: i32) -> (i32, i32) {
    %c0_i32 = arith.constant 0 : i32
    %c0_i32_0 = arith.constant 0 : i32
    %c0_i32_1 = arith.constant 0 : i32
    return %c0_i32, %c0_i32_0 : i32, i32
  }
  func.func @transform_23(%arg0: i32) -> (i32, i32) {
    %c0_i32 = arith.constant 0 : i32
    %c0_i32_0 = arith.constant 0 : i32
    %c0_i32_1 = arith.constant 0 : i32
    return %c0_i32, %c0_i32_0 : i32, i32
  }
  func.func @transform_24(%arg0: i32) -> (i32, i32) {
    %c0_i32 = arith.constant 0 : i32
    %c0_i32_0 = arith.constant 0 : i32
    %c0_i32_1 = arith.constant 0 : i32
    return %c0_i32, %c0_i32_0 : i32, i32
  }
  func.func @transform_25(%arg0: i32) -> (i32, i32, i32) {
    %c0_i32 = arith.constant 0 : i32
    %c0_i32_0 = arith.constant 0 : i32
    %c0_i32_1 = arith.constant 0 : i32
    return %arg0, %c0_i32, %c0_i32_0 : i32, i32, i32
  }
}

module attributes {stable_mosaic.version = 11 : i64} {
  func.func @block_kernel(%arg0: i32, %arg1: memref<1x8x64xf32, #tpu.memory_space<vmem>>, %arg2: memref<64x128xf32, #tpu.memory_space<vmem>>, %arg3: memref<1x128xf32, #tpu.memory_space<vmem>>, %arg4: memref<1x128xf32, #tpu.memory_space<vmem>>, %arg5: memref<5x128xf32, #tpu.memory_space<vmem>>, %arg6: memref<1x128xf32, #tpu.memory_space<vmem>>, %arg7: memref<1x128xf32, #tpu.memory_space<vmem>>, %arg8: memref<7x128xf32, #tpu.memory_space<vmem>>, %arg9: memref<1x128xf32, #tpu.memory_space<vmem>>, %arg10: memref<1x128xf32, #tpu.memory_space<vmem>>, %arg11: memref<128x128xf32, #tpu.memory_space<vmem>>, %arg12: memref<1x128xf32, #tpu.memory_space<vmem>>, %arg13: memref<1x128xf32, #tpu.memory_space<vmem>>, %arg14: memref<1x128xf32, #tpu.memory_space<vmem>>, %arg15: memref<1x128xf32, #tpu.memory_space<vmem>>, %arg16: memref<128x128xf32, #tpu.memory_space<vmem>>, %arg17: memref<1x128xf32, #tpu.memory_space<vmem>>, %arg18: memref<1x128xf32, #tpu.memory_space<vmem>>, %arg19: memref<128x32xf32, #tpu.memory_space<vmem>>, %arg20: memref<1x32xf32, #tpu.memory_space<vmem>>, %arg21: memref<32x128xf32, #tpu.memory_space<vmem>>, %arg22: memref<1x128xf32, #tpu.memory_space<vmem>>, %arg23: memref<64x128xf32, #tpu.memory_space<vmem>>, %arg24: memref<1x128xf32, #tpu.memory_space<vmem>>, %arg25: memref<1x128xf32, #tpu.memory_space<vmem>>, %arg26: memref<1x8x128xf32, #tpu.memory_space<vmem>>, %arg27: memref<26x128xf32, #tpu.memory_space<vmem>>) attributes {dimension_semantics = [#tpu.dimension_semantics<parallel>], iteration_bounds = array<i64: 2>, scalar_prefetch = 0 : i64, scratch_operands = 1 : i64, tpu.core_type = #tpu.core_type<tc>, window_params = [{transform_indices = @transform_0, window_bounds = array<i64: 1, 8, 64>}, {pipeline_mode = #tpu.pipeline_mode<synchronous>, transform_indices = @transform_1, window_bounds = array<i64: 64, 128>}, {pipeline_mode = #tpu.pipeline_mode<synchronous>, transform_indices = @transform_2, window_bounds = array<i64: 1, 128>}, {pipeline_mode = #tpu.pipeline_mode<synchronous>, transform_indices = @transform_3, window_bounds = array<i64: 1, 128>}, {pipeline_mode = #tpu.pipeline_mode<synchronous>, transform_indices = @transform_4, window_bounds = array<i64: 5, 128>}, {pipeline_mode = #tpu.pipeline_mode<synchronous>, transform_indices = @transform_5, window_bounds = array<i64: 1, 128>}, {pipeline_mode = #tpu.pipeline_mode<synchronous>, transform_indices = @transform_6, window_bounds = array<i64: 1, 128>}, {pipeline_mode = #tpu.pipeline_mode<synchronous>, transform_indices = @transform_7, window_bounds = array<i64: 7, 128>}, {pipeline_mode = #tpu.pipeline_mode<synchronous>, transform_indices = @transform_8, window_bounds = array<i64: 1, 128>}, {pipeline_mode = #tpu.pipeline_mode<synchronous>, transform_indices = @transform_9, window_bounds = array<i64: 1, 128>}, {pipeline_mode = #tpu.pipeline_mode<synchronous>, transform_indices = @transform_10, window_bounds = array<i64: 128, 128>}, {pipeline_mode = #tpu.pipeline_mode<synchronous>, transform_indices = @transform_11, window_bounds = array<i64: 1, 128>}, {pipeline_mode = #tpu.pipeline_mode<synchronous>, transform_indices = @transform_12, window_bounds = array<i64: 1, 128>}, {pipeline_mode = #tpu.pipeline_mode<synchronous>, transform_indices = @transform_13, window_bounds = array<i64: 1, 128>}, {pipeline_mode = #tpu.pipeline_mode<synchronous>, transform_indices = @transform_14, window_bounds = array<i64: 1, 128>}, {pipeline_mode = #tpu.pipeline_mode<synchronous>, transform_indices = @transform_15, window_bounds = array<i64: 128, 128>}, {pipeline_mode = #tpu.pipeline_mode<synchronous>, transform_indices = @transform_16, window_bounds = array<i64: 1, 128>}, {pipeline_mode = #tpu.pipeline_mode<synchronous>, transform_indices = @transform_17, window_bounds = array<i64: 1, 128>}, {pipeline_mode = #tpu.pipeline_mode<synchronous>, transform_indices = @transform_18, window_bounds = array<i64: 128, 32>}, {pipeline_mode = #tpu.pipeline_mode<synchronous>, transform_indices = @transform_19, window_bounds = array<i64: 1, 32>}, {pipeline_mode = #tpu.pipeline_mode<synchronous>, transform_indices = @transform_20, window_bounds = array<i64: 32, 128>}, {pipeline_mode = #tpu.pipeline_mode<synchronous>, transform_indices = @transform_21, window_bounds = array<i64: 1, 128>}, {pipeline_mode = #tpu.pipeline_mode<synchronous>, transform_indices = @transform_22, window_bounds = array<i64: 64, 128>}, {pipeline_mode = #tpu.pipeline_mode<synchronous>, transform_indices = @transform_23, window_bounds = array<i64: 1, 128>}, {pipeline_mode = #tpu.pipeline_mode<synchronous>, transform_indices = @transform_24, window_bounds = array<i64: 1, 128>}, {transform_indices = @transform_25, window_bounds = array<i64: 1, 8, 128>}]} {
    %c0 = arith.constant 0 : index
    %c0_0 = arith.constant 0 : index
    %c0_1 = arith.constant 0 : index
    %0 = vector.load %arg1[%c0, %c0_0, %c0_1] : memref<1x8x64xf32, #tpu.memory_space<vmem>>, vector<1x8x64xf32>
    %1 = vector.shape_cast %0 : vector<1x8x64xf32> to vector<8x64xf32>
    %c0_2 = arith.constant 0 : index
    %c0_3 = arith.constant 0 : index
    %2 = vector.load %arg23[%c0_2, %c0_3] : memref<64x128xf32, #tpu.memory_space<vmem>>, vector<64x128xf32>
    %cst = arith.constant dense<0.000000e+00> : vector<8x128xf32>
    %3 = tpu.matmul %1, %2, %cst {dimension_numbers = #tpu.dot_dimension_numbers<[1], [0], [0], [1], [0, 0, 1, 1], [], []>} : vector<8x64xf32>, vector<64x128xf32>, vector<8x128xf32> -> vector<8x128xf32>
    %c0_4 = arith.constant 0 : index
    %c0_5 = arith.constant 0 : index
    %4 = vector.load %arg24[%c0_4, %c0_5] : memref<1x128xf32, #tpu.memory_space<vmem>>, vector<1x128xf32>
    %5 = vector.broadcast %4 : vector<1x128xf32> to vector<8x128xf32>
    %6 = arith.mulf %3, %5 : vector<8x128xf32>
    %c0_6 = arith.constant 0 : index
    %c0_7 = arith.constant 0 : index
    %7 = vector.load %arg25[%c0_6, %c0_7] : memref<1x128xf32, #tpu.memory_space<vmem>>, vector<1x128xf32>
    %8 = vector.broadcast %7 : vector<1x128xf32> to vector<8x128xf32>
    %9 = arith.addf %6, %8 : vector<8x128xf32>
    %c0_8 = arith.constant 0 : index
    %c0_9 = arith.constant 0 : index
    %10 = vector.load %arg2[%c0_8, %c0_9] : memref<64x128xf32, #tpu.memory_space<vmem>>, vector<64x128xf32>
    %cst_10 = arith.constant dense<0.000000e+00> : vector<8x128xf32>
    %11 = tpu.matmul %1, %10, %cst_10 {dimension_numbers = #tpu.dot_dimension_numbers<[1], [0], [0], [1], [0, 0, 1, 1], [], []>} : vector<8x64xf32>, vector<64x128xf32>, vector<8x128xf32> -> vector<8x128xf32>
    %c0_11 = arith.constant 0 : index
    %c0_12 = arith.constant 0 : index
    %12 = vector.load %arg3[%c0_11, %c0_12] : memref<1x128xf32, #tpu.memory_space<vmem>>, vector<1x128xf32>
    %13 = vector.broadcast %12 : vector<1x128xf32> to vector<8x128xf32>
    %14 = arith.mulf %11, %13 : vector<8x128xf32>
    %c0_13 = arith.constant 0 : index
    %c0_14 = arith.constant 0 : index
    %15 = vector.load %arg4[%c0_13, %c0_14] : memref<1x128xf32, #tpu.memory_space<vmem>>, vector<1x128xf32>
    %16 = vector.broadcast %15 : vector<1x128xf32> to vector<8x128xf32>
    %17 = arith.addf %14, %16 : vector<8x128xf32>
    %cst_15 = arith.constant 0.000000e+00 : f32
    %18 = vector.broadcast %cst_15 : f32 to vector<8x128xf32>
    %19 = arith.maximumf %17, %18 : vector<8x128xf32>
    %cst_16 = arith.constant 0.000000e+00 : f32
    %20 = vector.broadcast %cst_16 : f32 to vector<12x128xf32>
    %c0_17 = arith.constant 0 : index
    %c0_18 = arith.constant 0 : index
    %21 = vector.load %arg27[%c0_17, %c0_18] : memref<26x128xf32, #tpu.memory_space<vmem>>, vector<12x128xf32>
    tpu.vector_store %arg27[%c0_17, %c0_18], %20 {strides = array<i32>} : memref<26x128xf32, #tpu.memory_space<vmem>>, vector<12x128xf32>,
    %c2 = arith.constant 2 : index
    %c0_19 = arith.constant 0 : index
    %22 = vector.load %arg27[%c2, %c0_19] : memref<26x128xf32, #tpu.memory_space<vmem>>, vector<8x128xf32>
    tpu.vector_store %arg27[%c2, %c0_19], %19 {strides = array<i32>} : memref<26x128xf32, #tpu.memory_space<vmem>>, vector<8x128xf32>,
    %c0_20 = arith.constant 0 : index
    %c0_21 = arith.constant 0 : index
    %23 = vector.load %arg27[%c0_20, %c0_21] : memref<26x128xf32, #tpu.memory_space<vmem>>, vector<8x128xf32>
    %c1 = arith.constant 1 : index
    %c0_22 = arith.constant 0 : index
    %24 = vector.load %arg27[%c1, %c0_22] : memref<26x128xf32, #tpu.memory_space<vmem>>, vector<8x128xf32>
    %c2_23 = arith.constant 2 : index
    %c0_24 = arith.constant 0 : index
    %25 = vector.load %arg27[%c2_23, %c0_24] : memref<26x128xf32, #tpu.memory_space<vmem>>, vector<8x128xf32>
    %c3 = arith.constant 3 : index
    %c0_25 = arith.constant 0 : index
    %26 = vector.load %arg27[%c3, %c0_25] : memref<26x128xf32, #tpu.memory_space<vmem>>, vector<8x128xf32>
    %c4 = arith.constant 4 : index
    %c0_26 = arith.constant 0 : index
    %27 = vector.load %arg27[%c4, %c0_26] : memref<26x128xf32, #tpu.memory_space<vmem>>, vector<8x128xf32>
    %c0_27 = arith.constant 0 : index
    %c0_28 = arith.constant 0 : index
    %28 = vector.load %arg5[%c0_27, %c0_28] : memref<5x128xf32, #tpu.memory_space<vmem>>, vector<1x128xf32>
    %29 = vector.shape_cast %28 : vector<1x128xf32> to vector<128xf32>
    %30 = vector.shape_cast %29 : vector<128xf32> to vector<1x128xf32>
    %31 = vector.broadcast %30 : vector<1x128xf32> to vector<8x128xf32>
    %32 = arith.mulf %23, %31 : vector<8x128xf32>
    %c1_29 = arith.constant 1 : index
    %c0_30 = arith.constant 0 : index
    %33 = vector.load %arg5[%c1_29, %c0_30] : memref<5x128xf32, #tpu.memory_space<vmem>>, vector<1x128xf32>
    %34 = vector.shape_cast %33 : vector<1x128xf32> to vector<128xf32>
    %35 = vector.shape_cast %34 : vector<128xf32> to vector<1x128xf32>
    %36 = vector.broadcast %35 : vector<1x128xf32> to vector<8x128xf32>
    %37 = arith.mulf %24, %36 : vector<8x128xf32>
    %38 = arith.addf %32, %37 : vector<8x128xf32>
    %c2_31 = arith.constant 2 : index
    %c0_32 = arith.constant 0 : index
    %39 = vector.load %arg5[%c2_31, %c0_32] : memref<5x128xf32, #tpu.memory_space<vmem>>, vector<1x128xf32>
    %40 = vector.shape_cast %39 : vector<1x128xf32> to vector<128xf32>
    %41 = vector.shape_cast %40 : vector<128xf32> to vector<1x128xf32>
    %42 = vector.broadcast %41 : vector<1x128xf32> to vector<8x128xf32>
    %43 = arith.mulf %25, %42 : vector<8x128xf32>
    %44 = arith.addf %38, %43 : vector<8x128xf32>
    %c3_33 = arith.constant 3 : index
    %c0_34 = arith.constant 0 : index
    %45 = vector.load %arg5[%c3_33, %c0_34] : memref<5x128xf32, #tpu.memory_space<vmem>>, vector<1x128xf32>
    %46 = vector.shape_cast %45 : vector<1x128xf32> to vector<128xf32>
    %47 = vector.shape_cast %46 : vector<128xf32> to vector<1x128xf32>
    %48 = vector.broadcast %47 : vector<1x128xf32> to vector<8x128xf32>
    %49 = arith.mulf %26, %48 : vector<8x128xf32>
    %50 = arith.addf %44, %49 : vector<8x128xf32>
    %c4_35 = arith.constant 4 : index
    %c0_36 = arith.constant 0 : index
    %51 = vector.load %arg5[%c4_35, %c0_36] : memref<5x128xf32, #tpu.memory_space<vmem>>, vector<1x128xf32>
    %52 = vector.shape_cast %51 : vector<1x128xf32> to vector<128xf32>
    %53 = vector.shape_cast %52 : vector<128xf32> to vector<1x128xf32>
    %54 = vector.broadcast %53 : vector<1x128xf32> to vector<8x128xf32>
    %55 = arith.mulf %27, %54 : vector<8x128xf32>
    %56 = arith.addf %50, %55 : vector<8x128xf32>
    %c0_37 = arith.constant 0 : index
    %c0_38 = arith.constant 0 : index
    %57 = vector.load %arg6[%c0_37, %c0_38] : memref<1x128xf32, #tpu.memory_space<vmem>>, vector<1x128xf32>
    %58 = vector.broadcast %57 : vector<1x128xf32> to vector<8x128xf32>
    %59 = arith.mulf %56, %58 : vector<8x128xf32>
    %c0_39 = arith.constant 0 : index
    %c0_40 = arith.constant 0 : index
    %60 = vector.load %arg7[%c0_39, %c0_40] : memref<1x128xf32, #tpu.memory_space<vmem>>, vector<1x128xf32>
    %61 = vector.broadcast %60 : vector<1x128xf32> to vector<8x128xf32>
    %62 = arith.addf %59, %61 : vector<8x128xf32>
    %cst_41 = arith.constant 0.000000e+00 : f32
    %63 = vector.broadcast %cst_41 : f32 to vector<8x128xf32>
    %64 = arith.maximumf %62, %63 : vector<8x128xf32>
    %cst_42 = arith.constant 0.000000e+00 : f32
    %65 = vector.broadcast %cst_42 : f32 to vector<26x128xf32>
    %c0_43 = arith.constant 0 : index
    %c0_44 = arith.constant 0 : index
    %66 = vector.load %arg27[%c0_43, %c0_44] : memref<26x128xf32, #tpu.memory_space<vmem>>, vector<26x128xf32>
    tpu.vector_store %arg27[%c0_43, %c0_44], %65 {strides = array<i32>} : memref<26x128xf32, #tpu.memory_space<vmem>>, vector<26x128xf32>,
    %c9 = arith.constant 9 : index
    %c0_45 = arith.constant 0 : index
    %67 = vector.load %arg27[%c9, %c0_45] : memref<26x128xf32, #tpu.memory_space<vmem>>, vector<8x128xf32>
    tpu.vector_store %arg27[%c9, %c0_45], %64 {strides = array<i32>} : memref<26x128xf32, #tpu.memory_space<vmem>>, vector<8x128xf32>,
    %c0_46 = arith.constant 0 : index
    %c0_47 = arith.constant 0 : index
    %68 = vector.load %arg27[%c0_46, %c0_47] : memref<26x128xf32, #tpu.memory_space<vmem>>, vector<8x128xf32>
    %c3_48 = arith.constant 3 : index
    %c0_49 = arith.constant 0 : index
    %69 = vector.load %arg27[%c3_48, %c0_49] : memref<26x128xf32, #tpu.memory_space<vmem>>, vector<8x128xf32>
    %c6 = arith.constant 6 : index
    %c0_50 = arith.constant 0 : index
    %70 = vector.load %arg27[%c6, %c0_50] : memref<26x128xf32, #tpu.memory_space<vmem>>, vector<8x128xf32>
    %c9_51 = arith.constant 9 : index
    %c0_52 = arith.constant 0 : index
    %71 = vector.load %arg27[%c9_51, %c0_52] : memref<26x128xf32, #tpu.memory_space<vmem>>, vector<8x128xf32>
    %c12 = arith.constant 12 : index
    %c0_53 = arith.constant 0 : index
    %72 = vector.load %arg27[%c12, %c0_53] : memref<26x128xf32, #tpu.memory_space<vmem>>, vector<8x128xf32>
    %c15 = arith.constant 15 : index
    %c0_54 = arith.constant 0 : index
    %73 = vector.load %arg27[%c15, %c0_54] : memref<26x128xf32, #tpu.memory_space<vmem>>, vector<8x128xf32>
    %c18 = arith.constant 18 : index
    %c0_55 = arith.constant 0 : index
    %74 = vector.load %arg27[%c18, %c0_55] : memref<26x128xf32, #tpu.memory_space<vmem>>, vector<8x128xf32>
    %c0_56 = arith.constant 0 : index
    %c0_57 = arith.constant 0 : index
    %75 = vector.load %arg8[%c0_56, %c0_57] : memref<7x128xf32, #tpu.memory_space<vmem>>, vector<1x128xf32>
    %76 = vector.shape_cast %75 : vector<1x128xf32> to vector<128xf32>
    %77 = vector.shape_cast %76 : vector<128xf32> to vector<1x128xf32>
    %78 = vector.broadcast %77 : vector<1x128xf32> to vector<8x128xf32>
    %79 = arith.mulf %68, %78 : vector<8x128xf32>
    %c1_58 = arith.constant 1 : index
    %c0_59 = arith.constant 0 : index
    %80 = vector.load %arg8[%c1_58, %c0_59] : memref<7x128xf32, #tpu.memory_space<vmem>>, vector<1x128xf32>
    %81 = vector.shape_cast %80 : vector<1x128xf32> to vector<128xf32>
    %82 = vector.shape_cast %81 : vector<128xf32> to vector<1x128xf32>
    %83 = vector.broadcast %82 : vector<1x128xf32> to vector<8x128xf32>
    %84 = arith.mulf %69, %83 : vector<8x128xf32>
    %85 = arith.addf %79, %84 : vector<8x128xf32>
    %c2_60 = arith.constant 2 : index
    %c0_61 = arith.constant 0 : index
    %86 = vector.load %arg8[%c2_60, %c0_61] : memref<7x128xf32, #tpu.memory_space<vmem>>, vector<1x128xf32>
    %87 = vector.shape_cast %86 : vector<1x128xf32> to vector<128xf32>
    %88 = vector.shape_cast %87 : vector<128xf32> to vector<1x128xf32>
    %89 = vector.broadcast %88 : vector<1x128xf32> to vector<8x128xf32>
    %90 = arith.mulf %70, %89 : vector<8x128xf32>
    %91 = arith.addf %85, %90 : vector<8x128xf32>
    %c3_62 = arith.constant 3 : index
    %c0_63 = arith.constant 0 : index
    %92 = vector.load %arg8[%c3_62, %c0_63] : memref<7x128xf32, #tpu.memory_space<vmem>>, vector<1x128xf32>
    %93 = vector.shape_cast %92 : vector<1x128xf32> to vector<128xf32>
    %94 = vector.shape_cast %93 : vector<128xf32> to vector<1x128xf32>
    %95 = vector.broadcast %94 : vector<1x128xf32> to vector<8x128xf32>
    %96 = arith.mulf %71, %95 : vector<8x128xf32>
    %97 = arith.addf %91, %96 : vector<8x128xf32>
    %c4_64 = arith.constant 4 : index
    %c0_65 = arith.constant 0 : index
    %98 = vector.load %arg8[%c4_64, %c0_65] : memref<7x128xf32, #tpu.memory_space<vmem>>, vector<1x128xf32>
    %99 = vector.shape_cast %98 : vector<1x128xf32> to vector<128xf32>
    %100 = vector.shape_cast %99 : vector<128xf32> to vector<1x128xf32>
    %101 = vector.broadcast %100 : vector<1x128xf32> to vector<8x128xf32>
    %102 = arith.mulf %72, %101 : vector<8x128xf32>
    %103 = arith.addf %97, %102 : vector<8x128xf32>
    %c5 = arith.constant 5 : index
    %c0_66 = arith.constant 0 : index
    %104 = vector.load %arg8[%c5, %c0_66] : memref<7x128xf32, #tpu.memory_space<vmem>>, vector<1x128xf32>
    %105 = vector.shape_cast %104 : vector<1x128xf32> to vector<128xf32>
    %106 = vector.shape_cast %105 : vector<128xf32> to vector<1x128xf32>
    %107 = vector.broadcast %106 : vector<1x128xf32> to vector<8x128xf32>
    %108 = arith.mulf %73, %107 : vector<8x128xf32>
    %109 = arith.addf %103, %108 : vector<8x128xf32>
    %c6_67 = arith.constant 6 : index
    %c0_68 = arith.constant 0 : index
    %110 = vector.load %arg8[%c6_67, %c0_68] : memref<7x128xf32, #tpu.memory_space<vmem>>, vector<1x128xf32>
    %111 = vector.shape_cast %110 : vector<1x128xf32> to vector<128xf32>
    %112 = vector.shape_cast %111 : vector<128xf32> to vector<1x128xf32>
    %113 = vector.broadcast %112 : vector<1x128xf32> to vector<8x128xf32>
    %114 = arith.mulf %74, %113 : vector<8x128xf32>
    %115 = arith.addf %109, %114 : vector<8x128xf32>
    %c0_69 = arith.constant 0 : index
    %c0_70 = arith.constant 0 : index
    %116 = vector.load %arg9[%c0_69, %c0_70] : memref<1x128xf32, #tpu.memory_space<vmem>>, vector<1x128xf32>
    %117 = vector.broadcast %116 : vector<1x128xf32> to vector<8x128xf32>
    %118 = arith.mulf %115, %117 : vector<8x128xf32>
    %c0_71 = arith.constant 0 : index
    %c0_72 = arith.constant 0 : index
    %119 = vector.load %arg10[%c0_71, %c0_72] : memref<1x128xf32, #tpu.memory_space<vmem>>, vector<1x128xf32>
    %120 = vector.broadcast %119 : vector<1x128xf32> to vector<8x128xf32>
    %121 = arith.addf %118, %120 : vector<8x128xf32>
    %cst_73 = arith.constant 0.000000e+00 : f32
    %122 = vector.broadcast %cst_73 : f32 to vector<8x128xf32>
    %123 = arith.maximumf %121, %122 : vector<8x128xf32>
    %c0_74 = arith.constant 0 : index
    %c0_75 = arith.constant 0 : index
    %124 = vector.load %arg11[%c0_74, %c0_75] : memref<128x128xf32, #tpu.memory_space<vmem>>, vector<128x128xf32>
    %cst_76 = arith.constant dense<0.000000e+00> : vector<8x128xf32>
    %125 = tpu.matmul %123, %124, %cst_76 {dimension_numbers = #tpu.dot_dimension_numbers<[1], [0], [0], [1], [0, 0, 1, 1], [], []>} : vector<8x128xf32>, vector<128x128xf32>, vector<8x128xf32> -> vector<8x128xf32>
    %c0_77 = arith.constant 0 : index
    %c0_78 = arith.constant 0 : index
    %126 = vector.load %arg12[%c0_77, %c0_78] : memref<1x128xf32, #tpu.memory_space<vmem>>, vector<1x128xf32>
    %127 = vector.broadcast %126 : vector<1x128xf32> to vector<8x128xf32>
    %128 = arith.mulf %125, %127 : vector<8x128xf32>
    %c0_79 = arith.constant 0 : index
    %c0_80 = arith.constant 0 : index
    %129 = vector.load %arg13[%c0_79, %c0_80] : memref<1x128xf32, #tpu.memory_space<vmem>>, vector<1x128xf32>
    %130 = vector.broadcast %129 : vector<1x128xf32> to vector<8x128xf32>
    %131 = arith.addf %128, %130 : vector<8x128xf32>
    %cst_81 = arith.constant 0.000000e+00 : f32
    %132 = vector.broadcast %cst_81 : f32 to vector<8x128xf32>
    %133 = arith.maximumf %131, %132 : vector<8x128xf32>
    %134 = arith.mulf %133, %19 : vector<8x128xf32>
    %c0_82 = arith.constant 0 : index
    %c0_83 = arith.constant 0 : index
    %135 = vector.load %arg14[%c0_82, %c0_83] : memref<1x128xf32, #tpu.memory_space<vmem>>, vector<1x128xf32>
    %136 = vector.broadcast %135 : vector<1x128xf32> to vector<8x128xf32>
    %137 = arith.mulf %134, %136 : vector<8x128xf32>
    %c0_84 = arith.constant 0 : index
    %c0_85 = arith.constant 0 : index
    %138 = vector.load %arg15[%c0_84, %c0_85] : memref<1x128xf32, #tpu.memory_space<vmem>>, vector<1x128xf32>
    %139 = vector.broadcast %138 : vector<1x128xf32> to vector<8x128xf32>
    %140 = arith.addf %137, %139 : vector<8x128xf32>
    %cst_86 = arith.constant 0.000000e+00 : f32
    %141 = vector.broadcast %cst_86 : f32 to vector<8x128xf32>
    %142 = arith.maximumf %140, %141 : vector<8x128xf32>
    %c0_87 = arith.constant 0 : index
    %c0_88 = arith.constant 0 : index
    %143 = vector.load %arg16[%c0_87, %c0_88] : memref<128x128xf32, #tpu.memory_space<vmem>>, vector<128x128xf32>
    %cst_89 = arith.constant dense<0.000000e+00> : vector<8x128xf32>
    %144 = tpu.matmul %142, %143, %cst_89 {dimension_numbers = #tpu.dot_dimension_numbers<[1], [0], [0], [1], [0, 0, 1, 1], [], []>} : vector<8x128xf32>, vector<128x128xf32>, vector<8x128xf32> -> vector<8x128xf32>
    %c0_90 = arith.constant 0 : index
    %c0_91 = arith.constant 0 : index
    %145 = vector.load %arg17[%c0_90, %c0_91] : memref<1x128xf32, #tpu.memory_space<vmem>>, vector<1x128xf32>
    %146 = vector.broadcast %145 : vector<1x128xf32> to vector<8x128xf32>
    %147 = arith.mulf %144, %146 : vector<8x128xf32>
    %c0_92 = arith.constant 0 : index
    %c0_93 = arith.constant 0 : index
    %148 = vector.load %arg18[%c0_92, %c0_93] : memref<1x128xf32, #tpu.memory_space<vmem>>, vector<1x128xf32>
    %149 = vector.broadcast %148 : vector<1x128xf32> to vector<8x128xf32>
    %150 = arith.addf %147, %149 : vector<8x128xf32>
    %cst_94 = arith.constant dense<0.000000e+00> : vector<128xf32>
    %151 = vector.multi_reduction <add>, %150, %cst_94 [0] : vector<8x128xf32> to vector<128xf32>
    %152 = vector.shape_cast %151 : vector<128xf32> to vector<1x128xf32>
    %cst_95 = arith.constant 8.000000e+00 : f32
    %153 = vector.broadcast %cst_95 : f32 to vector<1x128xf32>
    %154 = arith.divf %152, %153 : vector<1x128xf32>
    %c0_96 = arith.constant 0 : index
    %c0_97 = arith.constant 0 : index
    %155 = vector.load %arg19[%c0_96, %c0_97] : memref<128x32xf32, #tpu.memory_space<vmem>>, vector<128x32xf32>
    %cst_98 = arith.constant dense<0.000000e+00> : vector<1x32xf32>
    %156 = tpu.matmul %154, %155, %cst_98 {dimension_numbers = #tpu.dot_dimension_numbers<[1], [0], [0], [1], [0, 0, 1, 1], [], []>} : vector<1x128xf32>, vector<128x32xf32>, vector<1x32xf32> -> vector<1x32xf32>
    %c0_99 = arith.constant 0 : index
    %c0_100 = arith.constant 0 : index
    %157 = vector.load %arg20[%c0_99, %c0_100] : memref<1x32xf32, #tpu.memory_space<vmem>>, vector<1x32xf32>
    %158 = arith.addf %156, %157 : vector<1x32xf32>
    %cst_101 = arith.constant 0.000000e+00 : f32
    %159 = vector.broadcast %cst_101 : f32 to vector<1x32xf32>
    %160 = arith.maximumf %158, %159 : vector<1x32xf32>
    %c0_102 = arith.constant 0 : index
    %c0_103 = arith.constant 0 : index
    %161 = vector.load %arg21[%c0_102, %c0_103] : memref<32x128xf32, #tpu.memory_space<vmem>>, vector<32x128xf32>
    %cst_104 = arith.constant dense<0.000000e+00> : vector<1x128xf32>
    %162 = tpu.matmul %160, %161, %cst_104 {dimension_numbers = #tpu.dot_dimension_numbers<[1], [0], [0], [1], [0, 0, 1, 1], [], []>} : vector<1x32xf32>, vector<32x128xf32>, vector<1x128xf32> -> vector<1x128xf32>
    %c0_105 = arith.constant 0 : index
    %c0_106 = arith.constant 0 : index
    %163 = vector.load %arg22[%c0_105, %c0_106] : memref<1x128xf32, #tpu.memory_space<vmem>>, vector<1x128xf32>
    %164 = arith.addf %162, %163 : vector<1x128xf32>
    %cst_107 = arith.constant 0.000000e+00 : f32
    %165 = vector.broadcast %cst_107 : f32 to vector<1x128xf32>
    %166 = arith.subf %165, %164 : vector<1x128xf32>
    %167 = math.exp %166 : vector<1x128xf32>
    %cst_108 = arith.constant 1.000000e+00 : f32
    %168 = vector.broadcast %cst_108 : f32 to vector<1x128xf32>
    %169 = arith.addf %168, %167 : vector<1x128xf32>
    %cst_109 = arith.constant 1.000000e+00 : f32
    %170 = vector.broadcast %cst_109 : f32 to vector<1x128xf32>
    %171 = arith.divf %170, %169 : vector<1x128xf32>
    %172 = vector.broadcast %171 : vector<1x128xf32> to vector<8x128xf32>
    %173 = arith.mulf %150, %172 : vector<8x128xf32>
    %174 = arith.addf %173, %9 : vector<8x128xf32>
    %cst_110 = arith.constant 0.000000e+00 : f32
    %175 = vector.broadcast %cst_110 : f32 to vector<8x128xf32>
    %176 = arith.maximumf %174, %175 : vector<8x128xf32>
    %177 = vector.shape_cast %176 : vector<8x128xf32> to vector<1x8x128xf32>
    %c0_111 = arith.constant 0 : index
    %c0_112 = arith.constant 0 : index
    %c0_113 = arith.constant 0 : index
    %178 = vector.load %arg26[%c0_111, %c0_112, %c0_113] : memref<1x8x128xf32, #tpu.memory_space<vmem>>, vector<1x8x128xf32>
    tpu.vector_store %arg26[%c0_111, %c0_112, %c0_113], %177 {strides = array<i32>} : memref<1x8x128xf32, #tpu.memory_space<vmem>>, vector<1x8x128xf32>,
    return
  }
  func.func @transform_0(%arg0: i32) -> (i32, i32, i32) {
    %c0_i32 = arith.constant 0 : i32
    %c0_i32_0 = arith.constant 0 : i32
    %c0_i32_1 = arith.constant 0 : i32
    return %arg0, %c0_i32, %c0_i32_0 : i32, i32, i32
  }
  func.func @transform_1(%arg0: i32) -> (i32, i32) {
    %c0_i32 = arith.constant 0 : i32
    %c0_i32_0 = arith.constant 0 : i32
    %c0_i32_1 = arith.constant 0 : i32
    return %c0_i32, %c0_i32_0 : i32, i32
  }
  func.func @transform_2(%arg0: i32) -> (i32, i32) {
    %c0_i32 = arith.constant 0 : i32
    %c0_i32_0 = arith.constant 0 : i32
    %c0_i32_1 = arith.constant 0 : i32
    return %c0_i32, %c0_i32_0 : i32, i32
  }
  func.func @transform_3(%arg0: i32) -> (i32, i32) {
    %c0_i32 = arith.constant 0 : i32
    %c0_i32_0 = arith.constant 0 : i32
    %c0_i32_1 = arith.constant 0 : i32
    return %c0_i32, %c0_i32_0 : i32, i32
  }
  func.func @transform_4(%arg0: i32) -> (i32, i32) {
    %c0_i32 = arith.constant 0 : i32
    %c0_i32_0 = arith.constant 0 : i32
    %c0_i32_1 = arith.constant 0 : i32
    return %c0_i32, %c0_i32_0 : i32, i32
  }
  func.func @transform_5(%arg0: i32) -> (i32, i32) {
    %c0_i32 = arith.constant 0 : i32
    %c0_i32_0 = arith.constant 0 : i32
    %c0_i32_1 = arith.constant 0 : i32
    return %c0_i32, %c0_i32_0 : i32, i32
  }
  func.func @transform_6(%arg0: i32) -> (i32, i32) {
    %c0_i32 = arith.constant 0 : i32
    %c0_i32_0 = arith.constant 0 : i32
    %c0_i32_1 = arith.constant 0 : i32
    return %c0_i32, %c0_i32_0 : i32, i32
  }
  func.func @transform_7(%arg0: i32) -> (i32, i32) {
    %c0_i32 = arith.constant 0 : i32
    %c0_i32_0 = arith.constant 0 : i32
    %c0_i32_1 = arith.constant 0 : i32
    return %c0_i32, %c0_i32_0 : i32, i32
  }
  func.func @transform_8(%arg0: i32) -> (i32, i32) {
    %c0_i32 = arith.constant 0 : i32
    %c0_i32_0 = arith.constant 0 : i32
    %c0_i32_1 = arith.constant 0 : i32
    return %c0_i32, %c0_i32_0 : i32, i32
  }
  func.func @transform_9(%arg0: i32) -> (i32, i32) {
    %c0_i32 = arith.constant 0 : i32
    %c0_i32_0 = arith.constant 0 : i32
    %c0_i32_1 = arith.constant 0 : i32
    return %c0_i32, %c0_i32_0 : i32, i32
  }
  func.func @transform_10(%arg0: i32) -> (i32, i32) {
    %c0_i32 = arith.constant 0 : i32
    %c0_i32_0 = arith.constant 0 : i32
    %c0_i32_1 = arith.constant 0 : i32
    return %c0_i32, %c0_i32_0 : i32, i32
  }
  func.func @transform_11(%arg0: i32) -> (i32, i32) {
    %c0_i32 = arith.constant 0 : i32
    %c0_i32_0 = arith.constant 0 : i32
    %c0_i32_1 = arith.constant 0 : i32
    return %c0_i32, %c0_i32_0 : i32, i32
  }
  func.func @transform_12(%arg0: i32) -> (i32, i32) {
    %c0_i32 = arith.constant 0 : i32
    %c0_i32_0 = arith.constant 0 : i32
    %c0_i32_1 = arith.constant 0 : i32
    return %c0_i32, %c0_i32_0 : i32, i32
  }
  func.func @transform_13(%arg0: i32) -> (i32, i32) {
    %c0_i32 = arith.constant 0 : i32
    %c0_i32_0 = arith.constant 0 : i32
    %c0_i32_1 = arith.constant 0 : i32
    return %c0_i32, %c0_i32_0 : i32, i32
  }
  func.func @transform_14(%arg0: i32) -> (i32, i32) {
    %c0_i32 = arith.constant 0 : i32
    %c0_i32_0 = arith.constant 0 : i32
    %c0_i32_1 = arith.constant 0 : i32
    return %c0_i32, %c0_i32_0 : i32, i32
  }
  func.func @transform_15(%arg0: i32) -> (i32, i32) {
    %c0_i32 = arith.constant 0 : i32
    %c0_i32_0 = arith.constant 0 : i32
    %c0_i32_1 = arith.constant 0 : i32
    return %c0_i32, %c0_i32_0 : i32, i32
  }
  func.func @transform_16(%arg0: i32) -> (i32, i32) {
    %c0_i32 = arith.constant 0 : i32
    %c0_i32_0 = arith.constant 0 : i32
    %c0_i32_1 = arith.constant 0 : i32
    return %c0_i32, %c0_i32_0 : i32, i32
  }
  func.func @transform_17(%arg0: i32) -> (i32, i32) {
    %c0_i32 = arith.constant 0 : i32
    %c0_i32_0 = arith.constant 0 : i32
    %c0_i32_1 = arith.constant 0 : i32
    return %c0_i32, %c0_i32_0 : i32, i32
  }
  func.func @transform_18(%arg0: i32) -> (i32, i32) {
    %c0_i32 = arith.constant 0 : i32
    %c0_i32_0 = arith.constant 0 : i32
    %c0_i32_1 = arith.constant 0 : i32
    return %c0_i32, %c0_i32_0 : i32, i32
  }
  func.func @transform_19(%arg0: i32) -> (i32, i32) {
    %c0_i32 = arith.constant 0 : i32
    %c0_i32_0 = arith.constant 0 : i32
    %c0_i32_1 = arith.constant 0 : i32
    return %c0_i32, %c0_i32_0 : i32, i32
  }
  func.func @transform_20(%arg0: i32) -> (i32, i32) {
    %c0_i32 = arith.constant 0 : i32
    %c0_i32_0 = arith.constant 0 : i32
    %c0_i32_1 = arith.constant 0 : i32
    return %c0_i32, %c0_i32_0 : i32, i32
  }
  func.func @transform_21(%arg0: i32) -> (i32, i32) {
    %c0_i32 = arith.constant 0 : i32
    %c0_i32_0 = arith.constant 0 : i32
    %c0_i32_1 = arith.constant 0 : i32
    return %c0_i32, %c0_i32_0 : i32, i32
  }
  func.func @transform_22(%arg0: i32) -> (i32, i32) {
    %c0_i32 = arith.constant 0 : i32
    %c0_i32_0 = arith.constant 0 : i32
    %c0_i32_1 = arith.constant 0 : i32
    return %c0_i32, %c0_i32_0 : i32, i32
  }
  func.func @transform_23(%arg0: i32) -> (i32, i32) {
    %c0_i32 = arith.constant 0 : i32
    %c0_i32_0 = arith.constant 0 : i32
    %c0_i32_1 = arith.constant 0 : i32
    return %c0_i32, %c0_i32_0 : i32, i32
  }
  func.func @transform_24(%arg0: i32) -> (i32, i32) {
    %c0_i32 = arith.constant 0 : i32
    %c0_i32_0 = arith.constant 0 : i32
    %c0_i32_1 = arith.constant 0 : i32
    return %c0_i32, %c0_i32_0 : i32, i32
  }
  func.func @transform_25(%arg0: i32) -> (i32, i32, i32) {
    %c0_i32 = arith.constant 0 : i32
    %c0_i32_0 = arith.constant 0 : i32
    %c0_i32_1 = arith.constant 0 : i32
    return %arg0, %c0_i32, %c0_i32_0 : i32, i32, i32
  }
}

module attributes {stable_mosaic.version = 11 : i64} {
  func.func @fpn_kernel(%arg0: i32, %arg1: memref<1x64x16xf32, #tpu.memory_space<vmem>>, %arg2: memref<1x32x32xf32, #tpu.memory_space<vmem>>, %arg3: memref<1x16x64xf32, #tpu.memory_space<vmem>>, %arg4: memref<1x8x128xf32, #tpu.memory_space<vmem>>, %arg5: memref<128x16xf32, #tpu.memory_space<vmem>>, %arg6: memref<64x16xf32, #tpu.memory_space<vmem>>, %arg7: memref<32x16xf32, #tpu.memory_space<vmem>>, %arg8: memref<16x16xf32, #tpu.memory_space<vmem>>, %arg9: memref<16x8xf32, #tpu.memory_space<vmem>>, %arg10: memref<32x16xf32, #tpu.memory_space<vmem>>, %arg11: memref<64x32xf32, #tpu.memory_space<vmem>>, %arg12: memref<3x16x16xf32, #tpu.memory_space<vmem>>, %arg13: memref<1x16xf32, #tpu.memory_space<vmem>>, %arg14: memref<1x16xf32, #tpu.memory_space<vmem>>, %arg15: memref<1x64x16xf32, #tpu.memory_space<vmem>>, %arg16: memref<66x16xf32, #tpu.memory_space<vmem>>) attributes {dimension_semantics = [#tpu.dimension_semantics<parallel>], iteration_bounds = array<i64: 2>, scalar_prefetch = 0 : i64, scratch_operands = 1 : i64, tpu.core_type = #tpu.core_type<tc>, window_params = [{transform_indices = @transform_0, window_bounds = array<i64: 1, 64, 16>}, {transform_indices = @transform_1, window_bounds = array<i64: 1, 32, 32>}, {transform_indices = @transform_2, window_bounds = array<i64: 1, 16, 64>}, {transform_indices = @transform_3, window_bounds = array<i64: 1, 8, 128>}, {pipeline_mode = #tpu.pipeline_mode<synchronous>, transform_indices = @transform_4, window_bounds = array<i64: 128, 16>}, {pipeline_mode = #tpu.pipeline_mode<synchronous>, transform_indices = @transform_5, window_bounds = array<i64: 64, 16>}, {pipeline_mode = #tpu.pipeline_mode<synchronous>, transform_indices = @transform_6, window_bounds = array<i64: 32, 16>}, {pipeline_mode = #tpu.pipeline_mode<synchronous>, transform_indices = @transform_7, window_bounds = array<i64: 16, 16>}, {pipeline_mode = #tpu.pipeline_mode<synchronous>, transform_indices = @transform_8, window_bounds = array<i64: 16, 8>}, {pipeline_mode = #tpu.pipeline_mode<synchronous>, transform_indices = @transform_9, window_bounds = array<i64: 32, 16>}, {pipeline_mode = #tpu.pipeline_mode<synchronous>, transform_indices = @transform_10, window_bounds = array<i64: 64, 32>}, {pipeline_mode = #tpu.pipeline_mode<synchronous>, transform_indices = @transform_11, window_bounds = array<i64: 3, 16, 16>}, {pipeline_mode = #tpu.pipeline_mode<synchronous>, transform_indices = @transform_12, window_bounds = array<i64: 1, 16>}, {pipeline_mode = #tpu.pipeline_mode<synchronous>, transform_indices = @transform_13, window_bounds = array<i64: 1, 16>}, {transform_indices = @transform_14, window_bounds = array<i64: 1, 64, 16>}]} {
    %c0 = arith.constant 0 : index
    %c0_0 = arith.constant 0 : index
    %c0_1 = arith.constant 0 : index
    %0 = vector.load %arg4[%c0, %c0_0, %c0_1] : memref<1x8x128xf32, #tpu.memory_space<vmem>>, vector<1x8x128xf32>
    %1 = vector.shape_cast %0 : vector<1x8x128xf32> to vector<8x128xf32>
    %c0_2 = arith.constant 0 : index
    %c0_3 = arith.constant 0 : index
    %2 = vector.load %arg5[%c0_2, %c0_3] : memref<128x16xf32, #tpu.memory_space<vmem>>, vector<128x16xf32>
    %cst = arith.constant dense<0.000000e+00> : vector<8x16xf32>
    %3 = tpu.matmul %1, %2, %cst {dimension_numbers = #tpu.dot_dimension_numbers<[1], [0], [0], [1], [0, 0, 1, 1], [], []>} : vector<8x128xf32>, vector<128x16xf32>, vector<8x16xf32> -> vector<8x16xf32>
    %c0_4 = arith.constant 0 : index
    %c0_5 = arith.constant 0 : index
    %4 = vector.load %arg9[%c0_4, %c0_5] : memref<16x8xf32, #tpu.memory_space<vmem>>, vector<16x8xf32>
    %cst_6 = arith.constant dense<0.000000e+00> : vector<16x16xf32>
    %5 = tpu.matmul %4, %3, %cst_6 {dimension_numbers = #tpu.dot_dimension_numbers<[1], [0], [0], [1], [0, 0, 1, 1], [], []>} : vector<16x8xf32>, vector<8x16xf32>, vector<16x16xf32> -> vector<16x16xf32>
    %c0_7 = arith.constant 0 : index
    %c0_8 = arith.constant 0 : index
    %c0_9 = arith.constant 0 : index
    %6 = vector.load %arg3[%c0_7, %c0_8, %c0_9] : memref<1x16x64xf32, #tpu.memory_space<vmem>>, vector<1x16x64xf32>
    %7 = vector.shape_cast %6 : vector<1x16x64xf32> to vector<16x64xf32>
    %c0_10 = arith.constant 0 : index
    %c0_11 = arith.constant 0 : index
    %8 = vector.load %arg6[%c0_10, %c0_11] : memref<64x16xf32, #tpu.memory_space<vmem>>, vector<64x16xf32>
    %cst_12 = arith.constant dense<0.000000e+00> : vector<16x16xf32>
    %9 = tpu.matmul %7, %8, %cst_12 {dimension_numbers = #tpu.dot_dimension_numbers<[1], [0], [0], [1], [0, 0, 1, 1], [], []>} : vector<16x64xf32>, vector<64x16xf32>, vector<16x16xf32> -> vector<16x16xf32>
    %10 = arith.addf %5, %9 : vector<16x16xf32>
    %c0_13 = arith.constant 0 : index
    %c0_14 = arith.constant 0 : index
    %11 = vector.load %arg10[%c0_13, %c0_14] : memref<32x16xf32, #tpu.memory_space<vmem>>, vector<32x16xf32>
    %cst_15 = arith.constant dense<0.000000e+00> : vector<32x16xf32>
    %12 = tpu.matmul %11, %10, %cst_15 {dimension_numbers = #tpu.dot_dimension_numbers<[1], [0], [0], [1], [0, 0, 1, 1], [], []>} : vector<32x16xf32>, vector<16x16xf32>, vector<32x16xf32> -> vector<32x16xf32>
    %c0_16 = arith.constant 0 : index
    %c0_17 = arith.constant 0 : index
    %c0_18 = arith.constant 0 : index
    %13 = vector.load %arg2[%c0_16, %c0_17, %c0_18] : memref<1x32x32xf32, #tpu.memory_space<vmem>>, vector<1x32x32xf32>
    %14 = vector.shape_cast %13 : vector<1x32x32xf32> to vector<32x32xf32>
    %c0_19 = arith.constant 0 : index
    %c0_20 = arith.constant 0 : index
    %15 = vector.load %arg7[%c0_19, %c0_20] : memref<32x16xf32, #tpu.memory_space<vmem>>, vector<32x16xf32>
    %cst_21 = arith.constant dense<0.000000e+00> : vector<32x16xf32>
    %16 = tpu.matmul %14, %15, %cst_21 {dimension_numbers = #tpu.dot_dimension_numbers<[1], [0], [0], [1], [0, 0, 1, 1], [], []>} : vector<32x32xf32>, vector<32x16xf32>, vector<32x16xf32> -> vector<32x16xf32>
    %17 = arith.addf %12, %16 : vector<32x16xf32>
    %c0_22 = arith.constant 0 : index
    %c0_23 = arith.constant 0 : index
    %18 = vector.load %arg11[%c0_22, %c0_23] : memref<64x32xf32, #tpu.memory_space<vmem>>, vector<64x32xf32>
    %cst_24 = arith.constant dense<0.000000e+00> : vector<64x16xf32>
    %19 = tpu.matmul %18, %17, %cst_24 {dimension_numbers = #tpu.dot_dimension_numbers<[1], [0], [0], [1], [0, 0, 1, 1], [], []>} : vector<64x32xf32>, vector<32x16xf32>, vector<64x16xf32> -> vector<64x16xf32>
    %c0_25 = arith.constant 0 : index
    %c0_26 = arith.constant 0 : index
    %c0_27 = arith.constant 0 : index
    %20 = vector.load %arg1[%c0_25, %c0_26, %c0_27] : memref<1x64x16xf32, #tpu.memory_space<vmem>>, vector<1x64x16xf32>
    %21 = vector.shape_cast %20 : vector<1x64x16xf32> to vector<64x16xf32>
    %c0_28 = arith.constant 0 : index
    %c0_29 = arith.constant 0 : index
    %22 = vector.load %arg8[%c0_28, %c0_29] : memref<16x16xf32, #tpu.memory_space<vmem>>, vector<16x16xf32>
    %cst_30 = arith.constant dense<0.000000e+00> : vector<64x16xf32>
    %23 = tpu.matmul %21, %22, %cst_30 {dimension_numbers = #tpu.dot_dimension_numbers<[1], [0], [0], [1], [0, 0, 1, 1], [], []>} : vector<64x16xf32>, vector<16x16xf32>, vector<64x16xf32> -> vector<64x16xf32>
    %24 = arith.addf %19, %23 : vector<64x16xf32>
    %cst_31 = arith.constant 0.000000e+00 : f32
    %25 = vector.broadcast %cst_31 : f32 to vector<66x16xf32>
    %c0_32 = arith.constant 0 : index
    %c0_33 = arith.constant 0 : index
    %26 = vector.load %arg16[%c0_32, %c0_33] : memref<66x16xf32, #tpu.memory_space<vmem>>, vector<66x16xf32>
    tpu.vector_store %arg16[%c0_32, %c0_33], %25 {strides = array<i32>} : memref<66x16xf32, #tpu.memory_space<vmem>>, vector<66x16xf32>,
    %c1 = arith.constant 1 : index
    %c0_34 = arith.constant 0 : index
    %27 = vector.load %arg16[%c1, %c0_34] : memref<66x16xf32, #tpu.memory_space<vmem>>, vector<64x16xf32>
    tpu.vector_store %arg16[%c1, %c0_34], %24 {strides = array<i32>} : memref<66x16xf32, #tpu.memory_space<vmem>>, vector<64x16xf32>,
    %c0_35 = arith.constant 0 : index
    %c0_36 = arith.constant 0 : index
    %28 = vector.load %arg16[%c0_35, %c0_36] : memref<66x16xf32, #tpu.memory_space<vmem>>, vector<64x16xf32>
    %c1_37 = arith.constant 1 : index
    %c0_38 = arith.constant 0 : index
    %29 = vector.load %arg16[%c1_37, %c0_38] : memref<66x16xf32, #tpu.memory_space<vmem>>, vector<64x16xf32>
    %c2 = arith.constant 2 : index
    %c0_39 = arith.constant 0 : index
    %30 = vector.load %arg16[%c2, %c0_39] : memref<66x16xf32, #tpu.memory_space<vmem>>, vector<64x16xf32>
    %c0_40 = arith.constant 0 : index
    %c0_41 = arith.constant 0 : index
    %c0_42 = arith.constant 0 : index
    %31 = vector.load %arg12[%c0_40, %c0_41, %c0_42] : memref<3x16x16xf32, #tpu.memory_space<vmem>>, vector<1x16x16xf32>
    %32 = vector.shape_cast %31 : vector<1x16x16xf32> to vector<16x16xf32>
    %cst_43 = arith.constant dense<0.000000e+00> : vector<64x16xf32>
    %33 = tpu.matmul %28, %32, %cst_43 {dimension_numbers = #tpu.dot_dimension_numbers<[1], [0], [0], [1], [0, 0, 1, 1], [], []>} : vector<64x16xf32>, vector<16x16xf32>, vector<64x16xf32> -> vector<64x16xf32>
    %c1_44 = arith.constant 1 : index
    %c0_45 = arith.constant 0 : index
    %c0_46 = arith.constant 0 : index
    %34 = vector.load %arg12[%c1_44, %c0_45, %c0_46] : memref<3x16x16xf32, #tpu.memory_space<vmem>>, vector<1x16x16xf32>
    %35 = vector.shape_cast %34 : vector<1x16x16xf32> to vector<16x16xf32>
    %cst_47 = arith.constant dense<0.000000e+00> : vector<64x16xf32>
    %36 = tpu.matmul %29, %35, %cst_47 {dimension_numbers = #tpu.dot_dimension_numbers<[1], [0], [0], [1], [0, 0, 1, 1], [], []>} : vector<64x16xf32>, vector<16x16xf32>, vector<64x16xf32> -> vector<64x16xf32>
    %37 = arith.addf %33, %36 : vector<64x16xf32>
    %c2_48 = arith.constant 2 : index
    %c0_49 = arith.constant 0 : index
    %c0_50 = arith.constant 0 : index
    %38 = vector.load %arg12[%c2_48, %c0_49, %c0_50] : memref<3x16x16xf32, #tpu.memory_space<vmem>>, vector<1x16x16xf32>
    %39 = vector.shape_cast %38 : vector<1x16x16xf32> to vector<16x16xf32>
    %cst_51 = arith.constant dense<0.000000e+00> : vector<64x16xf32>
    %40 = tpu.matmul %30, %39, %cst_51 {dimension_numbers = #tpu.dot_dimension_numbers<[1], [0], [0], [1], [0, 0, 1, 1], [], []>} : vector<64x16xf32>, vector<16x16xf32>, vector<64x16xf32> -> vector<64x16xf32>
    %41 = arith.addf %37, %40 : vector<64x16xf32>
    %c0_52 = arith.constant 0 : index
    %c0_53 = arith.constant 0 : index
    %42 = vector.load %arg13[%c0_52, %c0_53] : memref<1x16xf32, #tpu.memory_space<vmem>>, vector<1x16xf32>
    %43 = vector.broadcast %42 : vector<1x16xf32> to vector<64x16xf32>
    %44 = arith.mulf %41, %43 : vector<64x16xf32>
    %c0_54 = arith.constant 0 : index
    %c0_55 = arith.constant 0 : index
    %45 = vector.load %arg14[%c0_54, %c0_55] : memref<1x16xf32, #tpu.memory_space<vmem>>, vector<1x16xf32>
    %46 = vector.broadcast %45 : vector<1x16xf32> to vector<64x16xf32>
    %47 = arith.addf %44, %46 : vector<64x16xf32>
    %cst_56 = arith.constant 0.000000e+00 : f32
    %48 = vector.broadcast %cst_56 : f32 to vector<64x16xf32>
    %49 = arith.maximumf %47, %48 : vector<64x16xf32>
    %50 = vector.shape_cast %49 : vector<64x16xf32> to vector<1x64x16xf32>
    %c0_57 = arith.constant 0 : index
    %c0_58 = arith.constant 0 : index
    %c0_59 = arith.constant 0 : index
    %51 = vector.load %arg15[%c0_57, %c0_58, %c0_59] : memref<1x64x16xf32, #tpu.memory_space<vmem>>, vector<1x64x16xf32>
    tpu.vector_store %arg15[%c0_57, %c0_58, %c0_59], %50 {strides = array<i32>} : memref<1x64x16xf32, #tpu.memory_space<vmem>>, vector<1x64x16xf32>,
    return
  }
  func.func @transform_0(%arg0: i32) -> (i32, i32, i32) {
    %c0_i32 = arith.constant 0 : i32
    %c0_i32_0 = arith.constant 0 : i32
    %c0_i32_1 = arith.constant 0 : i32
    return %arg0, %c0_i32, %c0_i32_0 : i32, i32, i32
  }
  func.func @transform_1(%arg0: i32) -> (i32, i32, i32) {
    %c0_i32 = arith.constant 0 : i32
    %c0_i32_0 = arith.constant 0 : i32
    %c0_i32_1 = arith.constant 0 : i32
    return %arg0, %c0_i32, %c0_i32_0 : i32, i32, i32
  }
  func.func @transform_2(%arg0: i32) -> (i32, i32, i32) {
    %c0_i32 = arith.constant 0 : i32
    %c0_i32_0 = arith.constant 0 : i32
    %c0_i32_1 = arith.constant 0 : i32
    return %arg0, %c0_i32, %c0_i32_0 : i32, i32, i32
  }
  func.func @transform_3(%arg0: i32) -> (i32, i32, i32) {
    %c0_i32 = arith.constant 0 : i32
    %c0_i32_0 = arith.constant 0 : i32
    %c0_i32_1 = arith.constant 0 : i32
    return %arg0, %c0_i32, %c0_i32_0 : i32, i32, i32
  }
  func.func @transform_4(%arg0: i32) -> (i32, i32) {
    %c0_i32 = arith.constant 0 : i32
    %c0_i32_0 = arith.constant 0 : i32
    %c0_i32_1 = arith.constant 0 : i32
    return %c0_i32, %c0_i32_0 : i32, i32
  }
  func.func @transform_5(%arg0: i32) -> (i32, i32) {
    %c0_i32 = arith.constant 0 : i32
    %c0_i32_0 = arith.constant 0 : i32
    %c0_i32_1 = arith.constant 0 : i32
    return %c0_i32, %c0_i32_0 : i32, i32
  }
  func.func @transform_6(%arg0: i32) -> (i32, i32) {
    %c0_i32 = arith.constant 0 : i32
    %c0_i32_0 = arith.constant 0 : i32
    %c0_i32_1 = arith.constant 0 : i32
    return %c0_i32, %c0_i32_0 : i32, i32
  }
  func.func @transform_7(%arg0: i32) -> (i32, i32) {
    %c0_i32 = arith.constant 0 : i32
    %c0_i32_0 = arith.constant 0 : i32
    %c0_i32_1 = arith.constant 0 : i32
    return %c0_i32, %c0_i32_0 : i32, i32
  }
  func.func @transform_8(%arg0: i32) -> (i32, i32) {
    %c0_i32 = arith.constant 0 : i32
    %c0_i32_0 = arith.constant 0 : i32
    %c0_i32_1 = arith.constant 0 : i32
    return %c0_i32, %c0_i32_0 : i32, i32
  }
  func.func @transform_9(%arg0: i32) -> (i32, i32) {
    %c0_i32 = arith.constant 0 : i32
    %c0_i32_0 = arith.constant 0 : i32
    %c0_i32_1 = arith.constant 0 : i32
    return %c0_i32, %c0_i32_0 : i32, i32
  }
  func.func @transform_10(%arg0: i32) -> (i32, i32) {
    %c0_i32 = arith.constant 0 : i32
    %c0_i32_0 = arith.constant 0 : i32
    %c0_i32_1 = arith.constant 0 : i32
    return %c0_i32, %c0_i32_0 : i32, i32
  }
  func.func @transform_11(%arg0: i32) -> (i32, i32, i32) {
    %c0_i32 = arith.constant 0 : i32
    %c0_i32_0 = arith.constant 0 : i32
    %c0_i32_1 = arith.constant 0 : i32
    %c0_i32_2 = arith.constant 0 : i32
    return %c0_i32, %c0_i32_0, %c0_i32_1 : i32, i32, i32
  }
  func.func @transform_12(%arg0: i32) -> (i32, i32) {
    %c0_i32 = arith.constant 0 : i32
    %c0_i32_0 = arith.constant 0 : i32
    %c0_i32_1 = arith.constant 0 : i32
    return %c0_i32, %c0_i32_0 : i32, i32
  }
  func.func @transform_13(%arg0: i32) -> (i32, i32) {
    %c0_i32 = arith.constant 0 : i32
    %c0_i32_0 = arith.constant 0 : i32
    %c0_i32_1 = arith.constant 0 : i32
    return %c0_i32, %c0_i32_0 : i32, i32
  }
  func.func @transform_14(%arg0: i32) -> (i32, i32, i32) {
    %c0_i32 = arith.constant 0 : i32
    %c0_i32_0 = arith.constant 0 : i32
    %c0_i32_1 = arith.constant 0 : i32
    return %arg0, %c0_i32, %c0_i32_0 : i32, i32, i32
  }
}

module attributes {stable_mosaic.version = 11 : i64} {
  func.func @head_kernel(%arg0: i32, %arg1: memref<1x32x16xf32, #tpu.memory_space<vmem>>, %arg2: memref<1x32x16xf32, #tpu.memory_space<vmem>>, %arg3: memref<3x16x64xf32, #tpu.memory_space<vmem>>, %arg4: memref<1x64xf32, #tpu.memory_space<vmem>>, %arg5: memref<1x64xf32, #tpu.memory_space<vmem>>, %arg6: memref<3x64x64xf32, #tpu.memory_space<vmem>>, %arg7: memref<1x64xf32, #tpu.memory_space<vmem>>, %arg8: memref<1x64xf32, #tpu.memory_space<vmem>>, %arg9: memref<64x2xf32, #tpu.memory_space<vmem>>, %arg10: memref<1x2xf32, #tpu.memory_space<vmem>>, %arg11: memref<1x1x2xf32, #tpu.memory_space<vmem>>, %arg12: memref<34x64xf32, #tpu.memory_space<vmem>>) attributes {dimension_semantics = [#tpu.dimension_semantics<parallel>], iteration_bounds = array<i64: 2>, scalar_prefetch = 0 : i64, scratch_operands = 1 : i64, tpu.core_type = #tpu.core_type<tc>, window_params = [{transform_indices = @transform_0, window_bounds = array<i64: 1, 32, 16>}, {transform_indices = @transform_1, window_bounds = array<i64: 1, 32, 16>}, {pipeline_mode = #tpu.pipeline_mode<synchronous>, transform_indices = @transform_2, window_bounds = array<i64: 3, 16, 64>}, {pipeline_mode = #tpu.pipeline_mode<synchronous>, transform_indices = @transform_3, window_bounds = array<i64: 1, 64>}, {pipeline_mode = #tpu.pipeline_mode<synchronous>, transform_indices = @transform_4, window_bounds = array<i64: 1, 64>}, {pipeline_mode = #tpu.pipeline_mode<synchronous>, transform_indices = @transform_5, window_bounds = array<i64: 3, 64, 64>}, {pipeline_mode = #tpu.pipeline_mode<synchronous>, transform_indices = @transform_6, window_bounds = array<i64: 1, 64>}, {pipeline_mode = #tpu.pipeline_mode<synchronous>, transform_indices = @transform_7, window_bounds = array<i64: 1, 64>}, {pipeline_mode = #tpu.pipeline_mode<synchronous>, transform_indices = @transform_8, window_bounds = array<i64: 64, 2>}, {pipeline_mode = #tpu.pipeline_mode<synchronous>, transform_indices = @transform_9, window_bounds = array<i64: 1, 2>}, {transform_indices = @transform_10, window_bounds = array<i64: 1, 1, 2>}]} {
    %c0 = arith.constant 0 : index
    %c0_0 = arith.constant 0 : index
    %c0_1 = arith.constant 0 : index
    %0 = vector.load %arg1[%c0, %c0_0, %c0_1] : memref<1x32x16xf32, #tpu.memory_space<vmem>>, vector<1x32x16xf32>
    %1 = vector.shape_cast %0 : vector<1x32x16xf32> to vector<32x16xf32>
    %c0_2 = arith.constant 0 : index
    %c0_3 = arith.constant 0 : index
    %c0_4 = arith.constant 0 : index
    %2 = vector.load %arg2[%c0_2, %c0_3, %c0_4] : memref<1x32x16xf32, #tpu.memory_space<vmem>>, vector<1x32x16xf32>
    %3 = vector.shape_cast %2 : vector<1x32x16xf32> to vector<32x16xf32>
    %cst = arith.constant 0.000000e+00 : f32
    %4 = vector.broadcast %cst : f32 to vector<34x16xf32>
    %c0_5 = arith.constant 0 : index
    %c0_6 = arith.constant 0 : index
    %5 = vector.load %arg12[%c0_5, %c0_6] : memref<34x64xf32, #tpu.memory_space<vmem>>, vector<34x16xf32>
    tpu.vector_store %arg12[%c0_5, %c0_6], %4 {strides = array<i32>} : memref<34x64xf32, #tpu.memory_space<vmem>>, vector<34x16xf32>,
    %c1 = arith.constant 1 : index
    %c0_7 = arith.constant 0 : index
    %6 = vector.load %arg12[%c1, %c0_7] : memref<34x64xf32, #tpu.memory_space<vmem>>, vector<32x16xf32>
    tpu.vector_store %arg12[%c1, %c0_7], %3 {strides = array<i32>} : memref<34x64xf32, #tpu.memory_space<vmem>>, vector<32x16xf32>,
    %c0_8 = arith.constant 0 : index
    %c0_9 = arith.constant 0 : index
    %7 = vector.load %arg12[%c0_8, %c0_9] : memref<34x64xf32, #tpu.memory_space<vmem>>, vector<32x16xf32>
    %c0_10 = arith.constant 0 : index
    %c0_11 = arith.constant 0 : index
    %c0_12 = arith.constant 0 : index
    %8 = vector.load %arg3[%c0_10, %c0_11, %c0_12] : memref<3x16x64xf32, #tpu.memory_space<vmem>>, vector<1x16x64xf32>
    %9 = vector.shape_cast %8 : vector<1x16x64xf32> to vector<16x64xf32>
    %cst_13 = arith.constant dense<0.000000e+00> : vector<32x64xf32>
    %10 = tpu.matmul %7, %9, %cst_13 {dimension_numbers = #tpu.dot_dimension_numbers<[1], [0], [0], [1], [0, 0, 1, 1], [], []>} : vector<32x16xf32>, vector<16x64xf32>, vector<32x64xf32> -> vector<32x64xf32>
    %c1_14 = arith.constant 1 : index
    %c0_15 = arith.constant 0 : index
    %c0_16 = arith.constant 0 : index
    %11 = vector.load %arg3[%c1_14, %c0_15, %c0_16] : memref<3x16x64xf32, #tpu.memory_space<vmem>>, vector<1x16x64xf32>
    %12 = vector.shape_cast %11 : vector<1x16x64xf32> to vector<16x64xf32>
    %cst_17 = arith.constant dense<0.000000e+00> : vector<32x64xf32>
    %13 = tpu.matmul %1, %12, %cst_17 {dimension_numbers = #tpu.dot_dimension_numbers<[1], [0], [0], [1], [0, 0, 1, 1], [], []>} : vector<32x16xf32>, vector<16x64xf32>, vector<32x64xf32> -> vector<32x64xf32>
    %14 = arith.addf %10, %13 : vector<32x64xf32>
    %c2 = arith.constant 2 : index
    %c0_18 = arith.constant 0 : index
    %c0_19 = arith.constant 0 : index
    %15 = vector.load %arg3[%c2, %c0_18, %c0_19] : memref<3x16x64xf32, #tpu.memory_space<vmem>>, vector<1x16x64xf32>
    %16 = vector.shape_cast %15 : vector<1x16x64xf32> to vector<16x64xf32>
    %cst_20 = arith.constant dense<0.000000e+00> : vector<32x64xf32>
    %17 = tpu.matmul %3, %16, %cst_20 {dimension_numbers = #tpu.dot_dimension_numbers<[1], [0], [0], [1], [0, 0, 1, 1], [], []>} : vector<32x16xf32>, vector<16x64xf32>, vector<32x64xf32> -> vector<32x64xf32>
    %18 = arith.addf %14, %17 : vector<32x64xf32>
    %c0_21 = arith.constant 0 : index
    %c0_22 = arith.constant 0 : index
    %19 = vector.load %arg4[%c0_21, %c0_22] : memref<1x64xf32, #tpu.memory_space<vmem>>, vector<1x64xf32>
    %20 = vector.broadcast %19 : vector<1x64xf32> to vector<32x64xf32>
    %21 = arith.mulf %18, %20 : vector<32x64xf32>
    %c0_23 = arith.constant 0 : index
    %c0_24 = arith.constant 0 : index
    %22 = vector.load %arg5[%c0_23, %c0_24] : memref<1x64xf32, #tpu.memory_space<vmem>>, vector<1x64xf32>
    %23 = vector.broadcast %22 : vector<1x64xf32> to vector<32x64xf32>
    %24 = arith.addf %21, %23 : vector<32x64xf32>
    %cst_25 = arith.constant 0.000000e+00 : f32
    %25 = vector.broadcast %cst_25 : f32 to vector<32x64xf32>
    %26 = arith.maximumf %24, %25 : vector<32x64xf32>
    %cst_26 = arith.constant 0.000000e+00 : f32
    %27 = vector.broadcast %cst_26 : f32 to vector<34x64xf32>
    %c0_27 = arith.constant 0 : index
    %c0_28 = arith.constant 0 : index
    %28 = vector.load %arg12[%c0_27, %c0_28] : memref<34x64xf32, #tpu.memory_space<vmem>>, vector<34x64xf32>
    tpu.vector_store %arg12[%c0_27, %c0_28], %27 {strides = array<i32>} : memref<34x64xf32, #tpu.memory_space<vmem>>, vector<34x64xf32>,
    %c1_29 = arith.constant 1 : index
    %c0_30 = arith.constant 0 : index
    %29 = vector.load %arg12[%c1_29, %c0_30] : memref<34x64xf32, #tpu.memory_space<vmem>>, vector<32x64xf32>
    tpu.vector_store %arg12[%c1_29, %c0_30], %26 {strides = array<i32>} : memref<34x64xf32, #tpu.memory_space<vmem>>, vector<32x64xf32>,
    %c0_31 = arith.constant 0 : index
    %c0_32 = arith.constant 0 : index
    %30 = vector.load %arg12[%c0_31, %c0_32] : memref<34x64xf32, #tpu.memory_space<vmem>>, vector<32x64xf32>
    %c1_33 = arith.constant 1 : index
    %c0_34 = arith.constant 0 : index
    %31 = vector.load %arg12[%c1_33, %c0_34] : memref<34x64xf32, #tpu.memory_space<vmem>>, vector<32x64xf32>
    %c2_35 = arith.constant 2 : index
    %c0_36 = arith.constant 0 : index
    %32 = vector.load %arg12[%c2_35, %c0_36] : memref<34x64xf32, #tpu.memory_space<vmem>>, vector<32x64xf32>
    %c0_37 = arith.constant 0 : index
    %c0_38 = arith.constant 0 : index
    %c0_39 = arith.constant 0 : index
    %33 = vector.load %arg6[%c0_37, %c0_38, %c0_39] : memref<3x64x64xf32, #tpu.memory_space<vmem>>, vector<1x64x64xf32>
    %34 = vector.shape_cast %33 : vector<1x64x64xf32> to vector<64x64xf32>
    %cst_40 = arith.constant dense<0.000000e+00> : vector<32x64xf32>
    %35 = tpu.matmul %30, %34, %cst_40 {dimension_numbers = #tpu.dot_dimension_numbers<[1], [0], [0], [1], [0, 0, 1, 1], [], []>} : vector<32x64xf32>, vector<64x64xf32>, vector<32x64xf32> -> vector<32x64xf32>
    %c1_41 = arith.constant 1 : index
    %c0_42 = arith.constant 0 : index
    %c0_43 = arith.constant 0 : index
    %36 = vector.load %arg6[%c1_41, %c0_42, %c0_43] : memref<3x64x64xf32, #tpu.memory_space<vmem>>, vector<1x64x64xf32>
    %37 = vector.shape_cast %36 : vector<1x64x64xf32> to vector<64x64xf32>
    %cst_44 = arith.constant dense<0.000000e+00> : vector<32x64xf32>
    %38 = tpu.matmul %31, %37, %cst_44 {dimension_numbers = #tpu.dot_dimension_numbers<[1], [0], [0], [1], [0, 0, 1, 1], [], []>} : vector<32x64xf32>, vector<64x64xf32>, vector<32x64xf32> -> vector<32x64xf32>
    %39 = arith.addf %35, %38 : vector<32x64xf32>
    %c2_45 = arith.constant 2 : index
    %c0_46 = arith.constant 0 : index
    %c0_47 = arith.constant 0 : index
    %40 = vector.load %arg6[%c2_45, %c0_46, %c0_47] : memref<3x64x64xf32, #tpu.memory_space<vmem>>, vector<1x64x64xf32>
    %41 = vector.shape_cast %40 : vector<1x64x64xf32> to vector<64x64xf32>
    %cst_48 = arith.constant dense<0.000000e+00> : vector<32x64xf32>
    %42 = tpu.matmul %32, %41, %cst_48 {dimension_numbers = #tpu.dot_dimension_numbers<[1], [0], [0], [1], [0, 0, 1, 1], [], []>} : vector<32x64xf32>, vector<64x64xf32>, vector<32x64xf32> -> vector<32x64xf32>
    %43 = arith.addf %39, %42 : vector<32x64xf32>
    %c0_49 = arith.constant 0 : index
    %c0_50 = arith.constant 0 : index
    %44 = vector.load %arg7[%c0_49, %c0_50] : memref<1x64xf32, #tpu.memory_space<vmem>>, vector<1x64xf32>
    %45 = vector.broadcast %44 : vector<1x64xf32> to vector<32x64xf32>
    %46 = arith.mulf %43, %45 : vector<32x64xf32>
    %c0_51 = arith.constant 0 : index
    %c0_52 = arith.constant 0 : index
    %47 = vector.load %arg8[%c0_51, %c0_52] : memref<1x64xf32, #tpu.memory_space<vmem>>, vector<1x64xf32>
    %48 = vector.broadcast %47 : vector<1x64xf32> to vector<32x64xf32>
    %49 = arith.addf %46, %48 : vector<32x64xf32>
    %cst_53 = arith.constant 0.000000e+00 : f32
    %50 = vector.broadcast %cst_53 : f32 to vector<32x64xf32>
    %51 = arith.maximumf %49, %50 : vector<32x64xf32>
    %cst_54 = arith.constant dense<0.000000e+00> : vector<64xf32>
    %52 = vector.multi_reduction <add>, %51, %cst_54 [0] : vector<32x64xf32> to vector<64xf32>
    %53 = vector.shape_cast %52 : vector<64xf32> to vector<1x64xf32>
    %cst_55 = arith.constant 3.200000e+01 : f32
    %54 = vector.broadcast %cst_55 : f32 to vector<1x64xf32>
    %55 = arith.divf %53, %54 : vector<1x64xf32>
    %c0_56 = arith.constant 0 : index
    %c0_57 = arith.constant 0 : index
    %56 = vector.load %arg9[%c0_56, %c0_57] : memref<64x2xf32, #tpu.memory_space<vmem>>, vector<64x2xf32>
    %cst_58 = arith.constant dense<0.000000e+00> : vector<1x2xf32>
    %57 = tpu.matmul %55, %56, %cst_58 {dimension_numbers = #tpu.dot_dimension_numbers<[1], [0], [0], [1], [0, 0, 1, 1], [], []>} : vector<1x64xf32>, vector<64x2xf32>, vector<1x2xf32> -> vector<1x2xf32>
    %c0_59 = arith.constant 0 : index
    %c0_60 = arith.constant 0 : index
    %58 = vector.load %arg10[%c0_59, %c0_60] : memref<1x2xf32, #tpu.memory_space<vmem>>, vector<1x2xf32>
    %59 = arith.addf %57, %58 : vector<1x2xf32>
    %60 = vector.shape_cast %59 : vector<1x2xf32> to vector<1x1x2xf32>
    %c0_61 = arith.constant 0 : index
    %c0_62 = arith.constant 0 : index
    %c0_63 = arith.constant 0 : index
    %61 = vector.load %arg11[%c0_61, %c0_62, %c0_63] : memref<1x1x2xf32, #tpu.memory_space<vmem>>, vector<1x1x2xf32>
    tpu.vector_store %arg11[%c0_61, %c0_62, %c0_63], %60 {strides = array<i32>} : memref<1x1x2xf32, #tpu.memory_space<vmem>>, vector<1x1x2xf32>,
    return
  }
  func.func @transform_0(%arg0: i32) -> (i32, i32, i32) {
    %c0_i32 = arith.constant 0 : i32
    %c0_i32_0 = arith.constant 0 : i32
    %c0_i32_1 = arith.constant 0 : i32
    return %arg0, %c0_i32, %c0_i32_0 : i32, i32, i32
  }
  func.func @transform_1(%arg0: i32) -> (i32, i32, i32) {
    %c0_i32 = arith.constant 0 : i32
    %c0_i32_0 = arith.constant 0 : i32
    %c0_i32_1 = arith.constant 0 : i32
    return %arg0, %c0_i32, %c0_i32_0 : i32, i32, i32
  }
  func.func @transform_2(%arg0: i32) -> (i32, i32, i32) {
    %c0_i32 = arith.constant 0 : i32
    %c0_i32_0 = arith.constant 0 : i32
    %c0_i32_1 = arith.constant 0 : i32
    %c0_i32_2 = arith.constant 0 : i32
    return %c0_i32, %c0_i32_0, %c0_i32_1 : i32, i32, i32
  }
  func.func @transform_3(%arg0: i32) -> (i32, i32) {
    %c0_i32 = arith.constant 0 : i32
    %c0_i32_0 = arith.constant 0 : i32
    %c0_i32_1 = arith.constant 0 : i32
    return %c0_i32, %c0_i32_0 : i32, i32
  }
  func.func @transform_4(%arg0: i32) -> (i32, i32) {
    %c0_i32 = arith.constant 0 : i32
    %c0_i32_0 = arith.constant 0 : i32
    %c0_i32_1 = arith.constant 0 : i32
    return %c0_i32, %c0_i32_0 : i32, i32
  }
  func.func @transform_5(%arg0: i32) -> (i32, i32, i32) {
    %c0_i32 = arith.constant 0 : i32
    %c0_i32_0 = arith.constant 0 : i32
    %c0_i32_1 = arith.constant 0 : i32
    %c0_i32_2 = arith.constant 0 : i32
    return %c0_i32, %c0_i32_0, %c0_i32_1 : i32, i32, i32
  }
  func.func @transform_6(%arg0: i32) -> (i32, i32) {
    %c0_i32 = arith.constant 0 : i32
    %c0_i32_0 = arith.constant 0 : i32
    %c0_i32_1 = arith.constant 0 : i32
    return %c0_i32, %c0_i32_0 : i32, i32
  }
  func.func @transform_7(%arg0: i32) -> (i32, i32) {
    %c0_i32 = arith.constant 0 : i32
    %c0_i32_0 = arith.constant 0 : i32
    %c0_i32_1 = arith.constant 0 : i32
    return %c0_i32, %c0_i32_0 : i32, i32
  }
  func.func @transform_8(%arg0: i32) -> (i32, i32) {
    %c0_i32 = arith.constant 0 : i32
    %c0_i32_0 = arith.constant 0 : i32
    %c0_i32_1 = arith.constant 0 : i32
    return %c0_i32, %c0_i32_0 : i32, i32
  }
  func.func @transform_9(%arg0: i32) -> (i32, i32) {
    %c0_i32 = arith.constant 0 : i32
    %c0_i32_0 = arith.constant 0 : i32
    %c0_i32_1 = arith.constant 0 : i32
    return %c0_i32, %c0_i32_0 : i32, i32
  }
  func.func @transform_10(%arg0: i32) -> (i32, i32, i32) {
    %c0_i32 = arith.constant 0 : i32
    %c0_i32_0 = arith.constant 0 : i32
    %c0_i32_1 = arith.constant 0 : i32
    return %arg0, %c0_i32, %c0_i32_0 : i32, i32, i32
  }
}

</mosaic_0001>

<bundles_post_ra>
// kernel: _lambda_.7
= control target key start
LH: loop header
LB: loop body
LE: loop exit
PB: predicated region body
PF: predicated region fallthrough
CT: control target
= control target key end

     0   :  { %s835_s18 = smov 0   ;;  %s964_s0 = inlined_call_operand.vmem [shape: f32[2,64,7], index: 0, kind: input, shape index: {}]   ;;  %s965_s1 = inlined_call_operand.vmem [shape: f32[2,64,7], index: 1, kind: input, shape index: {}]   ;;  %s966_s2 = inlined_call_operand.vmem [shape: f32[7,16], index: 2, kind: input, shape index: {}]   ;;  %s967_s3 = inlined_call_operand.vmem [shape: f32[1,16], index: 3, kind: input, shape index: {}]   ;;  %s968_s4 = inlined_call_operand.vmem [shape: f32[1,16], index: 4, kind: input, shape index: {}]   ;;  %s969_s5 = inlined_call_operand.vmem [shape: f32[2,64,16], index: 5, kind: output, shape index: {}]  }
   0x1 LB: > { %s705_s19 = sadd.s32 4294967295, %s802_s18   ;;  %p709_p0 = scmp.ge.s32.totalorder %s802_s18, 1  ;;  %s802_s18 = sphi %s835_s18, %s15_s18  }
   0x2   : > { %p197_p1 = scmp.lt.s32.totalorder %s802_s18, 3 }
   0x4   : > { %p198_p2 = pnand %p709_p0, %p197_p1 }
   0x5   : > { %v261_v0 = vld [vmem:[%s966_s2] sm:$0x7f] (!%p198_p2)  ;;  %vm287_vm0 = vcmask (!%p198_p2), 1046528   ;;  %p230_p3 = scmp.lt.s32.totalorder (!%p198_p2), %s705_s19, 1  ;;  %vm262_vm1 = vcmask (!%p198_p2), 56320   ;;  %vm587_vm2 = vcmask (!%p198_p2), 130048  }
   0x6   : > { %201 = sbr.rel (%p198_p2) target bundleno = 263 (0x107), region = 40  ;;  %773 = vmatprep.subr.msk.mxu1 (!%p198_p2), %vm287_vm0, %v261_v0  ;;  %759 = vmatprep.subr.msk.mxu0 (!%p198_p2), %vm287_vm0, %v261_v0  ;;  %v804_v17 = vmov (!%p198_p2), 0.0   ;;  %v883_v18 = vld [vmem:[%s967_s3] ss:$0 sm:$0xff] (!%p198_p2) }
   0x7   : > { %774 = vmatpush3.msk.msra.mxu1 (!%p198_p2), %vm287_vm0, %v261_v0  ;;  %760 = vmatpush3.msk.msra.mxu0 (!%p198_p2), %vm287_vm0, %v261_v0  ;;  %589 = vst.msk [vmem:[#allocation2 + $0x8] sm:$0xff] (!%p198_p2), %vm587_vm2, %v804_v17  ;;  %590 = vst.msk [vmem:[#allocation2 + $0x10] sm:$0xff] (!%p198_p2), %vm587_vm2, %v804_v17  ;;  %v888_v19 = vld [vmem:[%s968_s4] ss:$0 sm:$0xff] (!%p198_p2) }
   0x8   : > { %588 = vst.msk [vmem:[#allocation2] sm:$0xff] (!%p198_p2), %vm587_vm2, %v804_v17  ;;  %591 = vst.msk [vmem:[#allocation2 + $0x18] sm:$0xff] (!%p198_p2), %vm587_vm2, %v804_v17 }
   0x9   : > { %592 = vst.msk [vmem:[#allocation2 + $0x20] sm:$0xff] (!%p198_p2), %vm587_vm2, %v804_v17  ;;  %593 = vst.msk [vmem:[#allocation2 + $0x28] sm:$0xff] (!%p198_p2), %vm587_vm2, %v804_v17 }
   0xa   : > { %594 = vst.msk [vmem:[#allocation2 + $0x30] sm:$0xff] (!%p198_p2), %vm587_vm2, %v804_v17  ;;  %595 = vst.msk [vmem:[#allocation2 + $0x38] sm:$0xff] (!%p198_p2), %vm587_vm2, %v804_v17 }
   0xd   : > { %s971_s19 = smov (!%p230_p3, %s705_s19), 1 }
   0xe   : > { %s846_s22 = sshll.u32 %s971_s19, 6 }
   0xf   : > { %s239_s25 = scalar_lea.vmem %s965_s1, %s846_s22  ;;  %s234_s28 = scalar_lea.vmem %s964_s0, %s846_s22 }
  0x10   : > { %v253_v1 = vld [vmem:[%s239_s25] sm:$0xff]  ;;  %v254_v2 = vld [vmem:[%s239_s25 + $0x8] sm:$0xff]  ;;  %v255_v3 = vld [vmem:[%s239_s25 + $0x10] sm:$0xff]  ;;  %s939_s10 = scalar_lea.vmem %s969_s5, %s846_s22 }
  0x11   : > { %775 = vmatprep.mubr.msk.f32.mxu1 %vm262_vm1, %v253_v1  ;;  %v245_v4 = vld [vmem:[%s234_s28] sm:$0xff]  ;;  %v246_v5 = vld [vmem:[%s234_s28 + $0x8] sm:$0xff]  ;;  %v247_v6 = vld [vmem:[%s234_s28 + $0x10] sm:$0xff] }
  0x12   : > { %776 = vmatmul.mubr.msk.f32.vlgmr.msra.gmra.mrb[0].mxu1 %vm262_vm1, %v254_v2  ;;  %761 = vmatprep.mubr.msk.f32.mxu0 %vm262_vm1, %v245_v4  ;;  %v256_v7 = vld [vmem:[%s239_s25 + $0x18] sm:$0xff]  ;;  %v257_v8 = vld [vmem:[%s239_s25 + $0x20] sm:$0xff]  ;;  %v258_v11 = vld [vmem:[%s239_s25 + $0x28] sm:$0xff] }
  0x13   : > { %778 = vmatprep.mubr.msk.f32.mxu1 %vm262_vm1, %v255_v3  ;;  %762 = vmatmul.mubr.msk.f32.vlgmr.msra.gmra.mrb[0].mxu0 %vm262_vm1, %v246_v5  ;;  %v248_v9 = vld [vmem:[%s234_s28 + $0x18] sm:$0xff]  ;;  %v249_v10 = vld [vmem:[%s234_s28 + $0x20] sm:$0xff]  ;;  %v259_v12 = vld [vmem:[%s239_s25 + $0x30] sm:$0xff] }
  0x14   : > { %764 = vmatprep.mubr.msk.f32.mxu0 %vm262_vm1, %v247_v6  ;;  %v250_v13 = vld [vmem:[%s234_s28 + $0x28] sm:$0xff]  ;;  %v251_v14 = vld [vmem:[%s234_s28 + $0x30] sm:$0xff]  ;;  %v260_v15 = vld [vmem:[%s239_s25 + $0x38] sm:$0xff] }
  0x15   : > { %v252_v16 = vld [vmem:[%s234_s28 + $0x38] sm:$0xff] }
  0x16   : > { %779 = vmatmul.mubr.msk.f32.gmra.mrb[2].mxu1 %vm262_vm1, %v256_v7 }
  0x17   : > { %781 = vmatprep.mubr.msk.f32.mxu1 %vm262_vm1, %v257_v8  ;;  %765 = vmatmul.mubr.msk.f32.gmra.mrb[2].mxu0 %vm262_vm1, %v248_v9 }
  0x18   : > { %767 = vmatprep.mubr.msk.f32.mxu0 %vm262_vm1, %v249_v10 }
  0x1a   : > { %782 = vmatmul.mubr.msk.f32.gmra.mrb[4].mxu1 %vm262_vm1, %v258_v11 }
  0x1b   : > { %784 = vmatprep.mubr.msk.f32.mxu1 %vm262_vm1, %v259_v12  ;;  %768 = vmatmul.mubr.msk.f32.gmra.mrb[4].mxu0 %vm262_vm1, %v250_v13 }
  0x1c   : > { %770 = vmatprep.mubr.msk.f32.mxu0 %vm262_vm1, %v251_v14 }
  0x1e   : > { %785 = vmatmul.mubr.msk.f32.gmra.mrb[6].mxu1 %vm262_vm1, %v260_v15 }
  0x1f   : > { %771 = vmatmul.mubr.msk.f32.gmra.mrb[6].mxu0 %vm262_vm1, %v252_v16 }
  0xe5   : > { %v777_v20 = vpop.f32.mrb[0].mxu1 }
  0xe6   : > { %v564_v21 = vmul.f32 %v777_v20, %v883_v18  ;;  %v524_v22 = vpop.f32.mrb[1].mxu1  ;;  %v763_v23 = vpop.f32.mrb[0].mxu0 }
  0xe7   : > { %v563_v24 = vmul.f32 %v883_v18, %v524_v22  ;;  %v357_v25 = vpop.f32.mrb[1].mxu0  ;;  %v404_v29 = vmul.f32 %v763_v23, %v883_v18 }
  0xe8   : > { %v893_v26 = vadd.f32 %v888_v19, %v564_v21  ;;  %v403_v30 = vmul.f32 %v883_v18, %v357_v25 }
  0xe9   : > { %v896_v27 = vadd.f32 %v888_v19, %v563_v24  ;;  %v780_v28 = vpop.f32.mrb[2].mxu1  ;;  %v419_v42 = vadd.f32 %v888_v19, %v404_v29 }
  0xea   : > { %v580_v31 = vmax.f32 %v893_v26, 0.0  ;;  %v566_v32 = vmul.f32 %v780_v28, %v883_v18  ;;  %v534_v33 = vpop.f32.mrb[3].mxu1  ;;  %v766_v34 = vpop.f32.mrb[2].mxu0  ;;  %v418_v43 = vadd.f32 %v888_v19, %v403_v30 }
  0xeb   : > { %v579_v35 = vmax.f32 %v896_v27, 0.0  ;;  %v565_v36 = vmul.f32 %v883_v18, %v534_v33  ;;  %v406_v37 = vmul.f32 %v766_v34, %v883_v18  ;;  %v367_v38 = vpop.f32.mrb[3].mxu0  ;;  %v427_v57 = vmax.f32 %v419_v42, 0.0 }
  0xec   : > { %599 = vst.msk [vmem:[#allocation2 + $0x9] sm:$0xff] %vm587_vm2, %v580_v31  ;;  %v907_v39 = vadd.f32 %v888_v19, %v566_v32  ;;  %v405_v40 = vmul.f32 %v883_v18, %v367_v38  ;;  %v426_v58 = vmax.f32 %v418_v43, 0.0 }
  0xed   : > { %598 = vst.msk [vmem:[#allocation2 + $0x1] sm:$0xff] %vm587_vm2, %v579_v35  ;;  %v573_v41 = vadd.f32 %v888_v19, %v565_v36  ;;  %v783_v44 = vpop.f32.mrb[4].mxu1  ;;  %v421_v51 = vadd.f32 %v888_v19, %v406_v37 }
  0xee   : > { %v582_v45 = vmax.f32 %v907_v39, 0.0  ;;  %v568_v46 = vmul.f32 %v783_v44, %v883_v18  ;;  %v544_v47 = vpop.f32.mrb[5].mxu1  ;;  %v769_v48 = vpop.f32.mrb[4].mxu0  ;;  %v420_v52 = vadd.f32 %v888_v19, %v405_v40 }
  0xef   : > { %v581_v49 = vmax.f32 %v573_v41, 0.0  ;;  %v567_v50 = vmul.f32 %v883_v18, %v544_v47  ;;  %v377_v53 = vpop.f32.mrb[5].mxu0  ;;  %v408_v55 = vmul.f32 %v769_v48, %v883_v18  ;;  %v429_v2 = vmax.f32 %v421_v51, 0.0 }
  0xf0   : > { %601 = vst.msk [vmem:[#allocation2 + $0x19] sm:$0xff] %vm587_vm2, %v582_v45  ;;  %v576_v54 = vadd.f32 %v888_v19, %v568_v46  ;;  %v407_v56 = vmul.f32 %v883_v18, %v377_v53  ;;  %v428_v3 = vmax.f32 %v420_v52, 0.0 }
  0xf1   : > { %600 = vst.msk [vmem:[#allocation2 + $0x11] sm:$0xff] %vm587_vm2, %v581_v49  ;;  %v575_v59 = vadd.f32 %v888_v19, %v567_v50  ;;  %v786_v60 = vpop.f32.mrb[6].mxu1  ;;  %v423_v9 = vadd.f32 %v888_v19, %v408_v55 }
  0xf2   : > { %v584_v61 = vmax.f32 %v576_v54, 0.0  ;;  %v570_v62 = vmul.f32 %v786_v60, %v883_v18  ;;  %v554_v63 = vpop.f32.mrb[7].mxu1  ;;  %v772_v0 = vpop.f32.mrb[6].mxu0  ;;  %v422_v10 = vadd.f32 %v888_v19, %v407_v56 }
  0xf3   : > { %v583_v1 = vmax.f32 %v575_v59, 0.0  ;;  %v569_v4 = vmul.f32 %v883_v18, %v554_v63  ;;  %v387_v5 = vpop.f32.mrb[7].mxu0  ;;  %v410_v11 = vmul.f32 %v772_v0, %v883_v18  ;;  %v431_v24 = vmax.f32 %v423_v9, 0.0 }
  0xf4   : > { %v607_v6 = vld [vmem:[#allocation2 + $0x8] sm:$0xff]  ;;  %v606_v7 = vld [vmem:[#allocation2] sm:$0xff]  ;;  %603 = vst.msk [vmem:[#allocation2 + $0x29] sm:$0xff] %vm587_vm2, %v584_v61  ;;  %v578_v8 = vadd.f32 %v888_v19, %v570_v62  ;;  %v409_v15 = vmul.f32 %v883_v18, %v387_v5  ;;  %v430_v25 = vmax.f32 %v422_v10, 0.0 }
  0xf5   : > { %v615_v12 = vmax.f32 %v607_v6, %v427_v57  ;;  %v614_v13 = vmax.f32 %v606_v7, %v426_v58  ;;  %602 = vst.msk [vmem:[#allocation2 + $0x21] sm:$0xff] %vm587_vm2, %v583_v1  ;;  %v577_v14 = vadd.f32 %v888_v19, %v569_v4  ;;  %v425_v27 = vadd.f32 %v888_v19, %v410_v11 }
  0xf6   : > { %v586_v16 = vmax.f32 %v578_v8, 0.0  ;;  %v424_v28 = vadd.f32 %v888_v19, %v409_v15 }
  0xf7   : > { %v623_v17 = vmax.f32 %v615_v12, %v580_v31  ;;  %v622_v20 = vmax.f32 %v614_v13, %v579_v35  ;;  %v585_v21 = vmax.f32 %v577_v14, 0.0  ;;  %v433_v35 = vmax.f32 %v425_v27, 0.0 }
  0xf8   : > { %v609_v22 = vld [vmem:[#allocation2 + $0x18] sm:$0xff]  ;;  %v608_v23 = vld [vmem:[#allocation2 + $0x10] sm:$0xff]  ;;  %605 = vst.msk [vmem:[#allocation2 + $0x39] sm:$0xff] %vm587_vm2, %v586_v16  ;;  %v432_v36 = vmax.f32 %v424_v28, 0.0 }
  0xf9   : > { %631 = vst.msk [vmem:[%s939_s10 + $0x8] sm:$0xff] %vm587_vm2, %v623_v17  ;;  %630 = vst.msk [vmem:[%s939_s10] sm:$0xff] %vm587_vm2, %v622_v20  ;;  %v617_v18 = vmax.f32 %v609_v22, %v429_v2  ;;  %v616_v26 = vmax.f32 %v608_v23, %v428_v3 }
  0xfa   : > { %604 = vst.msk [vmem:[#allocation2 + $0x31] sm:$0xff] %vm587_vm2, %v585_v21 }
  0xfb   : > { %v625_v29 = vmax.f32 %v617_v18, %v582_v45  ;;  %v624_v30 = vmax.f32 %v616_v26, %v581_v49 }
  0xfc   : > { %v611_v31 = vld [vmem:[#allocation2 + $0x28] sm:$0xff]  ;;  %v610_v32 = vld [vmem:[#allocation2 + $0x20] sm:$0xff] }
  0xfd   : > { %633 = vst.msk [vmem:[%s939_s10 + $0x18] sm:$0xff] %vm587_vm2, %v625_v29  ;;  %632 = vst.msk [vmem:[%s939_s10 + $0x10] sm:$0xff] %vm587_vm2, %v624_v30  ;;  %v619_v33 = vmax.f32 %v611_v31, %v431_v24  ;;  %v618_v34 = vmax.f32 %v610_v32, %v430_v25 }
  0xff   : > { %v627_v37 = vmax.f32 %v619_v33, %v584_v61  ;;  %v626_v38 = vmax.f32 %v618_v34, %v583_v1 }
 0x101   : > { %v613_v39 = vld [vmem:[#allocation2 + $0x38] sm:$0xff]  ;;  %v612_v40 = vld [vmem:[#allocation2 + $0x30] sm:$0xff]  ;;  %635 = vst.msk [vmem:[%s939_s10 + $0x28] sm:$0xff] %vm587_vm2, %v627_v37  ;;  %634 = vst.msk [vmem:[%s939_s10 + $0x20] sm:$0xff] %vm587_vm2, %v626_v38 }
 0x102   : > { %v621_v19 = vmax.f32 %v613_v39, %v433_v35  ;;  %v620_v41 = vmax.f32 %v612_v40, %v432_v36 }
 0x104   : > { %v629_v42 = vmax.f32 %v621_v19, %v586_v16  ;;  %v628_v43 = vmax.f32 %v620_v41, %v585_v21 }
 0x106   : > { %637 = vst.msk [vmem:[%s939_s10 + $0x38] sm:$0xff] %vm587_vm2, %v629_v42  ;;  %636 = vst.msk [vmem:[%s939_s10 + $0x30] sm:$0xff] %vm587_vm2, %v628_v43 }
 0x107 PF: > { %s15_s18 = sadd.s32 1, %s802_s18  }
 0x108   : > { %p12_p4 = scmp.ge.s32.totalorder %s15_s18, 4  }
 0x10a   :  { %14 = sbr.rel (!%p12_p4) target bundleno = 1 (0x1), region = 73 }

// kernel: _lambda_.9
= control target key start
LH: loop header
LB: loop body
LE: loop exit
PB: predicated region body
PF: predicated region fallthrough
CT: control target
= control target key end

     0   :  { %s2148_s29 = smov 0   ;;  %s2405_s0 = inlined_call_operand.vmem [shape: f32[2,32,16], index: 0, kind: input, shape index: {}]   ;;  %s2406_s1 = inlined_call_operand.vmem [shape: f32[16,32], index: 1, kind: input, shape index: {}]   ;;  %s2407_s2 = inlined_call_operand.vmem [shape: f32[1,32], index: 2, kind: input, shape index: {}, may-alias: {2,5,8,11,13,16,23}]   ;;  %s2408_s3 = inlined_call_operand.vmem [shape: f32[1,32], index: 3, kind: input, shape index: {}, may-alias: {3,6,9,12,14,24}]   ;;  %s2409_s4 = inlined_call_operand.vmem [shape: f32[5,32], index: 4, kind: input, shape index: {}]   ;;  %s2410_s5 = inlined_call_operand.vmem [shape: f32[1,32], index: 5, kind: input, shape index: {}, may-alias: {2,5,8,11,13,16,23}]   ;;  %s2411_s6 = inlined_call_operand.vmem [shape: f32[1,32], index: 6, kind: input, shape index: {}, may-alias: {3,6,9,12,14,24}]   ;;  %s2412_s7 = inlined_call_operand.vmem [shape: f32[7,32], index: 7, kind: input, shape index: {}]   ;;  %s2413_s8 = inlined_call_operand.vmem [shape: f32[1,32], index: 8, kind: input, shape index: {}, may-alias: {2,5,8,11,13,16,23}]   ;;  %s2414_s9 = inlined_call_operand.vmem [shape: f32[1,32], index: 9, kind: input, shape index: {}, may-alias: {3,6,9,12,14,24}]   ;;  %s2415_s10 = inlined_call_operand.vmem [shape: f32[32,32], index: 10, kind: input, shape index: {}]   ;;  %s2416_s11 = inlined_call_operand.vmem [shape: f32[1,32], index: 11, kind: input, shape index: {}, may-alias: {2,5,8,11,13,16,23}]   ;;  %s2417_s12 = inlined_call_operand.vmem [shape: f32[1,32], index: 12, kind: input, shape index: {}, may-alias: {3,6,9,12,14,24}]   ;;  %s2418_s13 = inlined_call_operand.vmem [shape: f32[1,32], index: 13, kind: input, shape index: {}, may-alias: {2,5,8,11,13,16,23}]   ;;  %s2419_s14 = inlined_call_operand.vmem [shape: f32[1,32], index: 14, kind: input, shape index: {}, may-alias: {3,6,9,12,14,24}]   ;;  %s2420_s15 = inlined_call_operand.vmem [shape: f32[32,32], index: 15, kind: input, shape index: {}]   ;;  %s2421_s16 = inlined_call_operand.vmem [shape: f32[1,32], index: 16, kind: input, shape index: {}, may-alias: {2,5,8,11,13,16,23}]   ;;  %s2422_s17 = inlined_call_operand.vmem [shape: f32[1,32], index: 17, kind: input, shape index: {}]   ;;  %s2423_s18 = inlined_call_operand.vmem [shape: f32[32,8], index: 18, kind: input, shape index: {}]   ;;  %s2424_s19 = inlined_call_operand.vmem [shape: f32[1,8], index: 19, kind: input, shape index: {}]   ;;  %s2425_s20 = inlined_call_operand.vmem [shape: f32[8,32], index: 20, kind: input, shape index: {}]   ;;  %s2426_s21 = inlined_call_operand.vmem [shape: f32[1,32], index: 21, kind: input, shape index: {}]   ;;  %s2427_s22 = inlined_call_operand.vmem [shape: f32[16,32], index: 22, kind: input, shape index: {}]   ;;  %s2428_s23 = inlined_call_operand.vmem [shape: f32[1,32], index: 23, kind: input, shape index: {}, may-alias: {2,5,8,11,13,16,23}]   ;;  %s2429_s24 = inlined_call_operand.vmem [shape: f32[1,32], index: 24, kind: input, shape index: {}, may-alias: {3,6,9,12,14,24}]   ;;  %s2430_s25 = inlined_call_operand.vmem [shape: f32[2,32,32], index: 25, kind: output, shape index: {}]  }
   0x1   :  { %2434 = sst [smem:[#allocation3_spill]] %s2405_s0 }
   0x2   :  { %2435 = sst [smem:[#allocation4_spill]] %s2406_s1 }
   0x3   :  { %2436 = sst [smem:[#allocation5_spill]] %s2407_s2 }
   0x4   :  { %2437 = sst [smem:[#allocation6_spill]] %s2408_s3 }
   0x5   :  { %2438 = sst [smem:[#allocation7_spill]] %s2409_s4 }
   0x6   :  { %2439 = sst [smem:[#allocation8_spill]] %s2410_s5 }
   0x7   :  { %2440 = sst [smem:[#allocation9_spill]] %s2411_s6 }
   0x8   :  { %2441 = sst [smem:[#allocation10_spill]] %s2412_s7 }
   0x9   :  { %2442 = sst [smem:[#allocation11_spill]] %s2413_s8 }
   0xa   :  { %2443 = sst [smem:[#allocation12_spill]] %s2414_s9 }
   0xb LB: > { %s1806_s2 = sadd.s32 4294967295, %s2013_s29   ;;  %p1810_p0 = scmp.ge.s32.totalorder %s2013_s29, 1  ;;  %s2013_s29 = sphi %s2148_s29, %s35_s29  }
   0xc   : > { %p687_p1 = scmp.lt.s32.totalorder %s2013_s29, 3 }
   0xe   : > { %p688_p2 = pnand %p1810_p0, %p687_p1 }
   0xf   : > { %s2444_s7 = sld [smem:[#allocation4_spill]] (!%p688_p2)  ;;  %p755_p3 = scmp.lt.s32.totalorder (!%p688_p2), %s1806_s2, 1  ;;  %vm771_vm0 = vcmask (!%p688_p2), 130048   ;;  %vm1004_vm1 = vcmask (!%p688_p2), 261120   ;;  %v2015_v7 = vmov (!%p688_p2), 0.0   ;;  %vm1009_vm2 = vcmask (!%p688_p2), 257024  }
  0x10   : > { %691 = sbr.rel (%p688_p2) target bundleno = 1242 (0x4da), region = 120  ;;  %s2445_s4 = sld [smem:[#allocation3_spill]] (!%p688_p2)  ;;  %1006 = vst.msk [vmem:[#allocation2 + $0x8] sm:$0xff] (!%p688_p2), %vm1004_vm1, %v2015_v7  ;;  %1007 = vst.msk [vmem:[#allocation2 + $0x10] sm:$0xff] (!%p688_p2), %vm1004_vm1, %v2015_v7  ;;  %v769_v8 = vld [vmem:[%s2427_s22] sm:$0xff] (!%p688_p2)  ;;  %v770_v9 = vld [vmem:[%s2427_s22 + $0x8] sm:$0xff] (!%p688_p2) }
  0x11   : > { %1005 = vst.msk [vmem:[#allocation2] sm:$0xff] (!%p688_p2), %vm1004_vm1, %v2015_v7  ;;  %1008 = vst.msk [vmem:[#allocation2 + $0x18] sm:$0xff] (!%p688_p2), %vm1004_vm1, %v2015_v7  ;;  %v1275_v10 = vld [vmem:[%s2415_s10] sm:$0xff] (!%p688_p2)  ;;  %v1962_v11 = vpack.c.bf16 (!%p688_p2), %v770_v9, %v769_v8  ;;  %v1276_v12 = vld [vmem:[%s2415_s10 + $0x8] sm:$0xff] (!%p688_p2)  ;;  %vm1128_vm3 = vcmask (!%p688_p2), 254976   ;;  %s2446_s6 = sld [smem:[#allocation5_spill]] (!%p688_p2) }
  0x12   : > { %1127 = vst.msk [vmem:[#allocation2 + $0x28] sm:$0xff] (!%p688_p2), %vm1004_vm1, %v2015_v7  ;;  %v1970_v13 = vpack.c.bf16 (!%p688_p2), %v1276_v12, %v1275_v10  ;;  %v1277_v14 = vld [vmem:[%s2415_s10 + $0x10] sm:$0xff] (!%p688_p2)  ;;  %v1278_v15 = vld [vmem:[%s2415_s10 + $0x18] sm:$0xff] (!%p688_p2)  ;;  %s2447_s26 = sld [smem:[#allocation6_spill]] (!%p688_p2)  ;;  %s2450_s0 = sld [smem:[#allocation9_spill]] (!%p688_p2)  ;;  %vm2017_vm4 = vmmov (!%p688_p2), 0  }
  0x13   : > { %1010 = vst.msk [vmem:[#allocation2 + $0x20] sm:$0xf] (!%p688_p2), %vm1009_vm2, %v2015_v7  ;;  %1963 = vmatprep.subr.bf16.mxu0 (!%p688_p2), %v1962_v11  ;;  %v1974_v16 = vpack.c.bf16 (!%p688_p2), %v1278_v15, %v1277_v14  ;;  %s2451_s3 = sld [smem:[#allocation10_spill]] (!%p688_p2)  ;;  %s2452_s5 = sld [smem:[#allocation11_spill]] (!%p688_p2)  ;;  %vm1651_vm5 = vcmask (!%p688_p2), 64512  }
  0x14   : > { %1965 = vmatpush3.bf16.msra.mxu0 (!%p688_p2), %v1962_v11  ;;  %1129 = vst.msk [vmem:[#allocation2 + $0x30] sm:$0x3] (!%p688_p2), %vm1128_vm3, %v2015_v7  ;;  %s2453_s30 = sld [smem:[#allocation12_spill]] (!%p688_p2) }
  0x15   : > { %v891_v0 = vld [vmem:[%s2444_s7] sm:$0xff] (!%p688_p2)  ;;  %v892_v1 = vld [vmem:[%s2444_s7 + $0x8] sm:$0xff] (!%p688_p2)  ;;  %1971 = vmatprep.subr.bf16.mxu0 (!%p688_p2), %v1970_v13 }
  0x16   : > { %v1966_v2 = vpack.c.bf16 (!%p688_p2), %v892_v1, %v891_v0 }
  0x17   : > { %s2455_s2 = smov (!%p755_p3, %s1806_s2), 1  ;;  %v1825_v17 = vld [vmem:[%s2446_s6] ss:$0 sm:$0xff] }
  0x18   : > { %1967 = vmatprep.subr.bf16.mxu1 %v1966_v2  ;;  %s1861_s1 = sshll.u32 %s2455_s2, 5  ;;  %v1826_v19 = vld [vmem:[%s2447_s26] ss:$0 sm:$0xff] }
  0x19   : > { %1969 = vmatpush3.bf16.msra.mxu1 %v1966_v2  ;;  %s759_s28 = scalar_lea.vmem %s2445_s4, %s1861_s1  ;;  %s2448_s4 = sld [smem:[#allocation7_spill]] }
  0x1a   : > { %v765_v3 = vld [vmem:[%s759_s28] sm:$0xff]  ;;  %v766_v4 = vld [vmem:[%s759_s28 + $0x8] sm:$0xff]  ;;  %v767_v5 = vld [vmem:[%s759_s28 + $0x10] sm:$0xff]  ;;  %s764_s9 = scalar_lea.vmem %s2430_s25, %s1861_s1 }
  0x1b   : > { %1912 = vmatprep.mubr.msk.f32.mxu1 %vm771_vm0, %v765_v3  ;;  %1902 = vmatprep.mubr.msk.f32.mxu0 %vm771_vm0, %v765_v3  ;;  %v768_v6 = vld [vmem:[%s759_s28 + $0x18] sm:$0xff]  ;;  %s2449_s28 = sld [smem:[#allocation8_spill]] }
  0x1c   : > { %1913 = vmatmul.mubr.msk.f32.vlgmr.msra.gmra.mrb[0].mxu1 %vm771_vm0, %v766_v4  ;;  %1903 = vmatmul.mubr.msk.f32.vlgmr.msra.gmra.mrb[0].mxu0 %vm771_vm0, %v766_v4 }
  0x1d   : > { %1915 = vmatprep.mubr.msk.f32.mxu1 %vm771_vm0, %v767_v5  ;;  %1973 = vmatpush3.bf16.msra.mxu0 %v1970_v13 }
  0x1e   : > { %1905 = vmatprep.mubr.msk.f32.mxu0 %vm771_vm0, %v767_v5  ;;  %1975 = vmatprep.subr.bf16.mxu0 %v1974_v16 }
  0x1f   : > { %v1827_v35 = vld [vmem:[%s2448_s4] ss:$0 sm:$0xff]  ;;  %v1828_v36 = vld [vmem:[%s2448_s4 + $0x1] ss:$0 sm:$0xff]  ;;  %v1829_v38 = vld [vmem:[%s2448_s4 + $0x2] ss:$0 sm:$0xff] }
  0x20   : > { %1916 = vmatmul.mubr.msk.f32.gmra.mrb[2].mxu1 %vm771_vm0, %v768_v6  ;;  %1906 = vmatmul.mubr.msk.f32.gmra.mrb[2].mxu0 %vm771_vm0, %v768_v6  ;;  %v1830_v39 = vld [vmem:[%s2448_s4 + $0x3] ss:$0 sm:$0xff]  ;;  %v1831_v51 = vld [vmem:[%s2448_s4 + $0x4] ss:$0 sm:$0xff] }
  0x21   : > { %1977 = vmatpush3.bf16.msra.mxu0 %v1974_v16 }
  0xef   : > { %v1914_v18 = vpop.f32.mrb[0].mxu1 }
  0xf0   : > { %v986_v20 = vmul.f32 %v1914_v18, %v1825_v17  ;;  %v959_v21 = vpop.f32.mrb[1].mxu1 }
  0xf1   : > { %v985_v22 = vmul.f32 %v1825_v17, %v959_v21 }
  0xf2   : > { %v2214_v23 = vadd.f32 %v1826_v19, %v986_v20 }
  0xf3   : > { %v2216_v24 = vadd.f32 %v1826_v19, %v985_v22  ;;  %v1917_v25 = vpop.f32.mrb[2].mxu1 }
  0xf4   : > { %v1001_v26 = vmax.f32 %v2214_v23, 0.0  ;;  %v988_v27 = vmul.f32 %v1917_v25, %v1825_v17  ;;  %v969_v28 = vpop.f32.mrb[3].mxu1 }
  0xf5   : > { %v1000_v29 = vmax.f32 %v2216_v24, 0.0  ;;  %v987_v30 = vmul.f32 %v1825_v17, %v969_v28  ;;  %v1832_v17 = vld [vmem:[%s2449_s28] ss:$0 sm:$0xff] }
  0xf6   : > { %1012 = vst.msk [vmem:[#allocation2 + $0xa] sm:$0xff] %vm1004_vm1, %v1001_v26  ;;  %v2223_v31 = vadd.f32 %v1826_v19, %v988_v27  ;;  %v1833_v28 = vld [vmem:[%s2450_s0] ss:$0 sm:$0xff] }
  0xf7   : > { %1011 = vst.msk [vmem:[#allocation2 + $0x2] sm:$0xff] %vm1004_vm1, %v1000_v29  ;;  %v2228_v32 = vadd.f32 %v1826_v19, %v987_v30 }
  0xf8   : > { %v1003_v33 = vmax.f32 %v2223_v31, 0.0  ;;  %v1570_v31 = vld [vmem:[%s2423_s18] sm:$0xff] }
  0xf9   : > { %v1002_v34 = vmax.f32 %v2228_v32, 0.0  ;;  %v1571_v32 = vld [vmem:[%s2423_s18 + $0x8] sm:$0xff] }
  0xfa   : > { %1014 = vst.msk [vmem:[#allocation2 + $0x1a] sm:$0xff] %vm1004_vm1, %v1003_v33 }
  0xfb   : > { %1013 = vst.msk [vmem:[#allocation2 + $0x12] sm:$0xff] %vm1004_vm1, %v1002_v34 }
  0xfd   : > { %v1024_v37 = vld [vmem:[#allocation2 + $0xa] sm:$0xff] }
  0xfe   : > { %v1015_v40 = vld [vmem:[#allocation2] sm:$0xff]  ;;  %v1016_v41 = vld [vmem:[#allocation2 + $0x8] sm:$0xff]  ;;  %v1063_v57 = vmul.f32 %v1829_v38, %v1024_v37 }
  0xff   : > { %v1019_v42 = vld [vmem:[#allocation2 + $0x1] sm:$0xff]  ;;  %v1020_v43 = vld [vmem:[#allocation2 + $0x9] sm:$0xff]  ;;  %v1040_v46 = vmul.f32 %v1827_v35, %v1015_v40  ;;  %v1041_v47 = vmul.f32 %v1827_v35, %v1016_v41 }
 0x100   : > { %v1023_v44 = vld [vmem:[#allocation2 + $0x2] sm:$0xff]  ;;  %v1049_v48 = vmul.f32 %v1828_v36, %v1019_v42  ;;  %v1050_v50 = vmul.f32 %v1828_v36, %v1020_v43 }
 0x101   : > { %v1027_v45 = vld [vmem:[#allocation2 + $0x3] sm:$0xff]  ;;  %v1062_v53 = vmul.f32 %v1829_v38, %v1023_v44  ;;  %v1026_v54 = vld [vmem:[#allocation2 + $0x1a] sm:$0xff] }
 0x102   : > { %v1031_v49 = vld [vmem:[#allocation2 + $0x4] sm:$0xff]  ;;  %v1053_v52 = vadd.f32 %v1049_v48, %v1040_v46  ;;  %v1030_v55 = vld [vmem:[#allocation2 + $0x1b] sm:$0xff]  ;;  %v1054_v58 = vadd.f32 %v1050_v50, %v1041_v47  ;;  %v1075_v59 = vmul.f32 %v1830_v39, %v1027_v45  ;;  %v1017_v60 = vld [vmem:[#allocation2 + $0x10] sm:$0xff]  ;;  %v1065_v18 = vmul.f32 %v1829_v38, %v1026_v54 }
 0x103   : > { %1122 = vst.msk [vmem:[#allocation2] sm:$0xff] %vm1004_vm1, %v2015_v7  ;;  %v1034_v56 = vld [vmem:[#allocation2 + $0x1c] sm:$0xff]  ;;  %v1021_v62 = vld [vmem:[#allocation2 + $0x11] sm:$0xff]  ;;  %v1042_v3 = vmul.f32 %v1827_v35, %v1017_v60  ;;  %v1088_v14 = vmul.f32 %v1831_v51, %v1031_v49  ;;  %v1078_v30 = vmul.f32 %v1830_v39, %v1030_v55 }
 0x104   : > { %v1018_v61 = vld [vmem:[#allocation2 + $0x18] sm:$0xff]  ;;  %v1066_v63 = vadd.f32 %v1062_v53, %v1053_v52  ;;  %v1028_v2 = vld [vmem:[#allocation2 + $0xb] sm:$0xff]  ;;  %v1051_v5 = vmul.f32 %v1828_v36, %v1021_v62  ;;  %v1067_v6 = vadd.f32 %v1063_v57, %v1054_v58  ;;  %v1091_v42 = vmul.f32 %v1831_v51, %v1034_v56  ;;  %v1835_v56 = vld [vmem:[%s2451_s3 + $0x1] ss:$0 sm:$0xff] }
 0x105   : > { %v1022_v0 = vld [vmem:[#allocation2 + $0x19] sm:$0xff]  ;;  %v1043_v4 = vmul.f32 %v1827_v35, %v1018_v61  ;;  %v1032_v9 = vld [vmem:[#allocation2 + $0xc] sm:$0xff]  ;;  %v1076_v12 = vmul.f32 %v1830_v39, %v1028_v2 }
 0x106   : > { %v1025_v1 = vld [vmem:[#allocation2 + $0x12] sm:$0xff]  ;;  %v1052_v11 = vmul.f32 %v1828_v36, %v1022_v0  ;;  %1126 = vst.msk [vmem:[#allocation2 + $0x20] sm:$0xff] %vm1004_vm1, %v2015_v7  ;;  %v1079_v13 = vadd.f32 %v1075_v59, %v1066_v63  ;;  %v1055_v15 = vadd.f32 %v1051_v5, %v1042_v3  ;;  %1123 = vst.msk [vmem:[#allocation2 + $0x8] sm:$0xff] %vm1004_vm1, %v2015_v7  ;;  %v1836_v59 = vld [vmem:[%s2451_s3 + $0x2] ss:$0 sm:$0xff] }
 0x107   : > { %v1029_v8 = vld [vmem:[#allocation2 + $0x13] sm:$0xff]  ;;  %v1064_v16 = vmul.f32 %v1829_v38, %v1025_v1  ;;  %v1080_v20 = vadd.f32 %v1076_v12, %v1067_v6  ;;  %v1089_v21 = vmul.f32 %v1831_v51, %v1032_v9  ;;  %v1837_v5 = vld [vmem:[%s2451_s3 + $0x3] ss:$0 sm:$0xff] }
 0x108   : > { %v1033_v10 = vld [vmem:[#allocation2 + $0x14] sm:$0xff]  ;;  %v1056_v19 = vadd.f32 %v1052_v11, %v1043_v4  ;;  %v1092_v22 = vadd.f32 %v1088_v14, %v1079_v13  ;;  %v1077_v27 = vmul.f32 %v1830_v39, %v1029_v8 }
 0x109   : > { %1124 = vst.msk [vmem:[#allocation2 + $0x10] sm:$0xff] %vm1004_vm1, %v2015_v7  ;;  %1125 = vst.msk [vmem:[#allocation2 + $0x18] sm:$0xff] %vm1004_vm1, %v2015_v7  ;;  %v1068_v25 = vadd.f32 %v1064_v16, %v1055_v15  ;;  %v1093_v36 = vadd.f32 %v1089_v21, %v1080_v20  ;;  %v1090_v41 = vmul.f32 %v1831_v51, %v1033_v10  ;;  %v1834_v51 = vld [vmem:[%s2451_s3] ss:$0 sm:$0xff]  ;;  %v1838_v15 = vld [vmem:[%s2451_s3 + $0x4] ss:$0 sm:$0xff] }
 0x10a   : > { %v1069_v35 = vadd.f32 %v1065_v18, %v1056_v19  ;;  %v1103_v37 = vmul.f32 %v1832_v17, %v1092_v22  ;;  %v1134_v57 = vld [vmem:[#allocation2] sm:$0xff] }
 0x10b   : > { %v1081_v40 = vadd.f32 %v1077_v27, %v1068_v25  ;;  %v1104_v44 = vmul.f32 %v1832_v17, %v1093_v36  ;;  %v1167_v58 = vmul.f32 %v1834_v51, %v1134_v57  ;;  %v1839_v27 = vld [vmem:[%s2451_s3 + $0x5] ss:$0 sm:$0xff] }
 0x10c   : > { %v1082_v43 = vadd.f32 %v1078_v30, %v1069_v35  ;;  %v1114_v38 = vadd.f32 %v1833_v28, %v1103_v37 }
 0x10d   : > { %v1094_v45 = vadd.f32 %v1090_v41, %v1081_v40  ;;  %v1115_v47 = vadd.f32 %v1833_v28, %v1104_v44 }
 0x10e   : > { %v1095_v46 = vadd.f32 %v1091_v42, %v1082_v43  ;;  %v1118_v48 = vmax.f32 %v1114_v38, 0.0  ;;  %v1840_v38 = vld [vmem:[%s2451_s3 + $0x6] ss:$0 sm:$0xff] }
 0x10f   : > { %v1105_v49 = vmul.f32 %v1832_v17, %v1094_v45  ;;  %v1119_v52 = vmax.f32 %v1115_v47, 0.0 }
 0x110   : > { %v1106_v50 = vmul.f32 %v1832_v17, %v1095_v46  ;;  %1130 = vst.msk [vmem:[#allocation2 + $0x9] sm:$0xff] %vm1004_vm1, %v1118_v48 }
 0x111   : > { %v1116_v53 = vadd.f32 %v1833_v28, %v1105_v49  ;;  %1131 = vst.msk [vmem:[#allocation2 + $0x11] sm:$0xff] %vm1004_vm1, %v1119_v52 }
 0x112   : > { %v1117_v39 = vadd.f32 %v1833_v28, %v1106_v50 }
 0x113   : > { %v1120_v54 = vmax.f32 %v1116_v53, 0.0 }
 0x114   : > { %v1121_v55 = vmax.f32 %v1117_v39, 0.0 }
 0x115   : > { %1132 = vst.msk [vmem:[#allocation2 + $0x19] sm:$0xff] %vm1004_vm1, %v1120_v54 }
 0x116   : > { %1133 = vst.msk [vmem:[#allocation2 + $0x21] sm:$0xff] %vm1004_vm1, %v1121_v55 }
 0x117   : > { %v1135_v60 = vld [vmem:[#allocation2 + $0x8] sm:$0xff] }
 0x118   : > { %v1138_v61 = vld [vmem:[#allocation2 + $0x3] sm:$0xff]  ;;  %v1139_v63 = vld [vmem:[#allocation2 + $0xb] sm:$0xff]  ;;  %v1168_v1 = vmul.f32 %v1834_v51, %v1135_v60 }
 0x119   : > { %v1142_v62 = vld [vmem:[#allocation2 + $0x6] sm:$0xff]  ;;  %v1143_v0 = vld [vmem:[#allocation2 + $0xe] sm:$0xff]  ;;  %v1176_v2 = vmul.f32 %v1835_v56, %v1138_v61  ;;  %v1177_v4 = vmul.f32 %v1835_v56, %v1139_v63 }
 0x11a   : > { %v1146_v3 = vld [vmem:[#allocation2 + $0x9] sm:$0xff]  ;;  %v1147_v6 = vld [vmem:[#allocation2 + $0x11] sm:$0xff]  ;;  %v1189_v9 = vmul.f32 %v1836_v59, %v1142_v62  ;;  %v1190_v14 = vmul.f32 %v1836_v59, %v1143_v0 }
 0x11b   : > { %v1180_v8 = vadd.f32 %v1176_v2, %v1167_v58  ;;  %v1136_v10 = vld [vmem:[#allocation2 + $0x10] sm:$0xff]  ;;  %v1181_v13 = vadd.f32 %v1177_v4, %v1168_v1  ;;  %v1202_v17 = vmul.f32 %v1837_v5, %v1146_v3  ;;  %v1203_v25 = vmul.f32 %v1837_v5, %v1147_v6 }
 0x11c   : > { %v1150_v11 = vld [vmem:[#allocation2 + $0xc] sm:$0xff]  ;;  %v1151_v12 = vld [vmem:[#allocation2 + $0x14] sm:$0xff]  ;;  %v1169_v28 = vmul.f32 %v1834_v51, %v1136_v10 }
 0x11d   : > { %v1193_v16 = vadd.f32 %v1189_v9, %v1180_v8  ;;  %v1140_v18 = vld [vmem:[#allocation2 + $0x13] sm:$0xff]  ;;  %v1194_v22 = vadd.f32 %v1190_v14, %v1181_v13  ;;  %v1215_v36 = vmul.f32 %v1838_v15, %v1150_v11  ;;  %v1216_v37 = vmul.f32 %v1838_v15, %v1151_v12  ;;  %v1141_v42 = vld [vmem:[#allocation2 + $0x1b] sm:$0xff]  ;;  %v1153_v8 = vld [vmem:[#allocation2 + $0x24] sm:$0xff] }
 0x11e   : > { %v1144_v19 = vld [vmem:[#allocation2 + $0x16] sm:$0xff]  ;;  %v1178_v30 = vmul.f32 %v1835_v56, %v1140_v18  ;;  %v1145_v47 = vld [vmem:[#allocation2 + $0x1e] sm:$0xff]  ;;  %v1179_v39 = vmul.f32 %v1835_v56, %v1141_v42 }
 0x11f   : > { %v1154_v20 = vld [vmem:[#allocation2 + $0xf] sm:$0xff]  ;;  %v1155_v21 = vld [vmem:[#allocation2 + $0x17] sm:$0xff]  ;;  %v1206_v35 = vadd.f32 %v1202_v17, %v1193_v16  ;;  %v1207_v44 = vadd.f32 %v1203_v25, %v1194_v22  ;;  %v1191_v46 = vmul.f32 %v1836_v59, %v1144_v19  ;;  %v1149_v60 = vld [vmem:[#allocation2 + $0x21] sm:$0xff]  ;;  %v1192_v1 = vmul.f32 %v1836_v59, %v1145_v47 }
 0x120   : > { %v1148_v40 = vld [vmem:[#allocation2 + $0x19] sm:$0xff]  ;;  %v1182_v45 = vadd.f32 %v1178_v30, %v1169_v28  ;;  %v1228_v52 = vmul.f32 %v1839_v27, %v1154_v20  ;;  %v1229_v55 = vmul.f32 %v1839_v27, %v1155_v21  ;;  %v1160_v9 = vld [vmem:[#allocation2 + $0x22] sm:$0xff]  ;;  %v1205_v11 = vmul.f32 %v1837_v5, %v1149_v60  ;;  %v1161_v17 = vld [vmem:[#allocation2 + $0x2a] sm:$0xff] }
 0x121   : > { %v1137_v41 = vld [vmem:[#allocation2 + $0x18] sm:$0xff]  ;;  %v1219_v50 = vadd.f32 %v1215_v36, %v1206_v35  ;;  %v1220_v54 = vadd.f32 %v1216_v37, %v1207_v44  ;;  %v1204_v58 = vmul.f32 %v1837_v5, %v1148_v40  ;;  %v1842_v13 = vld [vmem:[%s2453_s30] ss:$0 sm:$0xff]  ;;  %v1157_v16 = vld [vmem:[#allocation2 + $0x27] sm:$0xff]  ;;  %v1218_v20 = vmul.f32 %v1838_v15, %v1153_v8 }
 0x122   : > { %v1158_v43 = vld [vmem:[#allocation2 + $0x12] sm:$0xff]  ;;  %v1170_v48 = vmul.f32 %v1834_v51, %v1137_v41  ;;  %v1159_v49 = vld [vmem:[#allocation2 + $0x1a] sm:$0xff]  ;;  %v1195_v57 = vadd.f32 %v1191_v46, %v1182_v45  ;;  %v1243_v25 = vmul.f32 %v1840_v38, %v1160_v9  ;;  %v1231_v35 = vmul.f32 %v1839_v27, %v1157_v16 }
 0x123   : > { %v1152_v53 = vld [vmem:[#allocation2 + $0x1c] sm:$0xff]  ;;  %v1232_v61 = vadd.f32 %v1228_v52, %v1219_v50  ;;  %v1241_v62 = vmul.f32 %v1840_v38, %v1158_v43  ;;  %v1233_v2 = vadd.f32 %v1229_v55, %v1220_v54  ;;  %v1242_v3 = vmul.f32 %v1840_v38, %v1159_v49  ;;  %v1434_v54 = vld [vmem:[%s2420_s15 + $0x10] sm:$0xff] }
 0x124   : > { %v1156_v63 = vld [vmem:[#allocation2 + $0x1f] sm:$0xff]  ;;  %v1183_v0 = vadd.f32 %v1179_v39, %v1170_v48  ;;  %v1208_v4 = vadd.f32 %v1204_v58, %v1195_v57  ;;  %v1217_v6 = vmul.f32 %v1838_v15, %v1152_v53  ;;  %v1244_v36 = vmul.f32 %v1840_v38, %v1161_v17  ;;  %v1433_v53 = vld [vmem:[%s2420_s15 + $0x8] sm:$0xff] }
 0x125   : > { %v1841_v51 = vld [vmem:[%s2452_s5] ss:$0 sm:$0xff]  ;;  %v1245_v56 = vadd.f32 %v1241_v62, %v1232_v61  ;;  %v1246_v12 = vadd.f32 %v1242_v3, %v1233_v2  ;;  %v1230_v59 = vmul.f32 %v1839_v27, %v1156_v63  ;;  %v2304_v27 = vpop.f32.mrb[0].mxu0  ;;  %v1435_v55 = vld [vmem:[%s2420_s15 + $0x18] sm:$0xff] }
 0x126   : > { %v1196_v10 = vadd.f32 %v1192_v1, %v1183_v0  ;;  %v1221_v14 = vadd.f32 %v1217_v6, %v1208_v4  ;;  %v2306_v38 = vpop.f32.mrb[1].mxu0  ;;  %v1432_v52 = vld [vmem:[%s2420_s15] sm:$0xff]  ;;  %v1982_v57 = vpack.c.bf16 %v1435_v55, %v1434_v54 }
 0x127   : > { %v1256_v18 = vmul.f32 %v1841_v51, %v1245_v56  ;;  %v1257_v21 = vmul.f32 %v1841_v51, %v1246_v12  ;;  %v2308_v49 = vpop.f32.mrb[2].mxu0  ;;  %v1978_v39 = vpack.c.bf16 %v1433_v53, %v1432_v52  ;;  %v1847_v58 = vld [vmem:[%s2416_s11] ss:$0 sm:$0xff] }
 0x128   : > { %v1209_v19 = vadd.f32 %v1205_v11, %v1196_v10  ;;  %v1234_v22 = vadd.f32 %v1230_v59, %v1221_v14  ;;  %v2310_v50 = vpop.f32.mrb[3].mxu0  ;;  %v1848_v61 = vld [vmem:[%s2417_s12] ss:$0 sm:$0xff] }
 0x129   : > { %v1267_v28 = vadd.f32 %v1842_v13, %v1256_v18  ;;  %v1268_v5 = vadd.f32 %v1842_v13, %v1257_v21  ;;  %1979 = vmatprep.subr.bf16.mxu1 %v1978_v39  ;;  %v1850_v56 = vld [vmem:[%s2419_s14] ss:$0 sm:$0xff] }
 0x12a   : > { %v1222_v30 = vadd.f32 %v1218_v20, %v1209_v19  ;;  %v1247_v37 = vadd.f32 %v1243_v25, %v1234_v22  ;;  %1981 = vmatpush3.bf16.msra.mxu1 %v1978_v39 }
 0x12b   : > { %v1271_v40 = vmax.f32 %v1267_v28, 0.0  ;;  %v1272_v42 = vmax.f32 %v1268_v5, 0.0  ;;  %1983 = vmatprep.subr.bf16.mxu1 %v1982_v57  ;;  %v1573_v5 = vld [vmem:[%s2423_s18 + $0x18] sm:$0xff] }
 0x12c   : > { %v1235_v41 = vadd.f32 %v1231_v35, %v1222_v30  ;;  %v1258_v43 = vmul.f32 %v1841_v51, %v1247_v37 }
 0x12d   : > { %1926 = vmatprep.mubr.msk.f32.mxu0 %vm1004_vm1, %v1271_v40  ;;  %v1649_v40 = vld [vmem:[%s2425_s20] sm:$0xff] }
 0x12e   : > { %v1248_v44 = vadd.f32 %v1244_v36, %v1235_v41  ;;  %1927 = vmatmul.mubr.msk.f32.vlgmr.msra.gmra.mrb[4].mxu0 %vm1004_vm1, %v1272_v42  ;;  %v1269_v45 = vadd.f32 %v1842_v13, %v1258_v43  ;;  %1985 = vmatpush3.bf16.msra.mxu1 %v1982_v57  ;;  %v1572_v36 = vld [vmem:[%s2423_s18 + $0x10] sm:$0xff]  ;;  %v1855_v41 = vld [vmem:[%s2421_s16] ss:$0 sm:$0xff] }
 0x12f   : > { %1957 = vmatprep.subr.mxu1 %v2015_v7  ;;  %v1990_v37 = vpack.c.bf16 %v1573_v5, %v1572_v36 }
 0x130   : > { %v1259_v15 = vmul.f32 %v1841_v51, %v1248_v44  ;;  %v1273_v46 = vmax.f32 %v1269_v45, 0.0  ;;  %v1849_v51 = vld [vmem:[%s2418_s13] ss:$0 sm:$0xff] }
 0x131   : > { %v1856_v45 = vld [vmem:[%s2422_s17] ss:$0 sm:$0xff] }
 0x132   : > { %v1270_v47 = vadd.f32 %v1842_v13, %v1259_v15  ;;  %1929 = vmatprep.mubr.msk.f32.mxu0 %vm1004_vm1, %v1273_v46 }
 0x134   : > { %v1274_v48 = vmax.f32 %v1270_v47, 0.0 }
 0x136   : > { %1930 = vmatmul.mubr.msk.f32.gmra.mrb[6].mxu0 %vm1004_vm1, %v1274_v48 }
 0x137   : > { %1954 = vmatprep.mubr.msk.f32.mxu0 %vm2017_vm4, %v2015_v7 }
 0x201   : > { %v1928_v60 = vpop.f32.mrb[4].mxu0 }
 0x202   : > { %v1384_v62 = vmul.f32 %v1928_v60, %v1847_v58  ;;  %v1357_v63 = vpop.f32.mrb[5].mxu0 }
 0x203   : > { %v1383_v0 = vmul.f32 %v1847_v58, %v1357_v63 }
 0x204   : > { %v1395_v1 = vadd.f32 %v1848_v61, %v1384_v62 }
 0x205   : > { %v1394_v2 = vadd.f32 %v1848_v61, %v1383_v0 }
 0x206   : > { %v1399_v3 = vmax.f32 %v1395_v1, 0.0 }
 0x207   : > { %v1398_v4 = vmax.f32 %v1394_v2, 0.0 }
 0x208   : > { %v1403_v6 = vmul.f32 %v1399_v3, %v1001_v26 }
 0x209   : > { %v1931_v8 = vpop.f32.mrb[6].mxu0  ;;  %v1402_v9 = vmul.f32 %v1398_v4, %v1000_v29 }
 0x20a   : > { %v1386_v10 = vmul.f32 %v1931_v8, %v1847_v58  ;;  %v1367_v11 = vpop.f32.mrb[7].mxu0  ;;  %v1414_v12 = vmul.f32 %v1849_v51, %v1403_v6  ;;  %v1574_v8 = vld [vmem:[%s2424_s19] sm:$0x1] }
 0x20b   : > { %v1385_v13 = vmul.f32 %v1847_v58, %v1367_v11  ;;  %v1413_v14 = vmul.f32 %v1849_v51, %v1402_v9 }
 0x20c   : > { %v1397_v59 = vadd.f32 %v1848_v61, %v1386_v10  ;;  %v1425_v16 = vadd.f32 %v1850_v56, %v1414_v12  ;;  %v1650_v12 = vld [vmem:[%s2426_s21] sm:$0x1] }
 0x20d   : > { %v1396_v17 = vadd.f32 %v1848_v61, %v1385_v13  ;;  %v1424_v19 = vadd.f32 %v1850_v56, %v1413_v14 }
 0x20e   : > { %v1401_v18 = vmax.f32 %v1397_v59, 0.0  ;;  %v1429_v21 = vmax.f32 %v1425_v16, 0.0 }
 0x20f   : > { %v1400_v23 = vmax.f32 %v1396_v17, 0.0  ;;  %v1428_v20 = vmax.f32 %v1424_v19, 0.0 }
 0x210   : > { %v1405_v26 = vmul.f32 %v1401_v18, %v1003_v33  ;;  %v1987_v33 = vpack.c.bf16 %v1571_v32, %v1570_v31 }
 0x211   : > { %v1404_v24 = vmul.f32 %v1400_v23, %v1002_v34  ;;  %1940 = vmatprep.mubr.msk.f32.mxu1 %vm1004_vm1, %v1428_v20  ;;  %v2016_v34 = vmov 0.0|0.0   ;;  %v1731_v23 = vlaneseq  ;;  %v1819_v20 = vld [vmem:[%s2428_s23] ss:$0 sm:$0xff] }
 0x212   : > { %v1416_v29 = vmul.f32 %v1849_v51, %v1405_v26  ;;  %1941 = vmatmul.mubr.msk.f32.vlgmr.msra.gmra.mrb[4].mxu1 %vm1004_vm1, %v1429_v21  ;;  %1986 = vmatprep.subr.bf16.mxu0 %v2016_v34 }
 0x213   : > { %v1415_v22 = vmul.f32 %v1849_v51, %v1404_v24  ;;  %1988 = vmatpush3.bf16.msra.mxu0 %v1987_v33  ;;  %1958 = vmatpush3.msra.mxu1 %v1649_v40  ;;  %v1732_v26 = vshrl.u32 %v1731_v23, 7  ;;  %v877_v24 = vmul.f32 %v2304_v27, %v1819_v20 }
 0x214   : > { %v1427_v25 = vadd.f32 %v1850_v56, %v1416_v29  ;;  %1989 = vmatprep.subr.bf16.mxu0 %v2016_v34  ;;  %v876_v29 = vmul.f32 %v1819_v20, %v2306_v38 }
 0x215   : > { %v1426_v28 = vadd.f32 %v1850_v56, %v1415_v22  ;;  %v1733_v21 = vsub.s32 0, %v1732_v26  ;;  %v879_v22 = vmul.f32 %v2308_v49, %v1819_v20 }
 0x216   : > { %v1431_v35 = vmax.f32 %v1427_v25, 0.0  ;;  %v878_v25 = vmul.f32 %v1819_v20, %v2310_v50 }
 0x217   : > { %v1430_v30 = vmax.f32 %v1426_v28, 0.0  ;;  %1991 = vmatpush3.bf16.msra.mxu0 %v1990_v37  ;;  %v1820_v28 = vld [vmem:[%s2429_s24] ss:$0 sm:$0xff] }
 0x218   : > { %v888_v31 = vadd.f32 %v1820_v28, %v877_v24  ;;  %v887_v32 = vadd.f32 %v1820_v28, %v876_v29  ;;  %v890_v33 = vadd.f32 %v1820_v28, %v879_v22  ;;  %v889_v34 = vadd.f32 %v1820_v28, %v878_v25 }
 0x219   : > { %1943 = vmatprep.mubr.msk.f32.mxu1 %vm1004_vm1, %v1430_v30 }
 0x21a   : > { %1944 = vmatmul.mubr.msk.f32.gmra.mrb[6].mxu1 %vm1004_vm1, %v1431_v35 }
 0x21b   : > { %1959 = vmatprep.mubr.msk.f32.mxu1 %vm2017_vm4, %v2015_v7 }
 0x2e5   : > { %v1942_v42 = vpop.f32.mrb[4].mxu1 }
 0x2e6   : > { %v1541_v43 = vmul.f32 %v1942_v42, %v1855_v41  ;;  %v1514_v44 = vpop.f32.mrb[5].mxu1 }
 0x2e7   : > { %v1540_v15 = vmul.f32 %v1855_v41, %v1514_v44 }
 0x2e8   : > { %v1552_v46 = vadd.f32 %v1856_v45, %v1541_v43 }
 0x2e9   : > { %v1551_v47 = vadd.f32 %v1856_v45, %v1540_v15 }
 0x2ea   : > { %v1556_v7 = vsel %vm1004_vm1, %v1552_v46, 0.0 }
 0x2eb   : > { %v1555_v39 = vsel %vm1004_vm1, %v1551_v47, 0.0 }
 0x2ec   : > { %v1557_v58 = vadd.f32 %v1556_v7, %v1555_v39 }
 0x2ed   : > { %v1945_v48 = vpop.f32.mrb[6].mxu1 }
 0x2ee   : > { %v1543_v52 = vmul.f32 %v1945_v48, %v1855_v41  ;;  %v1524_v53 = vpop.f32.mrb[7].mxu1 }
 0x2ef   : > { %v1542_v54 = vmul.f32 %v1855_v41, %v1524_v53 }
 0x2f0   : > { %v1554_v55 = vadd.f32 %v1856_v45, %v1543_v52 }
 0x2f1   : > { %v1553_v57 = vadd.f32 %v1856_v45, %v1542_v54 }
 0x2f2   : > { %v1560_v62 = vsel %vm1004_vm1, %v1554_v55, 0.0 }
 0x2f3   : > { %v1558_v60 = vsel %vm1004_vm1, %v1553_v57, 0.0 }
 0x2f4   : > { %v1559_v61 = vadd.f32 %v1558_v60, %v1557_v58 }
 0x2f6   : > { %v1561_v63 = vadd.f32 %v1560_v62, %v1559_v61 }
 0x2f8   : > { %v1562_v0 = vrot.slane %v1561_v63, 4 }
 0x2fa   : > { %v1563_v1 = vadd.f32 %v1562_v0, %v1561_v63 }
 0x2fc   : > { %v1564_v2 = vrot.slane %v1563_v1, 2 }
 0x2fe   : > { %v1565_v3 = vadd.f32 %v1564_v2, %v1563_v1 }
 0x300   : > { %v1566_v51 = vrot.slane %v1565_v3, 1 }
 0x302   : > { %v1567_v4 = vadd.f32 %v1566_v51, %v1565_v3 }
 0x304   : > { %v1569_v6 = vmul.f32 0.03125, %v1567_v4 }
 0x306   : > { %1955 = vmatmul.mubr.msk.f32.vlgmr.msra.gmra.mrb[8].mxu0 %vm1004_vm1, %v1569_v6 }
 0x3d9   : > { %v1644_v56 = vpop.f32.mrb[8].mxu0 }
 0x3da   : > { %v1645_v9 = vadd.f32 %v1644_v56, %v1574_v8  ;;  %v1956_v10 = vpop.f32.mrb[9].mxu0 }
 0x3dc   : > { %v1648_v11 = vmax.f32 %v1645_v9, 0.0 }
 0x3de   : > { %1960 = vmatmul.mubr.msk.f32.vlgmr.msra.gmra.mrb[8].mxu1 %vm1651_vm5, %v1648_v11 }
 0x4b1   : > { %v1721_v13 = vpop.f32.mrb[8].mxu1 }
 0x4b2   : > { %v1722_v14 = vadd.f32 %v1721_v13, %v1650_v12  ;;  %v1961_v59 = vpop.f32.mrb[9].mxu1 }
 0x4b4   : > { %v1725_v16 = vsub.f32 0.0, %v1722_v14 }
 0x4b6   : > { %v1726_v17 = vmul.f32 1.442695, %v1725_v16 }
 0x4b8   : > { %2003 = vpow2.f32 %v1726_v17 }
 0x4c2   : > { %v2004_v18 = vpop.eup %2003 }
 0x4c3   : > { %v1728_v19 = vadd.f32 1.0, %v2004_v18 }
 0x4c5   : > { %2005 = vrcp.f32 %v1728_v19 }
 0x4cf   : > { %v2006_v30 = vpop.eup %2005 }
 0x4d0   : > { %v1734_v35 = vrot.slane %v2006_v30, %v1733_v21 }
 0x4d2   : > { %v1735_v36 = vmul.f32 %v1734_v35, %v1551_v47  ;;  %v1736_v5 = vmul.f32 %v1734_v35, %v1552_v46  ;;  %v1737_v27 = vmul.f32 %v1734_v35, %v1553_v57  ;;  %v1738_v37 = vmul.f32 %v1734_v35, %v1554_v55 }
 0x4d4   : > { %v1739_v38 = vadd.f32 %v1735_v36, %v887_v32  ;;  %v1740_v40 = vadd.f32 %v1736_v5, %v888_v31  ;;  %v1741_v49 = vadd.f32 %v1737_v27, %v889_v34  ;;  %v1742_v41 = vadd.f32 %v1738_v37, %v890_v33 }
 0x4d6   : > { %v1743_v50 = vmax.f32 %v1739_v38, 0.0  ;;  %v1744_v42 = vmax.f32 %v1740_v40, 0.0  ;;  %v1745_v43 = vmax.f32 %v1741_v49, 0.0  ;;  %v1746_v44 = vmax.f32 %v1742_v41, 0.0 }
 0x4d8   : > { %1747 = vst.msk [vmem:[%s764_s9] sm:$0xff] %vm1004_vm1, %v1743_v50  ;;  %1748 = vst.msk [vmem:[%s764_s9 + $0x8] sm:$0xff] %vm1004_vm1, %v1744_v42 }
 0x4d9   : > { %1749 = vst.msk [vmem:[%s764_s9 + $0x10] sm:$0xff] %vm1004_vm1, %v1745_v43  ;;  %1750 = vst.msk [vmem:[%s764_s9 + $0x18] sm:$0xff] %vm1004_vm1, %v1746_v44 }
 0x4da PF: > { %s35_s29 = sadd.s32 1, %s2013_s29  }
 0x4db   : > { %p32_p4 = scmp.ge.s32.totalorder %s35_s29, 4  }
 0x4dd   :  { %34 = sbr.rel (!%p32_p4) target bundleno = 11 (0xb), region = 150 }

// kernel: _lambda_.8
= control target key start
LH: loop header
LB: loop body
LE: loop exit
PB: predicated region body
PF: predicated region fallthrough
CT: control target
= control target key end

     0   :  { %s2770_s0 = inlined_call_operand.vmem [shape: f32[2,64,16], index: 0, kind: input, shape index: {}]   ;;  %s2771_s1 = inlined_call_operand.vmem [shape: f32[16,16], index: 1, kind: input, shape index: {}]   ;;  %s2772_s2 = inlined_call_operand.vmem [shape: f32[1,16], index: 2, kind: input, shape index: {}, may-alias: {2,5,8,11,13,16}]   ;;  %s2773_s3 = inlined_call_operand.vmem [shape: f32[1,16], index: 3, kind: input, shape index: {}, may-alias: {3,6,9,12,14}]   ;;  %s2774_s4 = inlined_call_operand.vmem [shape: f32[5,16], index: 4, kind: input, shape index: {}]   ;;  %s2775_s5 = inlined_call_operand.vmem [shape: f32[1,16], index: 5, kind: input, shape index: {}, may-alias: {2,5,8,11,13,16}]   ;;  %s2776_s6 = inlined_call_operand.vmem [shape: f32[1,16], index: 6, kind: input, shape index: {}, may-alias: {3,6,9,12,14}]   ;;  %s2777_s7 = inlined_call_operand.vmem [shape: f32[7,16], index: 7, kind: input, shape index: {}]   ;;  %s2778_s8 = inlined_call_operand.vmem [shape: f32[1,16], index: 8, kind: input, shape index: {}, may-alias: {2,5,8,11,13,16}]   ;;  %s2779_s9 = inlined_call_operand.vmem [shape: f32[1,16], index: 9, kind: input, shape index: {}, may-alias: {3,6,9,12,14}]   ;;  %s2780_s10 = inlined_call_operand.vmem [shape: f32[16,16], index: 10, kind: input, shape index: {}]   ;;  %s2781_s11 = inlined_call_operand.vmem [shape: f32[1,16], index: 11, kind: input, shape index: {}, may-alias: {2,5,8,11,13,16}]   ;;  %s2782_s12 = inlined_call_operand.vmem [shape: f32[1,16], index: 12, kind: input, shape index: {}, may-alias: {3,6,9,12,14}]   ;;  %s2783_s13 = inlined_call_operand.vmem [shape: f32[1,16], index: 13, kind: input, shape index: {}, may-alias: {2,5,8,11,13,16}]   ;;  %s2784_s14 = inlined_call_operand.vmem [shape: f32[1,16], index: 14, kind: input, shape index: {}, may-alias: {3,6,9,12,14}]   ;;  %s2785_s15 = inlined_call_operand.vmem [shape: f32[16,16], index: 15, kind: input, shape index: {}]   ;;  %s2786_s16 = inlined_call_operand.vmem [shape: f32[1,16], index: 16, kind: input, shape index: {}, may-alias: {2,5,8,11,13,16}]   ;;  %s2787_s17 = inlined_call_operand.vmem [shape: f32[1,16], index: 17, kind: input, shape index: {}]   ;;  %s2788_s18 = inlined_call_operand.vmem [shape: f32[16,4], index: 18, kind: input, shape index: {}]   ;;  %s2789_s19 = inlined_call_operand.vmem [shape: f32[1,4], index: 19, kind: input, shape index: {}]   ;;  %s2790_s20 = inlined_call_operand.vmem [shape: f32[4,16], index: 20, kind: input, shape index: {}]   ;;  %s2791_s21 = inlined_call_operand.vmem [shape: f32[1,16], index: 21, kind: input, shape index: {}]   ;;  %s2792_s22 = inlined_call_operand.vmem [shape: f32[2,64,16], index: 22, kind: output, shape index: {}]  }
   0x1   :  { %2795 = sst [smem:[#allocation3_spill]] %s2770_s0 }
   0x2   :  { %2796 = sst [smem:[#allocation4_spill]] %s2771_s1 }
   0x3   :  { %2797 = sst [smem:[#allocation5_spill]] %s2772_s2 }
   0x4   :  { %2798 = sst [smem:[#allocation6_spill]] %s2773_s3  ;;  %s2286_s3 = smov 0  }
   0x5   :  { %2799 = sst [smem:[#allocation7_spill]] %s2774_s4 }
   0x6   :  { %2800 = sst [smem:[#allocation8_spill]] %s2775_s5 }
   0x7   :  { %2801 = sst [smem:[#allocation9_spill]] %s2776_s6 }
   0x8 LB: > { %s1961_s28 = sadd.s32 4294967295, %s2166_s3   ;;  %p1965_p0 = scmp.ge.s32.totalorder %s2166_s3, 1  ;;  %s2166_s3 = sphi %s2286_s3, %s32_s3  }
   0x9   : > { %p612_p1 = scmp.lt.s32.totalorder %s2166_s3, 3 }
   0xb   : > { %p613_p2 = pnand %p1965_p0, %p612_p1 }
   0xc   : > { %s2802_s4 = sld [smem:[#allocation4_spill]] (!%p613_p2)  ;;  %p674_p3 = scmp.lt.s32.totalorder (!%p613_p2), %s1961_s28, 1  ;;  %vm694_vm0 = vcmask (!%p613_p2), 130048   ;;  %v2168_v11 = vmov (!%p613_p2), 0.0   ;;  %vm870_vm1 = vcmask (!%p613_p2), 125952   ;;  %v1308_v12 = vld [vmem:[%s2780_s10] sm:$0xff] (!%p613_p2) }
   0xd   : > { %616 = sbr.rel (%p613_p2) target bundleno = 1258 (0x4ea), region = 108  ;;  %s2803_s6 = sld [smem:[#allocation3_spill]] (!%p613_p2)  ;;  %863 = vst.msk [vmem:[#allocation2 + $0x8] sm:$0xff] (!%p613_p2), %vm694_vm0, %v2168_v11  ;;  %864 = vst.msk [vmem:[#allocation2 + $0x10] sm:$0xff] (!%p613_p2), %vm694_vm0, %v2168_v11  ;;  %v1309_v13 = vld [vmem:[%s2780_s10 + $0x8] sm:$0xff] (!%p613_p2)  ;;  %vm1065_vm2 = vcmask (!%p613_p2), 123904  }
   0xe   : > { %862 = vst.msk [vmem:[#allocation2] sm:$0xff] (!%p613_p2), %vm694_vm0, %v2168_v11  ;;  %865 = vst.msk [vmem:[#allocation2 + $0x18] sm:$0xff] (!%p613_p2), %vm694_vm0, %v2168_v11  ;;  %v2124_v14 = vpack.c.bf16 (!%p613_p2), %v1309_v13, %v1308_v12  ;;  %s2804_s23 = sld [smem:[#allocation5_spill]] (!%p613_p2)  ;;  %s2806_s27 = sld [smem:[#allocation7_spill]] (!%p613_p2)  ;;  %vm2170_vm3 = vmmov (!%p613_p2), 0   ;;  %vm1790_vm4 = vcmask (!%p613_p2), 1043456  }
   0xf   : > { %866 = vst.msk [vmem:[#allocation2 + $0x20] sm:$0xff] (!%p613_p2), %vm694_vm0, %v2168_v11  ;;  %867 = vst.msk [vmem:[#allocation2 + $0x28] sm:$0xff] (!%p613_p2), %vm694_vm0, %v2168_v11  ;;  %s2807_s30 = sld [smem:[#allocation8_spill]] (!%p613_p2)  ;;  %s2808_s5 = sld [smem:[#allocation9_spill]] (!%p613_p2)  ;;  %vm1786_vm5 = vcmask (!%p613_p2), 31744  }
  0x10   : > { %868 = vst.msk [vmem:[#allocation2 + $0x30] sm:$0xff] (!%p613_p2), %vm694_vm0, %v2168_v11  ;;  %869 = vst.msk [vmem:[#allocation2 + $0x38] sm:$0xff] (!%p613_p2), %vm694_vm0, %v2168_v11 }
  0x11   : > { %1064 = vst.msk [vmem:[#allocation2 + $0x48] sm:$0xff] (!%p613_p2), %vm694_vm0, %v2168_v11 }
  0x12   : > { %v692_v0 = vld [vmem:[%s2802_s4] sm:$0xff] (!%p613_p2)  ;;  %v693_v1 = vld [vmem:[%s2802_s4 + $0x8] sm:$0xff] (!%p613_p2)  ;;  %871 = vst.msk [vmem:[#allocation2 + $0x40] sm:$0xf] (!%p613_p2), %vm870_vm1, %v2168_v11 }
  0x13   : > { %v2120_v2 = vpack.c.bf16 (!%p613_p2), %v693_v1, %v692_v0  ;;  %1066 = vst.msk [vmem:[#allocation2 + $0x50] sm:$0x3] (!%p613_p2), %vm1065_vm2, %v2168_v11 }
  0x14   : > { %s2810_s28 = smov (!%p674_p3, %s1961_s28), 1  ;;  %v1978_v15 = vld [vmem:[%s2804_s23] ss:$0 sm:$0xff]  ;;  %v2396_v46 = vld [vmem:[%s2806_s27 + $0x2] ss:$0 sm:$0xff] }
  0x15   : > { %2121 = vmatprep.subr.bf16.mxu0 %v2120_v2  ;;  %2135 = vmatprep.subr.bf16.mxu1 %v2120_v2  ;;  %s2023_s1 = sshll.u32 %s2810_s28, 6  ;;  %v2406_v48 = vld [vmem:[%s2806_s27] ss:$0 sm:$0xff]  ;;  %v2411_v49 = vld [vmem:[%s2806_s27 + $0x1] ss:$0 sm:$0xff] }
  0x16   : > { %2123 = vmatpush3.bf16.msra.mxu0 %v2120_v2  ;;  %2136 = vmatpush3.bf16.msra.mxu1 %v2120_v2  ;;  %s2308_s25 = scalar_lea.vmem %s2803_s6, %s2023_s1  ;;  %s2805_s6 = sld [smem:[#allocation6_spill]]  ;;  %v2417_v52 = vld [vmem:[%s2806_s27 + $0x3] ss:$0 sm:$0xff]  ;;  %v2422_v53 = vld [vmem:[%s2806_s27 + $0x4] ss:$0 sm:$0xff] }
  0x17   : > { %v684_v3 = vld [vmem:[%s2308_s25] sm:$0xff]  ;;  %v685_v4 = vld [vmem:[%s2308_s25 + $0x8] sm:$0xff]  ;;  %v686_v5 = vld [vmem:[%s2308_s25 + $0x10] sm:$0xff]  ;;  %2125 = vmatprep.subr.bf16.mxu1 %v2124_v14 }
  0x18   : > { %2064 = vmatprep.mubr.msk.f32.mxu0 %vm694_vm0, %v684_v3  ;;  %v690_v6 = vld [vmem:[%s2308_s25 + $0x30] sm:$0xff]  ;;  %v691_v7 = vld [vmem:[%s2308_s25 + $0x38] sm:$0xff]  ;;  %v688_v9 = vld [vmem:[%s2308_s25 + $0x20] sm:$0xff] }
  0x19   : > { %2065 = vmatmul.mubr.msk.f32.vlgmr.msra.gmra.mrb[0].mxu0 %vm694_vm0, %v685_v4  ;;  %2073 = vmatprep.mubr.msk.f32.mxu1 %vm694_vm0, %v690_v6  ;;  %v687_v8 = vld [vmem:[%s2308_s25 + $0x18] sm:$0xff]  ;;  %v689_v10 = vld [vmem:[%s2308_s25 + $0x28] sm:$0xff] }
  0x1a   : > { %2067 = vmatprep.mubr.msk.f32.mxu0 %vm694_vm0, %v686_v5  ;;  %2074 = vmatmul.mubr.msk.f32.vlgmr.msra.gmra.mrb[0].mxu1 %vm694_vm0, %v691_v7 }
  0x1b   : > { %2127 = vmatpush3.bf16.msra.mxu1 %v2124_v14 }
  0x1c   : > { %v1979_v17 = vld [vmem:[%s2805_s6] ss:$0 sm:$0xff]  ;;  %s683_s6 = scalar_lea.vmem %s2792_s22, %s2023_s1 }
  0x1d   : > { %2068 = vmatmul.mubr.msk.f32.gmra.mrb[2].mxu0 %vm694_vm0, %v687_v8 }
  0x1e   : > { %2070 = vmatprep.mubr.msk.f32.mxu0 %vm694_vm0, %v688_v9 }
  0x21   : > { %2071 = vmatmul.mubr.msk.f32.gmra.mrb[4].mxu0 %vm694_vm0, %v689_v10 }
  0xec   : > { %v2066_v16 = vpop.f32.mrb[0].mxu0 }
  0xed   : > { %v832_v18 = vmul.f32 %v2066_v16, %v1978_v15  ;;  %v785_v19 = vpop.f32.mrb[1].mxu0  ;;  %v2075_v20 = vpop.f32.mrb[0].mxu1 }
  0xee   : > { %v831_v21 = vmul.f32 %v1978_v15, %v785_v19  ;;  %v838_v22 = vmul.f32 %v2075_v20, %v1978_v15  ;;  %v815_v23 = vpop.f32.mrb[1].mxu1 }
  0xef   : > { %v2358_v24 = vadd.f32 %v1979_v17, %v832_v18  ;;  %v837_v25 = vmul.f32 %v1978_v15, %v815_v23 }
  0xf0   : > { %v2360_v26 = vadd.f32 %v1979_v17, %v831_v21  ;;  %v2069_v27 = vpop.f32.mrb[2].mxu0  ;;  %v2362_v28 = vadd.f32 %v1979_v17, %v838_v22 }
  0xf1   : > { %v855_v29 = vmax.f32 %v2358_v24, 0.0  ;;  %v834_v30 = vmul.f32 %v2069_v27, %v1978_v15  ;;  %v795_v31 = vpop.f32.mrb[3].mxu0  ;;  %v2365_v32 = vadd.f32 %v1979_v17, %v837_v25 }
  0xf2   : > { %v854_v33 = vmax.f32 %v2360_v26, 0.0  ;;  %v833_v34 = vmul.f32 %v1978_v15, %v795_v31  ;;  %v861_v35 = vmax.f32 %v2362_v28, 0.0  ;;  %v1707_v28 = vld [vmem:[%s2788_s18] sm:$0xff] }
  0xf3   : > { %873 = vst.msk [vmem:[#allocation2 + $0xa] sm:$0xff] %vm694_vm0, %v855_v29  ;;  %v2372_v36 = vadd.f32 %v1979_v17, %v834_v30  ;;  %v860_v37 = vmax.f32 %v2365_v32, 0.0  ;;  %v1708_v32 = vld [vmem:[%s2788_s18 + $0x8] sm:$0xff] }
  0xf4   : > { %872 = vst.msk [vmem:[#allocation2 + $0x2] sm:$0xff] %vm694_vm0, %v854_v33  ;;  %v2378_v38 = vadd.f32 %v1979_v17, %v833_v34  ;;  %879 = vst.msk [vmem:[#allocation2 + $0x3a] sm:$0xff] %vm694_vm0, %v861_v35  ;;  %v2072_v39 = vpop.f32.mrb[4].mxu0  ;;  %v2452_v34 = vld [vmem:[%s2807_s30] ss:$0 sm:$0xff] }
  0xf5   : > { %v857_v40 = vmax.f32 %v2372_v36, 0.0  ;;  %878 = vst.msk [vmem:[#allocation2 + $0x32] sm:$0xff] %vm694_vm0, %v860_v37  ;;  %v836_v41 = vmul.f32 %v2072_v39, %v1978_v15  ;;  %v805_v42 = vpop.f32.mrb[5].mxu0 }
  0xf6   : > { %v856_v43 = vmax.f32 %v2378_v38, 0.0  ;;  %v835_v44 = vmul.f32 %v1978_v15, %v805_v42 }
  0xf7   : > { %875 = vst.msk [vmem:[#allocation2 + $0x1a] sm:$0xff] %vm694_vm0, %v857_v40  ;;  %v2391_v45 = vadd.f32 %v1979_v17, %v836_v41 }
  0xf8   : > { %874 = vst.msk [vmem:[#allocation2 + $0x12] sm:$0xff] %vm694_vm0, %v856_v43  ;;  %v2401_v47 = vadd.f32 %v1979_v17, %v835_v44 }
  0xf9   : > { %v859_v50 = vmax.f32 %v2391_v45, 0.0 }
  0xfa   : > { %v897_v51 = vld [vmem:[#allocation2 + $0xa] sm:$0xff]  ;;  %v858_v54 = vmax.f32 %v2401_v47, 0.0 }
  0xfb   : > { %v880_v55 = vld [vmem:[#allocation2] sm:$0xff]  ;;  %v881_v56 = vld [vmem:[#allocation2 + $0x8] sm:$0xff]  ;;  %877 = vst.msk [vmem:[#allocation2 + $0x2a] sm:$0xff] %vm694_vm0, %v859_v50  ;;  %v960_v0 = vmul.f32 %v2396_v46, %v897_v51 }
  0xfc   : > { %v888_v57 = vld [vmem:[#allocation2 + $0x1] sm:$0xff]  ;;  %v889_v58 = vld [vmem:[#allocation2 + $0x9] sm:$0xff]  ;;  %v925_v61 = vmul.f32 %v2406_v48, %v880_v55  ;;  %v926_v62 = vmul.f32 %v2406_v48, %v881_v56  ;;  %876 = vst.msk [vmem:[#allocation2 + $0x22] sm:$0xff] %vm694_vm0, %v858_v54  ;;  %v887_v12 = vld [vmem:[#allocation2 + $0x38] sm:$0xff] }
  0xfd   : > { %v896_v59 = vld [vmem:[#allocation2 + $0x2] sm:$0xff]  ;;  %v938_v63 = vmul.f32 %v2411_v49, %v888_v57  ;;  %v939_v2 = vmul.f32 %v2411_v49, %v889_v58  ;;  %v903_v3 = vld [vmem:[#allocation2 + $0x3a] sm:$0xff]  ;;  %v932_v55 = vmul.f32 %v2406_v48, %v887_v12 }
  0xfe   : > { %v904_v60 = vld [vmem:[#allocation2 + $0x3] sm:$0xff]  ;;  %v911_v4 = vld [vmem:[#allocation2 + $0x3b] sm:$0xff]  ;;  %v959_v6 = vmul.f32 %v2396_v46, %v896_v59  ;;  %v966_v18 = vmul.f32 %v2396_v46, %v903_v3 }
  0xff   : > { %v912_v1 = vld [vmem:[#allocation2 + $0x4] sm:$0xff]  ;;  %v946_v5 = vadd.f32 %v938_v63, %v925_v61  ;;  %v980_v7 = vmul.f32 %v2417_v52, %v904_v60  ;;  %v899_v9 = vld [vmem:[#allocation2 + $0x1a] sm:$0xff]  ;;  %v947_v13 = vadd.f32 %v939_v2, %v926_v62  ;;  %v882_v15 = vld [vmem:[#allocation2 + $0x10] sm:$0xff]  ;;  %v2444_v19 = vmul.f32 %v2417_v52, %v911_v4 }
 0x100   : > { %v1001_v8 = vmul.f32 %v2422_v53, %v912_v1  ;;  %1055 = vst.msk [vmem:[#allocation2] sm:$0xff] %vm694_vm0, %v2168_v11  ;;  %v919_v10 = vld [vmem:[#allocation2 + $0x3c] sm:$0xff]  ;;  %v962_v14 = vmul.f32 %v2396_v46, %v899_v9  ;;  %v890_v17 = vld [vmem:[#allocation2 + $0x11] sm:$0xff]  ;;  %v927_v25 = vmul.f32 %v2406_v48, %v882_v15 }
 0x101   : > { %v883_v16 = vld [vmem:[#allocation2 + $0x18] sm:$0xff]  ;;  %v967_v20 = vadd.f32 %v959_v6, %v946_v5  ;;  %v905_v23 = vld [vmem:[#allocation2 + $0xb] sm:$0xff]  ;;  %v940_v30 = vmul.f32 %v2411_v49, %v890_v17  ;;  %v968_v31 = vadd.f32 %v960_v0, %v947_v13  ;;  %v1008_v59 = vmul.f32 %v2422_v53, %v919_v10  ;;  %v2466_v63 = vld [vmem:[%s2808_s5] ss:$0 sm:$0xff] }
 0x102   : > { %v891_v21 = vld [vmem:[#allocation2 + $0x19] sm:$0xff]  ;;  %v928_v27 = vmul.f32 %v2406_v48, %v883_v16  ;;  %v913_v41 = vld [vmem:[#allocation2 + $0xc] sm:$0xff]  ;;  %v981_v51 = vmul.f32 %v2417_v52, %v905_v23 }
 0x103   : > { %v898_v22 = vld [vmem:[#allocation2 + $0x12] sm:$0xff]  ;;  %v941_v44 = vmul.f32 %v2411_v49, %v891_v21  ;;  %v988_v56 = vadd.f32 %v980_v7, %v967_v20  ;;  %v948_v57 = vadd.f32 %v940_v30, %v927_v25  ;;  %1056 = vst.msk [vmem:[#allocation2 + $0x8] sm:$0xff] %vm694_vm0, %v2168_v11  ;;  %v1002_v2 = vmul.f32 %v2422_v53, %v913_v41  ;;  %v901_v13 = vld [vmem:[#allocation2 + $0x2a] sm:$0xff]  ;;  %v884_v23 = vld [vmem:[#allocation2 + $0x20] sm:$0xff] }
 0x104   : > { %v906_v39 = vld [vmem:[#allocation2 + $0x13] sm:$0xff]  ;;  %v961_v58 = vmul.f32 %v2396_v46, %v898_v22  ;;  %v989_v1 = vadd.f32 %v981_v51, %v968_v31  ;;  %v909_v15 = vld [vmem:[#allocation2 + $0x2b] sm:$0xff]  ;;  %v892_v25 = vld [vmem:[#allocation2 + $0x21] sm:$0xff] }
 0x105   : > { %v914_v42 = vld [vmem:[#allocation2 + $0x14] sm:$0xff]  ;;  %v949_v0 = vadd.f32 %v941_v44, %v928_v27  ;;  %v1009_v7 = vadd.f32 %v1001_v8, %v988_v56  ;;  %v982_v10 = vmul.f32 %v2417_v52, %v906_v39  ;;  %v2474_v16 = vld [vmem:[#allocation2 + $0x2c] sm:$0xff] }
 0x106   : > { %1057 = vst.msk [vmem:[#allocation2 + $0x10] sm:$0xff] %vm694_vm0, %v2168_v11  ;;  %v895_v60 = vld [vmem:[#allocation2 + $0x39] sm:$0xff]  ;;  %v886_v5 = vld [vmem:[#allocation2 + $0x30] sm:$0xff]  ;;  %v969_v9 = vadd.f32 %v961_v58, %v948_v57  ;;  %v1003_v12 = vmul.f32 %v2422_v53, %v914_v42  ;;  %v1010_v17 = vadd.f32 %v1002_v2, %v989_v1  ;;  %v885_v8 = vld [vmem:[#allocation2 + $0x28] sm:$0xff] }
 0x107   : > { %v902_v61 = vld [vmem:[#allocation2 + $0x32] sm:$0xff]  ;;  %v945_v4 = vmul.f32 %v2411_v49, %v895_v60  ;;  %1063 = vst.msk [vmem:[#allocation2 + $0x40] sm:$0xff] %vm694_vm0, %v2168_v11  ;;  %v1024_v27 = vmul.f32 %v2452_v34, %v1009_v7  ;;  %v931_v31 = vmul.f32 %v2406_v48, %v886_v5  ;;  %v893_v41 = vld [vmem:[#allocation2 + $0x29] sm:$0xff]  ;;  %v907_v44 = vld [vmem:[#allocation2 + $0x1b] sm:$0xff]  ;;  %v970_v51 = vadd.f32 %v962_v14, %v949_v0 }
 0x108   : > { %v910_v62 = vld [vmem:[#allocation2 + $0x33] sm:$0xff]  ;;  %v965_v21 = vmul.f32 %v2396_v46, %v902_v61  ;;  %v990_v30 = vadd.f32 %v982_v10, %v969_v9  ;;  %v900_v42 = vld [vmem:[#allocation2 + $0x22] sm:$0xff]  ;;  %v929_v0 = vmul.f32 %v2406_v48, %v884_v23  ;;  %v942_v9 = vmul.f32 %v2411_v49, %v892_v25 }
 0x109   : > { %v918_v3 = vld [vmem:[#allocation2 + $0x34] sm:$0xff]  ;;  %v953_v20 = vadd.f32 %v945_v4, %v932_v55  ;;  %v986_v22 = vmul.f32 %v2417_v52, %v910_v62  ;;  %v1025_v55 = vmul.f32 %v2452_v34, %v1010_v17  ;;  %v908_v58 = vld [vmem:[#allocation2 + $0x23] sm:$0xff]  ;;  %v1039_v62 = vadd.f32 %v2466_v63, %v1024_v27 }
 0x10a   : > { %v894_v6 = vld [vmem:[#allocation2 + $0x31] sm:$0xff]  ;;  %v1007_v57 = vmul.f32 %v2422_v53, %v918_v3  ;;  %v915_v60 = vld [vmem:[#allocation2 + $0x1c] sm:$0xff]  ;;  %v916_v61 = vld [vmem:[#allocation2 + $0x24] sm:$0xff]  ;;  %v1011_v1 = vadd.f32 %v1003_v12, %v990_v30  ;;  %v964_v4 = vmul.f32 %v2396_v46, %v901_v13  ;;  %v930_v3 = vmul.f32 %v2406_v48, %v885_v8 }
 0x10b   : > { %1062 = vst.msk [vmem:[#allocation2 + $0x38] sm:$0xff] %vm694_vm0, %v2168_v11  ;;  %v944_v39 = vmul.f32 %v2411_v49, %v894_v6  ;;  %v974_v56 = vadd.f32 %v966_v18, %v953_v20  ;;  %1061 = vst.msk [vmem:[#allocation2 + $0x30] sm:$0xff] %vm694_vm0, %v2168_v11  ;;  %v1040_v14 = vadd.f32 %v2466_v63, %v1025_v55  ;;  %v1047_v5 = vmax.f32 %v1039_v62, 0.0 }
 0x10c   : > { %1059 = vst.msk [vmem:[#allocation2 + $0x20] sm:$0xff] %vm694_vm0, %v2168_v11  ;;  %1060 = vst.msk [vmem:[#allocation2 + $0x28] sm:$0xff] %vm694_vm0, %v2168_v11  ;;  %v1026_v6 = vmul.f32 %v2452_v34, %v1011_v1  ;;  %v943_v13 = vmul.f32 %v2411_v49, %v893_v41  ;;  %v963_v17 = vmul.f32 %v2396_v46, %v900_v42  ;;  %v1075_v41 = vld [vmem:[#allocation2] sm:$0xff] }
 0x10d   : > { %v952_v2 = vadd.f32 %v944_v39, %v931_v31  ;;  %1058 = vst.msk [vmem:[#allocation2 + $0x18] sm:$0xff] %vm694_vm0, %v2168_v11  ;;  %v995_v18 = vadd.f32 %v2444_v19, %v974_v56  ;;  %v1048_v10 = vmax.f32 %v1040_v14, 0.0  ;;  %1067 = vst.msk [vmem:[#allocation2 + $0x9] sm:$0xff] %vm694_vm0, %v1047_v5  ;;  %v950_v23 = vadd.f32 %v942_v9, %v929_v0  ;;  %v2515_v42 = vld [vmem:[%s2777_s7] ss:$0 sm:$0xff] }
 0x10e   : > { %v1041_v20 = vadd.f32 %v2466_v63, %v1026_v6  ;;  %v983_v48 = vmul.f32 %v2417_v52, %v907_v44  ;;  %v951_v27 = vadd.f32 %v943_v13, %v930_v3  ;;  %v1004_v25 = vmul.f32 %v2422_v53, %v915_v60  ;;  %v2543_v9 = vld [vmem:[%s2777_s7 + $0x3] ss:$0 sm:$0xff] }
 0x10f   : > { %v973_v7 = vadd.f32 %v965_v21, %v952_v2  ;;  %v1016_v12 = vadd.f32 %v1008_v59, %v995_v18  ;;  %v984_v21 = vmul.f32 %v2417_v52, %v908_v58  ;;  %1068 = vst.msk [vmem:[#allocation2 + $0x11] sm:$0xff] %vm694_vm0, %v1048_v10  ;;  %v971_v46 = vadd.f32 %v963_v17, %v950_v23 }
 0x110   : > { %v1049_v49 = vmax.f32 %v1041_v20, 0.0  ;;  %v991_v30 = vadd.f32 %v983_v48, %v970_v51  ;;  %v972_v39 = vadd.f32 %v964_v4, %v951_v27  ;;  %v1005_v56 = vmul.f32 %v2422_v53, %v916_v61 }
 0x111   : > { %v994_v19 = vadd.f32 %v986_v22, %v973_v7  ;;  %v1031_v8 = vmul.f32 %v2452_v34, %v1016_v12  ;;  %v985_v22 = vmul.f32 %v2417_v52, %v909_v15  ;;  %v992_v55 = vadd.f32 %v984_v21, %v971_v46  ;;  %v2525_v15 = vld [vmem:[%s2777_s7 + $0x1] ss:$0 sm:$0xff] }
 0x112   : > { %v1012_v58 = vadd.f32 %v1004_v25, %v991_v30  ;;  %1069 = vst.msk [vmem:[#allocation2 + $0x19] sm:$0xff] %vm694_vm0, %v1049_v49  ;;  %v1136_v61 = vmul.f32 %v2515_v42, %v1075_v41 }
 0x113   : > { %v1015_v59 = vadd.f32 %v1007_v57, %v994_v19  ;;  %v1046_v31 = vadd.f32 %v2466_v63, %v1031_v8  ;;  %v1006_v57 = vmul.f32 %v2422_v53, %v2474_v16  ;;  %v993_v52 = vadd.f32 %v985_v22, %v972_v39  ;;  %v2534_v53 = vld [vmem:[%s2777_s7 + $0x2] ss:$0 sm:$0xff]  ;;  %v2561_v22 = vld [vmem:[%s2777_s7 + $0x5] ss:$0 sm:$0xff] }
 0x114   : > { %v1013_v62 = vadd.f32 %v1005_v56, %v992_v55  ;;  %v1027_v1 = vmul.f32 %v2452_v34, %v1012_v58  ;;  %v1083_v4 = vld [vmem:[#allocation2 + $0x3] sm:$0xff] }
 0x115   : > { %v1030_v44 = vmul.f32 %v2452_v34, %v1015_v59  ;;  %v1054_v51 = vmax.f32 %v1046_v31, 0.0  ;;  %v1014_v2 = vadd.f32 %v1006_v57, %v993_v52  ;;  %v1091_v14 = vld [vmem:[#allocation2 + $0x6] sm:$0xff]  ;;  %v1149_v3 = vmul.f32 %v2525_v15, %v1083_v4 }
 0x116   : > { %v1028_v18 = vmul.f32 %v2452_v34, %v1013_v62  ;;  %v1042_v0 = vadd.f32 %v2466_v63, %v1027_v1  ;;  %v1076_v5 = vld [vmem:[#allocation2 + $0x8] sm:$0xff]  ;;  %v1170_v20 = vmul.f32 %v2534_v53, %v1091_v14  ;;  %v1077_v21 = vld [vmem:[#allocation2 + $0x10] sm:$0xff] }
 0x117   : > { %v1045_v60 = vadd.f32 %v2466_v63, %v1030_v44  ;;  %1074 = vst.msk [vmem:[#allocation2 + $0x41] sm:$0xff] %vm694_vm0, %v1054_v51  ;;  %v1029_v6 = vmul.f32 %v2452_v34, %v1014_v2  ;;  %v1099_v7 = vld [vmem:[#allocation2 + $0x9] sm:$0xff]  ;;  %v1157_v17 = vadd.f32 %v1149_v3, %v1136_v61  ;;  %v2552_v34 = vld [vmem:[%s2777_s7 + $0x4] ss:$0 sm:$0xff]  ;;  %v1137_v8 = vmul.f32 %v2515_v42, %v1076_v5  ;;  %v1100_v46 = vld [vmem:[#allocation2 + $0x11] sm:$0xff] }
 0x118   : > { %v1084_v10 = vld [vmem:[#allocation2 + $0xb] sm:$0xff]  ;;  %v1043_v12 = vadd.f32 %v2466_v63, %v1028_v18  ;;  %v1050_v13 = vmax.f32 %v1042_v0, 0.0  ;;  %v1191_v59 = vmul.f32 %v2543_v9, %v1099_v7  ;;  %v1138_v51 = vmul.f32 %v2515_v42, %v1077_v21 }
 0x119   : > { %v1053_v16 = vmax.f32 %v1045_v60, 0.0  ;;  %v1092_v19 = vld [vmem:[#allocation2 + $0xe] sm:$0xff]  ;;  %v1044_v23 = vadd.f32 %v2466_v63, %v1029_v6  ;;  %v1150_v27 = vmul.f32 %v2525_v15, %v1084_v10  ;;  %v1178_v49 = vadd.f32 %v1170_v20, %v1157_v17  ;;  %v1093_v44 = vld [vmem:[#allocation2 + $0x16] sm:$0xff]  ;;  %v2572_v60 = vld [vmem:[%s2777_s7 + $0x6] ss:$0 sm:$0xff] }
 0x11a   : > { %v1107_v48 = vld [vmem:[#allocation2 + $0xc] sm:$0xff]  ;;  %v1051_v25 = vmax.f32 %v1043_v12, 0.0  ;;  %1070 = vst.msk [vmem:[#allocation2 + $0x21] sm:$0xff] %vm694_vm0, %v1050_v13  ;;  %v1171_v41 = vmul.f32 %v2534_v53, %v1092_v19  ;;  %v1108_v58 = vld [vmem:[#allocation2 + $0x14] sm:$0xff]  ;;  %v1192_v1 = vmul.f32 %v2543_v9, %v1100_v46  ;;  %v1172_v18 = vmul.f32 %v2534_v53, %v1093_v44  ;;  %v2582_v10 = vld [vmem:[%s2778_s8] ss:$0 sm:$0xff] }
 0x11b   : > { %1073 = vst.msk [vmem:[#allocation2 + $0x39] sm:$0xff] %vm694_vm0, %v1053_v16  ;;  %v1085_v30 = vld [vmem:[#allocation2 + $0x13] sm:$0xff]  ;;  %v1052_v63 = vmax.f32 %v1044_v23, 0.0  ;;  %v1158_v39 = vadd.f32 %v1150_v27, %v1137_v8  ;;  %v1199_v55 = vadd.f32 %v1191_v59, %v1178_v49  ;;  %v1212_v56 = vmul.f32 %v2552_v34, %v1107_v48 }
 0x11c   : > { %v1115_v31 = vld [vmem:[#allocation2 + $0xf] sm:$0xff]  ;;  %1071 = vst.msk [vmem:[#allocation2 + $0x29] sm:$0xff] %vm694_vm0, %v1051_v25  ;;  %v1151_v57 = vmul.f32 %v2525_v15, %v1085_v30  ;;  %v1101_v61 = vld [vmem:[#allocation2 + $0x19] sm:$0xff]  ;;  %v1213_v5 = vmul.f32 %v2552_v34, %v1108_v58 }
 0x11d   : > { %1072 = vst.msk [vmem:[#allocation2 + $0x31] sm:$0xff] %vm694_vm0, %v1052_v63  ;;  %v1123_v52 = vld [vmem:[#allocation2 + $0x12] sm:$0xff]  ;;  %v1179_v62 = vadd.f32 %v1171_v41, %v1158_v39  ;;  %v1220_v2 = vadd.f32 %v1212_v56, %v1199_v55  ;;  %v1233_v4 = vmul.f32 %v2561_v22, %v1115_v31  ;;  %v1193_v13 = vmul.f32 %v2543_v9, %v1101_v61  ;;  %v2591_v30 = vld [vmem:[%s2779_s9] ss:$0 sm:$0xff] }
 0x11e   : > { %v1116_v14 = vld [vmem:[#allocation2 + $0x17] sm:$0xff]  ;;  %v1159_v16 = vadd.f32 %v1151_v57, %v1138_v51  ;;  %v1254_v7 = vmul.f32 %v2572_v60, %v1123_v52 }
 0x11f   : > { %v1078_v0 = vld [vmem:[#allocation2 + $0x18] sm:$0xff]  ;;  %v1200_v3 = vadd.f32 %v1192_v1, %v1179_v62  ;;  %v1241_v6 = vadd.f32 %v1233_v4, %v1220_v2  ;;  %v1234_v19 = vmul.f32 %v2561_v22, %v1116_v14 }
 0x120   : > { %v1180_v12 = vadd.f32 %v1172_v18, %v1159_v16  ;;  %v1139_v8 = vmul.f32 %v2515_v42, %v1078_v0 }
 0x121   : > { %v1124_v17 = vld [vmem:[#allocation2 + $0x1a] sm:$0xff]  ;;  %v1221_v20 = vadd.f32 %v1213_v5, %v1200_v3  ;;  %v1262_v27 = vadd.f32 %v1254_v7, %v1241_v6 }
 0x122   : > { %v1109_v23 = vld [vmem:[#allocation2 + $0x1c] sm:$0xff]  ;;  %v1201_v21 = vadd.f32 %v1193_v13, %v1180_v12  ;;  %v1255_v31 = vmul.f32 %v2572_v60, %v1124_v17 }
 0x123   : > { %v1117_v48 = vld [vmem:[#allocation2 + $0x1f] sm:$0xff]  ;;  %v1214_v25 = vmul.f32 %v2552_v34, %v1109_v23  ;;  %v1242_v63 = vadd.f32 %v1234_v19, %v1221_v20  ;;  %v1277_v55 = vmul.f32 %v2582_v10, %v1262_v27  ;;  %v1118_v1 = vld [vmem:[#allocation2 + $0x27] sm:$0xff] }
 0x124   : > { %v1086_v49 = vld [vmem:[#allocation2 + $0x1b] sm:$0xff]  ;;  %v1235_v58 = vmul.f32 %v2561_v22, %v1117_v48  ;;  %v1087_v57 = vld [vmem:[#allocation2 + $0x23] sm:$0xff]  ;;  %v1088_v20 = vld [vmem:[#allocation2 + $0x2b] sm:$0xff] }
 0x125   : > { %v1094_v59 = vld [vmem:[#allocation2 + $0x1e] sm:$0xff]  ;;  %v1152_v44 = vmul.f32 %v2525_v15, %v1086_v49  ;;  %v1222_v56 = vadd.f32 %v1214_v25, %v1201_v21  ;;  %v1263_v52 = vadd.f32 %v1255_v31, %v1242_v63  ;;  %v1292_v14 = vadd.f32 %v2591_v30, %v1277_v55  ;;  %v1095_v3 = vld [vmem:[#allocation2 + $0x26] sm:$0xff]  ;;  %v1096_v63 = vld [vmem:[#allocation2 + $0x2e] sm:$0xff] }
 0x126   : > { %v1090_v46 = vld [vmem:[#allocation2 + $0x3b] sm:$0xff]  ;;  %v1110_v62 = vld [vmem:[#allocation2 + $0x24] sm:$0xff]  ;;  %v1173_v2 = vmul.f32 %v2534_v53, %v1094_v59  ;;  %v1153_v13 = vmul.f32 %v2525_v15, %v1087_v57  ;;  %v1111_v49 = vld [vmem:[#allocation2 + $0x2c] sm:$0xff]  ;;  %v1154_v55 = vmul.f32 %v2525_v15, %v1088_v20 }
 0x127   : > { %v1125_v39 = vld [vmem:[#allocation2 + $0x22] sm:$0xff]  ;;  %v1160_v61 = vadd.f32 %v1152_v44, %v1139_v8  ;;  %v2599_v4 = vmul.f32 %v2525_v15, %v1090_v46  ;;  %v1243_v16 = vadd.f32 %v1235_v58, %v1222_v56  ;;  %v1278_v5 = vmul.f32 %v2582_v10, %v1263_v52  ;;  %v1126_v6 = vld [vmem:[#allocation2 + $0x2a] sm:$0xff] }
 0x128   : > { %v1102_v41 = vld [vmem:[#allocation2 + $0x21] sm:$0xff]  ;;  %v1256_v18 = vmul.f32 %v2572_v60, %v1125_v39  ;;  %v1300_v19 = vmax.f32 %v1292_v14, 0.0  ;;  %v1215_v48 = vmul.f32 %v2552_v34, %v1110_v62  ;;  %v1236_v8 = vmul.f32 %v2561_v22, %v1118_v1  ;;  %v1103_v27 = vld [vmem:[#allocation2 + $0x29] sm:$0xff]  ;;  %v1104_v62 = vld [vmem:[#allocation2 + $0x31] sm:$0xff] }
 0x129   : > { %v1079_v51 = vld [vmem:[#allocation2 + $0x20] sm:$0xff]  ;;  %v1194_v0 = vmul.f32 %v2543_v9, %v1102_v41  ;;  %v1181_v7 = vadd.f32 %v1173_v2, %v1160_v61  ;;  %v1080_v17 = vld [vmem:[#allocation2 + $0x28] sm:$0xff]  ;;  %v1293_v21 = vadd.f32 %v2591_v30, %v1278_v5  ;;  %v1174_v46 = vmul.f32 %v2534_v53, %v1095_v3  ;;  %v1081_v56 = vld [vmem:[#allocation2 + $0x30] sm:$0xff] }
 0x12a   : > { %v1140_v12 = vmul.f32 %v2515_v42, %v1079_v51  ;;  %v1264_v23 = vadd.f32 %v1256_v18, %v1243_v16  ;;  %2080 = vmatprep.mubr.msk.f32.mxu1 %vm694_vm0, %v1300_v19  ;;  %v1257_v39 = vmul.f32 %v2572_v60, %v1126_v6  ;;  %v1119_v41 = vld [vmem:[#allocation2 + $0x2f] sm:$0xff]  ;;  %v1141_v44 = vmul.f32 %v2515_v42, %v1080_v17 }
 0x12b   : > { %v1202_v25 = vadd.f32 %v1194_v0, %v1181_v7  ;;  %v1301_v58 = vmax.f32 %v1293_v21, 0.0  ;;  %v1195_v52 = vmul.f32 %v2543_v9, %v1103_v27  ;;  %v1089_v1 = vld [vmem:[#allocation2 + $0x33] sm:$0xff]  ;;  %v1216_v14 = vmul.f32 %v2552_v34, %v1111_v49 }
 0x12c   : > { %v1161_v59 = vadd.f32 %v1153_v13, %v1140_v12  ;;  %v1279_v31 = vmul.f32 %v2582_v10, %v1264_v23  ;;  %v1127_v2 = vld [vmem:[#allocation2 + $0x32] sm:$0xff]  ;;  %v1162_v16 = vadd.f32 %v1154_v55, %v1141_v44  ;;  %v1175_v18 = vmul.f32 %v2534_v53, %v1096_v63  ;;  %v1106_v44 = vld [vmem:[#allocation2 + $0x41] sm:$0xff] }
 0x12d   : > { %v1223_v51 = vadd.f32 %v1215_v48, %v1202_v25  ;;  %v1082_v0 = vld [vmem:[#allocation2 + $0x38] sm:$0xff]  ;;  %2081 = vmatmul.mubr.msk.f32.vlgmr.msra.gmra.mrb[2].mxu1 %vm694_vm0, %v1301_v58  ;;  %v1237_v6 = vmul.f32 %v2561_v22, %v1119_v41  ;;  %v1142_v13 = vmul.f32 %v2515_v42, %v1081_v56  ;;  %v1196_v19 = vmul.f32 %v2543_v9, %v1104_v62 }
 0x12e   : > { %v1182_v57 = vadd.f32 %v1174_v46, %v1161_v59  ;;  %v1294_v61 = vadd.f32 %v2591_v30, %v1279_v31  ;;  %v1112_v7 = vld [vmem:[#allocation2 + $0x34] sm:$0xff]  ;;  %v1183_v20 = vadd.f32 %v1175_v18, %v1162_v16  ;;  %v1155_v23 = vmul.f32 %v2525_v15, %v1089_v1  ;;  %v1098_v48 = vld [vmem:[#allocation2 + $0x3e] sm:$0xff] }
 0x12f   : > { %v1244_v3 = vadd.f32 %v1236_v8, %v1223_v51  ;;  %v1097_v12 = vld [vmem:[#allocation2 + $0x36] sm:$0xff]  ;;  %v1258_v25 = vmul.f32 %v2572_v60, %v1127_v2  ;;  %v1143_v59 = vmul.f32 %v2515_v42, %v1082_v0  ;;  %v1217_v63 = vmul.f32 %v2552_v34, %v1112_v7  ;;  %v1114_v1 = vld [vmem:[#allocation2 + $0x44] sm:$0xff] }
 0x130   : > { %v1203_v5 = vadd.f32 %v1195_v52, %v1182_v57  ;;  %v1302_v17 = vmax.f32 %v1294_v61, 0.0  ;;  %v1120_v49 = vld [vmem:[#allocation2 + $0x37] sm:$0xff]  ;;  %v1204_v46 = vadd.f32 %v1196_v19, %v1183_v20  ;;  %v1163_v31 = vadd.f32 %v1155_v23, %v1142_v13  ;;  %v1129_v13 = vld [vmem:[#allocation2 + $0x42] sm:$0xff] }
 0x131   : > { %v1265_v27 = vadd.f32 %v1257_v39, %v1244_v3  ;;  %v1105_v8 = vld [vmem:[#allocation2 + $0x39] sm:$0xff]  ;;  %v1176_v41 = vmul.f32 %v2534_v53, %v1097_v12  ;;  %v1164_v58 = vadd.f32 %v2599_v4, %v1143_v59  ;;  %v1177_v51 = vmul.f32 %v2534_v53, %v1098_v48 }
 0x132   : > { %v1224_v21 = vadd.f32 %v1216_v14, %v1203_v5  ;;  %2083 = vmatprep.mubr.msk.f32.mxu1 %vm694_vm0, %v1302_v17  ;;  %v1128_v39 = vld [vmem:[#allocation2 + $0x3a] sm:$0xff]  ;;  %v1225_v57 = vadd.f32 %v1217_v63, %v1204_v46  ;;  %v1238_v42 = vmul.f32 %v2561_v22, %v1120_v49  ;;  %v1197_v62 = vmul.f32 %v2543_v9, %v1105_v8  ;;  %v1122_v5 = vld [vmem:[#allocation2 + $0x47] sm:$0xff] }
 0x133   : > { %v1280_v15 = vmul.f32 %v2582_v10, %v1265_v27  ;;  %v1113_v56 = vld [vmem:[#allocation2 + $0x3c] sm:$0xff]  ;;  %v1184_v52 = vadd.f32 %v1176_v41, %v1163_v31  ;;  %v1185_v16 = vadd.f32 %v1177_v51, %v1164_v58  ;;  %v1198_v18 = vmul.f32 %v2543_v9, %v1106_v44 }
 0x134   : > { %v1245_v55 = vadd.f32 %v1237_v6, %v1224_v21  ;;  %v1121_v14 = vld [vmem:[#allocation2 + $0x3f] sm:$0xff]  ;;  %v1246_v0 = vadd.f32 %v1238_v42, %v1225_v57  ;;  %v1259_v3 = vmul.f32 %v2572_v60, %v1128_v39  ;;  %v1218_v53 = vmul.f32 %v2552_v34, %v1113_v56  ;;  %v1130_v6 = vld [vmem:[#allocation2 + $0x4a] sm:$0xff] }
 0x135   : > { %v1295_v61 = vadd.f32 %v2591_v30, %v1280_v15  ;;  %v1205_v4 = vadd.f32 %v1197_v62, %v1184_v52  ;;  %v1206_v17 = vadd.f32 %v1198_v18, %v1185_v16  ;;  %v1219_v20 = vmul.f32 %v2552_v34, %v1114_v1  ;;  %v1523_v58 = vld [vmem:[%s2785_s15] sm:$0xff] }
 0x136   : > { %v1266_v2 = vadd.f32 %v1258_v25, %v1245_v55  ;;  %v1267_v19 = vadd.f32 %v1259_v3, %v1246_v0  ;;  %v1239_v48 = vmul.f32 %v2561_v22, %v1121_v14  ;;  %v1240_v21 = vmul.f32 %v2561_v22, %v1122_v5  ;;  %v2005_v42 = vld [vmem:[%s2782_s12] ss:$0 sm:$0xff] }
 0x137   : > { %v1303_v7 = vmax.f32 %v1295_v61, 0.0  ;;  %v1226_v23 = vadd.f32 %v1218_v53, %v1205_v4  ;;  %v1227_v27 = vadd.f32 %v1219_v20, %v1206_v17  ;;  %v1261_v25 = vmul.f32 %v2572_v60, %v1130_v6  ;;  %v2006_v16 = vld [vmem:[%s2783_s13] ss:$0 sm:$0xff] }
 0x138   : > { %v1281_v12 = vmul.f32 %v2582_v10, %v1266_v2  ;;  %v1282_v49 = vmul.f32 %v2582_v10, %v1267_v19  ;;  %v1260_v59 = vmul.f32 %v2572_v60, %v1129_v13  ;;  %v2007_v3 = vld [vmem:[%s2784_s14] ss:$0 sm:$0xff] }
 0x139   : > { %2084 = vmatmul.mubr.msk.f32.gmra.mrb[4].mxu1 %vm694_vm0, %v1303_v7  ;;  %v1247_v8 = vadd.f32 %v1239_v48, %v1226_v23  ;;  %v1248_v34 = vadd.f32 %v1240_v21, %v1227_v27 }
 0x13a   : > { %v1296_v9 = vadd.f32 %v2591_v30, %v1281_v12  ;;  %v1297_v63 = vadd.f32 %v2591_v30, %v1282_v49 }
 0x13b   : > { %v1268_v31 = vadd.f32 %v1260_v59, %v1247_v8  ;;  %v1269_v41 = vadd.f32 %v1261_v25, %v1248_v34 }
 0x13c   : > { %v1304_v46 = vmax.f32 %v1296_v9, 0.0  ;;  %v1305_v44 = vmax.f32 %v1297_v63, 0.0 }
 0x13d   : > { %v1283_v15 = vmul.f32 %v2582_v10, %v1268_v31  ;;  %v1284_v22 = vmul.f32 %v2582_v10, %v1269_v41  ;;  %v1524_v10 = vld [vmem:[%s2785_s15 + $0x8] sm:$0xff] }
 0x13e   : > { %2086 = vmatprep.mubr.msk.f32.mxu1 %vm694_vm0, %v1304_v46  ;;  %v2128_v51 = vpack.c.bf16 %v1524_v10, %v1523_v58 }
 0x13f   : > { %2087 = vmatmul.mubr.msk.f32.gmra.mrb[6].mxu1 %vm694_vm0, %v1305_v44  ;;  %v1298_v55 = vadd.f32 %v2591_v30, %v1283_v15  ;;  %v1299_v39 = vadd.f32 %v2591_v30, %v1284_v22  ;;  %v2004_v30 = vld [vmem:[%s2781_s11] ss:$0 sm:$0xff] }
 0x140   : > { %2129 = vmatprep.subr.bf16.mxu0 %v2128_v51 }
 0x141   : > { %v1306_v60 = vmax.f32 %v1298_v55, 0.0  ;;  %v1307_v56 = vmax.f32 %v1299_v39, 0.0  ;;  %2131 = vmatpush3.bf16.msra.mxu0 %v2128_v51 }
 0x143   : > { %2089 = vmatprep.mubr.msk.f32.mxu1 %vm694_vm0, %v1306_v60 }
 0x144   : > { %2090 = vmatmul.mubr.msk.f32.gmra.mrb[8].mxu1 %vm694_vm0, %v1307_v56 }
 0x145   : > { %2112 = vmatprep.mubr.msk.f32.mxu1 %vm2170_vm3, %v2168_v11 }
 0x200   : > { %v2082_v57 = vpop.f32.mrb[2].mxu1 }
 0x201   : > { %v1447_v52 = vmul.f32 %v2082_v57, %v2004_v30  ;;  %v1400_v62 = vpop.f32.mrb[3].mxu1 }
 0x202   : > { %v1446_v1 = vmul.f32 %v2004_v30, %v1400_v62 }
 0x203   : > { %v1462_v61 = vadd.f32 %v2005_v42, %v1447_v52 }
 0x204   : > { %v1461_v2 = vadd.f32 %v2005_v42, %v1446_v1 }
 0x205   : > { %v1470_v14 = vmax.f32 %v1462_v61, 0.0 }
 0x206   : > { %v1469_v18 = vmax.f32 %v1461_v2, 0.0 }
 0x207   : > { %v1478_v0 = vmul.f32 %v1470_v14, %v855_v29 }
 0x208   : > { %v1477_v4 = vmul.f32 %v1469_v18, %v854_v33  ;;  %v2016_v18 = vld [vmem:[%s2786_s16] ss:$0 sm:$0xff] }
 0x209   : > { %v1493_v53 = vmul.f32 %v2006_v16, %v1478_v0 }
 0x20a   : > { %v1492_v5 = vmul.f32 %v2006_v16, %v1477_v4 }
 0x20b   : > { %v1508_v7 = vadd.f32 %v2007_v3, %v1493_v53  ;;  %v2017_v53 = vld [vmem:[%s2787_s17] ss:$0 sm:$0xff] }
 0x20c   : > { %v2085_v6 = vpop.f32.mrb[4].mxu1  ;;  %v1507_v20 = vadd.f32 %v2007_v3, %v1492_v5 }
 0x20d   : > { %v1449_v12 = vmul.f32 %v2085_v6, %v2004_v30  ;;  %v1410_v13 = vpop.f32.mrb[5].mxu1  ;;  %v1516_v24 = vmax.f32 %v1508_v7, 0.0 }
 0x20e   : > { %v1448_v17 = vmul.f32 %v2004_v30, %v1410_v13  ;;  %v1515_v48 = vmax.f32 %v1507_v20, 0.0 }
 0x20f   : > { %v1464_v19 = vadd.f32 %v2005_v42, %v1449_v12 }
 0x210   : > { %v1463_v23 = vadd.f32 %v2005_v42, %v1448_v17  ;;  %2096 = vmatprep.mubr.msk.f32.mxu0 %vm694_vm0, %v1515_v48 }
 0x211   : > { %v1472_v29 = vmax.f32 %v1464_v19, 0.0  ;;  %2097 = vmatmul.mubr.msk.f32.vlgmr.msra.gmra.mrb[6].mxu0 %vm694_vm0, %v1516_v24 }
 0x212   : > { %v1471_v9 = vmax.f32 %v1463_v23, 0.0  ;;  %v2088_v33 = vpop.f32.mrb[6].mxu1 }
 0x213   : > { %v1480_v26 = vmul.f32 %v1472_v29, %v857_v40  ;;  %v1451_v21 = vmul.f32 %v2088_v33, %v2004_v30  ;;  %v1420_v25 = vpop.f32.mrb[7].mxu1 }
 0x214   : > { %v1479_v27 = vmul.f32 %v1471_v9, %v856_v43  ;;  %v1450_v8 = vmul.f32 %v2004_v30, %v1420_v25 }
 0x215   : > { %v1495_v49 = vmul.f32 %v2006_v16, %v1480_v26  ;;  %v1466_v46 = vadd.f32 %v2005_v42, %v1451_v21 }
 0x216   : > { %v1494_v59 = vmul.f32 %v2006_v16, %v1479_v27  ;;  %v1465_v34 = vadd.f32 %v2005_v42, %v1450_v8 }
 0x217   : > { %v1510_v63 = vadd.f32 %v2007_v3, %v1495_v49  ;;  %v1474_v31 = vmax.f32 %v1466_v46, 0.0  ;;  %v2091_v41 = vpop.f32.mrb[8].mxu1 }
 0x218   : > { %v1509_v44 = vadd.f32 %v2007_v3, %v1494_v59  ;;  %v1473_v15 = vmax.f32 %v1465_v34, 0.0  ;;  %v1453_v36 = vmul.f32 %v2091_v41, %v2004_v30  ;;  %v1430_v40 = vpop.f32.mrb[9].mxu1 }
 0x219   : > { %v1482_v22 = vmul.f32 %v1474_v31, %v859_v50  ;;  %v1452_v55 = vmul.f32 %v2004_v30, %v1430_v40  ;;  %v1518_v60 = vmax.f32 %v1510_v63, 0.0 }
 0x21a   : > { %v1517_v38 = vmax.f32 %v1509_v44, 0.0  ;;  %v1481_v43 = vmul.f32 %v1473_v15, %v858_v54  ;;  %v1468_v39 = vadd.f32 %v2005_v42, %v1453_v36 }
 0x21b   : > { %v1497_v56 = vmul.f32 %v2006_v16, %v1482_v22  ;;  %v1467_v58 = vadd.f32 %v2005_v42, %v1452_v55 }
 0x21c   : > { %2099 = vmatprep.mubr.msk.f32.mxu0 %vm694_vm0, %v1517_v38  ;;  %v1496_v10 = vmul.f32 %v2006_v16, %v1481_v43  ;;  %v1476_v51 = vmax.f32 %v1468_v39, 0.0 }
 0x21d   : > { %2100 = vmatmul.mubr.msk.f32.gmra.mrb[8].mxu0 %vm694_vm0, %v1518_v60  ;;  %v1475_v57 = vmax.f32 %v1467_v58, 0.0  ;;  %v1512_v52 = vadd.f32 %v2007_v3, %v1497_v56 }
 0x21e   : > { %v1484_v45 = vmul.f32 %v1476_v51, %v861_v35  ;;  %v1511_v50 = vadd.f32 %v2007_v3, %v1496_v10  ;;  %v2169_v35 = vmov 0.0|0.0  }
 0x21f   : > { %v1483_v47 = vmul.f32 %v1475_v57, %v860_v37  ;;  %v1520_v1 = vmax.f32 %v1512_v52, 0.0  ;;  %2132 = vmatprep.subr.bf16.mxu1 %v2169_v35  ;;  %v2133_v37 = vpack.c.bf16 %v1708_v32, %v1707_v28  ;;  %v1870_v35 = vlaneseq }
 0x220   : > { %v1499_v54 = vmul.f32 %v2006_v16, %v1484_v45  ;;  %v1519_v30 = vmax.f32 %v1511_v50, 0.0  ;;  %v1784_v45 = vld [vmem:[%s2790_s20] sm:$0xf] }
 0x221   : > { %v1498_v62 = vmul.f32 %v2006_v16, %v1483_v47  ;;  %2134 = vmatpush3.bf16.msra.mxu1 %v2133_v37  ;;  %v1709_v50 = vld [vmem:[%s2789_s19] sm:$0x1]  ;;  %v1871_v37 = vshrl.u32 %v1870_v35, 7 }
 0x222   : > { %2102 = vmatprep.mubr.msk.f32.mxu0 %vm694_vm0, %v1519_v30  ;;  %v1514_v42 = vadd.f32 %v2007_v3, %v1499_v54  ;;  %2115 = vmatprep.subr.mxu1 %v2168_v11 }
 0x223   : > { %2103 = vmatmul.mubr.msk.f32.gmra.mrb[10].mxu0 %vm694_vm0, %v1520_v1  ;;  %v1513_v61 = vadd.f32 %v2007_v3, %v1498_v62 }
 0x224   : > { %v1522_v14 = vmax.f32 %v1514_v42, 0.0 }
 0x225   : > { %v1521_v2 = vmax.f32 %v1513_v61, 0.0 }
 0x227   : > { %2105 = vmatprep.mubr.msk.f32.mxu0 %vm694_vm0, %v1521_v2 }
 0x228   : > { %2106 = vmatmul.mubr.msk.f32.gmra.mrb[12].mxu0 %vm694_vm0, %v1522_v14 }
 0x2e4   : > { %v2098_v16 = vpop.f32.mrb[6].mxu0 }
 0x2e5   : > { %v1615_v0 = vpop.f32.mrb[7].mxu0  ;;  %v1662_v3 = vmul.f32 %v2098_v16, %v2016_v18  ;;  %v1872_v16 = vsub.s32 0, %v1871_v37 }
 0x2e6   : > { %v1661_v4 = vmul.f32 %v2016_v18, %v1615_v0 }
 0x2e7   : > { %v2714_v5 = vadd.f32 %v2017_v53, %v1662_v3 }
 0x2e8   : > { %v2716_v6 = vadd.f32 %v2017_v53, %v1661_v4 }
 0x2e9   : > { %v1685_v17 = vsel %vm694_vm0, %v2714_v5, 0.0 }
 0x2ea   : > { %v1684_v20 = vsel %vm694_vm0, %v2716_v6, 0.0 }
 0x2eb   : > { %v1686_v48 = vadd.f32 %v1685_v17, %v1684_v20 }
 0x2f0   : > { %v2101_v7 = vpop.f32.mrb[8].mxu0 }
 0x2f1   : > { %v1664_v12 = vmul.f32 %v2101_v7, %v2016_v18  ;;  %v1625_v13 = vpop.f32.mrb[9].mxu0 }
 0x2f2   : > { %v1663_v19 = vmul.f32 %v2016_v18, %v1625_v13 }
 0x2f3   : > { %v1679_v24 = vadd.f32 %v2017_v53, %v1664_v12 }
 0x2f4   : > { %v2722_v23 = vadd.f32 %v2017_v53, %v1663_v19  ;;  %v2152_v19 = vld [vmem:[%s2308_s25] sm:$0xff] }
 0x2f5   : > { %v1689_v21 = vsel %vm694_vm0, %v1679_v24, 0.0 }
 0x2f6   : > { %v1687_v29 = vsel %vm694_vm0, %v2722_v23, 0.0  ;;  %v2104_v26 = vpop.f32.mrb[10].mxu0 }
 0x2f7   : > { %v1688_v9 = vadd.f32 %v1687_v29, %v1686_v48  ;;  %v1666_v33 = vmul.f32 %v2104_v26, %v2016_v18  ;;  %v1635_v27 = vpop.f32.mrb[11].mxu0  ;;  %v2153_v29 = vld [vmem:[%s2308_s25 + $0x8] sm:$0xff]  ;;  %v2154_v26 = vld [vmem:[%s2308_s25 + $0x10] sm:$0xff] }
 0x2f8   : > { %v1665_v25 = vmul.f32 %v2016_v18, %v1635_v27 }
 0x2f9   : > { %v1690_v49 = vadd.f32 %v1689_v21, %v1688_v9  ;;  %v1681_v8 = vadd.f32 %v2017_v53, %v1666_v33  ;;  %v2155_v33 = vld [vmem:[%s2308_s25 + $0x18] sm:$0xff] }
 0x2fa   : > { %v1680_v59 = vadd.f32 %v2017_v53, %v1665_v25  ;;  %v2158_v25 = vld [vmem:[%s2308_s25 + $0x30] sm:$0xff] }
 0x2fb   : > { %v2107_v46 = vpop.f32.mrb[12].mxu0  ;;  %v1693_v15 = vsel %vm694_vm0, %v1681_v8, 0.0 }
 0x2fc   : > { %v1691_v34 = vsel %vm694_vm0, %v1680_v59, 0.0  ;;  %v1668_v63 = vmul.f32 %v2107_v46, %v2016_v18  ;;  %v1645_v31 = vpop.f32.mrb[13].mxu0 }
 0x2fd   : > { %v1692_v41 = vadd.f32 %v1691_v34, %v1690_v49  ;;  %v1667_v44 = vmul.f32 %v2016_v18, %v1645_v31 }
 0x2fe   : > { %v1683_v36 = vadd.f32 %v2017_v53, %v1668_v63 }
 0x2ff   : > { %v1682_v40 = vadd.f32 %v2017_v53, %v1667_v44  ;;  %v1694_v22 = vadd.f32 %v1693_v15, %v1692_v41 }
 0x300   : > { %v1697_v43 = vsel %vm694_vm0, %v1683_v36, 0.0 }
 0x301   : > { %v1695_v55 = vsel %vm694_vm0, %v1682_v40, 0.0 }
 0x302   : > { %v1696_v38 = vadd.f32 %v1695_v55, %v1694_v22 }
 0x304   : > { %v1698_v39 = vadd.f32 %v1697_v43, %v1696_v38 }
 0x306   : > { %v1699_v60 = vrot.slane %v1698_v39, 4 }
 0x308   : > { %v1700_v56 = vadd.f32 %v1699_v60, %v1698_v39 }
 0x30a   : > { %v1701_v58 = vrot.slane %v1700_v56, 2 }
 0x30c   : > { %v1702_v10 = vadd.f32 %v1701_v58, %v1700_v56 }
 0x30e   : > { %v1703_v51 = vrot.slane %v1702_v10, 1 }
 0x310   : > { %v1704_v57 = vadd.f32 %v1703_v51, %v1702_v10 }
 0x312   : > { %v1706_v52 = vmul.f32 0.015625, %v1704_v57 }
 0x314   : > { %2113 = vmatmul.mubr.msk.f32.vlgmr.msra.gmra.mrb[10].mxu1 %vm694_vm0, %v1706_v52 }
 0x315   : > { %2117 = vmatprep.mubr.msk.f32.mxu1 %vm2170_vm3, %v2168_v11  ;;  %2116 = vmatpush3.msk.msra.mxu1 %vm1790_vm4, %v1784_v45  ;;  %v1785_v11 = vld [vmem:[%s2791_s21] sm:$0x1] }
 0x3e7   : > { %v1779_v47 = vpop.f32.mrb[10].mxu1 }
 0x3e8   : > { %v1780_v54 = vadd.f32 %v1779_v47, %v1709_v50  ;;  %v2114_v30 = vpop.f32.mrb[11].mxu1 }
 0x3ea   : > { %v1783_v62 = vmax.f32 %v1780_v54, 0.0 }
 0x3ec   : > { %2118 = vmatmul.mubr.msk.f32.vlgmr.msra.gmra.mrb[12].mxu1 %vm1786_vm5, %v1783_v62 }
 0x4bf   : > { %v1860_v1 = vpop.f32.mrb[12].mxu1 }
 0x4c0   : > { %v1861_v42 = vadd.f32 %v1860_v1, %v1785_v11  ;;  %v2119_v61 = vpop.f32.mrb[13].mxu1 }
 0x4c2   : > { %v1864_v2 = vsub.f32 0.0, %v1861_v42 }
 0x4c4   : > { %v1865_v14 = vmul.f32 1.442695, %v1864_v2 }
 0x4c6   : > { %2148 = vpow2.f32 %v1865_v14 }
 0x4d0   : > { %v2149_v28 = vpop.eup %2148 }
 0x4d1   : > { %v1867_v32 = vadd.f32 1.0, %v2149_v28 }
 0x4d3   : > { %2150 = vrcp.f32 %v1867_v32 }
 0x4dd   : > { %v2151_v18 = vpop.eup %2150 }
 0x4de   : > { %v1873_v0 = vrot.slane %v2151_v18, %v1872_v16 }
 0x4e0   : > { %v1874_v3 = vmul.f32 %v1873_v0, %v2716_v6  ;;  %v1875_v4 = vmul.f32 %v1873_v0, %v2714_v5  ;;  %v1876_v53 = vmul.f32 %v1873_v0, %v2722_v23  ;;  %v1877_v7 = vmul.f32 %v1873_v0, %v1679_v24  ;;  %v2156_v5 = vld [vmem:[%s2308_s25 + $0x20] sm:$0xff]  ;;  %v2157_v24 = vld [vmem:[%s2308_s25 + $0x28] sm:$0xff] }
 0x4e1   : > { %v1878_v12 = vmul.f32 %v1873_v0, %v1680_v59  ;;  %v1879_v13 = vmul.f32 %v1873_v0, %v1681_v8  ;;  %v1880_v17 = vmul.f32 %v1873_v0, %v1682_v40  ;;  %v1881_v20 = vmul.f32 %v1873_v0, %v1683_v36  ;;  %v2159_v8 = vld [vmem:[%s2308_s25 + $0x38] sm:$0xff] }
 0x4e2   : > { %v1882_v48 = vadd.f32 %v2152_v19, %v1874_v3  ;;  %v1883_v9 = vadd.f32 %v2153_v29, %v1875_v4  ;;  %v1884_v6 = vadd.f32 %v2154_v26, %v1876_v53  ;;  %v1885_v27 = vadd.f32 %v2155_v33, %v1877_v7 }
 0x4e3   : > { %v1886_v23 = vadd.f32 %v2156_v5, %v1878_v12  ;;  %v1887_v21 = vadd.f32 %v2157_v24, %v1879_v13  ;;  %v1888_v49 = vadd.f32 %v2158_v25, %v1880_v17  ;;  %v1889_v59 = vadd.f32 %v2159_v8, %v1881_v20 }
 0x4e4   : > { %v1890_v46 = vmax.f32 %v1882_v48, 0.0  ;;  %v1891_v34 = vmax.f32 %v1883_v9, 0.0  ;;  %v1892_v63 = vmax.f32 %v1884_v6, 0.0  ;;  %v1893_v31 = vmax.f32 %v1885_v27, 0.0 }
 0x4e5   : > { %v1894_v41 = vmax.f32 %v1886_v23, 0.0  ;;  %v1895_v44 = vmax.f32 %v1887_v21, 0.0  ;;  %v1896_v15 = vmax.f32 %v1888_v49, 0.0  ;;  %v1897_v36 = vmax.f32 %v1889_v59, 0.0 }
 0x4e6   : > { %1898 = vst.msk [vmem:[%s683_s6] sm:$0xff] %vm694_vm0, %v1890_v46  ;;  %1899 = vst.msk [vmem:[%s683_s6 + $0x8] sm:$0xff] %vm694_vm0, %v1891_v34 }
 0x4e7   : > { %1900 = vst.msk [vmem:[%s683_s6 + $0x10] sm:$0xff] %vm694_vm0, %v1892_v63  ;;  %1901 = vst.msk [vmem:[%s683_s6 + $0x18] sm:$0xff] %vm694_vm0, %v1893_v31 }
 0x4e8   : > { %1902 = vst.msk [vmem:[%s683_s6 + $0x20] sm:$0xff] %vm694_vm0, %v1894_v41  ;;  %1903 = vst.msk [vmem:[%s683_s6 + $0x28] sm:$0xff] %vm694_vm0, %v1895_v44 }
 0x4e9   : > { %1904 = vst.msk [vmem:[%s683_s6 + $0x30] sm:$0xff] %vm694_vm0, %v1896_v15  ;;  %1905 = vst.msk [vmem:[%s683_s6 + $0x38] sm:$0xff] %vm694_vm0, %v1897_v36 }
 0x4ea PF: > { %s32_s3 = sadd.s32 1, %s2166_s3  }
 0x4eb   : > { %p29_p4 = scmp.ge.s32.totalorder %s32_s3, 4  }
 0x4ed   :  { %31 = sbr.rel (!%p29_p4) target bundleno = 8 (0x8), region = 138 }

// kernel: _lambda_.10
= control target key start
LH: loop header
LB: loop body
LE: loop exit
PB: predicated region body
PF: predicated region fallthrough
CT: control target
= control target key end

     0   :  { %s2033_s29 = smov 0   ;;  %s2296_s0 = inlined_call_operand.vmem [shape: f32[2,16,32], index: 0, kind: input, shape index: {}]   ;;  %s2297_s1 = inlined_call_operand.vmem [shape: f32[32,64], index: 1, kind: input, shape index: {}]   ;;  %s2298_s2 = inlined_call_operand.vmem [shape: f32[1,64], index: 2, kind: input, shape index: {}, may-alias: {2,5,8,11,13,16,23}]   ;;  %s2299_s3 = inlined_call_operand.vmem [shape: f32[1,64], index: 3, kind: input, shape index: {}, may-alias: {3,6,9,12,14,24}]   ;;  %s2300_s4 = inlined_call_operand.vmem [shape: f32[5,64], index: 4, kind: input, shape index: {}]   ;;  %s2301_s5 = inlined_call_operand.vmem [shape: f32[1,64], index: 5, kind: input, shape index: {}, may-alias: {2,5,8,11,13,16,23}]   ;;  %s2302_s6 = inlined_call_operand.vmem [shape: f32[1,64], index: 6, kind: input, shape index: {}, may-alias: {3,6,9,12,14,24}]   ;;  %s2303_s7 = inlined_call_operand.vmem [shape: f32[7,64], index: 7, kind: input, shape index: {}]   ;;  %s2304_s8 = inlined_call_operand.vmem [shape: f32[1,64], index: 8, kind: input, shape index: {}, may-alias: {2,5,8,11,13,16,23}]   ;;  %s2305_s9 = inlined_call_operand.vmem [shape: f32[1,64], index: 9, kind: input, shape index: {}, may-alias: {3,6,9,12,14,24}]   ;;  %s2306_s10 = inlined_call_operand.vmem [shape: f32[64,64], index: 10, kind: input, shape index: {}]   ;;  %s2307_s11 = inlined_call_operand.vmem [shape: f32[1,64], index: 11, kind: input, shape index: {}, may-alias: {2,5,8,11,13,16,23}]   ;;  %s2308_s12 = inlined_call_operand.vmem [shape: f32[1,64], index: 12, kind: input, shape index: {}, may-alias: {3,6,9,12,14,24}]   ;;  %s2309_s13 = inlined_call_operand.vmem [shape: f32[1,64], index: 13, kind: input, shape index: {}, may-alias: {2,5,8,11,13,16,23}]   ;;  %s2310_s14 = inlined_call_operand.vmem [shape: f32[1,64], index: 14, kind: input, shape index: {}, may-alias: {3,6,9,12,14,24}]   ;;  %s2311_s15 = inlined_call_operand.vmem [shape: f32[64,64], index: 15, kind: input, shape index: {}]   ;;  %s2312_s16 = inlined_call_operand.vmem [shape: f32[1,64], index: 16, kind: input, shape index: {}, may-alias: {2,5,8,11,13,16,23}]   ;;  %s2313_s17 = inlined_call_operand.vmem [shape: f32[1,64], index: 17, kind: input, shape index: {}]   ;;  %s2314_s18 = inlined_call_operand.vmem [shape: f32[64,16], index: 18, kind: input, shape index: {}]   ;;  %s2315_s19 = inlined_call_operand.vmem [shape: f32[1,16], index: 19, kind: input, shape index: {}]   ;;  %s2316_s20 = inlined_call_operand.vmem [shape: f32[16,64], index: 20, kind: input, shape index: {}]   ;;  %s2317_s21 = inlined_call_operand.vmem [shape: f32[1,64], index: 21, kind: input, shape index: {}]   ;;  %s2318_s22 = inlined_call_operand.vmem [shape: f32[32,64], index: 22, kind: input, shape index: {}]   ;;  %s2319_s23 = inlined_call_operand.vmem [shape: f32[1,64], index: 23, kind: input, shape index: {}, may-alias: {2,5,8,11,13,16,23}]   ;;  %s2320_s24 = inlined_call_operand.vmem [shape: f32[1,64], index: 24, kind: input, shape index: {}, may-alias: {3,6,9,12,14,24}]   ;;  %s2321_s25 = inlined_call_operand.vmem [shape: f32[2,16,64], index: 25, kind: output, shape index: {}]  }
   0x1   :  { %2325 = sst [smem:[#allocation3_spill]] %s2296_s0 }
   0x2   :  { %2326 = sst [smem:[#allocation4_spill]] %s2297_s1 }
   0x3   :  { %2327 = sst [smem:[#allocation5_spill]] %s2298_s2 }
   0x4   :  { %2328 = sst [smem:[#allocation6_spill]] %s2299_s3 }
   0x5   :  { %2329 = sst [smem:[#allocation7_spill]] %s2300_s4 }
   0x6   :  { %2330 = sst [smem:[#allocation8_spill]] %s2301_s5 }
   0x7   :  { %2331 = sst [smem:[#allocation9_spill]] %s2302_s6 }
   0x8   :  { %2332 = sst [smem:[#allocation10_spill]] %s2303_s7 }
   0x9   :  { %2333 = sst [smem:[#allocation11_spill]] %s2304_s8 }
   0xa   :  { %2334 = sst [smem:[#allocation12_spill]] %s2305_s9 }
   0xb LB: > { %s1635_s2 = sadd.s32 4294967295, %s1898_s29   ;;  %p1639_p0 = scmp.ge.s32.totalorder %s1898_s29, 1  ;;  %s1898_s29 = sphi %s2033_s29, %s35_s29  }
   0xc   : > { %p687_p1 = scmp.lt.s32.totalorder %s1898_s29, 3 }
   0xe   : > { %p688_p2 = pnand %p1639_p0, %p687_p1 }
   0xf   : > { %v767_v0 = vld [vmem:[%s2318_s22] sm:$0xff] (!%p688_p2)  ;;  %v768_v1 = vld [vmem:[%s2318_s22 + $0x8] sm:$0xff] (!%p688_p2)  ;;  %v769_v2 = vld [vmem:[%s2318_s22 + $0x10] sm:$0xff] (!%p688_p2)  ;;  %p755_p3 = scmp.lt.s32.totalorder (!%p688_p2), %s1635_s2, 1  ;;  %s2335_s9 = sld [smem:[#allocation4_spill]] (!%p688_p2)  ;;  %vm771_vm0 = vcmask (!%p688_p2), 261120  }
  0x10   : > { %691 = sbr.rel (%p688_p2) target bundleno = 1240 (0x4d8), region = 120  ;;  %v1814_v3 = vpack.c.bf16 (!%p688_p2), %v768_v1, %v767_v0  ;;  %v770_v4 = vld [vmem:[%s2318_s22 + $0x18] sm:$0xff] (!%p688_p2)  ;;  %s2336_s3 = sld [smem:[#allocation3_spill]] (!%p688_p2)  ;;  %vm970_vm1 = vcmask (!%p688_p2), 523264   ;;  %vm973_vm2 = vcmask (!%p688_p2), 519168   ;;  %v1900_v14 = vmov (!%p688_p2), 0.0  }
  0x11   : > { %v1818_v5 = vpack.c.bf16 (!%p688_p2), %v770_v4, %v769_v2  ;;  %972 = vst.msk [vmem:[#allocation2 + $0x8] sm:$0xff] (!%p688_p2), %vm970_vm1, %v1900_v14  ;;  %971 = vst.msk [vmem:[#allocation2] sm:$0xff] (!%p688_p2), %vm970_vm1, %v1900_v14  ;;  %v1153_v15 = vld [vmem:[%s2306_s10] sm:$0xff] (!%p688_p2)  ;;  %v1154_v16 = vld [vmem:[%s2306_s10 + $0x8] sm:$0xff] (!%p688_p2)  ;;  %vm1054_vm3 = vcmask (!%p688_p2), 517120   ;;  %s2337_s1 = sld [smem:[#allocation5_spill]] (!%p688_p2) }
  0x12   : > { %1815 = vmatprep.subr.bf16.mxu1 (!%p688_p2), %v1814_v3  ;;  %974 = vst.msk [vmem:[#allocation2 + $0x10] sm:$0xf] (!%p688_p2), %vm973_vm2, %v1900_v14  ;;  %v1830_v17 = vpack.c.bf16 (!%p688_p2), %v1154_v16, %v1153_v15  ;;  %v1155_v18 = vld [vmem:[%s2306_s10 + $0x10] sm:$0xff] (!%p688_p2)  ;;  %v1156_v19 = vld [vmem:[%s2306_s10 + $0x18] sm:$0xff] (!%p688_p2)  ;;  %v1157_v20 = vld [vmem:[%s2306_s10 + $0x20] sm:$0xff] (!%p688_p2)  ;;  %s2338_s4 = sld [smem:[#allocation6_spill]] (!%p688_p2) }
  0x13   : > { %1817 = vmatpush3.bf16.msra.mxu1 (!%p688_p2), %v1814_v3  ;;  %1053 = vst.msk [vmem:[#allocation2 + $0x18] sm:$0xff] (!%p688_p2), %vm970_vm1, %v1900_v14  ;;  %v1834_v21 = vpack.c.bf16 (!%p688_p2), %v1156_v19, %v1155_v18  ;;  %v1158_v22 = vld [vmem:[%s2306_s10 + $0x28] sm:$0xff] (!%p688_p2)  ;;  %v1159_v24 = vld [vmem:[%s2306_s10 + $0x30] sm:$0xff] (!%p688_p2)  ;;  %v1160_v25 = vld [vmem:[%s2306_s10 + $0x38] sm:$0xff] (!%p688_p2)  ;;  %s2339_s0 = sld [smem:[#allocation7_spill]] (!%p688_p2)  ;;  %s2340_s30 = sld [smem:[#allocation8_spill]] (!%p688_p2) }
  0x14   : > { %1819 = vmatprep.subr.bf16.mxu1 (!%p688_p2), %v1818_v5  ;;  %1831 = vmatprep.subr.bf16.mxu0 (!%p688_p2), %v1830_v17  ;;  %1055 = vst.msk [vmem:[#allocation2 + $0x20] sm:$0x3] (!%p688_p2), %vm1054_vm3, %v1900_v14  ;;  %v1838_v23 = vpack.c.bf16 (!%p688_p2), %v1158_v22, %v1157_v20  ;;  %v1842_v26 = vpack.c.bf16 (!%p688_p2), %v1160_v25, %v1159_v24  ;;  %s2342_s27 = sld [smem:[#allocation10_spill]] (!%p688_p2)  ;;  %s2344_s8 = sld [smem:[#allocation12_spill]] (!%p688_p2)  ;;  %vm1902_vm4 = vmmov (!%p688_p2), 0   ;;  %vm1488_vm5 = vcmask (!%p688_p2), 130048  }
  0x15   : > { %v871_v6 = vld [vmem:[%s2335_s9] sm:$0xff] (!%p688_p2)  ;;  %v872_v7 = vld [vmem:[%s2335_s9 + $0x8] sm:$0xff] (!%p688_p2)  ;;  %v873_v10 = vld [vmem:[%s2335_s9 + $0x10] sm:$0xff] (!%p688_p2)  ;;  %1833 = vmatpush3.bf16.msra.mxu0 (!%p688_p2), %v1830_v17 }
  0x16   : > { %v1822_v8 = vpack.c.bf16 (!%p688_p2), %v872_v7, %v871_v6  ;;  %v874_v11 = vld [vmem:[%s2335_s9 + $0x18] sm:$0xff] (!%p688_p2)  ;;  %1835 = vmatprep.subr.bf16.mxu0 (!%p688_p2), %v1834_v21 }
  0x17   : > { %s2346_s2 = smov (!%p755_p3, %s1635_s2), 1  ;;  %1821 = vmatpush3.bf16.msra.mxu1 %v1818_v5  ;;  %v1826_v13 = vpack.c.bf16 %v874_v11, %v873_v10  ;;  %v1650_v29 = vld [vmem:[%s2337_s1] ss:$0 sm:$0xff] }
  0x18   : > { %s1682_s6 = sshll.u32 %s2346_s2, 4  ;;  %1823 = vmatprep.subr.bf16.mxu1 %v1822_v8  ;;  %v1651_v31 = vld [vmem:[%s2338_s4] ss:$0 sm:$0xff] }
  0x19   : > { %s759_s26 = scalar_lea.vmem %s2336_s3, %s1682_s6  ;;  %1837 = vmatpush3.bf16.msra.mxu0 %v1834_v21  ;;  %v1652_v39 = vld [vmem:[%s2339_s0] ss:$0 sm:$0xff]  ;;  %v1653_v40 = vld [vmem:[%s2339_s0 + $0x1] ss:$0 sm:$0xff]  ;;  %v1654_v43 = vld [vmem:[%s2339_s0 + $0x2] ss:$0 sm:$0xff]  ;;  %s764_s7 = scalar_lea.vmem %s2321_s25, %s1682_s6 }
  0x1a   : > { %v765_v9 = vld [vmem:[%s759_s26] sm:$0xff]  ;;  %v766_v12 = vld [vmem:[%s759_s26 + $0x8] sm:$0xff]  ;;  %1839 = vmatprep.subr.bf16.mxu0 %v1838_v23  ;;  %s2341_s26 = sld [smem:[#allocation9_spill]]  ;;  %s2343_s3 = sld [smem:[#allocation11_spill]] }
  0x1b   : > { %1736 = vmatprep.mubr.msk.f32.mxu1 %vm771_vm0, %v765_v9  ;;  %v1655_v56 = vld [vmem:[%s2339_s0 + $0x3] ss:$0 sm:$0xff]  ;;  %v1656_v61 = vld [vmem:[%s2339_s0 + $0x4] ss:$0 sm:$0xff]  ;;  %v1657_v6 = vld [vmem:[%s2340_s30] ss:$0 sm:$0xff] }
  0x1c   : > { %1737 = vmatmul.mubr.msk.f32.vlgmr.msra.gmra.mrb[0].mxu1 %vm771_vm0, %v766_v12  ;;  %v1659_v18 = vld [vmem:[%s2342_s27] ss:$0 sm:$0xff]  ;;  %v1660_v19 = vld [vmem:[%s2342_s27 + $0x1] ss:$0 sm:$0xff]  ;;  %v1661_v21 = vld [vmem:[%s2342_s27 + $0x2] ss:$0 sm:$0xff] }
  0x1d   : > { %1825 = vmatpush3.bf16.msra.mxu1 %v1822_v8  ;;  %1747 = vmatprep.mubr.msk.f32.mxu1 %vm771_vm0, %v765_v9 }
  0x1e   : > { %1827 = vmatprep.subr.bf16.mxu1 %v1826_v13  ;;  %1841 = vmatpush3.bf16.msra.mxu0 %v1838_v23 }
  0x1f   : > { %1843 = vmatprep.subr.bf16.mxu0 %v1842_v26 }
  0x20   : > { %v1658_v9 = vld [vmem:[%s2341_s26] ss:$0 sm:$0xff] }
  0x21   : > { %1829 = vmatpush3.bf16.msra.mxu1 %v1826_v13 }
  0x22   : > { %1845 = vmatpush3.bf16.msra.mxu0 %v1842_v26 }
  0x24   : > { %1748 = vmatmul.mubr.msk.f32.vlgmr.msra.gmra.mrb[2].mxu1 %vm771_vm0, %v766_v12 }
  0xef   : > { %v2109_v27 = vpop.f32.mrb[0].mxu1 }
  0xf0   : > { %v2111_v28 = vpop.f32.mrb[1].mxu1 }
  0xf7   : > { %v1749_v30 = vpop.f32.mrb[2].mxu1 }
  0xf8   : > { %v958_v32 = vmul.f32 %v1749_v30, %v1650_v29  ;;  %v941_v33 = vpop.f32.mrb[3].mxu1 }
  0xf9   : > { %v957_v34 = vmul.f32 %v1650_v29, %v941_v33  ;;  %v1662_v33 = vld [vmem:[%s2342_s27 + $0x3] ss:$0 sm:$0xff] }
  0xfa   : > { %v2119_v35 = vadd.f32 %v1651_v31, %v958_v32 }
  0xfb   : > { %v2121_v36 = vadd.f32 %v1651_v31, %v957_v34 }
  0xfc   : > { %v969_v37 = vmax.f32 %v2119_v35, 0.0  ;;  %v1402_v35 = vld [vmem:[%s2314_s18] sm:$0xff] }
  0xfd   : > { %v968_v38 = vmax.f32 %v2121_v36, 0.0 }
  0xfe   : > { %976 = vst.msk [vmem:[#allocation2 + $0xa] sm:$0xff] %vm970_vm1, %v969_v37 }
  0xff   : > { %975 = vst.msk [vmem:[#allocation2 + $0x2] sm:$0xff] %vm970_vm1, %v968_v38 }
 0x105   : > { %v982_v41 = vld [vmem:[#allocation2 + $0xa] sm:$0xff] }
 0x106   : > { %v984_v42 = vld [vmem:[#allocation2 + $0xb] sm:$0xff]  ;;  %v977_v44 = vld [vmem:[#allocation2] sm:$0xff]  ;;  %v1009_v60 = vmul.f32 %v1654_v43, %v982_v41 }
 0x107   : > { %v978_v45 = vld [vmem:[#allocation2 + $0x8] sm:$0xff]  ;;  %v992_v50 = vmul.f32 %v1652_v39, %v977_v44  ;;  %v1018_v1 = vmul.f32 %v1655_v56, %v984_v42  ;;  %v1663_v44 = vld [vmem:[%s2342_s27 + $0x4] ss:$0 sm:$0xff] }
 0x108   : > { %v979_v46 = vld [vmem:[#allocation2 + $0x1] sm:$0xff]  ;;  %v986_v47 = vld [vmem:[#allocation2 + $0xc] sm:$0xff]  ;;  %v993_v51 = vmul.f32 %v1652_v39, %v978_v45 }
 0x109   : > { %v980_v48 = vld [vmem:[#allocation2 + $0x9] sm:$0xff]  ;;  %v999_v52 = vmul.f32 %v1653_v40, %v979_v46  ;;  %v1027_v5 = vmul.f32 %v1656_v61, %v986_v47 }
 0x10a   : > { %v981_v49 = vld [vmem:[#allocation2 + $0x2] sm:$0xff]  ;;  %v1000_v55 = vmul.f32 %v1653_v40, %v980_v48  ;;  %1052 = vst.msk [vmem:[#allocation2 + $0x10] sm:$0xff] %vm970_vm1, %v1900_v14 }
 0x10b   : > { %v983_v53 = vld [vmem:[#allocation2 + $0x3] sm:$0xff]  ;;  %v1001_v57 = vadd.f32 %v999_v52, %v992_v50  ;;  %v1008_v58 = vmul.f32 %v1654_v43, %v981_v49 }
 0x10c   : > { %v985_v54 = vld [vmem:[#allocation2 + $0x4] sm:$0xff]  ;;  %v1002_v59 = vadd.f32 %v1000_v55, %v993_v51  ;;  %v1017_v63 = vmul.f32 %v1655_v56, %v983_v53  ;;  %v1071_v53 = vld [vmem:[#allocation2 + $0x1a] sm:$0xff] }
 0x10d   : > { %1050 = vst.msk [vmem:[#allocation2] sm:$0xff] %vm970_vm1, %v1900_v14  ;;  %1051 = vst.msk [vmem:[#allocation2 + $0x8] sm:$0xff] %vm970_vm1, %v1900_v14  ;;  %v1010_v62 = vadd.f32 %v1008_v58, %v1001_v57  ;;  %v1026_v3 = vmul.f32 %v1656_v61, %v985_v54  ;;  %v1664_v51 = vld [vmem:[%s2342_s27 + $0x5] ss:$0 sm:$0xff] }
 0x10e   : > { %v1011_v0 = vadd.f32 %v1009_v60, %v1002_v59  ;;  %v1665_v59 = vld [vmem:[%s2342_s27 + $0x6] ss:$0 sm:$0xff] }
 0x10f   : > { %v1019_v2 = vadd.f32 %v1017_v63, %v1010_v62 }
 0x110   : > { %v1020_v4 = vadd.f32 %v1018_v1, %v1011_v0  ;;  %v1130_v0 = vmul.f32 %v1665_v59, %v1071_v53  ;;  %v1404_v53 = vld [vmem:[%s2314_s18 + $0x10] sm:$0xff] }
 0x111   : > { %v1028_v7 = vadd.f32 %v1026_v3, %v1019_v2 }
 0x112   : > { %v1029_v8 = vadd.f32 %v1027_v5, %v1020_v4  ;;  %v1666_v4 = vld [vmem:[%s2343_s3] ss:$0 sm:$0xff] }
 0x113   : > { %v1037_v10 = vmul.f32 %v1657_v6, %v1028_v7  ;;  %v1667_v7 = vld [vmem:[%s2344_s8] ss:$0 sm:$0xff] }
 0x114   : > { %v1038_v11 = vmul.f32 %v1657_v6, %v1029_v8  ;;  %v1058_v17 = vld [vmem:[#allocation2] sm:$0xff] }
 0x115   : > { %v1046_v12 = vadd.f32 %v1658_v9, %v1037_v10  ;;  %v1077_v20 = vmul.f32 %v1659_v18, %v1058_v17 }
 0x116   : > { %v1047_v13 = vadd.f32 %v1658_v9, %v1038_v11 }
 0x117   : > { %v1048_v15 = vmax.f32 %v1046_v12, 0.0 }
 0x118   : > { %v1049_v16 = vmax.f32 %v1047_v13, 0.0 }
 0x119   : > { %1056 = vst.msk [vmem:[#allocation2 + $0x9] sm:$0xff] %vm970_vm1, %v1048_v15  ;;  %v1284_v15 = vld [vmem:[%s2311_s15] sm:$0xff] }
 0x11a   : > { %1057 = vst.msk [vmem:[#allocation2 + $0x11] sm:$0xff] %vm970_vm1, %v1049_v16  ;;  %v1285_v16 = vld [vmem:[%s2311_s15 + $0x8] sm:$0xff] }
 0x11b   : > { %v1846_v17 = vpack.c.bf16 %v1285_v16, %v1284_v15  ;;  %v1485_v16 = vld [vmem:[%s2316_s20] sm:$0xff] }
 0x11d   : > { %1847 = vmatprep.subr.bf16.mxu1 %v1846_v17 }
 0x11e   : > { %1849 = vmatpush3.bf16.msra.mxu1 %v1846_v17  ;;  %v1486_v17 = vld [vmem:[%s2316_s20 + $0x8] sm:$0xff] }
 0x120   : > { %v1059_v22 = vld [vmem:[#allocation2 + $0x8] sm:$0xff] }
 0x121   : > { %v1060_v23 = vld [vmem:[#allocation2 + $0x3] sm:$0xff]  ;;  %v1061_v25 = vld [vmem:[#allocation2 + $0xb] sm:$0xff]  ;;  %v1078_v29 = vmul.f32 %v1659_v18, %v1059_v22  ;;  %v1067_v45 = vld [vmem:[#allocation2 + $0x14] sm:$0xff] }
 0x122   : > { %v1062_v24 = vld [vmem:[#allocation2 + $0x6] sm:$0xff]  ;;  %v1063_v26 = vld [vmem:[#allocation2 + $0xe] sm:$0xff]  ;;  %v1084_v30 = vmul.f32 %v1660_v19, %v1060_v23  ;;  %v1085_v32 = vmul.f32 %v1660_v19, %v1061_v25  ;;  %v1069_v52 = vld [vmem:[#allocation2 + $0x17] sm:$0xff]  ;;  %v1112_v58 = vmul.f32 %v1663_v44, %v1067_v45 }
 0x123   : > { %v1064_v31 = vld [vmem:[#allocation2 + $0x9] sm:$0xff]  ;;  %v1065_v34 = vld [vmem:[#allocation2 + $0x11] sm:$0xff]  ;;  %v1093_v40 = vmul.f32 %v1661_v21, %v1062_v24  ;;  %v1094_v43 = vmul.f32 %v1661_v21, %v1063_v26  ;;  %v1121_v63 = vmul.f32 %v1664_v51, %v1069_v52  ;;  %v1288_v21 = vld [vmem:[%s2311_s15 + $0x20] sm:$0xff] }
 0x124   : > { %v1086_v39 = vadd.f32 %v1084_v30, %v1077_v20  ;;  %v1066_v41 = vld [vmem:[#allocation2 + $0xc] sm:$0xff]  ;;  %v1087_v42 = vadd.f32 %v1085_v32, %v1078_v29  ;;  %v1102_v47 = vmul.f32 %v1662_v33, %v1064_v31  ;;  %v1103_v50 = vmul.f32 %v1662_v33, %v1065_v34  ;;  %v1287_v19 = vld [vmem:[%s2311_s15 + $0x18] sm:$0xff]  ;;  %v1670_v29 = vld [vmem:[%s2307_s11] ss:$0 sm:$0xff] }
 0x125   : > { %v1068_v48 = vld [vmem:[#allocation2 + $0xf] sm:$0xff]  ;;  %v1111_v55 = vmul.f32 %v1663_v44, %v1066_v41  ;;  %v1291_v25 = vld [vmem:[%s2311_s15 + $0x38] sm:$0xff]  ;;  %v1671_v31 = vld [vmem:[%s2308_s12] ss:$0 sm:$0xff] }
 0x126   : > { %v1095_v46 = vadd.f32 %v1093_v40, %v1086_v39  ;;  %v1096_v49 = vadd.f32 %v1094_v43, %v1087_v42  ;;  %v1070_v56 = vld [vmem:[#allocation2 + $0x12] sm:$0xff]  ;;  %v1120_v61 = vmul.f32 %v1664_v51, %v1068_v48  ;;  %v1289_v22 = vld [vmem:[%s2311_s15 + $0x28] sm:$0xff]  ;;  %v1672_v42 = vld [vmem:[%s2309_s13] ss:$0 sm:$0xff] }
 0x127   : > { %v1129_v2 = vmul.f32 %v1665_v59, %v1070_v56  ;;  %v1286_v18 = vld [vmem:[%s2311_s15 + $0x10] sm:$0xff]  ;;  %v1854_v23 = vpack.c.bf16 %v1289_v22, %v1288_v21  ;;  %v1673_v45 = vld [vmem:[%s2310_s14] ss:$0 sm:$0xff] }
 0x128   : > { %v1104_v54 = vadd.f32 %v1102_v47, %v1095_v46  ;;  %v1105_v57 = vadd.f32 %v1103_v50, %v1096_v49  ;;  %v1850_v20 = vpack.c.bf16 %v1287_v19, %v1286_v18  ;;  %v1290_v24 = vld [vmem:[%s2311_s15 + $0x30] sm:$0xff]  ;;  %v1406_v56 = vld [vmem:[%s2314_s18 + $0x20] sm:$0xff]  ;;  %v1875_v18 = vpack.c.bf16 %v1486_v17, %v1485_v16 }
 0x129   : > { %v1858_v26 = vpack.c.bf16 %v1291_v25, %v1290_v24  ;;  %v1408_v59 = vld [vmem:[%s2314_s18 + $0x30] sm:$0xff]  ;;  %v1410_v19 = vld [vmem:[%s2315_s19] sm:$0x1] }
 0x12a   : > { %v1113_v60 = vadd.f32 %v1111_v55, %v1104_v54  ;;  %v1114_v62 = vadd.f32 %v1112_v58, %v1105_v57  ;;  %1851 = vmatprep.subr.bf16.mxu1 %v1850_v20  ;;  %v1405_v54 = vld [vmem:[%s2314_s18 + $0x18] sm:$0xff]  ;;  %v1407_v57 = vld [vmem:[%s2314_s18 + $0x28] sm:$0xff]  ;;  %v1487_v24 = vld [vmem:[%s2317_s21] sm:$0x1] }
 0x12b   : > { %1853 = vmatpush3.bf16.msra.mxu1 %v1850_v20  ;;  %v1866_v55 = vpack.c.bf16 %v1405_v54, %v1404_v53  ;;  %v1869_v58 = vpack.c.bf16 %v1407_v57, %v1406_v56 }
 0x12c   : > { %v1122_v1 = vadd.f32 %v1120_v61, %v1113_v60  ;;  %v1123_v3 = vadd.f32 %v1121_v63, %v1114_v62  ;;  %1855 = vmatprep.subr.bf16.mxu1 %v1854_v23  ;;  %v1409_v60 = vld [vmem:[%s2314_s18 + $0x38] sm:$0xff]  ;;  %v1676_v62 = vld [vmem:[%s2312_s16] ss:$0 sm:$0xff] }
 0x12d   : > { %v1872_v61 = vpack.c.bf16 %v1409_v60, %v1408_v59 }
 0x12e   : > { %v1131_v5 = vadd.f32 %v1129_v2, %v1122_v1  ;;  %v1132_v6 = vadd.f32 %v1130_v0, %v1123_v3  ;;  %v1677_v0 = vld [vmem:[%s2313_s17] ss:$0 sm:$0xff] }
 0x12f   : > { %1857 = vmatpush3.bf16.msra.mxu1 %v1854_v23 }
 0x130   : > { %v1140_v8 = vmul.f32 %v1666_v4, %v1131_v5  ;;  %v1141_v9 = vmul.f32 %v1666_v4, %v1132_v6  ;;  %1859 = vmatprep.subr.bf16.mxu1 %v1858_v26 }
 0x132   : > { %v1149_v10 = vadd.f32 %v1667_v7, %v1140_v8  ;;  %v1150_v11 = vadd.f32 %v1667_v7, %v1141_v9 }
 0x133   : > { %1861 = vmatpush3.bf16.msra.mxu1 %v1858_v26 }
 0x134   : > { %v1151_v12 = vmax.f32 %v1149_v10, 0.0  ;;  %v1152_v13 = vmax.f32 %v1150_v11, 0.0 }
 0x136   : > { %1766 = vmatprep.mubr.msk.f32.mxu0 %vm970_vm1, %v1151_v12 }
 0x137   : > { %1767 = vmatmul.mubr.msk.f32.vlgmr.msra.gmra.mrb[0].mxu0 %vm970_vm1, %v1152_v13 }
 0x138   : > { %1804 = vmatprep.mubr.msk.f32.mxu0 %vm1902_vm4, %v1900_v14 }
 0x20a   : > { %v1768_v30 = vpop.f32.mrb[0].mxu0 }
 0x20b   : > { %v1250_v32 = vmul.f32 %v1768_v30, %v1670_v29  ;;  %v1233_v33 = vpop.f32.mrb[1].mxu0 }
 0x20c   : > { %v1249_v34 = vmul.f32 %v1670_v29, %v1233_v33 }
 0x20d   : > { %v1259_v39 = vadd.f32 %v1671_v31, %v1250_v32 }
 0x20e   : > { %v1258_v40 = vadd.f32 %v1671_v31, %v1249_v34  ;;  %v1568_v34 = vlaneseq }
 0x20f   : > { %v1261_v41 = vmax.f32 %v1259_v39, 0.0 }
 0x210   : > { %v1260_v43 = vmax.f32 %v1258_v40, 0.0  ;;  %v1569_v39 = vshrl.u32 %v1568_v34, 7  ;;  %v1646_v40 = vld [vmem:[%s2319_s23] ss:$0 sm:$0xff] }
 0x211   : > { %v1263_v44 = vmul.f32 %v1261_v41, %v969_v37  ;;  %v1403_v37 = vld [vmem:[%s2314_s18 + $0x8] sm:$0xff] }
 0x212   : > { %v1262_v46 = vmul.f32 %v1260_v43, %v968_v38  ;;  %v1863_v36 = vpack.c.bf16 %v1403_v37, %v1402_v35  ;;  %v1901_v38 = vmov 0.0|0.0   ;;  %v1570_v41 = vsub.s32 0, %v1569_v39 }
 0x213   : > { %v1272_v47 = vmul.f32 %v1672_v42, %v1263_v44  ;;  %1862 = vmatprep.subr.bf16.mxu0 %v1901_v38  ;;  %1874 = vmatprep.subr.bf16.mxu1 %v1901_v38  ;;  %v860_v43 = vmul.f32 %v1646_v40, %v2111_v28 }
 0x214   : > { %v1271_v48 = vmul.f32 %v1672_v42, %v1262_v46  ;;  %1864 = vmatpush3.bf16.msra.mxu0 %v1863_v36  ;;  %v861_v42 = vmul.f32 %v2109_v27, %v1646_v40 }
 0x215   : > { %v1281_v49 = vadd.f32 %v1673_v45, %v1272_v47  ;;  %1865 = vmatprep.subr.bf16.mxu0 %v1901_v38 }
 0x216   : > { %v1280_v50 = vadd.f32 %v1673_v45, %v1271_v48  ;;  %v1647_v45 = vld [vmem:[%s2320_s24] ss:$0 sm:$0xff] }
 0x217   : > { %v1283_v52 = vmax.f32 %v1281_v49, 0.0  ;;  %v870_v47 = vadd.f32 %v1647_v45, %v861_v42  ;;  %v869_v48 = vadd.f32 %v1647_v45, %v860_v43 }
 0x218   : > { %v1282_v51 = vmax.f32 %v1280_v50, 0.0  ;;  %1867 = vmatpush3.bf16.msra.mxu0 %v1866_v55 }
 0x219   : > { %1868 = vmatprep.subr.bf16.mxu0 %v1901_v38 }
 0x21a   : > { %1785 = vmatprep.mubr.msk.f32.mxu1 %vm970_vm1, %v1282_v51 }
 0x21b   : > { %1786 = vmatmul.mubr.msk.f32.vlgmr.msra.gmra.mrb[4].mxu1 %vm970_vm1, %v1283_v52 }
 0x21c   : > { %1870 = vmatpush3.bf16.msra.mxu0 %v1869_v58  ;;  %1811 = vmatprep.mubr.msk.f32.mxu1 %vm1902_vm4, %v1900_v14 }
 0x21d   : > { %1871 = vmatprep.subr.bf16.mxu0 %v1901_v38  ;;  %1876 = vmatpush3.bf16.msra.mxu1 %v1875_v18 }
 0x220   : > { %1873 = vmatpush3.bf16.msra.mxu0 %v1872_v61 }
 0x2ee   : > { %v1787_v63 = vpop.f32.mrb[4].mxu1 }
 0x2ef   : > { %v1381_v1 = vmul.f32 %v1787_v63, %v1676_v62  ;;  %v1364_v2 = vpop.f32.mrb[5].mxu1 }
 0x2f0   : > { %v1380_v3 = vmul.f32 %v1676_v62, %v1364_v2 }
 0x2f1   : > { %v1390_v4 = vadd.f32 %v1677_v0, %v1381_v1 }
 0x2f2   : > { %v1389_v5 = vadd.f32 %v1677_v0, %v1380_v3 }
 0x2f3   : > { %v1392_v6 = vsel %vm970_vm1, %v1390_v4, 0.0 }
 0x2f4   : > { %v1391_v7 = vsel %vm970_vm1, %v1389_v5, 0.0 }
 0x2f5   : > { %v1393_v14 = vadd.f32 %v1392_v6, %v1391_v7 }
 0x2f7   : > { %v1394_v8 = vrot.slane %v1393_v14, 4 }
 0x2f9   : > { %v1395_v9 = vadd.f32 %v1394_v8, %v1393_v14 }
 0x2fb   : > { %v1396_v10 = vrot.slane %v1395_v9, 2 }
 0x2fd   : > { %v1397_v11 = vadd.f32 %v1396_v10, %v1395_v9 }
 0x2ff   : > { %v1398_v12 = vrot.slane %v1397_v11, 1 }
 0x301   : > { %v1399_v13 = vadd.f32 %v1398_v12, %v1397_v11 }
 0x303   : > { %v1401_v15 = vmul.f32 0.0625, %v1399_v13 }
 0x305   : > { %1805 = vmatmul.mubr.msk.f32.vlgmr.msra.gmra.mrb[2].mxu0 %vm970_vm1, %v1401_v15 }
 0x3d8   : > { %v1480_v20 = vpop.f32.mrb[2].mxu0 }
 0x3d9   : > { %v1481_v21 = vadd.f32 %v1480_v20, %v1410_v19  ;;  %v1806_v22 = vpop.f32.mrb[3].mxu0 }
 0x3db   : > { %v1484_v23 = vmax.f32 %v1481_v21, 0.0 }
 0x3dd   : > { %1812 = vmatmul.mubr.msk.f32.vlgmr.msra.gmra.mrb[6].mxu1 %vm1488_vm5, %v1484_v23 }
 0x4b0   : > { %v1558_v25 = vpop.f32.mrb[6].mxu1 }
 0x4b1   : > { %v1559_v26 = vadd.f32 %v1558_v25, %v1487_v24  ;;  %v1813_v29 = vpop.f32.mrb[7].mxu1 }
 0x4b3   : > { %v1562_v30 = vsub.f32 0.0, %v1559_v26 }
 0x4b5   : > { %v1563_v31 = vmul.f32 1.442695, %v1562_v30 }
 0x4b7   : > { %1888 = vpow2.f32 %v1563_v31 }
 0x4c1   : > { %v1889_v32 = vpop.eup %1888 }
 0x4c2   : > { %v1565_v33 = vadd.f32 1.0, %v1889_v32 }
 0x4c4   : > { %1890 = vrcp.f32 %v1565_v33 }
 0x4ce   : > { %v1891_v44 = vpop.eup %1890 }
 0x4cf   : > { %v1571_v46 = vrot.slane %v1891_v44, %v1570_v41 }
 0x4d1   : > { %v1572_v49 = vmul.f32 %v1571_v46, %v1389_v5  ;;  %v1573_v50 = vmul.f32 %v1571_v46, %v1390_v4 }
 0x4d3   : > { %v1574_v51 = vadd.f32 %v1572_v49, %v869_v48  ;;  %v1575_v52 = vadd.f32 %v1573_v50, %v870_v47 }
 0x4d5   : > { %v1576_v27 = vmax.f32 %v1574_v51, 0.0  ;;  %v1577_v35 = vmax.f32 %v1575_v52, 0.0 }
 0x4d7   : > { %1578 = vst.msk [vmem:[%s764_s7] sm:$0xff] %vm970_vm1, %v1576_v27  ;;  %1579 = vst.msk [vmem:[%s764_s7 + $0x8] sm:$0xff] %vm970_vm1, %v1577_v35 }
 0x4d8 PF: > { %s35_s29 = sadd.s32 1, %s1898_s29  }
 0x4d9   : > { %p32_p4 = scmp.ge.s32.totalorder %s35_s29, 4  }
 0x4db   :  { %34 = sbr.rel (!%p32_p4) target bundleno = 11 (0xb), region = 150 }

// kernel: _lambda_.11
= control target key start
LH: loop header
LB: loop body
LE: loop exit
PB: predicated region body
PF: predicated region fallthrough
CT: control target
= control target key end

     0   :  { %s2079_s29 = smov 0   ;;  %s2453_s0 = inlined_call_operand.vmem [shape: f32[2,8,64], index: 0, kind: input, shape index: {}]   ;;  %s2454_s1 = inlined_call_operand.vmem [shape: f32[64,128], index: 1, kind: input, shape index: {}]   ;;  %s2455_s2 = inlined_call_operand.vmem [shape: f32[1,128], index: 2, kind: input, shape index: {}, may-alias: {2,5,8,11,13,16,23}]   ;;  %s2456_s3 = inlined_call_operand.vmem [shape: f32[1,128], index: 3, kind: input, shape index: {}, may-alias: {3,6,9,12,14,24}]   ;;  %s2457_s4 = inlined_call_operand.vmem [shape: f32[5,128], index: 4, kind: input, shape index: {}]   ;;  %s2458_s5 = inlined_call_operand.vmem [shape: f32[1,128], index: 5, kind: input, shape index: {}, may-alias: {2,5,8,11,13,16,23}]   ;;  %s2459_s6 = inlined_call_operand.vmem [shape: f32[1,128], index: 6, kind: input, shape index: {}, may-alias: {3,6,9,12,14,24}]   ;;  %s2460_s7 = inlined_call_operand.vmem [shape: f32[7,128], index: 7, kind: input, shape index: {}]   ;;  %s2461_s8 = inlined_call_operand.vmem [shape: f32[1,128], index: 8, kind: input, shape index: {}, may-alias: {2,5,8,11,13,16,23}]   ;;  %s2462_s9 = inlined_call_operand.vmem [shape: f32[1,128], index: 9, kind: input, shape index: {}, may-alias: {3,6,9,12,14,24}]   ;;  %s2463_s10 = inlined_call_operand.vmem [shape: f32[128,128], index: 10, kind: input, shape index: {}]   ;;  %s2464_s11 = inlined_call_operand.vmem [shape: f32[1,128], index: 11, kind: input, shape index: {}, may-alias: {2,5,8,11,13,16,23}]   ;;  %s2465_s12 = inlined_call_operand.vmem [shape: f32[1,128], index: 12, kind: input, shape index: {}, may-alias: {3,6,9,12,14,24}]   ;;  %s2466_s13 = inlined_call_operand.vmem [shape: f32[1,128], index: 13, kind: input, shape index: {}, may-alias: {2,5,8,11,13,16,23}]   ;;  %s2467_s14 = inlined_call_operand.vmem [shape: f32[1,128], index: 14, kind: input, shape index: {}, may-alias: {3,6,9,12,14,24}]   ;;  %s2468_s15 = inlined_call_operand.vmem [shape: f32[128,128], index: 15, kind: input, shape index: {}]   ;;  %s2469_s16 = inlined_call_operand.vmem [shape: f32[1,128], index: 16, kind: input, shape index: {}, may-alias: {2,5,8,11,13,16,23}]   ;;  %s2470_s17 = inlined_call_operand.vmem [shape: f32[1,128], index: 17, kind: input, shape index: {}]   ;;  %s2471_s18 = inlined_call_operand.vmem [shape: f32[128,32], index: 18, kind: input, shape index: {}]   ;;  %s2472_s19 = inlined_call_operand.vmem [shape: f32[1,32], index: 19, kind: input, shape index: {}]   ;;  %s2473_s20 = inlined_call_operand.vmem [shape: f32[32,128], index: 20, kind: input, shape index: {}]   ;;  %s2474_s21 = inlined_call_operand.vmem [shape: f32[1,128], index: 21, kind: input, shape index: {}]   ;;  %s2475_s22 = inlined_call_operand.vmem [shape: f32[64,128], index: 22, kind: input, shape index: {}]   ;;  %s2476_s23 = inlined_call_operand.vmem [shape: f32[1,128], index: 23, kind: input, shape index: {}, may-alias: {2,5,8,11,13,16,23}]   ;;  %s2477_s24 = inlined_call_operand.vmem [shape: f32[1,128], index: 24, kind: input, shape index: {}, may-alias: {3,6,9,12,14,24}]   ;;  %s2478_s25 = inlined_call_operand.vmem [shape: f32[2,8,128], index: 25, kind: output, shape index: {}]  }
   0x1   :  { %2483 = sst [smem:[#allocation3_spill]] %s2453_s0 }
   0x2   :  { %2484 = sst [smem:[#allocation4_spill]] %s2454_s1 }
   0x3   :  { %2485 = sst [smem:[#allocation5_spill]] %s2455_s2 }
   0x4   :  { %2486 = sst [smem:[#allocation6_spill]] %s2456_s3 }
   0x5   :  { %2487 = sst [smem:[#allocation7_spill]] %s2457_s4 }
   0x6   :  { %2488 = sst [smem:[#allocation8_spill]] %s2458_s5 }
   0x7   :  { %2489 = sst [smem:[#allocation9_spill]] %s2459_s6 }
   0x8   :  { %2490 = sst [smem:[#allocation10_spill]] %s2460_s7 }
   0x9   :  { %2491 = sst [smem:[#allocation11_spill]] %s2461_s8 }
   0xa   :  { %2492 = sst [smem:[#allocation12_spill]] %s2462_s9 }
   0xb LB: > { %s1555_s2 = sadd.s32 4294967295, %s1944_s29   ;;  %p1559_p0 = scmp.ge.s32.totalorder %s1944_s29, 1  ;;  %s1944_s29 = sphi %s2079_s29, %s35_s29  }
   0xc   : > { %p686_p1 = scmp.lt.s32.totalorder %s1944_s29, 3 }
   0xe   : > { %p687_p2 = pnand %p1559_p0, %p686_p1 }
   0xf   : > { %v761_v0 = vld [vmem:[%s2475_s22] sm:$0xff] (!%p687_p2)  ;;  %v762_v1 = vld [vmem:[%s2475_s22 + $0x8] sm:$0xff] (!%p687_p2)  ;;  %v763_v2 = vld [vmem:[%s2475_s22 + $0x10] sm:$0xff] (!%p687_p2)  ;;  %v1946_v3 = vmov (!%p687_p2), 0.0|0.0   ;;  %vm1947_vm0 = vmmov (!%p687_p2), 0   ;;  %v1948_v6 = vmov (!%p687_p2), 0.0  }
  0x10   : > { %690 = sbr.rel (%p687_p2) target bundleno = 1243 (0x4db), region = 120  ;;  %1821 = vmatprep.subr.bf16.mxu1 (!%p687_p2), %v1946_v3  ;;  %v1822_v4 = vpack.c.bf16 (!%p687_p2), %v762_v1, %v761_v0  ;;  %v764_v5 = vld [vmem:[%s2475_s22 + $0x18] sm:$0xff] (!%p687_p2)  ;;  %1683 = vmatprep.mubr.msk.f32.mxu1 (!%p687_p2), %vm1947_vm0, %v1948_v6  ;;  %954 = vst [vmem:[#allocation2] sm:$0xff] (!%p687_p2), %v1948_v6  ;;  %955 = vst [vmem:[#allocation2 + $0x8] sm:$0xf] (!%p687_p2), %v1948_v6  ;;  %p752_p3 = scmp.lt.s32.totalorder (!%p687_p2), %s1555_s2, 1 }
  0x11   : > { %1015 = vst [vmem:[#allocation2 + $0x10] sm:$0xff] (!%p687_p2), %v1948_v6  ;;  %1016 = vst [vmem:[#allocation2 + $0x18] sm:$0x3] (!%p687_p2), %v1948_v6  ;;  %1845 = vmatprep.subr.bf16.mxu0 (!%p687_p2), %v1946_v3  ;;  %1737 = vmatprep.mubr.msk.f32.mxu0 (!%p687_p2), %vm1947_vm0, %v1948_v6  ;;  %v1825_v7 = vpack.c.bf16 (!%p687_p2), %v764_v5, %v763_v2  ;;  %v765_v8 = vld [vmem:[%s2475_s22 + $0x20] sm:$0xff] (!%p687_p2)  ;;  %v766_v9 = vld [vmem:[%s2475_s22 + $0x28] sm:$0xff] (!%p687_p2)  ;;  %s2493_s8 = sld [smem:[#allocation3_spill]] (!%p687_p2) }
  0x12   : > { %1823 = vmatpush3.bf16.msra.mxu1 (!%p687_p2), %v1822_v4  ;;  %v1828_v10 = vpack.c.bf16 (!%p687_p2), %v766_v9, %v765_v8  ;;  %v767_v11 = vld [vmem:[%s2475_s22 + $0x30] sm:$0xff] (!%p687_p2)  ;;  %v768_v12 = vld [vmem:[%s2475_s22 + $0x38] sm:$0xff] (!%p687_p2)  ;;  %s2494_s9 = sld [smem:[#allocation4_spill]] (!%p687_p2)  ;;  %vm769_vm1 = vcmask (!%p687_p2), 523264   ;;  %v1090_v27 = vld [vmem:[%s2463_s10] sm:$0xff] (!%p687_p2)  ;;  %s2495_s4 = sld [smem:[#allocation5_spill]] (!%p687_p2) }
  0x13   : > { %1824 = vmatprep.subr.bf16.mxu1 (!%p687_p2), %v1946_v3  ;;  %v1831_v13 = vpack.c.bf16 (!%p687_p2), %v768_v12, %v767_v11  ;;  %v1091_v28 = vld [vmem:[%s2463_s10 + $0x8] sm:$0xff] (!%p687_p2)  ;;  %v1092_v30 = vld [vmem:[%s2463_s10 + $0x10] sm:$0xff] (!%p687_p2)  ;;  %v1093_v31 = vld [vmem:[%s2463_s10 + $0x18] sm:$0xff] (!%p687_p2)  ;;  %s2496_s0 = sld [smem:[#allocation6_spill]] (!%p687_p2)  ;;  %s2497_s7 = sld [smem:[#allocation7_spill]] (!%p687_p2)  ;;  %vm1414_vm2 = vcmask (!%p687_p2), 261120  }
  0x14   : > { %v1846_v29 = vpack.c.bf16 (!%p687_p2), %v1091_v28, %v1090_v27  ;;  %v1849_v32 = vpack.c.bf16 (!%p687_p2), %v1093_v31, %v1092_v30  ;;  %v1094_v33 = vld [vmem:[%s2463_s10 + $0x20] sm:$0xff] (!%p687_p2)  ;;  %v1095_v34 = vld [vmem:[%s2463_s10 + $0x28] sm:$0xff] (!%p687_p2)  ;;  %v1096_v36 = vld [vmem:[%s2463_s10 + $0x30] sm:$0xff] (!%p687_p2)  ;;  %s2498_s26 = sld [smem:[#allocation8_spill]] (!%p687_p2)  ;;  %s2500_s5 = sld [smem:[#allocation10_spill]] (!%p687_p2) }
  0x15   : > { %v1852_v35 = vpack.c.bf16 (!%p687_p2), %v1095_v34, %v1094_v33  ;;  %v1097_v37 = vld [vmem:[%s2463_s10 + $0x38] sm:$0xff] (!%p687_p2)  ;;  %v1098_v39 = vld [vmem:[%s2463_s10 + $0x40] sm:$0xff] (!%p687_p2)  ;;  %v1099_v40 = vld [vmem:[%s2463_s10 + $0x48] sm:$0xff] (!%p687_p2) }
  0x16   : > { %1826 = vmatpush3.bf16.msra.mxu1 (!%p687_p2), %v1825_v7  ;;  %1847 = vmatpush3.bf16.msra.mxu0 (!%p687_p2), %v1846_v29  ;;  %v1855_v38 = vpack.c.bf16 (!%p687_p2), %v1097_v37, %v1096_v36  ;;  %v1858_v41 = vpack.c.bf16 (!%p687_p2), %v1099_v40, %v1098_v39  ;;  %v1100_v42 = vld [vmem:[%s2463_s10 + $0x50] sm:$0xff] (!%p687_p2)  ;;  %v1101_v43 = vld [vmem:[%s2463_s10 + $0x58] sm:$0xff] (!%p687_p2)  ;;  %v1102_v45 = vld [vmem:[%s2463_s10 + $0x60] sm:$0xff] (!%p687_p2) }
  0x17   : > { %s2505_s2 = smov (!%p752_p3, %s1555_s2), 1  ;;  %1827 = vmatprep.subr.bf16.mxu1 %v1946_v3  ;;  %1848 = vmatprep.subr.bf16.mxu0 %v1946_v3  ;;  %v1861_v44 = vpack.c.bf16 %v1101_v43, %v1100_v42  ;;  %v1103_v46 = vld [vmem:[%s2463_s10 + $0x68] sm:$0xff]  ;;  %v1104_v48 = vld [vmem:[%s2463_s10 + $0x70] sm:$0xff]  ;;  %v1105_v49 = vld [vmem:[%s2463_s10 + $0x78] sm:$0xff] }
  0x18   : > { %s2482_s3 = sshll.u32 %s2505_s2, 3  ;;  %v859_v14 = vld [vmem:[%s2494_s9] sm:$0xff]  ;;  %v860_v15 = vld [vmem:[%s2494_s9 + $0x8] sm:$0xff]  ;;  %v861_v18 = vld [vmem:[%s2494_s9 + $0x10] sm:$0xff]  ;;  %v1864_v47 = vpack.c.bf16 %v1103_v46, %v1102_v45  ;;  %v1867_v50 = vpack.c.bf16 %v1105_v49, %v1104_v48 }
  0x19   : > { %s755_s27 = scalar_lea.vmem %s2493_s8, %s2482_s3  ;;  %v1834_v17 = vpack.c.bf16 %v860_v15, %v859_v14  ;;  %v862_v19 = vld [vmem:[%s2494_s9 + $0x18] sm:$0xff]  ;;  %v863_v21 = vld [vmem:[%s2494_s9 + $0x20] sm:$0xff]  ;;  %v864_v22 = vld [vmem:[%s2494_s9 + $0x28] sm:$0xff] }
  0x1a   : > { %1829 = vmatpush3.bf16.msra.mxu1 %v1828_v10  ;;  %v760_v16 = vld [vmem:[%s755_s27] sm:$0xff]  ;;  %v1837_v20 = vpack.c.bf16 %v862_v19, %v861_v18  ;;  %v1840_v23 = vpack.c.bf16 %v864_v22, %v863_v21  ;;  %v865_v24 = vld [vmem:[%s2494_s9 + $0x30] sm:$0xff]  ;;  %v866_v25 = vld [vmem:[%s2494_s9 + $0x38] sm:$0xff]  ;;  %1850 = vmatpush3.bf16.msra.mxu0 %v1849_v32  ;;  %s2499_s27 = sld [smem:[#allocation9_spill]] }
  0x1b   : > { %1830 = vmatprep.subr.bf16.mxu1 %v1946_v3  ;;  %v1843_v26 = vpack.c.bf16 %v866_v25, %v865_v24  ;;  %1851 = vmatprep.subr.bf16.mxu0 %v1946_v3  ;;  %v1211_v51 = vld [vmem:[%s2468_s15] sm:$0xff]  ;;  %v1212_v52 = vld [vmem:[%s2468_s15 + $0x8] sm:$0xff]  ;;  %v1213_v53 = vld [vmem:[%s2468_s15 + $0x10] sm:$0xff] }
  0x1c   : > { %v1870_v54 = vpack.c.bf16 %v1212_v52, %v1211_v51  ;;  %v1214_v55 = vld [vmem:[%s2468_s15 + $0x18] sm:$0xff]  ;;  %v1215_v57 = vld [vmem:[%s2468_s15 + $0x20] sm:$0xff]  ;;  %v1216_v58 = vld [vmem:[%s2468_s15 + $0x28] sm:$0xff] }
  0x1d   : > { %v1873_v56 = vpack.c.bf16 %v1214_v55, %v1213_v53  ;;  %v1876_v59 = vpack.c.bf16 %v1216_v58, %v1215_v57  ;;  %v1217_v60 = vld [vmem:[%s2468_s15 + $0x30] sm:$0xff]  ;;  %v1218_v61 = vld [vmem:[%s2468_s15 + $0x38] sm:$0xff]  ;;  %v1566_v1 = vld [vmem:[%s2495_s4] ss:$0 sm:$0xff] }
  0x1e   : > { %1832 = vmatpush3.bf16.msra.mxu1 %v1831_v13  ;;  %1853 = vmatpush3.bf16.msra.mxu0 %v1852_v35  ;;  %v1879_v62 = vpack.c.bf16 %v1218_v61, %v1217_v60  ;;  %v1567_v4 = vld [vmem:[%s2496_s0] ss:$0 sm:$0xff]  ;;  %v1569_v11 = vld [vmem:[%s2497_s7 + $0x1] ss:$0 sm:$0xff]  ;;  %v1570_v14 = vld [vmem:[%s2497_s7 + $0x2] ss:$0 sm:$0xff] }
  0x1f   : > { %1833 = vmatprep.subr.bf16.mxu1 %v1946_v3  ;;  %1854 = vmatprep.subr.bf16.mxu0 %v1946_v3  ;;  %v1568_v10 = vld [vmem:[%s2497_s7] ss:$0 sm:$0xff]  ;;  %v1571_v19 = vld [vmem:[%s2497_s7 + $0x3] ss:$0 sm:$0xff]  ;;  %v1572_v22 = vld [vmem:[%s2497_s7 + $0x4] ss:$0 sm:$0xff] }
  0x20   : > { %v1573_v27 = vld [vmem:[%s2498_s26] ss:$0 sm:$0xff]  ;;  %v1576_v34 = vld [vmem:[%s2500_s5 + $0x1] ss:$0 sm:$0xff]  ;;  %v1578_v40 = vld [vmem:[%s2500_s5 + $0x3] ss:$0 sm:$0xff] }
  0x21   : > { %1684 = vmatmul.mubr.msk.f32.vlgmr.msra.gmra.mrb[0].mxu1 %vm769_vm1, %v760_v16  ;;  %v1574_v29 = vld [vmem:[%s2499_s27] ss:$0 sm:$0xff]  ;;  %v1024_v45 = vld [vmem:[#allocation2 + $0x12] sm:$0xff]  ;;  %v1580_v49 = vld [vmem:[%s2500_s5 + $0x5] ss:$0 sm:$0xff]  ;;  %s2501_s26 = sld [smem:[#allocation11_spill]] }
  0x22   : > { %1835 = vmatpush3.bf16.msra.mxu1 %v1834_v17  ;;  %1702 = vmatprep.mubr.msk.f32.mxu1 %vm1947_vm0, %v1948_v6  ;;  %v1575_v33 = vld [vmem:[%s2500_s5] ss:$0 sm:$0xff]  ;;  %s2502_s27 = sld [smem:[#allocation12_spill]] }
  0x23   : > { %1836 = vmatprep.subr.bf16.mxu1 %v1946_v3  ;;  %1856 = vmatpush3.bf16.msra.mxu0 %v1855_v38  ;;  %v1030_v35 = vmul.f32 0.0, %v1575_v33  ;;  %v1577_v38 = vld [vmem:[%s2500_s5 + $0x2] ss:$0 sm:$0xff]  ;;  %v1587_v33 = vld [vmem:[%s2467_s14] ss:$0 sm:$0xff] }
  0x24   : > { %1857 = vmatprep.subr.bf16.mxu0 %v1946_v3 }
  0x26   : > { %1838 = vmatpush3.bf16.msra.mxu1 %v1837_v20 }
  0x27   : > { %1839 = vmatprep.subr.bf16.mxu1 %v1946_v3  ;;  %1859 = vmatpush3.bf16.msra.mxu0 %v1858_v41  ;;  %v1582_v57 = vld [vmem:[%s2501_s26] ss:$0 sm:$0xff]  ;;  %s2503_s26 = sshll.u32 %s2505_s2, 3 }
  0x28   : > { %1860 = vmatprep.subr.bf16.mxu0 %v1946_v3 }
  0x2a   : > { %1841 = vmatpush3.bf16.msra.mxu1 %v1840_v23 }
  0x2b   : > { %1842 = vmatprep.subr.bf16.mxu1 %v1946_v3  ;;  %1862 = vmatpush3.bf16.msra.mxu0 %v1861_v44  ;;  %v1579_v44 = vld [vmem:[%s2500_s5 + $0x4] ss:$0 sm:$0xff] }
  0x2c   : > { %1863 = vmatprep.subr.bf16.mxu0 %v1946_v3 }
  0x2e   : > { %1844 = vmatpush3.bf16.msra.mxu1 %v1843_v26 }
  0x2f   : > { %1869 = vmatprep.subr.bf16.mxu1 %v1946_v3  ;;  %1865 = vmatpush3.bf16.msra.mxu0 %v1864_v47 }
  0x30   : > { %1866 = vmatprep.subr.bf16.mxu0 %v1946_v3 }
  0x31   : > { %1703 = vmatmul.mubr.msk.f32.vlgmr.msra.gmra.mrb[2].mxu1 %vm769_vm1, %v760_v16 }
  0x32   : > { %1772 = vmatprep.mubr.msk.f32.mxu1 %vm1947_vm0, %v1948_v6  ;;  %1871 = vmatpush3.bf16.msra.mxu1 %v1870_v54 }
  0x33   : > { %1868 = vmatpush3.bf16.msra.mxu0 %v1867_v50  ;;  %1872 = vmatprep.subr.bf16.mxu1 %v1946_v3  ;;  %v1581_v50 = vld [vmem:[%s2500_s5 + $0x6] ss:$0 sm:$0xff] }
  0x34   : > { %1893 = vmatprep.subr.bf16.mxu0 %v1946_v3  ;;  %v1071_v55 = vmul.f32 %v1581_v50, %v1024_v45  ;;  %v1334_v45 = vld [vmem:[%s2471_s18 + $0x68] sm:$0xff]  ;;  %v1409_v50 = vld [vmem:[%s2473_s20] sm:$0xff] }
  0x36   : > { %1874 = vmatpush3.bf16.msra.mxu1 %v1873_v56 }
  0x37   : > { %1875 = vmatprep.subr.bf16.mxu1 %v1946_v3 }
  0x3a   : > { %1877 = vmatpush3.bf16.msra.mxu1 %v1876_v59  ;;  %v1583_v59 = vld [vmem:[%s2502_s27] ss:$0 sm:$0xff]  ;;  %s759_s27 = scalar_lea.vmem %s2478_s25, %s2503_s26 }
  0x3b   : > { %1878 = vmatprep.subr.bf16.mxu1 %v1946_v3 }
  0x3e   : > { %1880 = vmatpush3.bf16.msra.mxu1 %v1879_v62 }
  0x3f   : > { %1881 = vmatprep.subr.bf16.mxu1 %v1946_v3 }
  0xf4   : > { %v2251_v63 = vpop.f32.mrb[0].mxu1 }
  0xf5   : > { %v1685_v0 = vpop.f32.mrb[1].mxu1 }
  0xf6   : > { %v1219_v0 = vld [vmem:[%s2468_s15 + $0x40] sm:$0xff] }
 0x104   : > { %v933_v2 = vpop.f32.mrb[2].mxu1 }
 0x105   : > { %v944_v5 = vmul.f32 %v1566_v1, %v933_v2  ;;  %v1704_v7 = vpop.f32.mrb[3].mxu1  ;;  %v1220_v1 = vld [vmem:[%s2468_s15 + $0x48] sm:$0xff] }
 0x106   : > { %v1882_v2 = vpack.c.bf16 %v1220_v1, %v1219_v0 }
 0x107   : > { %v952_v8 = vadd.f32 %v1567_v4, %v944_v5  ;;  %v1221_v4 = vld [vmem:[%s2468_s15 + $0x50] sm:$0xff]  ;;  %v1222_v5 = vld [vmem:[%s2468_s15 + $0x58] sm:$0xff] }
 0x108   : > { %1883 = vmatpush3.bf16.msra.mxu1 %v1882_v2  ;;  %v1885_v7 = vpack.c.bf16 %v1222_v5, %v1221_v4  ;;  %v1412_v4 = vld [vmem:[%s2473_s20 + $0x18] sm:$0xff] }
 0x109   : > { %v2259_v9 = vmax.f32 %v952_v8, 0.0  ;;  %1884 = vmatprep.subr.bf16.mxu1 %v1946_v3  ;;  %v1223_v8 = vld [vmem:[%s2468_s15 + $0x60] sm:$0xff] }
 0x10b   : > { %956 = vst [vmem:[#allocation2 + $0x2] sm:$0xff] %v2259_v9  ;;  %v980_v21 = vmul.f32 %v1570_v14, %v2259_v9 }
 0x10c   : > { %1886 = vmatpush3.bf16.msra.mxu1 %v1885_v7  ;;  %v1337_v7 = vld [vmem:[%s2472_s19] sm:$0x1] }
 0x10d   : > { %1887 = vmatprep.subr.bf16.mxu1 %v1946_v3 }
 0x112   : > { %v957_v12 = vld [vmem:[#allocation2] sm:$0xff] }
 0x113   : > { %v958_v13 = vld [vmem:[#allocation2 + $0x1] sm:$0xff]  ;;  %v967_v17 = vmul.f32 %v1568_v10, %v957_v12  ;;  %v1225_v12 = vld [vmem:[%s2468_s15 + $0x70] sm:$0xff] }
 0x114   : > { %v960_v15 = vld [vmem:[#allocation2 + $0x3] sm:$0xff]  ;;  %v973_v18 = vmul.f32 %v1569_v11, %v958_v13  ;;  %v1226_v13 = vld [vmem:[%s2468_s15 + $0x78] sm:$0xff] }
 0x115   : > { %v961_v16 = vld [vmem:[#allocation2 + $0x4] sm:$0xff]  ;;  %v987_v24 = vmul.f32 %v1571_v19, %v960_v15  ;;  %v1891_v14 = vpack.c.bf16 %v1226_v13, %v1225_v12  ;;  %v1324_v19 = vld [vmem:[%s2471_s18 + $0x18] sm:$0xff]  ;;  %v1413_v13 = vld [vmem:[%s2474_s21] sm:$0x1] }
 0x116   : > { %1013 = vst [vmem:[#allocation2] sm:$0xff] %v1948_v6  ;;  %1014 = vst [vmem:[#allocation2 + $0x8] sm:$0xff] %v1948_v6  ;;  %v974_v20 = vadd.f32 %v973_v18, %v967_v17  ;;  %v994_v26 = vmul.f32 %v1572_v22, %v961_v16  ;;  %v1224_v10 = vld [vmem:[%s2468_s15 + $0x68] sm:$0xff]  ;;  %v1321_v15 = vld [vmem:[%s2471_s18] sm:$0xff] }
 0x117   : > { %v1888_v11 = vpack.c.bf16 %v1224_v10, %v1223_v8  ;;  %v1322_v16 = vld [vmem:[%s2471_s18 + $0x8] sm:$0xff]  ;;  %v1323_v17 = vld [vmem:[%s2471_s18 + $0x10] sm:$0xff] }
 0x118   : > { %v981_v23 = vadd.f32 %v980_v21, %v974_v20  ;;  %v1894_v18 = vpack.c.bf16 %v1322_v16, %v1321_v15  ;;  %v1897_v20 = vpack.c.bf16 %v1324_v19, %v1323_v17  ;;  %v1325_v21 = vld [vmem:[%s2471_s18 + $0x20] sm:$0xff]  ;;  %v1326_v22 = vld [vmem:[%s2471_s18 + $0x28] sm:$0xff] }
 0x119   : > { %1889 = vmatpush3.bf16.msra.mxu1 %v1888_v11 }
 0x11a   : > { %v988_v25 = vadd.f32 %v987_v24, %v981_v23  ;;  %1890 = vmatprep.subr.bf16.mxu1 %v1946_v3  ;;  %v1900_v23 = vpack.c.bf16 %v1326_v22, %v1325_v21  ;;  %v1584_v24 = vld [vmem:[%s2464_s11] ss:$0 sm:$0xff]  ;;  %v1494_v21 = vlaneseq }
 0x11c   : > { %v995_v28 = vadd.f32 %v994_v26, %v988_v25  ;;  %v1585_v26 = vld [vmem:[%s2465_s12] ss:$0 sm:$0xff]  ;;  %v1495_v22 = vshrl.u32 %v1494_v21, 7 }
 0x11d   : > { %1892 = vmatpush3.bf16.msra.mxu1 %v1891_v14 }
 0x11e   : > { %v1003_v30 = vmul.f32 %v1573_v27, %v995_v28  ;;  %1917 = vmatprep.subr.bf16.mxu1 %v1946_v3 }
 0x120   : > { %v1011_v31 = vadd.f32 %v1574_v29, %v1003_v30 }
 0x122   : > { %v1012_v32 = vmax.f32 %v1011_v31, 0.0  ;;  %v1586_v31 = vld [vmem:[%s2466_s13] ss:$0 sm:$0xff] }
 0x124   : > { %1017 = vst [vmem:[#allocation2 + $0x9] sm:$0xff] %v1012_v32  ;;  %v1050_v47 = vmul.f32 %v1578_v40, %v1012_v32 }
 0x12b   : > { %v1019_v36 = vld [vmem:[#allocation2 + $0x3] sm:$0xff]  ;;  %v1022_v43 = vld [vmem:[#allocation2 + $0xc] sm:$0xff] }
 0x12c   : > { %v1020_v37 = vld [vmem:[#allocation2 + $0x6] sm:$0xff]  ;;  %v1036_v39 = vmul.f32 %v1576_v34, %v1019_v36  ;;  %v1023_v48 = vld [vmem:[#allocation2 + $0xf] sm:$0xff]  ;;  %v1057_v52 = vmul.f32 %v1579_v44, %v1022_v43 }
 0x12d   : > { %v1043_v42 = vmul.f32 %v1577_v38, %v1020_v37  ;;  %v1064_v54 = vmul.f32 %v1580_v49, %v1023_v48  ;;  %v1327_v37 = vld [vmem:[%s2471_s18 + $0x30] sm:$0xff]  ;;  %v1328_v38 = vld [vmem:[%s2471_s18 + $0x38] sm:$0xff]  ;;  %v1333_v44 = vld [vmem:[%s2471_s18 + $0x60] sm:$0xff] }
 0x12e   : > { %v1037_v41 = vadd.f32 %v1036_v39, %v1030_v35  ;;  %v1329_v39 = vld [vmem:[%s2471_s18 + $0x40] sm:$0xff]  ;;  %v1336_v48 = vld [vmem:[%s2471_s18 + $0x78] sm:$0xff] }
 0x130   : > { %v1044_v46 = vadd.f32 %v1043_v42, %v1037_v41  ;;  %v1331_v41 = vld [vmem:[%s2471_s18 + $0x50] sm:$0xff]  ;;  %v1332_v42 = vld [vmem:[%s2471_s18 + $0x58] sm:$0xff] }
 0x131   : > { %v1909_v43 = vpack.c.bf16 %v1332_v42, %v1331_v41 }
 0x132   : > { %v1051_v51 = vadd.f32 %v1050_v47, %v1044_v46  ;;  %v1912_v46 = vpack.c.bf16 %v1334_v45, %v1333_v44  ;;  %v1335_v47 = vld [vmem:[%s2471_s18 + $0x70] sm:$0xff] }
 0x133   : > { %v1915_v49 = vpack.c.bf16 %v1336_v48, %v1335_v47 }
 0x134   : > { %v1058_v53 = vadd.f32 %v1057_v52, %v1051_v51  ;;  %v1410_v51 = vld [vmem:[%s2473_s20 + $0x8] sm:$0xff] }
 0x135   : > { %v1918_v52 = vpack.c.bf16 %v1410_v51, %v1409_v50 }
 0x136   : > { %v1065_v56 = vadd.f32 %v1064_v54, %v1058_v53  ;;  %v1588_v53 = vld [vmem:[%s2469_s16] ss:$0 sm:$0xff] }
 0x138   : > { %v1072_v58 = vadd.f32 %v1071_v55, %v1065_v56  ;;  %v1589_v55 = vld [vmem:[%s2470_s17] ss:$0 sm:$0xff] }
 0x13a   : > { %v1080_v60 = vmul.f32 %v1582_v57, %v1072_v58 }
 0x13c   : > { %v1088_v61 = vadd.f32 %v1583_v59, %v1080_v60 }
 0x13e   : > { %v1089_v62 = vmax.f32 %v1088_v61, 0.0 }
 0x140   : > { %1738 = vmatmul.mubr.f32.vlgmr.msra.gmra.mrb[0].mxu0 %v1089_v62 }
 0x141   : > { %1807 = vmatprep.mubr.msk.f32.mxu0 %vm1947_vm0, %v1948_v6  ;;  %1895 = vmatpush3.bf16.msra.mxu0 %v1894_v18 }
 0x142   : > { %1896 = vmatprep.subr.bf16.mxu0 %v1946_v3 }
 0x145   : > { %1898 = vmatpush3.bf16.msra.mxu0 %v1897_v20 }
 0x146   : > { %1899 = vmatprep.subr.bf16.mxu0 %v1946_v3 }
 0x149   : > { %1901 = vmatpush3.bf16.msra.mxu0 %v1900_v23  ;;  %v1563_v23 = vld [vmem:[%s2476_s23] ss:$0 sm:$0xff] }
 0x14a   : > { %1902 = vmatprep.subr.bf16.mxu0 %v1946_v3 }
 0x213   : > { %v1172_v25 = vpop.f32.mrb[0].mxu0 }
 0x214   : > { %v1183_v27 = vmul.f32 %v1584_v24, %v1172_v25  ;;  %v1739_v28 = vpop.f32.mrb[1].mxu0  ;;  %v1496_v24 = vsub.s32 0, %v1495_v22  ;;  %v850_v25 = vmul.f32 %v1563_v23, %v2251_v63 }
 0x216   : > { %v1191_v29 = vadd.f32 %v1585_v26, %v1183_v27  ;;  %v1564_v27 = vld [vmem:[%s2477_s24] ss:$0 sm:$0xff] }
 0x218   : > { %v1192_v30 = vmax.f32 %v1191_v29, 0.0  ;;  %v858_v29 = vadd.f32 %v1564_v27, %v850_v25 }
 0x21a   : > { %v1193_v32 = vmul.f32 %v1192_v30, %v2259_v9  ;;  %v1903_v9 = vpack.c.bf16 %v1328_v38, %v1327_v37 }
 0x21c   : > { %v1201_v34 = vmul.f32 %v1586_v31, %v1193_v32  ;;  %1904 = vmatpush3.bf16.msra.mxu0 %v1903_v9 }
 0x21d   : > { %1905 = vmatprep.subr.bf16.mxu0 %v1946_v3 }
 0x21e   : > { %v1209_v35 = vadd.f32 %v1587_v33, %v1201_v34 }
 0x220   : > { %v1210_v36 = vmax.f32 %v1209_v35, 0.0 }
 0x222   : > { %1773 = vmatmul.mubr.f32.vlgmr.msra.gmra.mrb[4].mxu1 %v1210_v36 }
 0x223   : > { %1818 = vmatprep.mubr.msk.f32.mxu1 %vm1947_vm0, %v1948_v6  ;;  %v1330_v6 = vld [vmem:[%s2471_s18 + $0x48] sm:$0xff]  ;;  %1919 = vmatpush3.bf16.msra.mxu1 %v1918_v52 }
 0x224   : > { %v1906_v40 = vpack.c.bf16 %v1330_v6, %v1329_v39  ;;  %1920 = vmatprep.subr.bf16.mxu1 %v1946_v3 }
 0x226   : > { %1907 = vmatpush3.bf16.msra.mxu0 %v1906_v40 }
 0x227   : > { %1908 = vmatprep.subr.bf16.mxu0 %v1946_v3 }
 0x22a   : > { %1910 = vmatpush3.bf16.msra.mxu0 %v1909_v43 }
 0x22b   : > { %1911 = vmatprep.subr.bf16.mxu0 %v1946_v3 }
 0x22e   : > { %1913 = vmatpush3.bf16.msra.mxu0 %v1912_v46 }
 0x22f   : > { %1914 = vmatprep.subr.bf16.mxu0 %v1946_v3  ;;  %v1411_v3 = vld [vmem:[%s2473_s20 + $0x10] sm:$0xff] }
 0x230   : > { %v1921_v5 = vpack.c.bf16 %v1412_v4, %v1411_v3 }
 0x232   : > { %1916 = vmatpush3.bf16.msra.mxu0 %v1915_v49  ;;  %1922 = vmatpush3.bf16.msra.mxu1 %v1921_v5 }
 0x2f5   : > { %v1293_v54 = vpop.f32.mrb[4].mxu1 }
 0x2f6   : > { %v1304_v56 = vmul.f32 %v1588_v53, %v1293_v54  ;;  %v1774_v57 = vpop.f32.mrb[5].mxu1 }
 0x2f8   : > { %v1312_v58 = vadd.f32 %v1589_v55, %v1304_v56 }
 0x2fa   : > { %v1313_v59 = vrot.slane %v1312_v58, 4 }
 0x2fc   : > { %v1314_v60 = vadd.f32 %v1313_v59, %v1312_v58 }
 0x2fe   : > { %v1315_v61 = vrot.slane %v1314_v60, 2 }
 0x300   : > { %v1316_v62 = vadd.f32 %v1315_v61, %v1314_v60 }
 0x302   : > { %v1317_v0 = vrot.slane %v1316_v62, 1 }
 0x304   : > { %v1318_v1 = vadd.f32 %v1317_v0, %v1316_v62 }
 0x306   : > { %v1320_v2 = vmul.f32 0.125, %v1318_v1 }
 0x308   : > { %1808 = vmatmul.mubr.f32.vlgmr.msra.gmra.mrb[2].mxu0 %v1320_v2 }
 0x3db   : > { %v1404_v8 = vpop.f32.mrb[2].mxu0 }
 0x3dc   : > { %v1405_v10 = vadd.f32 %v1404_v8, %v1337_v7  ;;  %v1809_v11 = vpop.f32.mrb[3].mxu0 }
 0x3de   : > { %v1408_v12 = vmax.f32 %v1405_v10, 0.0 }
 0x3e0   : > { %1819 = vmatmul.mubr.msk.f32.vlgmr.msra.gmra.mrb[6].mxu1 %vm1414_vm2, %v1408_v12 }
 0x4b3   : > { %v1484_v14 = vpop.f32.mrb[6].mxu1 }
 0x4b4   : > { %v1485_v15 = vadd.f32 %v1484_v14, %v1413_v13  ;;  %v1820_v16 = vpop.f32.mrb[7].mxu1 }
 0x4b6   : > { %v1488_v17 = vsub.f32 0.0, %v1485_v15 }
 0x4b8   : > { %v1489_v18 = vmul.f32 1.442695, %v1488_v17 }
 0x4ba   : > { %1934 = vpow2.f32 %v1489_v18 }
 0x4c4   : > { %v1935_v19 = vpop.eup %1934 }
 0x4c5   : > { %v1491_v20 = vadd.f32 1.0, %v1935_v19 }
 0x4c7   : > { %1936 = vrcp.f32 %v1491_v20 }
 0x4d1   : > { %v1937_v26 = vpop.eup %1936 }
 0x4d2   : > { %v1497_v28 = vrot.slane %v1937_v26, %v1496_v24 }
 0x4d4   : > { %v1498_v30 = vmul.f32 %v1497_v28, %v1312_v58 }
 0x4d6   : > { %v1499_v31 = vadd.f32 %v1498_v30, %v858_v29 }
 0x4d8   : > { %v1500_v32 = vmax.f32 %v1499_v31, 0.0 }
 0x4da   : > { %1501 = vst [vmem:[%s759_s27] sm:$0xff] %v1500_v32 }
 0x4db PF: > { %s35_s29 = sadd.s32 1, %s1944_s29  }
 0x4dc   : > { %p32_p4 = scmp.ge.s32.totalorder %s35_s29, 4  }
 0x4de   :  { %34 = sbr.rel (!%p32_p4) target bundleno = 11 (0xb), region = 150 }

// kernel: _lambda_.12
= control target key start
LH: loop header
LB: loop body
LE: loop exit
PB: predicated region body
PF: predicated region fallthrough
CT: control target
= control target key end

     0   :  { %s2398_s29 = smov 0   ;;  %s2702_s0 = inlined_call_operand.vmem [shape: f32[2,64,16], index: 0, kind: input, shape index: {}]   ;;  %s2703_s1 = inlined_call_operand.vmem [shape: f32[2,32,32], index: 1, kind: input, shape index: {}]   ;;  %s2704_s2 = inlined_call_operand.vmem [shape: f32[2,16,64], index: 2, kind: input, shape index: {}]   ;;  %s2705_s3 = inlined_call_operand.vmem [shape: f32[2,8,128], index: 3, kind: input, shape index: {}]   ;;  %s2706_s4 = inlined_call_operand.vmem [shape: f32[128,16], index: 4, kind: input, shape index: {}]   ;;  %s2707_s5 = inlined_call_operand.vmem [shape: f32[64,16], index: 5, kind: input, shape index: {}]   ;;  %s2708_s6 = inlined_call_operand.vmem [shape: f32[32,16], index: 6, kind: input, shape index: {}]   ;;  %s2709_s7 = inlined_call_operand.vmem [shape: f32[16,16], index: 7, kind: input, shape index: {}]   ;;  %s2710_s8 = inlined_call_operand.vmem [shape: f32[16,8], index: 8, kind: input, shape index: {}]   ;;  %s2711_s9 = inlined_call_operand.vmem [shape: f32[32,16], index: 9, kind: input, shape index: {}]   ;;  %s2712_s10 = inlined_call_operand.vmem [shape: f32[64,32], index: 10, kind: input, shape index: {}]   ;;  %s2713_s11 = inlined_call_operand.vmem [shape: f32[3,16,16], index: 11, kind: input, shape index: {}]   ;;  %s2714_s12 = inlined_call_operand.vmem [shape: f32[1,16], index: 12, kind: input, shape index: {}]   ;;  %s2715_s13 = inlined_call_operand.vmem [shape: f32[1,16], index: 13, kind: input, shape index: {}]   ;;  %s2716_s14 = inlined_call_operand.vmem [shape: f32[2,64,16], index: 14, kind: output, shape index: {}]  }
   0x1 LB: > { %s1854_s30 = sadd.s32 4294967295, %s2318_s29   ;;  %p1858_p0 = scmp.ge.s32.totalorder %s2318_s29, 1  ;;  %s2318_s29 = sphi %s2398_s29, %s24_s29  }
   0x2   : > { %p441_p1 = scmp.lt.s32.totalorder %s2318_s29, 3 }
   0x4   : > { %p442_p2 = pnand %p1858_p0, %p441_p1 }
   0x5   : > { %v526_v0 = vld [vmem:[%s2706_s4] sm:$0xff] (!%p442_p2)  ;;  %v527_v1 = vld [vmem:[%s2706_s4 + $0x8] sm:$0xff] (!%p442_p2)  ;;  %v528_v2 = vld [vmem:[%s2706_s4 + $0x10] sm:$0xff] (!%p442_p2)  ;;  %v2320_v3 = vmov (!%p442_p2), 0.0|0.0   ;;  %vm2321_vm0 = vmmov (!%p442_p2), 0   ;;  %v2322_v6 = vmov (!%p442_p2), 0.0  }
   0x6   : > { %445 = sbr.rel (%p442_p2) target bundleno = 1183 (0x49f), region = 76  ;;  %2195 = vmatprep.subr.bf16.mxu0 (!%p442_p2), %v2320_v3  ;;  %v2196_v4 = vpack.c.bf16 (!%p442_p2), %v527_v1, %v526_v0  ;;  %v529_v5 = vld [vmem:[%s2706_s4 + $0x18] sm:$0xff] (!%p442_p2)  ;;  %2060 = vmatprep.mubr.msk.f32.mxu0 (!%p442_p2), %vm2321_vm0, %v2322_v6  ;;  %p501_p3 = scmp.lt.s32.totalorder (!%p442_p2), %s1854_s30, 1  ;;  %v530_v8 = vld [vmem:[%s2706_s4 + $0x20] sm:$0xff] (!%p442_p2)  ;;  %v531_v9 = vld [vmem:[%s2706_s4 + $0x28] sm:$0xff] (!%p442_p2)  ;;  %vm624_vm1 = vcmask (!%p442_p2), 523264  }
   0x7   : > { %v2199_v7 = vpack.c.bf16 (!%p442_p2), %v529_v5, %v528_v2  ;;  %v616_v10 = vld [vmem:[%s2707_s5] sm:$0xff] (!%p442_p2)  ;;  %v617_v11 = vld [vmem:[%s2707_s5 + $0x8] sm:$0xff] (!%p442_p2)  ;;  %v618_v13 = vld [vmem:[%s2707_s5 + $0x10] sm:$0xff] (!%p442_p2)  ;;  %v2202_v15 = vpack.c.bf16 (!%p442_p2), %v531_v9, %v530_v8  ;;  %vm706_vm2 = vcmask (!%p442_p2), 64512   ;;  %vm800_vm3 = vcmask (!%p442_p2), 261120  }
   0x8   : > { %2197 = vmatpush3.bf16.msra.mxu0 (!%p442_p2), %v2196_v4  ;;  %v2219_v12 = vpack.c.bf16 (!%p442_p2), %v617_v11, %v616_v10  ;;  %v619_v14 = vld [vmem:[%s2707_s5 + $0x18] sm:$0xff] (!%p442_p2)  ;;  %v620_v17 = vld [vmem:[%s2707_s5 + $0x20] sm:$0xff] (!%p442_p2)  ;;  %v621_v18 = vld [vmem:[%s2707_s5 + $0x28] sm:$0xff] (!%p442_p2)  ;;  %vm898_vm4 = vcmask (!%p442_p2), 130048   ;;  %vm1280_vm5 = vcmask (!%p442_p2), 123904  }
   0x9   : > { %2198 = vmatprep.subr.bf16.mxu0 (!%p442_p2), %v2320_v3  ;;  %v2223_v16 = vpack.c.bf16 (!%p442_p2), %v619_v14, %v618_v13  ;;  %v532_v19 = vld [vmem:[%s2706_s4 + $0x30] sm:$0xff] (!%p442_p2)  ;;  %v533_v20 = vld [vmem:[%s2706_s4 + $0x38] sm:$0xff] (!%p442_p2)  ;;  %v2227_v22 = vpack.c.bf16 (!%p442_p2), %v621_v18, %v620_v17  ;;  %v534_v26 = vld [vmem:[%s2706_s4 + $0x40] sm:$0xff] (!%p442_p2)  ;;  %1272 = vst.msk [vmem:[#allocation2] sm:$0xff] (!%p442_p2), %vm898_vm4, %v2322_v6 }
   0xa   : > { %2220 = vmatprep.subr.bf16.mxu1 (!%p442_p2), %v2219_v12  ;;  %v2205_v23 = vpack.c.bf16 (!%p442_p2), %v533_v20, %v532_v19  ;;  %v622_v24 = vld [vmem:[%s2707_s5 + $0x30] sm:$0xff] (!%p442_p2)  ;;  %v623_v25 = vld [vmem:[%s2707_s5 + $0x38] sm:$0xff] (!%p442_p2)  ;;  %v535_v27 = vld [vmem:[%s2706_s4 + $0x48] sm:$0xff] (!%p442_p2)  ;;  %1273 = vst.msk [vmem:[#allocation2 + $0x8] sm:$0xff] (!%p442_p2), %vm898_vm4, %v2322_v6 }
   0xb   : > { %2222 = vmatpush3.bf16.msra.mxu1 (!%p442_p2), %v2219_v12  ;;  %v2231_v28 = vpack.c.bf16 (!%p442_p2), %v623_v25, %v622_v24  ;;  %v2208_v29 = vpack.c.bf16 (!%p442_p2), %v535_v27, %v534_v26  ;;  %v536_v30 = vld [vmem:[%s2706_s4 + $0x50] sm:$0xff] (!%p442_p2)  ;;  %v537_v31 = vld [vmem:[%s2706_s4 + $0x58] sm:$0xff] (!%p442_p2)  ;;  %v538_v33 = vld [vmem:[%s2706_s4 + $0x60] sm:$0xff] (!%p442_p2)  ;;  %1274 = vst.msk [vmem:[#allocation2 + $0x10] sm:$0xff] (!%p442_p2), %vm898_vm4, %v2322_v6 }
   0xc   : > { %2200 = vmatpush3.bf16.msra.mxu0 (!%p442_p2), %v2199_v7  ;;  %2224 = vmatprep.subr.bf16.mxu1 (!%p442_p2), %v2223_v16  ;;  %v2211_v32 = vpack.c.bf16 (!%p442_p2), %v537_v31, %v536_v30  ;;  %v539_v34 = vld [vmem:[%s2706_s4 + $0x68] sm:$0xff] (!%p442_p2)  ;;  %v540_v37 = vld [vmem:[%s2706_s4 + $0x70] sm:$0xff] (!%p442_p2)  ;;  %v541_v38 = vld [vmem:[%s2706_s4 + $0x78] sm:$0xff] (!%p442_p2)  ;;  %1275 = vst.msk [vmem:[#allocation2 + $0x18] sm:$0xff] (!%p442_p2), %vm898_vm4, %v2322_v6 }
   0xd   : > { %s2718_s30 = smov (!%p501_p3, %s1854_s30), 1  ;;  %2201 = vmatprep.subr.bf16.mxu0 %v2320_v3  ;;  %v2214_v36 = vpack.c.bf16 %v539_v34, %v538_v33  ;;  %v2217_v39 = vpack.c.bf16 %v541_v38, %v540_v37  ;;  %v612_v41 = vld [vmem:[%s2710_s8] sm:$0xff]  ;;  %v797_v43 = vld [vmem:[%s2708_s6 + $0x8] sm:$0xff]  ;;  %v798_v48 = vld [vmem:[%s2708_s6 + $0x10] sm:$0xff]  ;;  %1276 = vst.msk [vmem:[#allocation2 + $0x20] sm:$0xff] %vm898_vm4, %v2322_v6 }
   0xe   : > { %s1930_s25 = sshll.u32 %s2718_s30, 4  ;;  %s1865_s26 = sshll.u32 %s2718_s30, 3  ;;  %v796_v42 = vld [vmem:[%s2708_s6] sm:$0xff]  ;;  %v613_v46 = vld [vmem:[%s2710_s8 + $0x8] sm:$0xff]  ;;  %v799_v49 = vld [vmem:[%s2708_s6 + $0x18] sm:$0xff]  ;;  %1277 = vst.msk [vmem:[#allocation2 + $0x28] sm:$0xff] %vm898_vm4, %v2322_v6 }
   0xf   : > { %s515_s18 = scalar_lea.vmem %s2704_s2, %s1930_s25  ;;  %2226 = vmatpush3.bf16.msra.mxu1 %v2223_v16  ;;  %s519_s28 = scalar_lea.vmem %s2705_s3, %s1865_s26  ;;  %v2235_v44 = vpack.c.bf16 %v797_v43, %v796_v42  ;;  %v2239_v50 = vpack.c.bf16 %v799_v49, %v798_v48  ;;  %v788_v53 = vld [vmem:[%s2711_s9] sm:$0xff]  ;;  %1278 = vst.msk [vmem:[#allocation2 + $0x30] sm:$0xff] %vm898_vm4, %v2322_v6  ;;  %1279 = vst.msk [vmem:[#allocation2 + $0x38] sm:$0xff] %vm898_vm4, %v2322_v6  ;;  %v1013_v57 = vld [vmem:[%s2709_s7 + $0x8] sm:$0xff] }
  0x10   : > { %v614_v21 = vld [vmem:[%s515_s18] sm:$0xff]  ;;  %2203 = vmatpush3.bf16.msra.mxu0 %v2202_v15  ;;  %2228 = vmatprep.subr.bf16.mxu1 %v2227_v22  ;;  %v615_v35 = vld [vmem:[%s515_s18 + $0x8] sm:$0xff]  ;;  %s1929_s27 = sshll.u32 %s2718_s30, 5  ;;  %s1928_s20 = sshll.u32 %s2718_s30, 6  ;;  %v790_v1 = vld [vmem:[%s2711_s9 + $0x10] sm:$0xff] }
  0x11   : > { %2079 = vmatprep.mubr.msk.f32.mxu1 %vm624_vm1, %v614_v21  ;;  %2204 = vmatprep.subr.bf16.mxu0 %v2320_v3  ;;  %v525_v40 = vld [vmem:[%s519_s28] sm:$0xff]  ;;  %s510_s16 = scalar_lea.vmem %s2703_s1, %s1929_s27  ;;  %s2549_s23 = scalar_lea.vmem %s2702_s0, %s1928_s20  ;;  %v789_v0 = vld [vmem:[%s2711_s9 + $0x8] sm:$0xff]  ;;  %v791_v2 = vld [vmem:[%s2711_s9 + $0x18] sm:$0xff]  ;;  %1281 = vst.msk [vmem:[#allocation2 + $0x40] sm:$0x3] %vm1280_vm5, %v2322_v6 }
  0x12   : > { %v792_v51 = vld [vmem:[%s510_s16] sm:$0xff]  ;;  %v793_v52 = vld [vmem:[%s510_s16 + $0x8] sm:$0xff]  ;;  %v794_v54 = vld [vmem:[%s510_s16 + $0x10] sm:$0xff]  ;;  %s2681_s28 = scalar_lea.vmem %s2716_s14, %s1928_s20 }
  0x13   : > { %2230 = vmatpush3.bf16.msra.mxu1 %v2227_v22  ;;  %v795_v55 = vld [vmem:[%s510_s16 + $0x18] sm:$0xff]  ;;  %v1012_v56 = vld [vmem:[%s2709_s7] sm:$0xff]  ;;  %v1005_v60 = vld [vmem:[%s2549_s23 + $0x8] sm:$0xff] }
  0x14   : > { %2206 = vmatpush3.bf16.msra.mxu0 %v2205_v23  ;;  %2232 = vmatprep.subr.bf16.mxu1 %v2231_v28  ;;  %v1004_v58 = vld [vmem:[%s2549_s23] sm:$0xff]  ;;  %v2247_v59 = vpack.c.bf16 %v1013_v57, %v1012_v56  ;;  %v1006_v5 = vld [vmem:[%s2549_s23 + $0x10] sm:$0xff]  ;;  %v1007_v7 = vld [vmem:[%s2549_s23 + $0x18] sm:$0xff] }
  0x15   : > { %2207 = vmatprep.subr.bf16.mxu0 %v2320_v3  ;;  %v1008_v10 = vld [vmem:[%s2549_s23 + $0x20] sm:$0xff]  ;;  %v1009_v11 = vld [vmem:[%s2549_s23 + $0x28] sm:$0xff]  ;;  %v1010_v12 = vld [vmem:[%s2549_s23 + $0x30] sm:$0xff] }
  0x16   : > { %v1011_v13 = vld [vmem:[%s2549_s23 + $0x38] sm:$0xff]  ;;  %v996_v14 = vld [vmem:[%s2712_s10] sm:$0xff]  ;;  %v997_v25 = vld [vmem:[%s2712_s10 + $0x8] sm:$0xff] }
  0x17   : > { %2234 = vmatpush3.bf16.msra.mxu1 %v2231_v28  ;;  %v998_v26 = vld [vmem:[%s2712_s10 + $0x10] sm:$0xff]  ;;  %v999_v27 = vld [vmem:[%s2712_s10 + $0x18] sm:$0xff]  ;;  %v1000_v28 = vld [vmem:[%s2712_s10 + $0x20] sm:$0xff] }
  0x18   : > { %2209 = vmatpush3.bf16.msra.mxu0 %v2208_v29  ;;  %v1001_v29 = vld [vmem:[%s2712_s10 + $0x28] sm:$0xff]  ;;  %v1002_v30 = vld [vmem:[%s2712_s10 + $0x30] sm:$0xff]  ;;  %v1003_v31 = vld [vmem:[%s2712_s10 + $0x38] sm:$0xff] }
  0x19   : > { %2210 = vmatprep.subr.bf16.mxu0 %v2320_v3  ;;  %v1897_v33 = vld [vmem:[%s2713_s11 + $0x18] sm:$0xff]  ;;  %v1915_v42 = vld [vmem:[%s2713_s11 + $0x28] sm:$0xff] }
  0x1a   : > { %2080 = vmatmul.mubr.msk.f32.vlgmr.msra.gmra.mrb[0].mxu1 %vm624_vm1, %v615_v35  ;;  %v1314_v35 = vld [vmem:[%s2713_s11] sm:$0xff] }
  0x1b   : > { %2084 = vmatprep.mubr.msk.f32.mxu1 %vm706_vm2, %v612_v41  ;;  %v1914_v41 = vld [vmem:[%s2713_s11 + $0x20] sm:$0xff] }
  0x1c   : > { %2212 = vmatpush3.bf16.msra.mxu0 %v2211_v32  ;;  %v1896_v32 = vld [vmem:[%s2713_s11 + $0x10] sm:$0xff] }
  0x1d   : > { %2213 = vmatprep.subr.bf16.mxu0 %v2320_v3  ;;  %v2259_v34 = vpack.c.bf16 %v1897_v33, %v1896_v32 }
  0x20   : > { %2215 = vmatpush3.bf16.msra.mxu0 %v2214_v36  ;;  %v1315_v36 = vld [vmem:[%s2713_s11 + $0x8] sm:$0xff] }
  0x21   : > { %2216 = vmatprep.subr.bf16.mxu0 %v2320_v3  ;;  %v2263_v37 = vpack.c.bf16 %v1315_v36, %v1314_v35 }
  0x24   : > { %2218 = vmatpush3.bf16.msra.mxu0 %v2217_v39 }
  0x25   : > { %2236 = vmatprep.subr.bf16.mxu0 %v2235_v44 }
  0x27   : > { %2061 = vmatmul.mubr.f32.vlgmr.msra.gmra.mrb[0].mxu0 %v525_v40 }
  0x28   : > { %2238 = vmatpush3.bf16.msra.mxu0 %v2235_v44  ;;  %2095 = vmatprep.mubr.msk.f32.mxu0 %vm800_vm3, %v792_v51 }
  0x29   : > { %2240 = vmatprep.subr.bf16.mxu0 %v2239_v50 }
  0x2c   : > { %2242 = vmatpush3.bf16.msra.mxu0 %v2239_v50 }
  0x2d   : > { %2248 = vmatprep.subr.bf16.mxu0 %v2247_v59 }
  0x2f   : > { %2096 = vmatmul.mubr.msk.f32.vlgmr.msra.gmra.mrb[2].mxu0 %vm800_vm3, %v793_v52 }
  0x30   : > { %2098 = vmatprep.mubr.msk.f32.mxu0 %vm800_vm3, %v794_v54  ;;  %2250 = vmatpush3.bf16.msra.mxu0 %v2247_v59 }
  0x33   : > { %2099 = vmatmul.mubr.msk.f32.gmra.mrb[4].mxu0 %vm800_vm3, %v795_v55 }
  0x34   : > { %2115 = vmatprep.mubr.msk.f32.mxu0 %vm898_vm4, %v1004_v58 }
  0x37   : > { %2116 = vmatmul.mubr.msk.f32.vlgmr.msra.gmra.mrb[6].mxu0 %vm898_vm4, %v1005_v60 }
  0x38   : > { %2118 = vmatprep.mubr.msk.f32.mxu0 %vm898_vm4, %v1006_v5 }
  0x3b   : > { %2119 = vmatmul.mubr.msk.f32.gmra.mrb[8].mxu0 %vm898_vm4, %v1007_v7 }
  0x3c   : > { %2121 = vmatprep.mubr.msk.f32.mxu0 %vm898_vm4, %v1008_v10 }
  0x3f   : > { %2122 = vmatmul.mubr.msk.f32.gmra.mrb[10].mxu0 %vm898_vm4, %v1009_v11  ;;  %v1925_v11 = vld [vmem:[%s2715_s13] ss:$0 sm:$0xff] }
  0x40   : > { %2124 = vmatprep.mubr.msk.f32.mxu0 %vm898_vm4, %v1010_v12 }
  0x43   : > { %2125 = vmatmul.mubr.msk.f32.gmra.mrb[12].mxu0 %vm898_vm4, %v1011_v13 }
  0x44   : > { %2135 = vmatprep.mubr.msk.f32.mxu0 %vm800_vm3, %v996_v14 }
  0xfa   : > { %v608_v45 = vpop.f32.mrb[0].mxu0 }
  0xfb   : > { %v2062_v47 = vpop.f32.mrb[1].mxu0  ;;  %2082 = vmatprep.subr.mxu1 %v608_v45 }
  0xfc   : > { %2083 = vmatpush3.msra.mxu1 %v608_v45 }
  0xfd   : > { %2085 = vmatmul.mubr.msk.f32.vlgmr.msra.gmra.mrb[0].mxu1 %vm706_vm2, %v613_v46  ;;  %v2267_v46 = vpack.c.bf16 %v1915_v42, %v1914_v41 }
  0xfe   : > { %2105 = vmatprep.mubr.msk.f32.mxu1 %vm898_vm4, %v788_v53 }
 0x102   : > { %v2097_v3 = vpop.f32.mrb[2].mxu0 }
 0x103   : > { %v879_v4 = vpop.f32.mrb[3].mxu0 }
 0x106   : > { %v2100_v8 = vpop.f32.mrb[4].mxu0 }
 0x107   : > { %v889_v9 = vpop.f32.mrb[5].mxu0 }
 0x1d0   : > { %v2086_v61 = vpop.f32.mrb[0].mxu1 }
 0x1d1   : > { %v779_v62 = vpop.f32.mrb[1].mxu1 }
 0x1d2   : > { %v2243_v63 = vpack.c.bf16 %v2086_v61, %v779_v62 }
 0x1d4   : > { %2244 = vmatprep.subr.bf16.mxu1 %v2243_v63 }
 0x1d5   : > { %2246 = vmatpush3.bf16.msra.mxu1 %v2243_v63 }
 0x1d6   : > { %2260 = vmatprep.subr.bf16.mxu1 %v2259_v34 }
 0x1d8   : > { %2106 = vmatmul.mubr.msk.f32.vlgmr.msra.gmra.mrb[2].mxu1 %vm898_vm4, %v789_v0 }
 0x1d9   : > { %2108 = vmatprep.mubr.msk.f32.mxu1 %vm898_vm4, %v790_v1  ;;  %2262 = vmatpush3.bf16.msra.mxu1 %v2259_v34 }
 0x1da   : > { %2264 = vmatprep.subr.bf16.mxu1 %v2263_v37 }
 0x1dc   : > { %2109 = vmatmul.mubr.msk.f32.gmra.mrb[4].mxu1 %vm898_vm4, %v791_v2 }
 0x2ab   : > { %v2107_v15 = vpop.f32.mrb[2].mxu1 }
 0x2ac   : > { %v983_v16 = vadd.f32 %v2107_v15, %v2097_v3  ;;  %v977_v17 = vpop.f32.mrb[3].mxu1 }
 0x2ad   : > { %v978_v18 = vadd.f32 %v977_v17, %v879_v4 }
 0x2af   : > { %v2251_v19 = vpack.c.bf16 %v983_v16, %v978_v18  ;;  %v2110_v20 = vpop.f32.mrb[4].mxu1 }
 0x2b0   : > { %v993_v21 = vadd.f32 %v2110_v20, %v2100_v8  ;;  %v987_v22 = vpop.f32.mrb[5].mxu1 }
 0x2b1   : > { %v988_v23 = vadd.f32 %v987_v22, %v889_v9  ;;  %2252 = vmatprep.subr.bf16.mxu0 %v2251_v19  ;;  %v1924_v9 = vld [vmem:[%s2714_s12] ss:$0 sm:$0xff] }
 0x2b2   : > { %2254 = vmatpush3.bf16.msra.mxu0 %v2251_v19 }
 0x2b3   : > { %v2255_v24 = vpack.c.bf16 %v993_v21, %v988_v23 }
 0x2b5   : > { %2256 = vmatprep.subr.bf16.mxu0 %v2255_v24 }
 0x2b6   : > { %2258 = vmatpush3.bf16.msra.mxu0 %v2255_v24 }
 0x2b9   : > { %2136 = vmatmul.mubr.msk.f32.vlgmr.msra.gmra.mrb[6].mxu0 %vm800_vm3, %v997_v25 }
 0x2ba   : > { %2138 = vmatprep.mubr.msk.f32.mxu0 %vm800_vm3, %v998_v26 }
 0x2bd   : > { %2139 = vmatmul.mubr.msk.f32.gmra.mrb[8].mxu0 %vm800_vm3, %v999_v27 }
 0x2be   : > { %2141 = vmatprep.mubr.msk.f32.mxu0 %vm800_vm3, %v1000_v28 }
 0x2c1   : > { %2142 = vmatmul.mubr.msk.f32.gmra.mrb[10].mxu0 %vm800_vm3, %v1001_v29 }
 0x2c2   : > { %2144 = vmatprep.mubr.msk.f32.mxu0 %vm800_vm3, %v1002_v30 }
 0x2c5   : > { %2145 = vmatmul.mubr.msk.f32.gmra.mrb[12].mxu0 %vm800_vm3, %v1003_v31 }
 0x38c   : > { %v2137_v38 = vpop.f32.mrb[6].mxu0 }
 0x38d   : > { %1283 = vst.msk [vmem:[#allocation2 + $0x9] sm:$0xff] %vm898_vm4, %v2137_v38  ;;  %v1233_v39 = vpop.f32.mrb[7].mxu0 }
 0x38e   : > { %1282 = vst.msk [vmem:[#allocation2 + $0x1] sm:$0xff] %vm898_vm4, %v1233_v39 }
 0x390   : > { %v2140_v40 = vpop.f32.mrb[8].mxu0 }
 0x391   : > { %1285 = vst.msk [vmem:[#allocation2 + $0x19] sm:$0xff] %vm898_vm4, %v2140_v40  ;;  %v1243_v6 = vpop.f32.mrb[9].mxu0 }
 0x392   : > { %1284 = vst.msk [vmem:[#allocation2 + $0x11] sm:$0xff] %vm898_vm4, %v1243_v6 }
 0x394   : > { %v2143_v43 = vpop.f32.mrb[10].mxu0  ;;  %v1299_v47 = vld [vmem:[#allocation2 + $0x9] sm:$0xff] }
 0x395   : > { %1287 = vst.msk [vmem:[#allocation2 + $0x29] sm:$0xff] %vm898_vm4, %v2143_v43  ;;  %v1253_v44 = vpop.f32.mrb[11].mxu0  ;;  %v1298_v45 = vld [vmem:[#allocation2 + $0x1] sm:$0xff] }
 0x396   : > { %1286 = vst.msk [vmem:[#allocation2 + $0x21] sm:$0xff] %vm898_vm4, %v1253_v44  ;;  %2151 = vmatprep.mubr.msk.f32.mxu1 %vm898_vm4, %v1298_v45  ;;  %v1290_v56 = vld [vmem:[#allocation2] sm:$0xff]  ;;  %v1291_v57 = vld [vmem:[#allocation2 + $0x8] sm:$0xff] }
 0x397   : > { %2152 = vmatmul.mubr.msk.f32.vlgmr.msra.gmra.mrb[6].mxu1 %vm898_vm4, %v1299_v47  ;;  %v1306_v0 = vld [vmem:[#allocation2 + $0x2] sm:$0xff] }
 0x398   : > { %v2146_v48 = vpop.f32.mrb[12].mxu0  ;;  %2266 = vmatpush3.bf16.msra.mxu1 %v2263_v37  ;;  %v1301_v51 = vld [vmem:[#allocation2 + $0x19] sm:$0xff] }
 0x399   : > { %1289 = vst.msk [vmem:[#allocation2 + $0x39] sm:$0xff] %vm898_vm4, %v2146_v48  ;;  %v1263_v49 = vpop.f32.mrb[13].mxu0  ;;  %v1300_v50 = vld [vmem:[#allocation2 + $0x11] sm:$0xff]  ;;  %2268 = vmatprep.subr.bf16.mxu1 %v2267_v46 }
 0x39a   : > { %1288 = vst.msk [vmem:[#allocation2 + $0x31] sm:$0xff] %vm898_vm4, %v1263_v49  ;;  %2154 = vmatprep.mubr.msk.f32.mxu1 %vm898_vm4, %v1300_v50  ;;  %v1292_v58 = vld [vmem:[#allocation2 + $0x10] sm:$0xff]  ;;  %v1293_v59 = vld [vmem:[#allocation2 + $0x18] sm:$0xff] }
 0x39b   : > { %2155 = vmatmul.mubr.msk.f32.gmra.mrb[8].mxu1 %vm898_vm4, %v1301_v51  ;;  %v1307_v1 = vld [vmem:[#allocation2 + $0xa] sm:$0xff]  ;;  %v1308_v2 = vld [vmem:[#allocation2 + $0x12] sm:$0xff] }
 0x39c   : > { %v1303_v53 = vld [vmem:[#allocation2 + $0x29] sm:$0xff] }
 0x39d   : > { %v1302_v52 = vld [vmem:[#allocation2 + $0x21] sm:$0xff] }
 0x39e   : > { %2157 = vmatprep.mubr.msk.f32.mxu1 %vm898_vm4, %v1302_v52  ;;  %v1294_v60 = vld [vmem:[#allocation2 + $0x20] sm:$0xff]  ;;  %v1295_v61 = vld [vmem:[#allocation2 + $0x28] sm:$0xff] }
 0x39f   : > { %2158 = vmatmul.mubr.msk.f32.gmra.mrb[10].mxu1 %vm898_vm4, %v1303_v53  ;;  %v1309_v3 = vld [vmem:[#allocation2 + $0x1a] sm:$0xff]  ;;  %v1310_v4 = vld [vmem:[#allocation2 + $0x22] sm:$0xff] }
 0x3a0   : > { %v1305_v55 = vld [vmem:[#allocation2 + $0x39] sm:$0xff] }
 0x3a1   : > { %v1304_v54 = vld [vmem:[#allocation2 + $0x31] sm:$0xff]  ;;  %v1313_v8 = vld [vmem:[#allocation2 + $0x3a] sm:$0xff] }
 0x3a2   : > { %2160 = vmatprep.mubr.msk.f32.mxu1 %vm898_vm4, %v1304_v54  ;;  %v1296_v62 = vld [vmem:[#allocation2 + $0x30] sm:$0xff]  ;;  %v1297_v63 = vld [vmem:[#allocation2 + $0x38] sm:$0xff] }
 0x3a3   : > { %2161 = vmatmul.mubr.msk.f32.gmra.mrb[12].mxu1 %vm898_vm4, %v1305_v55  ;;  %v1311_v5 = vld [vmem:[#allocation2 + $0x2a] sm:$0xff]  ;;  %v1312_v7 = vld [vmem:[#allocation2 + $0x32] sm:$0xff] }
 0x3a4   : > { %2167 = vmatprep.mubr.msk.f32.mxu1 %vm898_vm4, %v1290_v56 }
 0x3a7   : > { %2168 = vmatmul.mubr.msk.f32.vlgmr.msra.gmra.mrb[6].mxu1 %vm898_vm4, %v1291_v57 }
 0x3a8   : > { %2170 = vmatprep.mubr.msk.f32.mxu1 %vm898_vm4, %v1292_v58  ;;  %2270 = vmatpush3.bf16.msra.mxu1 %v2267_v46 }
 0x3ab   : > { %2171 = vmatmul.mubr.msk.f32.gmra.mrb[8].mxu1 %vm898_vm4, %v1293_v59 }
 0x3ac   : > { %2173 = vmatprep.mubr.msk.f32.mxu1 %vm898_vm4, %v1294_v60 }
 0x3af   : > { %2174 = vmatmul.mubr.msk.f32.gmra.mrb[10].mxu1 %vm898_vm4, %v1295_v61 }
 0x3b0   : > { %2176 = vmatprep.mubr.msk.f32.mxu1 %vm898_vm4, %v1296_v62 }
 0x3b3   : > { %2177 = vmatmul.mubr.msk.f32.gmra.mrb[12].mxu1 %vm898_vm4, %v1297_v63 }
 0x3b4   : > { %2183 = vmatprep.mubr.msk.f32.mxu1 %vm898_vm4, %v1306_v0 }
 0x3b7   : > { %2184 = vmatmul.mubr.msk.f32.vlgmr.msra.gmra.mrb[6].mxu1 %vm898_vm4, %v1307_v1 }
 0x3b8   : > { %2186 = vmatprep.mubr.msk.f32.mxu1 %vm898_vm4, %v1308_v2 }
 0x3bb   : > { %2187 = vmatmul.mubr.msk.f32.gmra.mrb[8].mxu1 %vm898_vm4, %v1309_v3 }
 0x3bc   : > { %2189 = vmatprep.mubr.msk.f32.mxu1 %vm898_vm4, %v1310_v4 }
 0x3bf   : > { %2190 = vmatmul.mubr.msk.f32.gmra.mrb[10].mxu1 %vm898_vm4, %v1311_v5 }
 0x3c0   : > { %2192 = vmatprep.mubr.msk.f32.mxu1 %vm898_vm4, %v1312_v7 }
 0x3c3   : > { %2193 = vmatmul.mubr.msk.f32.gmra.mrb[12].mxu1 %vm898_vm4, %v1313_v8 }
 0x48a   : > { %v2185_v10 = vpop.f32.mrb[6].mxu1 }
 0x48b   : > { %v1725_v12 = vmul.f32 %v2185_v10, %v1924_v9  ;;  %v1670_v13 = vpop.f32.mrb[7].mxu1 }
 0x48c   : > { %v1724_v14 = vmul.f32 %v1924_v9, %v1670_v13 }
 0x48d   : > { %v1740_v15 = vadd.f32 %v1925_v11, %v1725_v12 }
 0x48e   : > { %v1739_v16 = vadd.f32 %v1925_v11, %v1724_v14  ;;  %v2188_v17 = vpop.f32.mrb[8].mxu1 }
 0x48f   : > { %v1748_v18 = vmax.f32 %v1740_v15, 0.0  ;;  %v1727_v19 = vmul.f32 %v2188_v17, %v1924_v9  ;;  %v1680_v20 = vpop.f32.mrb[9].mxu1 }
 0x490   : > { %v1747_v21 = vmax.f32 %v1739_v16, 0.0  ;;  %v1726_v22 = vmul.f32 %v1924_v9, %v1680_v20 }
 0x491   : > { %1756 = vst.msk [vmem:[%s2681_s28 + $0x8] sm:$0xff] %vm898_vm4, %v1748_v18  ;;  %v1742_v23 = vadd.f32 %v1925_v11, %v1727_v19 }
 0x492   : > { %1755 = vst.msk [vmem:[%s2681_s28] sm:$0xff] %vm898_vm4, %v1747_v21  ;;  %v1741_v24 = vadd.f32 %v1925_v11, %v1726_v22  ;;  %v2191_v25 = vpop.f32.mrb[10].mxu1 }
 0x493   : > { %v1750_v26 = vmax.f32 %v1742_v23, 0.0  ;;  %v1729_v27 = vmul.f32 %v2191_v25, %v1924_v9  ;;  %v1690_v28 = vpop.f32.mrb[11].mxu1 }
 0x494   : > { %v1749_v29 = vmax.f32 %v1741_v24, 0.0  ;;  %v1728_v30 = vmul.f32 %v1924_v9, %v1690_v28 }
 0x495   : > { %1758 = vst.msk [vmem:[%s2681_s28 + $0x18] sm:$0xff] %vm898_vm4, %v1750_v26  ;;  %v1744_v31 = vadd.f32 %v1925_v11, %v1729_v27 }
 0x496   : > { %1757 = vst.msk [vmem:[%s2681_s28 + $0x10] sm:$0xff] %vm898_vm4, %v1749_v29  ;;  %v1743_v32 = vadd.f32 %v1925_v11, %v1728_v30  ;;  %v2194_v33 = vpop.f32.mrb[12].mxu1 }
 0x497   : > { %v1752_v34 = vmax.f32 %v1744_v31, 0.0  ;;  %v1731_v35 = vmul.f32 %v2194_v33, %v1924_v9  ;;  %v1700_v36 = vpop.f32.mrb[13].mxu1 }
 0x498   : > { %v1751_v37 = vmax.f32 %v1743_v32, 0.0  ;;  %v1730_v38 = vmul.f32 %v1924_v9, %v1700_v36 }
 0x499   : > { %1760 = vst.msk [vmem:[%s2681_s28 + $0x28] sm:$0xff] %vm898_vm4, %v1752_v34  ;;  %v1746_v39 = vadd.f32 %v1925_v11, %v1731_v35 }
 0x49a   : > { %1759 = vst.msk [vmem:[%s2681_s28 + $0x20] sm:$0xff] %vm898_vm4, %v1751_v37  ;;  %v1745_v40 = vadd.f32 %v1925_v11, %v1730_v38 }
 0x49b   : > { %v1754_v6 = vmax.f32 %v1746_v39, 0.0 }
 0x49c   : > { %v1753_v41 = vmax.f32 %v1745_v40, 0.0 }
 0x49d   : > { %1762 = vst.msk [vmem:[%s2681_s28 + $0x38] sm:$0xff] %vm898_vm4, %v1754_v6 }
 0x49e   : > { %1761 = vst.msk [vmem:[%s2681_s28 + $0x30] sm:$0xff] %vm898_vm4, %v1753_v41 }
 0x49f PF: > { %s24_s29 = sadd.s32 1, %s2318_s29  }
 0x4a0   : > { %p21_p4 = scmp.ge.s32.totalorder %s24_s29, 4  }
 0x4a2   :  { %23 = sbr.rel (!%p21_p4) target bundleno = 1 (0x1), region = 117 }

// kernel: _lambda_.13
= control target key start
LH: loop header
LB: loop body
LE: loop exit
PB: predicated region body
PF: predicated region fallthrough
CT: control target
= control target key end

     0   :  { %s1661_s13 = smov 0   ;;  %s1870_s0 = inlined_call_operand.vmem [shape: f32[2,32,16], index: 0, kind: input, shape index: {}]   ;;  %s1871_s1 = inlined_call_operand.vmem [shape: f32[2,32,16], index: 1, kind: input, shape index: {}]   ;;  %s1872_s2 = inlined_call_operand.vmem [shape: f32[3,16,64], index: 2, kind: input, shape index: {}]   ;;  %s1873_s3 = inlined_call_operand.vmem [shape: f32[1,64], index: 3, kind: input, shape index: {}, may-alias: {3,6}]   ;;  %s1874_s4 = inlined_call_operand.vmem [shape: f32[1,64], index: 4, kind: input, shape index: {}, may-alias: {4,7}]   ;;  %s1875_s5 = inlined_call_operand.vmem [shape: f32[3,64,64], index: 5, kind: input, shape index: {}]   ;;  %s1876_s6 = inlined_call_operand.vmem [shape: f32[1,64], index: 6, kind: input, shape index: {}, may-alias: {3,6}]   ;;  %s1877_s7 = inlined_call_operand.vmem [shape: f32[1,64], index: 7, kind: input, shape index: {}, may-alias: {4,7}]   ;;  %s1878_s8 = inlined_call_operand.vmem [shape: f32[64,2], index: 8, kind: input, shape index: {}]   ;;  %s1879_s9 = inlined_call_operand.vmem [shape: f32[1,2], index: 9, kind: input, shape index: {}]   ;;  %s1880_s10 = inlined_call_operand.vmem [shape: f32[2,1,2], index: 10, kind: output, shape index: {}]  }
   0x1 LB: > { %s1256_s14 = sadd.s32 4294967295, %s1601_s13   ;;  %p1260_p0 = scmp.ge.s32.totalorder %s1601_s13, 1  ;;  %s1601_s13 = sphi %s1661_s13, %s20_s13  }
   0x2   : > { %p322_p1 = scmp.lt.s32.totalorder %s1601_s13, 3 }
   0x4   : > { %p323_p2 = pnand %p1260_p0, %p322_p1 }
   0x5   : > { %v1265_v0 = vld [vmem:[%s1872_s2 + $0x10] sm:$0xff] (!%p323_p2)  ;;  %v1266_v1 = vld [vmem:[%s1872_s2 + $0x18] sm:$0xff] (!%p323_p2)  ;;  %p363_p3 = scmp.lt.s32.totalorder (!%p323_p2), %s1256_s14, 1  ;;  %vm384_vm0 = vcmask (!%p323_p2), 130048   ;;  %vm389_vm1 = vcmask (!%p323_p2), 123904   ;;  %v1603_v3 = vmov (!%p323_p2), 0.0  }
   0x6   : > { %326 = sbr.rel (%p323_p2) target bundleno = 752 (0x2f0), region = 60  ;;  %v1496_v2 = vpack.c.bf16 (!%p323_p2), %v1266_v1, %v1265_v0  ;;  %385 = vst.msk [vmem:[#allocation2] sm:$0xff] (!%p323_p2), %vm384_vm0, %v1603_v3  ;;  %386 = vst.msk [vmem:[#allocation2 + $0x8] sm:$0xff] (!%p323_p2), %vm384_vm0, %v1603_v3  ;;  %v399_v4 = vld [vmem:[%s1872_s2] sm:$0xff] (!%p323_p2)  ;;  %v400_v5 = vld [vmem:[%s1872_s2 + $0x8] sm:$0xff] (!%p323_p2)  ;;  %vm728_vm2 = vcmask (!%p323_p2), 523264  }
   0x7   : > { %387 = vst.msk [vmem:[#allocation2 + $0x10] sm:$0xff] (!%p323_p2), %vm384_vm0, %v1603_v3  ;;  %388 = vst.msk [vmem:[#allocation2 + $0x18] sm:$0xff] (!%p323_p2), %vm384_vm0, %v1603_v3  ;;  %v1500_v6 = vpack.c.bf16 (!%p323_p2), %v400_v5, %v399_v4  ;;  %v1275_v7 = vld [vmem:[%s1872_s2 + $0x20] sm:$0xff] (!%p323_p2)  ;;  %v1276_v8 = vld [vmem:[%s1872_s2 + $0x28] sm:$0xff] (!%p323_p2)  ;;  %vm733_vm3 = vcmask (!%p323_p2), 517120   ;;  %vm1605_vm4 = vmmov (!%p323_p2), 0  }
   0x8   : > { %390 = vst.msk [vmem:[#allocation2 + $0x20] sm:$0x3] (!%p323_p2), %vm389_vm1, %v1603_v3  ;;  %1497 = vmatprep.subr.bf16.mxu0 (!%p323_p2), %v1496_v2  ;;  %v1504_v12 = vpack.c.bf16 (!%p323_p2), %v1276_v8, %v1275_v7  ;;  %v1283_v22 = vld [vmem:[%s1875_s5 + $0x40] sm:$0xff] (!%p323_p2)  ;;  %v1284_v23 = vld [vmem:[%s1875_s5 + $0x48] sm:$0xff] (!%p323_p2)  ;;  %v1285_v25 = vld [vmem:[%s1875_s5 + $0x50] sm:$0xff] (!%p323_p2)  ;;  %vm1195_vm5 = vcmask (!%p323_p2), 8192  }
   0x9   : > { %1499 = vmatpush3.bf16.msra.mxu0 (!%p323_p2), %v1496_v2  ;;  %v1508_v24 = vpack.c.bf16 (!%p323_p2), %v1284_v23, %v1283_v22  ;;  %v1286_v26 = vld [vmem:[%s1875_s5 + $0x58] sm:$0xff] (!%p323_p2)  ;;  %v1287_v28 = vld [vmem:[%s1875_s5 + $0x60] sm:$0xff] (!%p323_p2)  ;;  %v1288_v29 = vld [vmem:[%s1875_s5 + $0x68] sm:$0xff] (!%p323_p2) }
   0xa   : > { %1501 = vmatprep.subr.bf16.mxu0 (!%p323_p2), %v1500_v6  ;;  %v1512_v27 = vpack.c.bf16 (!%p323_p2), %v1286_v26, %v1285_v25  ;;  %v1516_v30 = vpack.c.bf16 (!%p323_p2), %v1288_v29, %v1287_v28  ;;  %v1289_v31 = vld [vmem:[%s1875_s5 + $0x70] sm:$0xff] (!%p323_p2)  ;;  %v1290_v32 = vld [vmem:[%s1875_s5 + $0x78] sm:$0xff] (!%p323_p2)  ;;  %v751_v34 = vld [vmem:[%s1875_s5] sm:$0xff] (!%p323_p2)  ;;  %v1604_v28 = vmov (!%p323_p2), 0.0|0.0  }
   0xb   : > { %1509 = vmatprep.subr.bf16.mxu1 (!%p323_p2), %v1508_v24  ;;  %v1520_v33 = vpack.c.bf16 (!%p323_p2), %v1290_v32, %v1289_v31  ;;  %v752_v35 = vld [vmem:[%s1875_s5 + $0x8] sm:$0xff] (!%p323_p2)  ;;  %v1281_v37 = vld [vmem:[%s1873_s3] ss:$0 sm:$0xff] (!%p323_p2)  ;;  %v753_v55 = vld [vmem:[%s1875_s5 + $0x10] sm:$0xff] (!%p323_p2) }
   0xc   : > { %1511 = vmatpush3.bf16.msra.mxu1 (!%p323_p2), %v1508_v24  ;;  %v1524_v36 = vpack.c.bf16 (!%p323_p2), %v752_v35, %v751_v34  ;;  %v1282_v39 = vld [vmem:[%s1874_s4] ss:$0 sm:$0xff] (!%p323_p2)  ;;  %v754_v56 = vld [vmem:[%s1875_s5 + $0x18] sm:$0xff] (!%p323_p2)  ;;  %v756_v61 = vld [vmem:[%s1875_s5 + $0x28] sm:$0xff] (!%p323_p2) }
   0xd   : > { %s1882_s14 = smov (!%p363_p3, %s1256_s14), 1  ;;  %1513 = vmatprep.subr.bf16.mxu1 %v1512_v27  ;;  %v1528_v58 = vpack.c.bf16 %v754_v56, %v753_v55  ;;  %v755_v60 = vld [vmem:[%s1875_s5 + $0x20] sm:$0xff]  ;;  %v757_v1 = vld [vmem:[%s1875_s5 + $0x30] sm:$0xff]  ;;  %v758_v2 = vld [vmem:[%s1875_s5 + $0x38] sm:$0xff] }
   0xe   : > { %s1316_s27 = sshll.u32 %s1882_s14, 5  ;;  %v1532_v63 = vpack.c.bf16 %v756_v61, %v755_v60  ;;  %v1536_v5 = vpack.c.bf16 %v758_v2, %v757_v1  ;;  %v1300_v7 = vld [vmem:[%s1875_s5 + $0x88] sm:$0xff]  ;;  %v1113_v25 = vld [vmem:[%s1878_s8] sm:$0xff]  ;;  %v1115_v29 = vld [vmem:[%s1878_s8 + $0x10] sm:$0xff]  ;;  %s375_s20 = scalar_lea.vmem %s1880_s10, %s1882_s14 }
   0xf   : > { %s367_s30 = scalar_lea.vmem %s1870_s0, %s1316_s27  ;;  %s372_s15 = scalar_lea.vmem %s1871_s1, %s1316_s27  ;;  %v1114_v26 = vld [vmem:[%s1878_s8 + $0x8] sm:$0xff]  ;;  %v1117_v32 = vld [vmem:[%s1878_s8 + $0x20] sm:$0xff]  ;;  %v1119_v35 = vld [vmem:[%s1878_s8 + $0x30] sm:$0xff] }
  0x10   : > { %v376_v9 = vld [vmem:[%s367_s30] sm:$0xff]  ;;  %v381_v11 = vld [vmem:[%s372_s15 + $0x8] sm:$0xff]  ;;  %v382_v13 = vld [vmem:[%s372_s15 + $0x10] sm:$0xff]  ;;  %1515 = vmatpush3.bf16.msra.mxu1 %v1512_v27  ;;  %v1557_v27 = vpack.c.bf16 %v1114_v26, %v1113_v25 }
  0x11   : > { %v380_v10 = vld [vmem:[%s372_s15] sm:$0xff]  ;;  %v383_v14 = vld [vmem:[%s372_s15 + $0x18] sm:$0xff]  ;;  %392 = vst.msk [vmem:[#allocation2 + $0x9] sm:$0xff] %vm384_vm0, %v381_v11  ;;  %1385 = vmatprep.mubr.msk.f32.mxu0 %vm384_vm0, %v376_v9  ;;  %v377_v15 = vld [vmem:[%s367_s30 + $0x8] sm:$0xff]  ;;  %1517 = vmatprep.subr.bf16.mxu1 %v1516_v30 }
  0x12   : > { %391 = vst.msk [vmem:[#allocation2 + $0x1] sm:$0xff] %vm384_vm0, %v380_v10  ;;  %393 = vst.msk [vmem:[#allocation2 + $0x11] sm:$0xff] %vm384_vm0, %v382_v13  ;;  %1386 = vmatmul.mubr.msk.f32.vlgmr.msra.gmra.mrb[0].mxu0 %vm384_vm0, %v377_v15  ;;  %v378_v16 = vld [vmem:[%s367_s30 + $0x10] sm:$0xff]  ;;  %v379_v17 = vld [vmem:[%s367_s30 + $0x18] sm:$0xff] }
  0x13   : > { %394 = vst.msk [vmem:[#allocation2 + $0x19] sm:$0xff] %vm384_vm0, %v383_v14  ;;  %1503 = vmatpush3.bf16.msra.mxu0 %v1500_v6  ;;  %1388 = vmatprep.mubr.msk.f32.mxu0 %vm384_vm0, %v378_v16  ;;  %v1299_v6 = vld [vmem:[%s1875_s5 + $0x80] sm:$0xff]  ;;  %v1301_v9 = vld [vmem:[%s1875_s5 + $0x90] sm:$0xff] }
  0x14   : > { %1505 = vmatprep.subr.bf16.mxu0 %v1504_v12  ;;  %1519 = vmatpush3.bf16.msra.mxu1 %v1516_v30  ;;  %734 = vst.msk [vmem:[#allocation2 + $0x20] sm:$0x3] %vm733_vm3, %v1603_v3  ;;  %v1540_v8 = vpack.c.bf16 %v1300_v7, %v1299_v6  ;;  %v1116_v30 = vld [vmem:[%s1878_s8 + $0x18] sm:$0xff]  ;;  %v1121_v6 = vld [vmem:[%s1879_s9] sm:$0x1] }
  0x15   : > { %1521 = vmatprep.subr.bf16.mxu1 %v1520_v33  ;;  %v1560_v31 = vpack.c.bf16 %v1116_v30, %v1115_v29 }
  0x16   : > { %1389 = vmatmul.mubr.msk.f32.gmra.mrb[2].mxu0 %vm384_vm0, %v379_v17 }
  0x18   : > { %1523 = vmatpush3.bf16.msra.mxu1 %v1520_v33  ;;  %v1118_v33 = vld [vmem:[%s1878_s8 + $0x28] sm:$0xff] }
  0x19   : > { %v395_v18 = vld [vmem:[#allocation2] sm:$0xff]  ;;  %v396_v19 = vld [vmem:[#allocation2 + $0x8] sm:$0xff]  ;;  %v397_v20 = vld [vmem:[#allocation2 + $0x10] sm:$0xff]  ;;  %1525 = vmatprep.subr.bf16.mxu1 %v1524_v36  ;;  %v1563_v34 = vpack.c.bf16 %v1118_v33, %v1117_v32 }
  0x1a   : > { %1395 = vmatprep.mubr.msk.f32.mxu0 %vm384_vm0, %v395_v18  ;;  %729 = vst.msk [vmem:[#allocation2] sm:$0xff] %vm728_vm2, %v1603_v3  ;;  %730 = vst.msk [vmem:[#allocation2 + $0x8] sm:$0xff] %vm728_vm2, %v1603_v3  ;;  %v398_v21 = vld [vmem:[#allocation2 + $0x18] sm:$0xff]  ;;  %v1305_v18 = vld [vmem:[%s1875_s5 + $0xb0] sm:$0xff] }
  0x1b   : > { %1396 = vmatmul.mubr.msk.f32.vlgmr.msra.gmra.mrb[0].mxu0 %vm384_vm0, %v396_v19  ;;  %731 = vst.msk [vmem:[#allocation2 + $0x10] sm:$0xff] %vm728_vm2, %v1603_v3  ;;  %732 = vst.msk [vmem:[#allocation2 + $0x18] sm:$0xff] %vm728_vm2, %v1603_v3  ;;  %v1306_v19 = vld [vmem:[%s1875_s5 + $0xb8] sm:$0xff] }
  0x1c   : > { %1507 = vmatpush3.bf16.msra.mxu0 %v1504_v12  ;;  %1398 = vmatprep.mubr.msk.f32.mxu0 %vm384_vm0, %v397_v20 }
  0x1d   : > { %1556 = vmatprep.subr.bf16.mxu0 %v1604_v28 }
  0x1f   : > { %1399 = vmatmul.mubr.msk.f32.gmra.mrb[2].mxu0 %vm384_vm0, %v398_v21  ;;  %v1552_v21 = vpack.c.bf16 %v1306_v19, %v1305_v18 }
  0x20   : > { %1405 = vmatprep.mubr.msk.f32.mxu0 %vm384_vm0, %v380_v10  ;;  %v1302_v10 = vld [vmem:[%s1875_s5 + $0x98] sm:$0xff] }
  0x23   : > { %1406 = vmatmul.mubr.msk.f32.vlgmr.msra.gmra.mrb[0].mxu0 %vm384_vm0, %v381_v11  ;;  %v1544_v11 = vpack.c.bf16 %v1302_v10, %v1301_v9 }
  0x24   : > { %1408 = vmatprep.mubr.msk.f32.mxu0 %vm384_vm0, %v382_v13  ;;  %v1303_v13 = vld [vmem:[%s1875_s5 + $0xa0] sm:$0xff]  ;;  %1558 = vmatpush3.bf16.msra.mxu0 %v1557_v27 }
  0x25   : > { %1559 = vmatprep.subr.bf16.mxu0 %v1604_v28 }
  0x27   : > { %1409 = vmatmul.mubr.msk.f32.gmra.mrb[2].mxu0 %vm384_vm0, %v383_v14  ;;  %v1304_v14 = vld [vmem:[%s1875_s5 + $0xa8] sm:$0xff] }
  0x28   : > { %v1548_v16 = vpack.c.bf16 %v1304_v14, %v1303_v13  ;;  %1561 = vmatpush3.bf16.msra.mxu0 %v1560_v31  ;;  %1493 = vmatprep.mubr.msk.f32.mxu0 %vm1605_vm4, %v1603_v3 }
  0x29   : > { %1562 = vmatprep.subr.bf16.mxu0 %v1604_v28 }
  0x2c   : > { %1564 = vmatpush3.bf16.msra.mxu0 %v1563_v34 }
  0x2d   : > { %1565 = vmatprep.subr.bf16.mxu0 %v1604_v28 }
  0xf6   : > { %v1407_v38 = vpop.f32.mrb[0].mxu0 }
  0xf7   : > { %v710_v40 = vmul.f32 %v1407_v38, %v1281_v37  ;;  %v679_v41 = vpop.f32.mrb[1].mxu0  ;;  %v1311_v38 = vld [vmem:[%s1876_s6] ss:$0 sm:$0xff] }
  0xf8   : > { %v709_v42 = vmul.f32 %v1281_v37, %v679_v41 }
  0xf9   : > { %v721_v43 = vadd.f32 %v1282_v39, %v710_v40  ;;  %v1312_v40 = vld [vmem:[%s1877_s7] ss:$0 sm:$0xff] }
  0xfa   : > { %v720_v44 = vadd.f32 %v1282_v39, %v709_v42  ;;  %v1410_v45 = vpop.f32.mrb[2].mxu0 }
  0xfb   : > { %v725_v46 = vmax.f32 %v721_v43, 0.0  ;;  %v712_v47 = vmul.f32 %v1410_v45, %v1281_v37  ;;  %v689_v48 = vpop.f32.mrb[3].mxu0 }
  0xfc   : > { %v724_v49 = vmax.f32 %v720_v44, 0.0  ;;  %v711_v50 = vmul.f32 %v1281_v37, %v689_v48 }
  0xfd   : > { %736 = vst.msk [vmem:[#allocation2 + $0x9] sm:$0xff] %vm728_vm2, %v725_v46  ;;  %v723_v51 = vadd.f32 %v1282_v39, %v712_v47 }
  0xfe   : > { %735 = vst.msk [vmem:[#allocation2 + $0x1] sm:$0xff] %vm728_vm2, %v724_v49  ;;  %v722_v52 = vadd.f32 %v1282_v39, %v711_v50 }
  0xff   : > { %v727_v53 = vmax.f32 %v723_v51, 0.0 }
 0x100   : > { %v726_v54 = vmax.f32 %v722_v52, 0.0 }
 0x101   : > { %738 = vst.msk [vmem:[#allocation2 + $0x19] sm:$0xff] %vm728_vm2, %v727_v53 }
 0x102   : > { %737 = vst.msk [vmem:[#allocation2 + $0x11] sm:$0xff] %vm728_vm2, %v726_v54 }
 0x104   : > { %v744_v59 = vld [vmem:[#allocation2 + $0x9] sm:$0xff] }
 0x105   : > { %v743_v57 = vld [vmem:[#allocation2 + $0x1] sm:$0xff] }
 0x106   : > { %1427 = vmatprep.mubr.msk.f32.mxu1 %vm728_vm2, %v743_v57  ;;  %v739_v4 = vld [vmem:[#allocation2] sm:$0xff]  ;;  %v740_v12 = vld [vmem:[#allocation2 + $0x8] sm:$0xff] }
 0x107   : > { %1428 = vmatmul.mubr.msk.f32.vlgmr.msra.gmra.mrb[0].mxu1 %vm728_vm2, %v744_v59  ;;  %v747_v20 = vld [vmem:[#allocation2 + $0x2] sm:$0xff] }
 0x108   : > { %1527 = vmatpush3.bf16.msra.mxu1 %v1524_v36  ;;  %v746_v0 = vld [vmem:[#allocation2 + $0x19] sm:$0xff] }
 0x109   : > { %v745_v62 = vld [vmem:[#allocation2 + $0x11] sm:$0xff]  ;;  %1529 = vmatprep.subr.bf16.mxu1 %v1528_v58  ;;  %v750_v24 = vld [vmem:[#allocation2 + $0x1a] sm:$0xff] }
 0x10a   : > { %1430 = vmatprep.mubr.msk.f32.mxu1 %vm728_vm2, %v745_v62  ;;  %v741_v15 = vld [vmem:[#allocation2 + $0x10] sm:$0xff]  ;;  %v742_v17 = vld [vmem:[#allocation2 + $0x18] sm:$0xff] }
 0x10b   : > { %1431 = vmatmul.mubr.msk.f32.gmra.mrb[2].mxu1 %vm728_vm2, %v746_v0  ;;  %v748_v22 = vld [vmem:[#allocation2 + $0xa] sm:$0xff]  ;;  %v749_v23 = vld [vmem:[#allocation2 + $0x12] sm:$0xff] }
 0x10c   : > { %1531 = vmatpush3.bf16.msra.mxu1 %v1528_v58  ;;  %1449 = vmatprep.mubr.msk.f32.mxu1 %vm728_vm2, %v739_v4  ;;  %v1120_v36 = vld [vmem:[%s1878_s8 + $0x38] sm:$0xff] }
 0x10d   : > { %1533 = vmatprep.subr.bf16.mxu1 %v1532_v63  ;;  %v1566_v37 = vpack.c.bf16 %v1120_v36, %v1119_v35 }
 0x10f   : > { %1567 = vmatpush3.bf16.msra.mxu0 %v1566_v37 }
 0x110   : > { %1535 = vmatpush3.bf16.msra.mxu1 %v1532_v63 }
 0x111   : > { %1537 = vmatprep.subr.bf16.mxu1 %v1536_v5 }
 0x114   : > { %1539 = vmatpush3.bf16.msra.mxu1 %v1536_v5 }
 0x115   : > { %1541 = vmatprep.subr.bf16.mxu1 %v1540_v8 }
 0x117   : > { %1450 = vmatmul.mubr.msk.f32.vlgmr.msra.gmra.mrb[0].mxu1 %vm728_vm2, %v740_v12 }
 0x118   : > { %1452 = vmatprep.mubr.msk.f32.mxu1 %vm728_vm2, %v741_v15  ;;  %1543 = vmatpush3.bf16.msra.mxu1 %v1540_v8 }
 0x119   : > { %1545 = vmatprep.subr.bf16.mxu1 %v1544_v11 }
 0x11b   : > { %1453 = vmatmul.mubr.msk.f32.gmra.mrb[2].mxu1 %vm728_vm2, %v742_v17 }
 0x11c   : > { %1547 = vmatpush3.bf16.msra.mxu1 %v1544_v11  ;;  %1471 = vmatprep.mubr.msk.f32.mxu1 %vm728_vm2, %v747_v20 }
 0x11d   : > { %1549 = vmatprep.subr.bf16.mxu1 %v1548_v16 }
 0x120   : > { %1551 = vmatpush3.bf16.msra.mxu1 %v1548_v16 }
 0x121   : > { %1553 = vmatprep.subr.bf16.mxu1 %v1552_v21 }
 0x124   : > { %1555 = vmatpush3.bf16.msra.mxu1 %v1552_v21 }
 0x127   : > { %1472 = vmatmul.mubr.msk.f32.vlgmr.msra.gmra.mrb[0].mxu1 %vm728_vm2, %v748_v22 }
 0x128   : > { %1474 = vmatprep.mubr.msk.f32.mxu1 %vm728_vm2, %v749_v23 }
 0x12b   : > { %1475 = vmatmul.mubr.msk.f32.gmra.mrb[2].mxu1 %vm728_vm2, %v750_v24 }
 0x1fa   : > { %v1473_v39 = vpop.f32.mrb[0].mxu1 }
 0x1fb   : > { %v1080_v41 = vmul.f32 %v1473_v39, %v1311_v38  ;;  %v1049_v42 = vpop.f32.mrb[1].mxu1 }
 0x1fc   : > { %v1079_v43 = vmul.f32 %v1311_v38, %v1049_v42 }
 0x1fd   : > { %v1091_v44 = vadd.f32 %v1312_v40, %v1080_v41 }
 0x1fe   : > { %v1090_v45 = vadd.f32 %v1312_v40, %v1079_v43  ;;  %v1476_v46 = vpop.f32.mrb[2].mxu1 }
 0x1ff   : > { %v1095_v47 = vmax.f32 %v1091_v44, 0.0  ;;  %v1082_v48 = vmul.f32 %v1476_v46, %v1311_v38  ;;  %v1059_v49 = vpop.f32.mrb[3].mxu1 }
 0x200   : > { %v1094_v50 = vmax.f32 %v1090_v45, 0.0  ;;  %v1081_v3 = vmul.f32 %v1311_v38, %v1059_v49 }
 0x201   : > { %v1099_v51 = vsel %vm728_vm2, %v1095_v47, 0.0  ;;  %v1093_v52 = vadd.f32 %v1312_v40, %v1082_v48 }
 0x202   : > { %v1098_v53 = vsel %vm728_vm2, %v1094_v50, 0.0  ;;  %v1092_v54 = vadd.f32 %v1312_v40, %v1081_v3 }
 0x203   : > { %v1100_v55 = vadd.f32 %v1099_v51, %v1098_v53  ;;  %v1097_v56 = vmax.f32 %v1093_v52, 0.0 }
 0x204   : > { %v1096_v57 = vmax.f32 %v1092_v54, 0.0 }
 0x205   : > { %v1103_v60 = vsel %vm728_vm2, %v1097_v56, 0.0 }
 0x206   : > { %v1101_v58 = vsel %vm728_vm2, %v1096_v57, 0.0 }
 0x207   : > { %v1102_v59 = vadd.f32 %v1101_v58, %v1100_v55 }
 0x209   : > { %v1104_v61 = vadd.f32 %v1103_v60, %v1102_v59 }
 0x20b   : > { %v1105_v62 = vrot.slane %v1104_v61, 4 }
 0x20d   : > { %v1106_v63 = vadd.f32 %v1105_v62, %v1104_v61 }
 0x20f   : > { %v1107_v0 = vrot.slane %v1106_v63, 2 }
 0x211   : > { %v1108_v1 = vadd.f32 %v1107_v0, %v1106_v63 }
 0x213   : > { %v1109_v2 = vrot.slane %v1108_v1, 1 }
 0x215   : > { %v1110_v4 = vadd.f32 %v1109_v2, %v1108_v1 }
 0x217   : > { %v1112_v5 = vmul.f32 0.03125, %v1110_v4 }
 0x219   : > { %1494 = vmatmul.mubr.msk.f32.vlgmr.msra.gmra.mrb[4].mxu0 %vm728_vm2, %v1112_v5 }
 0x2ec   : > { %v1191_v7 = vpop.f32.mrb[4].mxu0 }
 0x2ed   : > { %v1192_v8 = vadd.f32 %v1191_v7, %v1121_v6  ;;  %v1495_v9 = vpop.f32.mrb[5].mxu0 }
 0x2ef   : > { %1196 = vst.msk [vmem:[%s375_s20] sm:$0x1] %vm1195_vm5, %v1192_v8 }
 0x2f0 PF: > { %s20_s13 = sadd.s32 1, %s1601_s13  }
 0x2f1   : > { %p17_p4 = scmp.ge.s32.totalorder %s20_s13, 4  }
 0x2f3   :  { %19 = sbr.rel (!%p17_p4) target bundleno = 1 (0x1), region = 97 }

</bundles_post_ra>
